<compile_context>
chip_gen: v6e
topology: v6e:2x2x1
jax: 0.10.0
libtpu: 0.0.40
codegen_flags: <defaults>
</compile_context>

<pallas_src>
import math
from functools import partial

import numpy as np
import jax
import jax.numpy as jnp
from jax import lax
from jax.experimental import pallas as pl
from jax.experimental.pallas import tpu as pltpu

LANE = 128


def _round_up(n, m=LANE):
    return ((n + m - 1) // m) * m


def _pad_last(x, to, value=0.0):
    d = x.shape[-1]
    if d >= to:
        return x
    return jnp.pad(x, [(0, 0)] * (x.ndim - 1) + [(0, to - d)],
                   constant_values=value)


def _pad_first(x, to, value=0.0):
    r = x.shape[0]
    if r >= to:
        return x
    return jnp.pad(x, [(0, to - r)] + [(0, 0)] * (x.ndim - 1),
                   constant_values=value)


# ----------------------------------------------------------------------------
# recover / flatten glue: static gather indices computed at trace time
# (seq_lens is static under jit) -> one XLA gather each, no Python concat
# loops, no transposes around the decoders (time-major layout end-to-end).
# ----------------------------------------------------------------------------
def _recover_bm(flat, seq_lens, T):
    """flat (N, D) -> zero-padded batch-major (B, T, D)."""
    B = len(seq_lens)
    lens = np.asarray(seq_lens, np.int32)
    offs = np.concatenate([[0], np.cumsum(lens)[:-1]]).astype(np.int32)
    t = np.arange(T, dtype=np.int32)[None, :]
    mask = t < lens[:, None]                                        # (B, T)
    idx = np.where(mask, offs[:, None] + t, 0).reshape(-1).astype(np.int32)
    out = flat[idx] * jnp.asarray(mask.reshape(-1, 1), flat.dtype)
    return out.reshape(B, T, flat.shape[-1])


def _recover_tm(flat, seq_lens, T_pad):
    """flat (N, D) -> zero-padded time-major (T_pad, B, D)."""
    B = len(seq_lens)
    lens = np.asarray(seq_lens, np.int32)
    offs = np.concatenate([[0], np.cumsum(lens)[:-1]]).astype(np.int32)
    t = np.arange(T_pad, dtype=np.int32)[:, None]
    mask = t < lens[None, :]                                        # (T_pad, B)
    idx = np.where(mask, offs[None, :] + t, 0).reshape(-1).astype(np.int32)
    out = flat[idx] * jnp.asarray(mask.reshape(-1, 1), flat.dtype)
    return out.reshape(T_pad, B, flat.shape[-1])


def _flatten_tm(y_tm, seq_lens):
    """time-major (T_pad, B, D) -> flat (sum(seq_lens), D) in sentence order."""
    T_pad, B, D = y_tm.shape
    idx = np.concatenate([np.arange(l, dtype=np.int32) * B + b
                          for b, l in enumerate(seq_lens)]).astype(np.int32)
    return y_tm.reshape(T_pad * B, D)[idx]


# ----------------------------------------------------------------------------
# Kernel 1: chunked autoregressive LSTM decoder (grid = time chunks).
# ----------------------------------------------------------------------------
def _make_lstm_decoder_kernel(K, hd, num_x):
    """K time steps per grid step, B sequences in lockstep, unrolled chunk."""

    def kernel(*refs):
        xs = refs[:num_x]                                 # (K, B, Din_i) each
        wxs = refs[num_x:2 * num_x]                       # (Din_i, 4*hd) each
        (wp_ref, wh_ref, b_ref, wout_ref, bout_ref,
         emb_ref, init_ref) = refs[2 * num_x:2 * num_x + 7]
        y_ref, fidx_ref = refs[2 * num_x + 7:2 * num_x + 9]
        h_sc, c_sc, prev_sc = refs[2 * num_x + 9:]

        @pl.when(pl.program_id(0) == 0)
        def _init():
            h_sc[...] = jnp.zeros_like(h_sc)
            c_sc[...] = jnp.zeros_like(c_sc)
            prev_sc[...] = jnp.zeros_like(prev_sc) + init_ref[...]

        # hoist weight / table loads out of the unrolled chunk loop
        wx_vs = [w[...] for w in wxs]
        wp_v, wh_v, b_v = wp_ref[...], wh_ref[...], b_ref[...]
        wout_v, bout_v, emb_v = wout_ref[...], bout_ref[...], emb_ref[...]
        dpad = wout_v.shape[1]

        h = h_sc[...]
        c = c_sc[...]
        prev = prev_sc[...]

        for k in range(K):                                # fully unrolled
            # single fused gate matmul per operand (4 gates, order i, f, g, o)
            gates = b_v
            for x_ref, wx_v in zip(xs, wx_vs):
                gates = gates + jnp.dot(x_ref[k], wx_v,
                                        preferred_element_type=jnp.float32)
            gates = (gates
                     + jnp.dot(prev, wp_v, preferred_element_type=jnp.float32)
                     + jnp.dot(h, wh_v, preferred_element_type=jnp.float32))
            i = jax.nn.sigmoid(gates[:, 0 * hd:1 * hd])
            f = jax.nn.sigmoid(gates[:, 1 * hd:2 * hd])
            g = jnp.tanh(gates[:, 2 * hd:3 * hd])
            o = jax.nn.sigmoid(gates[:, 3 * hd:4 * hd])
            c = f * c + i * g
            h = o * jnp.tanh(c)

            logits = (jnp.dot(h, wout_v, preferred_element_type=jnp.float32)
                      + bout_v)                           # (B, dpad)
            y_ref[k] = logits

            # greedy feedback (== torch .topk(1): first index of the max),
            # realised as a one-hot matmul against the embedding table.
            mx = jnp.max(logits, axis=-1, keepdims=True)
            iota = lax.broadcasted_iota(jnp.int32, logits.shape, 1)
            idx = jnp.min(jnp.where(logits >= mx, iota, dpad),
                          axis=-1, keepdims=True)         # (B, 1)
            fidx_ref[k] = idx.astype(jnp.float32)
            onehot = (iota == idx).astype(jnp.float32)
            prev = jnp.dot(onehot, emb_v, preferred_element_type=jnp.float32)

        h_sc[...] = h
        c_sc[...] = c
        prev_sc[...] = prev

    return kernel


def lstm_decoder(p, xs, K):
    """Autoregressive LSTMDecoder (embedding feedback, no forced input).

    xs: list of time-major (T_pad, B, Din_i) slabs (zero-padded); the LSTM
        input is conceptually their concatenation (gate weights are split
        accordingly, so no concat is ever materialised).
    Returns (logits_tm (T_pad, B, Dpad), greedy_idx_tm (T_pad, B, 1))."""
    T_pad, B = xs[0].shape[0], xs[0].shape[1]
    num_x = len(xs)
    hd = p["whh"].shape[0]
    emb_dim = p["emb"].shape[1]
    dpad = p["wout"].shape[1]

    x_specs = [pl.BlockSpec((K, B, x.shape[2]), lambda t: (t, 0, 0)) for x in xs]
    const2 = lambda arr: pl.BlockSpec(arr.shape, lambda t: (0, 0))
    in_specs = x_specs + [const2(w) for w in p["wx"]] + [
        const2(p["wp"]), const2(p["whh"]), const2(p["b"]),
        const2(p["wout"]), const2(p["bout"]), const2(p["emb"]),
        const2(p["init"]),
    ]

    y_tm, f_tm = pl.pallas_call(
        _make_lstm_decoder_kernel(K=K, hd=hd, num_x=num_x),
        grid=(T_pad // K,),
        in_specs=in_specs,
        out_specs=[pl.BlockSpec((K, B, dpad), lambda t: (t, 0, 0)),
                   pl.BlockSpec((K, B, 1), lambda t: (t, 0, 0))],
        out_shape=[jax.ShapeDtypeStruct((T_pad, B, dpad), jnp.float32),
                   jax.ShapeDtypeStruct((T_pad, B, 1), jnp.float32)],
        scratch_shapes=[
            pltpu.VMEM((B, hd), jnp.float32),        # h
            pltpu.VMEM((B, hd), jnp.float32),        # c
            pltpu.VMEM((B, emb_dim), jnp.float32),   # fed-back embedding
        ],
        compiler_params=pltpu.CompilerParams(
            dimension_semantics=("arbitrary",)),     # sequential recurrence
    )(*xs, *p["wx"], p["wp"], p["whh"], p["b"],
      p["wout"], p["bout"], p["emb"], p["init"])
    return y_tm, f_tm


# ----------------------------------------------------------------------------
# Kernel 2: fused feed_bio mask + intent attention + intent head + Q attention.
# ----------------------------------------------------------------------------
def _make_attn_intent_kernel(B, ap, dop, scale):
    """One launch for the whole batch.  Per-batch work is a short unrolled
    Python loop of 2-D matmuls (projections use fused [K|V] weights)."""

    def kernel(cls_ref, h_ref, f_ref,
               wqi_ref, bqi_ref, wkvi_ref, bkvi_ref,
               wqq_ref, bqq_ref, wkvq_ref, bkvq_ref,
               wcls_ref, watt_ref, bint_ref,
               intent_ref, newh_ref):
        # hoist all weight loads out of the unrolled batch loop
        wqi, bqi = wqi_ref[...], bqi_ref[...]
        wkvi, bkvi = wkvi_ref[...], bkvi_ref[...]
        wqq, bqq = wqq_ref[...], bqq_ref[...]
        wkvq, bkvq = wkvq_ref[...], bkvq_ref[...]
        wcls, watt, bint = wcls_ref[...], watt_ref[...], bint_ref[...]

        for b in range(B):                               # unrolled (tiny B)
            h_b = h_ref[b]                               # (T, H) queries/base
            y_b = h_b * f_ref[b]                         # masked keys==values
            cls_b = cls_ref[pl.ds(b, 1), :]              # (1, H)

            # fused K|V projections of the masked tensor (lane-dense slabs)
            kv_i = jnp.dot(y_b, wkvi, preferred_element_type=jnp.float32) + bkvi
            lk_i, lv_i = kv_i[:, :ap], kv_i[:, ap:]
            kv_q = jnp.dot(y_b, wkvq, preferred_element_type=jnp.float32) + bkvq
            lk_q, lv_q = kv_q[:, :ap], kv_q[:, ap:]

            # ---- intent attention (query = cls) + fused intent linear head
            lq_i = jnp.dot(cls_b, wqi, preferred_element_type=jnp.float32) + bqi
            s_i = lax.dot_general(lq_i, lk_i, (((1,), (1,)), ((), ())),
                                  preferred_element_type=jnp.float32)  # (1, T)
            s_i = s_i - jnp.max(s_i, axis=-1, keepdims=True)
            e_i = jnp.exp(s_i)
            # exact reciprocal: the greedy slot decoder downstream is
            # discretely sensitive.  Scale applied AFTER softmax (== torch).
            p_i = e_i * (scale / jnp.sum(e_i, axis=-1, keepdims=True))
            ctx_i = jnp.dot(p_i, lv_i, preferred_element_type=jnp.float32)
            intent_ref[pl.ds(b, 1), :] = (
                jnp.dot(cls_b, wcls, preferred_element_type=jnp.float32)
                + jnp.dot(ctx_i, watt, preferred_element_type=jnp.float32)
                + bint)

            # ---- Q attention (queries = all token hiddens of this sentence)
            lq_q = jnp.dot(h_b, wqq, preferred_element_type=jnp.float32) + bqq
            s_q = lax.dot_general(lq_q, lk_q, (((1,), (1,)), ((), ())),
                                  preferred_element_type=jnp.float32)  # (T, T)
            s_q = s_q - jnp.max(s_q, axis=-1, keepdims=True)
            e_q = jnp.exp(s_q)
            p_q = e_q * (scale / jnp.sum(e_q, axis=-1, keepdims=True))
            newh_ref[b] = jnp.dot(p_q, lv_q, preferred_element_type=jnp.float32)

    return kernel


def attention_block(p, cls_hidden, h_bm, f_bm, att_hidden_dim):
    """Fused AttentionIntent + intent Linear + AttentionQ (one pallas_call).

    cls_hidden (B, H); h_bm (B, T, H) recovered hiddens; f_bm (B, T, 1) greedy
    BIO feed (0/1 floats).  Returns (intent_logits_padded (B, 128),
    new_hiddens_padded (B, T, 128)).
    # TODO(synk): at production sizes split the batch into 2 "parallel" grid
    # chunks on v7x (2 TCs) and budget for its 64 MiB VMEM.
    """
    B, T, H = h_bm.shape
    ap = p["wq_i"].shape[1]
    dop = p["wkv_i"].shape[1] - ap
    ip = p["b_int"].shape[1]
    scale = 1.0 / math.sqrt(att_hidden_dim)
    intent_pad, newh_bm = pl.pallas_call(
        _make_attn_intent_kernel(B, ap, dop, scale),
        out_shape=(jax.ShapeDtypeStruct((B, ip), jnp.float32),
                   jax.ShapeDtypeStruct((B, T, dop), jnp.float32)),
    )(cls_hidden, h_bm, f_bm,
      p["wq_i"], p["bq_i"], p["wkv_i"], p["bkv_i"],
      p["wq_q"], p["bq_q"], p["wkv_q"], p["bkv_q"],
      p["w_cls"], p["w_att"], p["b_int"])
    return intent_pad, newh_bm


# ----------------------------------------------------------------------------
# Forward (glue in plain JAX inside one jit, compute in the 3 kernels).
# ----------------------------------------------------------------------------
@partial(jax.jit, static_argnames=("seq_lens", "dims", "single_intent"))
def cpos_forward(params, hiddens, cls_hidden, seq_lens, dims, single_intent=True):
    """CPosModelBertIntent.forward (n_predicts=None, no forced inputs)."""
    att_hid, num_slot, num_intent = dims
    T = seq_lens[0]                       # seq_lens sorted descending (torch)
    K = T if T <= 32 else 32              # decoder time chunk (unrolled)
    T_pad = ((T + K - 1) // K) * K

    # shared recovered views (static gather indices)
    h_tm = _recover_tm(hiddens, seq_lens, T_pad)          # decoders
    h_bm = _recover_bm(hiddens, seq_lens, T)              # attention

    # BIO decoder: one launch; greedy feed emitted by the kernel itself.
    bio_tm, feed_tm = lstm_decoder(params["bio_decoder"], [h_tm], K)
    pred_bio = _flatten_tm(bio_tm, seq_lens)[:, :2]                    # (N, 2)
    f_bm = jnp.transpose(feed_tm[:T], (1, 0, 2))                       # (B, T, 1)

    # fused mask + both attentions + intent head: one launch.
    intent_pad, newh_bm = attention_block(params["attn"], cls_hidden,
                                          h_bm, f_bm, att_hid)
    pred_intent = intent_pad[:, :num_intent]                           # (B, I)

    # slot decoder: two time-major inputs (no 2H-wide concat in HBM).
    newh_tm = jnp.transpose(newh_bm, (1, 0, 2))                        # (T, B, 128)
    if T_pad > T:
        newh_tm = jnp.pad(newh_tm, ((0, T_pad - T), (0, 0), (0, 0)))
    slot_tm, _ = lstm_decoder(params["slot_decoder"], [newh_tm, h_tm], K)
    pred_slot = _flatten_tm(slot_tm, seq_lens)[:, :num_slot]           # (N, S)

    if single_intent:
        pred_intent = jax.nn.log_softmax(pred_intent, axis=-1)
    return (jax.nn.log_softmax(pred_slot, axis=1),
            jax.nn.log_softmax(pred_bio, axis=-1),
            pred_intent)


# ----------------------------------------------------------------------------
# Parameter init (torch-equivalent layout, linear weights pre-transposed) and
# one-time preparation into the lane-dense / fused layouts the kernels consume.
# ----------------------------------------------------------------------------
def init_qkv_attention(key, query_dim, key_dim, value_dim, hidden_dim, output_dim):
    ks = jax.random.split(key, 6)
    s = 0.1
    return dict(
        wq=jax.random.normal(ks[0], (query_dim, hidden_dim), jnp.float32) * s,
        bq=jax.random.normal(ks[1], (1, hidden_dim), jnp.float32) * s,
        wk=jax.random.normal(ks[2], (key_dim, hidden_dim), jnp.float32) * s,
        bk=jax.random.normal(ks[3], (1, hidden_dim), jnp.float32) * s,
        wv=jax.random.normal(ks[4], (value_dim, output_dim), jnp.float32) * s,
        bv=jax.random.normal(ks[5], (1, output_dim), jnp.float32) * s,
    )


def init_lstm_decoder(key, input_dims, hidden_dim, output_dim, embedding_dim):
    """input_dims: the LSTM input is conceptually the concat of these parts
    plus the fed-back label embedding (torch: one nn.LSTM over the concat);
    the gate weight is stored split so the kernel never concatenates."""
    ks = jax.random.split(key, 7 + len(input_dims))
    s = 0.1
    wx = [jax.random.normal(ks[i], (d, 4 * hidden_dim), jnp.float32) * s
          for i, d in enumerate(input_dims)]
    k = len(input_dims)
    return dict(
        wx=wx,                                                      # gate order i,f,g,o
        wp=jax.random.normal(ks[k + 0], (embedding_dim, 4 * hidden_dim), jnp.float32) * s,
        whh=jax.random.normal(ks[k + 1], (hidden_dim, 4 * hidden_dim), jnp.float32) * s,
        b=jax.random.normal(ks[k + 2], (1, 4 * hidden_dim), jnp.float32) * s,  # b_ih+b_hh
        wout=jax.random.normal(ks[k + 3], (hidden_dim, output_dim), jnp.float32) * s,
        bout=jax.random.normal(ks[k + 4], (1, output_dim), jnp.float32) * s,
        emb=jax.random.normal(ks[k + 5], (output_dim, embedding_dim), jnp.float32) * s,
        init=jax.random.normal(ks[k + 6], (1, embedding_dim), jnp.float32) * s,
    )


def init_params(key, hidden, att_hid, bio_hid, bio_emb, slot_hid, slot_emb,
                num_slot, num_intent):
    ks = jax.random.split(key, 6)
    return dict(
        bio_decoder=init_lstm_decoder(ks[0], [hidden], bio_hid, 2, bio_emb),
        slot_decoder=init_lstm_decoder(ks[1], [hidden, hidden], slot_hid,
                                       num_slot, slot_emb),
        att_intent=init_qkv_attention(ks[2], hidden, hidden, hidden, att_hid, hidden),
        att_q=init_qkv_attention(ks[3], hidden, hidden, hidden, att_hid, hidden),
        intent_w=jax.random.normal(ks[4], (2 * hidden, num_intent), jnp.float32) * 0.1,
        intent_b=jax.random.normal(ks[5], (1, num_intent), jnp.float32) * 0.1,
        # __slot_Linear / __border_Linear exist in __init__ but are unused in
        # forward, so they are omitted.
    )


def prepare_params(raw, hidden, att_hid):
    """One-time (outside jit) padding / fusion into kernel layouts."""
    ap = _round_up(att_hid)            # padded attention hidden dim
    dop = _round_up(hidden)            # padded attention output dim
    ip = _round_up(raw["intent_w"].shape[1])

    def prep_attn(a):
        return dict(
            wq=_pad_last(a["wq"], ap), bq=_pad_last(a["bq"], ap),
            # fused [K | V] projection (single matmul on the key/value tensor)
            wkv=jnp.concatenate([_pad_last(a["wk"], ap),
                                 _pad_last(a["wv"], dop)], axis=1),
            bkv=jnp.concatenate([_pad_last(a["bk"], ap),
                                 _pad_last(a["bv"], dop)], axis=1),
        )

    def prep_dec(d, row_pads):
        dpad = _round_up(d["wout"].shape[1])
        return dict(
            wx=[_pad_first(w, rp) for w, rp in zip(d["wx"], row_pads)],
            wp=d["wp"], whh=d["whh"], b=d["b"],
            wout=_pad_last(d["wout"], dpad),
            bout=_pad_last(d["bout"], dpad, -1e30),   # argmax never picks pad
            emb=_pad_first(d["emb"], dpad),
            init=d["init"],
        )

    ai, aq = prep_attn(raw["att_intent"]), prep_attn(raw["att_q"])
    return dict(
        bio_decoder=prep_dec(raw["bio_decoder"], [hidden]),
        # slot decoder input 0 is the (lane-padded) attention output
        slot_decoder=prep_dec(raw["slot_decoder"], [dop, hidden]),
        attn=dict(
            wq_i=ai["wq"], bq_i=ai["bq"], wkv_i=ai["wkv"], bkv_i=ai["bkv"],
            wq_q=aq["wq"], bq_q=aq["bq"], wkv_q=aq["wkv"], bkv_q=aq["bkv"],
            # intent head split: rows [:H] act on cls, rows [H:] on the
            # attention context (zero-padded rows; ctx pad columns are zero)
            w_cls=_pad_last(raw["intent_w"][:hidden], ip),
            w_att=_pad_last(_pad_first(raw["intent_w"][hidden:], dop), ip),
            b_int=_pad_last(raw["intent_b"], ip),
        ),
    )


# ----------------------------------------------------------------------------
if __name__ == "__main__":
    key = jax.random.PRNGKey(0)

    H = 32                 # transformer hidden size
    ATT_HID = 16           # attention_hidden_dim
    BIO_HID, BIO_EMB = 16, 8
    SLOT_HID, SLOT_EMB = 16, 8
    NUM_SLOT, NUM_INTENT = 8, 5
    seq_lens = (8, 5)      # sorted descending (seq_lens[0] is the pad length)
    B, N = len(seq_lens), sum(seq_lens)

    k_h, k_cls, k_p = jax.random.split(key, 3)
    # TODO(synk): BERT encoder outputs substituted with deterministic randoms.
    hiddens = jax.random.normal(k_h, (N, H), jnp.float32)
    cls_hidden = jax.random.normal(k_cls, (B, H), jnp.float32)

    raw = init_params(k_p, H, ATT_HID, BIO_HID, BIO_EMB,
                      SLOT_HID, SLOT_EMB, NUM_SLOT, NUM_INTENT)
    params = prepare_params(raw, H, ATT_HID)

    pred_slot, pred_bio, pred_intent = cpos_forward(
        params, hiddens, cls_hidden, seq_lens=seq_lens,
        dims=(ATT_HID, NUM_SLOT, NUM_INTENT), single_intent=True)
    jax.block_until_ready((pred_slot, pred_bio, pred_intent))

    assert pred_slot.shape == (N, NUM_SLOT)
    assert pred_bio.shape == (N, 2)
    assert pred_intent.shape == (B, NUM_INTENT)
    assert bool(jnp.isfinite(pred_slot).all())
    assert bool(jnp.isfinite(pred_bio).all())
    assert bool(jnp.isfinite(pred_intent).all())
    print("KERNEL_OK")
</pallas_src>

<mosaic_0001>
module attributes {stable_mosaic.version = 11 : i64} {
  func.func @kernel(%arg0: memref<2x32xf32, #tpu.memory_space<vmem>>, %arg1: memref<2x8x32xf32, #tpu.memory_space<vmem>>, %arg2: memref<2x8x1xf32, #tpu.memory_space<vmem>>, %arg3: memref<32x128xf32, #tpu.memory_space<vmem>>, %arg4: memref<1x128xf32, #tpu.memory_space<vmem>>, %arg5: memref<32x256xf32, #tpu.memory_space<vmem>>, %arg6: memref<1x256xf32, #tpu.memory_space<vmem>>, %arg7: memref<32x128xf32, #tpu.memory_space<vmem>>, %arg8: memref<1x128xf32, #tpu.memory_space<vmem>>, %arg9: memref<32x256xf32, #tpu.memory_space<vmem>>, %arg10: memref<1x256xf32, #tpu.memory_space<vmem>>, %arg11: memref<32x128xf32, #tpu.memory_space<vmem>>, %arg12: memref<128x128xf32, #tpu.memory_space<vmem>>, %arg13: memref<1x128xf32, #tpu.memory_space<vmem>>, %arg14: memref<2x128xf32, #tpu.memory_space<vmem>>, %arg15: memref<2x8x128xf32, #tpu.memory_space<vmem>>) attributes {dimension_semantics = [], scalar_prefetch = 0 : i64, scratch_operands = 0 : i64, tpu.core_type = #tpu.core_type<tc>} {
    %c0 = arith.constant 0 : index
    %c0_0 = arith.constant 0 : index
    %0 = vector.load %arg3[%c0, %c0_0] : memref<32x128xf32, #tpu.memory_space<vmem>>, vector<32x128xf32>
    %c0_1 = arith.constant 0 : index
    %c0_2 = arith.constant 0 : index
    %1 = vector.load %arg4[%c0_1, %c0_2] : memref<1x128xf32, #tpu.memory_space<vmem>>, vector<1x128xf32>
    %c0_3 = arith.constant 0 : index
    %c0_4 = arith.constant 0 : index
    %2 = vector.load %arg5[%c0_3, %c0_4] : memref<32x256xf32, #tpu.memory_space<vmem>>, vector<32x256xf32>
    %c0_5 = arith.constant 0 : index
    %c0_6 = arith.constant 0 : index
    %3 = vector.load %arg6[%c0_5, %c0_6] : memref<1x256xf32, #tpu.memory_space<vmem>>, vector<1x256xf32>
    %c0_7 = arith.constant 0 : index
    %c0_8 = arith.constant 0 : index
    %4 = vector.load %arg7[%c0_7, %c0_8] : memref<32x128xf32, #tpu.memory_space<vmem>>, vector<32x128xf32>
    %c0_9 = arith.constant 0 : index
    %c0_10 = arith.constant 0 : index
    %5 = vector.load %arg8[%c0_9, %c0_10] : memref<1x128xf32, #tpu.memory_space<vmem>>, vector<1x128xf32>
    %c0_11 = arith.constant 0 : index
    %c0_12 = arith.constant 0 : index
    %6 = vector.load %arg9[%c0_11, %c0_12] : memref<32x256xf32, #tpu.memory_space<vmem>>, vector<32x256xf32>
    %c0_13 = arith.constant 0 : index
    %c0_14 = arith.constant 0 : index
    %7 = vector.load %arg10[%c0_13, %c0_14] : memref<1x256xf32, #tpu.memory_space<vmem>>, vector<1x256xf32>
    %c0_15 = arith.constant 0 : index
    %c0_16 = arith.constant 0 : index
    %8 = vector.load %arg11[%c0_15, %c0_16] : memref<32x128xf32, #tpu.memory_space<vmem>>, vector<32x128xf32>
    %c0_17 = arith.constant 0 : index
    %c0_18 = arith.constant 0 : index
    %9 = vector.load %arg12[%c0_17, %c0_18] : memref<128x128xf32, #tpu.memory_space<vmem>>, vector<128x128xf32>
    %c0_19 = arith.constant 0 : index
    %c0_20 = arith.constant 0 : index
    %10 = vector.load %arg13[%c0_19, %c0_20] : memref<1x128xf32, #tpu.memory_space<vmem>>, vector<1x128xf32>
    %c0_21 = arith.constant 0 : index
    %c0_22 = arith.constant 0 : index
    %c0_23 = arith.constant 0 : index
    %11 = vector.load %arg1[%c0_21, %c0_22, %c0_23] : memref<2x8x32xf32, #tpu.memory_space<vmem>>, vector<1x8x32xf32>
    %12 = vector.shape_cast %11 : vector<1x8x32xf32> to vector<8x32xf32>
    %c0_24 = arith.constant 0 : index
    %c0_25 = arith.constant 0 : index
    %c0_26 = arith.constant 0 : index
    %13 = vector.load %arg2[%c0_24, %c0_25, %c0_26] : memref<2x8x1xf32, #tpu.memory_space<vmem>>, vector<1x8x1xf32>
    %14 = vector.shape_cast %13 : vector<1x8x1xf32> to vector<8x1xf32>
    %15 = vector.broadcast %14 : vector<8x1xf32> to vector<8x32xf32>
    %16 = arith.mulf %12, %15 : vector<8x32xf32>
    %c0_27 = arith.constant 0 : index
    %c0_28 = arith.constant 0 : index
    %17 = vector.load %arg0[%c0_27, %c0_28] : memref<2x32xf32, #tpu.memory_space<vmem>>, vector<1x32xf32>
    %cst = arith.constant dense<0.000000e+00> : vector<8x256xf32>
    %18 = tpu.matmul %16, %2, %cst {dimension_numbers = #tpu.dot_dimension_numbers<[1], [0], [0], [1], [0, 0, 1, 1], [], []>} : vector<8x32xf32>, vector<32x256xf32>, vector<8x256xf32> -> vector<8x256xf32>
    %19 = vector.broadcast %3 : vector<1x256xf32> to vector<8x256xf32>
    %20 = arith.addf %18, %19 : vector<8x256xf32>
    %21 = vector.extract_strided_slice %20 {offsets = [0, 0], sizes = [8, 128], strides = [1, 1]} : vector<8x256xf32> to vector<8x128xf32>
    %22 = vector.extract_strided_slice %20 {offsets = [0, 128], sizes = [8, 128], strides = [1, 1]} : vector<8x256xf32> to vector<8x128xf32>
    %cst_29 = arith.constant dense<0.000000e+00> : vector<8x256xf32>
    %23 = tpu.matmul %16, %6, %cst_29 {dimension_numbers = #tpu.dot_dimension_numbers<[1], [0], [0], [1], [0, 0, 1, 1], [], []>} : vector<8x32xf32>, vector<32x256xf32>, vector<8x256xf32> -> vector<8x256xf32>
    %24 = vector.broadcast %7 : vector<1x256xf32> to vector<8x256xf32>
    %25 = arith.addf %23, %24 : vector<8x256xf32>
    %26 = vector.extract_strided_slice %25 {offsets = [0, 0], sizes = [8, 128], strides = [1, 1]} : vector<8x256xf32> to vector<8x128xf32>
    %27 = vector.extract_strided_slice %25 {offsets = [0, 128], sizes = [8, 128], strides = [1, 1]} : vector<8x256xf32> to vector<8x128xf32>
    %cst_30 = arith.constant dense<0.000000e+00> : vector<1x128xf32>
    %28 = tpu.matmul %17, %0, %cst_30 {dimension_numbers = #tpu.dot_dimension_numbers<[1], [0], [0], [1], [0, 0, 1, 1], [], []>} : vector<1x32xf32>, vector<32x128xf32>, vector<1x128xf32> -> vector<1x128xf32>
    %29 = arith.addf %28, %1 : vector<1x128xf32>
    %cst_31 = arith.constant dense<0.000000e+00> : vector<1x8xf32>
    %30 = tpu.matmul %29, %21, %cst_31 {dimension_numbers = #tpu.dot_dimension_numbers<[1], [1], [0], [0], [0, 0, 1, 0], [], []>} : vector<1x128xf32>, vector<8x128xf32>, vector<1x8xf32> -> vector<1x8xf32>
    %cst_32 = arith.constant dense<0xFF800000> : vector<1xf32>
    %31 = vector.multi_reduction <maximumf>, %30, %cst_32 [1] : vector<1x8xf32> to vector<1xf32>
    %32 = vector.shape_cast %31 : vector<1xf32> to vector<1x1xf32>
    %33 = vector.broadcast %32 : vector<1x1xf32> to vector<1x8xf32>
    %34 = arith.subf %30, %33 : vector<1x8xf32>
    %35 = math.exp %34 : vector<1x8xf32>
    %cst_33 = arith.constant dense<0.000000e+00> : vector<1xf32>
    %36 = vector.multi_reduction <add>, %35, %cst_33 [1] : vector<1x8xf32> to vector<1xf32>
    %37 = vector.shape_cast %36 : vector<1xf32> to vector<1x1xf32>
    %cst_34 = arith.constant 2.500000e-01 : f32
    %38 = vector.broadcast %cst_34 : f32 to vector<1x1xf32>
    %39 = arith.divf %38, %37 : vector<1x1xf32>
    %40 = vector.broadcast %39 : vector<1x1xf32> to vector<1x8xf32>
    %41 = arith.mulf %35, %40 : vector<1x8xf32>
    %cst_35 = arith.constant dense<0.000000e+00> : vector<1x128xf32>
    %42 = tpu.matmul %41, %22, %cst_35 {dimension_numbers = #tpu.dot_dimension_numbers<[1], [0], [0], [1], [0, 0, 1, 1], [], []>} : vector<1x8xf32>, vector<8x128xf32>, vector<1x128xf32> -> vector<1x128xf32>
    %cst_36 = arith.constant dense<0.000000e+00> : vector<1x128xf32>
    %43 = tpu.matmul %17, %8, %cst_36 {dimension_numbers = #tpu.dot_dimension_numbers<[1], [0], [0], [1], [0, 0, 1, 1], [], []>} : vector<1x32xf32>, vector<32x128xf32>, vector<1x128xf32> -> vector<1x128xf32>
    %cst_37 = arith.constant dense<0.000000e+00> : vector<1x128xf32>
    %44 = tpu.matmul %42, %9, %cst_37 {dimension_numbers = #tpu.dot_dimension_numbers<[1], [0], [0], [1], [0, 0, 1, 1], [], []>} : vector<1x128xf32>, vector<128x128xf32>, vector<1x128xf32> -> vector<1x128xf32>
    %45 = arith.addf %43, %44 : vector<1x128xf32>
    %46 = arith.addf %45, %10 : vector<1x128xf32>
    %c0_38 = arith.constant 0 : index
    %c0_39 = arith.constant 0 : index
    %47 = vector.load %arg14[%c0_38, %c0_39] : memref<2x128xf32, #tpu.memory_space<vmem>>, vector<1x128xf32>
    tpu.vector_store %arg14[%c0_38, %c0_39], %46 {strides = array<i32>} : memref<2x128xf32, #tpu.memory_space<vmem>>, vector<1x128xf32>,
    %cst_40 = arith.constant dense<0.000000e+00> : vector<8x128xf32>
    %48 = tpu.matmul %12, %4, %cst_40 {dimension_numbers = #tpu.dot_dimension_numbers<[1], [0], [0], [1], [0, 0, 1, 1], [], []>} : vector<8x32xf32>, vector<32x128xf32>, vector<8x128xf32> -> vector<8x128xf32>
    %49 = vector.broadcast %5 : vector<1x128xf32> to vector<8x128xf32>
    %50 = arith.addf %48, %49 : vector<8x128xf32>
    %cst_41 = arith.constant dense<0.000000e+00> : vector<8x8xf32>
    %51 = tpu.matmul %50, %26, %cst_41 {dimension_numbers = #tpu.dot_dimension_numbers<[1], [1], [0], [0], [0, 0, 1, 0], [], []>} : vector<8x128xf32>, vector<8x128xf32>, vector<8x8xf32> -> vector<8x8xf32>
    %cst_42 = arith.constant dense<0xFF800000> : vector<8xf32>
    %52 = vector.multi_reduction <maximumf>, %51, %cst_42 [1] : vector<8x8xf32> to vector<8xf32>
    %53 = vector.shape_cast %52 : vector<8xf32> to vector<8x1xf32>
    %54 = vector.broadcast %53 : vector<8x1xf32> to vector<8x8xf32>
    %55 = arith.subf %51, %54 : vector<8x8xf32>
    %56 = math.exp %55 : vector<8x8xf32>
    %cst_43 = arith.constant dense<0.000000e+00> : vector<8xf32>
    %57 = vector.multi_reduction <add>, %56, %cst_43 [1] : vector<8x8xf32> to vector<8xf32>
    %58 = vector.shape_cast %57 : vector<8xf32> to vector<8x1xf32>
    %cst_44 = arith.constant 2.500000e-01 : f32
    %59 = vector.broadcast %cst_44 : f32 to vector<8x1xf32>
    %60 = arith.divf %59, %58 : vector<8x1xf32>
    %61 = vector.broadcast %60 : vector<8x1xf32> to vector<8x8xf32>
    %62 = arith.mulf %56, %61 : vector<8x8xf32>
    %cst_45 = arith.constant dense<0.000000e+00> : vector<8x128xf32>
    %63 = tpu.matmul %62, %27, %cst_45 {dimension_numbers = #tpu.dot_dimension_numbers<[1], [0], [0], [1], [0, 0, 1, 1], [], []>} : vector<8x8xf32>, vector<8x128xf32>, vector<8x128xf32> -> vector<8x128xf32>
    %c0_46 = arith.constant 0 : index
    %c0_47 = arith.constant 0 : index
    %c0_48 = arith.constant 0 : index
    %64 = vector.load %arg15[%c0_46, %c0_47, %c0_48] : memref<2x8x128xf32, #tpu.memory_space<vmem>>, vector<1x8x128xf32>
    %65 = vector.shape_cast %64 : vector<1x8x128xf32> to vector<8x128xf32>
    %66 = vector.shape_cast %63 : vector<8x128xf32> to vector<1x8x128xf32>
    tpu.vector_store %arg15[%c0_46, %c0_47, %c0_48], %66 {strides = array<i32>} : memref<2x8x128xf32, #tpu.memory_space<vmem>>, vector<1x8x128xf32>,
    %c1 = arith.constant 1 : index
    %c0_49 = arith.constant 0 : index
    %c0_50 = arith.constant 0 : index
    %67 = vector.load %arg1[%c1, %c0_49, %c0_50] : memref<2x8x32xf32, #tpu.memory_space<vmem>>, vector<1x8x32xf32>
    %68 = vector.shape_cast %67 : vector<1x8x32xf32> to vector<8x32xf32>
    %c1_51 = arith.constant 1 : index
    %c0_52 = arith.constant 0 : index
    %c0_53 = arith.constant 0 : index
    %69 = vector.load %arg2[%c1_51, %c0_52, %c0_53] : memref<2x8x1xf32, #tpu.memory_space<vmem>>, vector<1x8x1xf32>
    %70 = vector.shape_cast %69 : vector<1x8x1xf32> to vector<8x1xf32>
    %71 = vector.broadcast %70 : vector<8x1xf32> to vector<8x32xf32>
    %72 = arith.mulf %68, %71 : vector<8x32xf32>
    %c1_54 = arith.constant 1 : index
    %c0_55 = arith.constant 0 : index
    %73 = vector.load %arg0[%c1_54, %c0_55] : memref<2x32xf32, #tpu.memory_space<vmem>>, vector<1x32xf32>
    %cst_56 = arith.constant dense<0.000000e+00> : vector<8x256xf32>
    %74 = tpu.matmul %72, %2, %cst_56 {dimension_numbers = #tpu.dot_dimension_numbers<[1], [0], [0], [1], [0, 0, 1, 1], [], []>} : vector<8x32xf32>, vector<32x256xf32>, vector<8x256xf32> -> vector<8x256xf32>
    %75 = vector.broadcast %3 : vector<1x256xf32> to vector<8x256xf32>
    %76 = arith.addf %74, %75 : vector<8x256xf32>
    %77 = vector.extract_strided_slice %76 {offsets = [0, 0], sizes = [8, 128], strides = [1, 1]} : vector<8x256xf32> to vector<8x128xf32>
    %78 = vector.extract_strided_slice %76 {offsets = [0, 128], sizes = [8, 128], strides = [1, 1]} : vector<8x256xf32> to vector<8x128xf32>
    %cst_57 = arith.constant dense<0.000000e+00> : vector<8x256xf32>
    %79 = tpu.matmul %72, %6, %cst_57 {dimension_numbers = #tpu.dot_dimension_numbers<[1], [0], [0], [1], [0, 0, 1, 1], [], []>} : vector<8x32xf32>, vector<32x256xf32>, vector<8x256xf32> -> vector<8x256xf32>
    %80 = vector.broadcast %7 : vector<1x256xf32> to vector<8x256xf32>
    %81 = arith.addf %79, %80 : vector<8x256xf32>
    %82 = vector.extract_strided_slice %81 {offsets = [0, 0], sizes = [8, 128], strides = [1, 1]} : vector<8x256xf32> to vector<8x128xf32>
    %83 = vector.extract_strided_slice %81 {offsets = [0, 128], sizes = [8, 128], strides = [1, 1]} : vector<8x256xf32> to vector<8x128xf32>
    %cst_58 = arith.constant dense<0.000000e+00> : vector<1x128xf32>
    %84 = tpu.matmul %73, %0, %cst_58 {dimension_numbers = #tpu.dot_dimension_numbers<[1], [0], [0], [1], [0, 0, 1, 1], [], []>} : vector<1x32xf32>, vector<32x128xf32>, vector<1x128xf32> -> vector<1x128xf32>
    %85 = arith.addf %84, %1 : vector<1x128xf32>
    %cst_59 = arith.constant dense<0.000000e+00> : vector<1x8xf32>
    %86 = tpu.matmul %85, %77, %cst_59 {dimension_numbers = #tpu.dot_dimension_numbers<[1], [1], [0], [0], [0, 0, 1, 0], [], []>} : vector<1x128xf32>, vector<8x128xf32>, vector<1x8xf32> -> vector<1x8xf32>
    %cst_60 = arith.constant dense<0xFF800000> : vector<1xf32>
    %87 = vector.multi_reduction <maximumf>, %86, %cst_60 [1] : vector<1x8xf32> to vector<1xf32>
    %88 = vector.shape_cast %87 : vector<1xf32> to vector<1x1xf32>
    %89 = vector.broadcast %88 : vector<1x1xf32> to vector<1x8xf32>
    %90 = arith.subf %86, %89 : vector<1x8xf32>
    %91 = math.exp %90 : vector<1x8xf32>
    %cst_61 = arith.constant dense<0.000000e+00> : vector<1xf32>
    %92 = vector.multi_reduction <add>, %91, %cst_61 [1] : vector<1x8xf32> to vector<1xf32>
    %93 = vector.shape_cast %92 : vector<1xf32> to vector<1x1xf32>
    %cst_62 = arith.constant 2.500000e-01 : f32
    %94 = vector.broadcast %cst_62 : f32 to vector<1x1xf32>
    %95 = arith.divf %94, %93 : vector<1x1xf32>
    %96 = vector.broadcast %95 : vector<1x1xf32> to vector<1x8xf32>
    %97 = arith.mulf %91, %96 : vector<1x8xf32>
    %cst_63 = arith.constant dense<0.000000e+00> : vector<1x128xf32>
    %98 = tpu.matmul %97, %78, %cst_63 {dimension_numbers = #tpu.dot_dimension_numbers<[1], [0], [0], [1], [0, 0, 1, 1], [], []>} : vector<1x8xf32>, vector<8x128xf32>, vector<1x128xf32> -> vector<1x128xf32>
    %cst_64 = arith.constant dense<0.000000e+00> : vector<1x128xf32>
    %99 = tpu.matmul %73, %8, %cst_64 {dimension_numbers = #tpu.dot_dimension_numbers<[1], [0], [0], [1], [0, 0, 1, 1], [], []>} : vector<1x32xf32>, vector<32x128xf32>, vector<1x128xf32> -> vector<1x128xf32>
    %cst_65 = arith.constant dense<0.000000e+00> : vector<1x128xf32>
    %100 = tpu.matmul %98, %9, %cst_65 {dimension_numbers = #tpu.dot_dimension_numbers<[1], [0], [0], [1], [0, 0, 1, 1], [], []>} : vector<1x128xf32>, vector<128x128xf32>, vector<1x128xf32> -> vector<1x128xf32>
    %101 = arith.addf %99, %100 : vector<1x128xf32>
    %102 = arith.addf %101, %10 : vector<1x128xf32>
    %c1_66 = arith.constant 1 : index
    %c0_67 = arith.constant 0 : index
    %103 = vector.load %arg14[%c1_66, %c0_67] : memref<2x128xf32, #tpu.memory_space<vmem>>, vector<1x128xf32>
    tpu.vector_store %arg14[%c1_66, %c0_67], %102 {strides = array<i32>} : memref<2x128xf32, #tpu.memory_space<vmem>>, vector<1x128xf32>,
    %cst_68 = arith.constant dense<0.000000e+00> : vector<8x128xf32>
    %104 = tpu.matmul %68, %4, %cst_68 {dimension_numbers = #tpu.dot_dimension_numbers<[1], [0], [0], [1], [0, 0, 1, 1], [], []>} : vector<8x32xf32>, vector<32x128xf32>, vector<8x128xf32> -> vector<8x128xf32>
    %105 = vector.broadcast %5 : vector<1x128xf32> to vector<8x128xf32>
    %106 = arith.addf %104, %105 : vector<8x128xf32>
    %cst_69 = arith.constant dense<0.000000e+00> : vector<8x8xf32>
    %107 = tpu.matmul %106, %82, %cst_69 {dimension_numbers = #tpu.dot_dimension_numbers<[1], [1], [0], [0], [0, 0, 1, 0], [], []>} : vector<8x128xf32>, vector<8x128xf32>, vector<8x8xf32> -> vector<8x8xf32>
    %cst_70 = arith.constant dense<0xFF800000> : vector<8xf32>
    %108 = vector.multi_reduction <maximumf>, %107, %cst_70 [1] : vector<8x8xf32> to vector<8xf32>
    %109 = vector.shape_cast %108 : vector<8xf32> to vector<8x1xf32>
    %110 = vector.broadcast %109 : vector<8x1xf32> to vector<8x8xf32>
    %111 = arith.subf %107, %110 : vector<8x8xf32>
    %112 = math.exp %111 : vector<8x8xf32>
    %cst_71 = arith.constant dense<0.000000e+00> : vector<8xf32>
    %113 = vector.multi_reduction <add>, %112, %cst_71 [1] : vector<8x8xf32> to vector<8xf32>
    %114 = vector.shape_cast %113 : vector<8xf32> to vector<8x1xf32>
    %cst_72 = arith.constant 2.500000e-01 : f32
    %115 = vector.broadcast %cst_72 : f32 to vector<8x1xf32>
    %116 = arith.divf %115, %114 : vector<8x1xf32>
    %117 = vector.broadcast %116 : vector<8x1xf32> to vector<8x8xf32>
    %118 = arith.mulf %112, %117 : vector<8x8xf32>
    %cst_73 = arith.constant dense<0.000000e+00> : vector<8x128xf32>
    %119 = tpu.matmul %118, %83, %cst_73 {dimension_numbers = #tpu.dot_dimension_numbers<[1], [0], [0], [1], [0, 0, 1, 1], [], []>} : vector<8x8xf32>, vector<8x128xf32>, vector<8x128xf32> -> vector<8x128xf32>
    %c1_74 = arith.constant 1 : index
    %c0_75 = arith.constant 0 : index
    %c0_76 = arith.constant 0 : index
    %120 = vector.load %arg15[%c1_74, %c0_75, %c0_76] : memref<2x8x128xf32, #tpu.memory_space<vmem>>, vector<1x8x128xf32>
    %121 = vector.shape_cast %120 : vector<1x8x128xf32> to vector<8x128xf32>
    %122 = vector.shape_cast %119 : vector<8x128xf32> to vector<1x8x128xf32>
    tpu.vector_store %arg15[%c1_74, %c0_75, %c0_76], %122 {strides = array<i32>} : memref<2x8x128xf32, #tpu.memory_space<vmem>>, vector<1x8x128xf32>,
    return
  }
}

module attributes {stable_mosaic.version = 11 : i64} {
  func.func @kernel(%arg0: i32, %arg1: memref<8x2x32xf32, #tpu.memory_space<vmem>>, %arg2: memref<32x64xf32, #tpu.memory_space<vmem>>, %arg3: memref<8x64xf32, #tpu.memory_space<vmem>>, %arg4: memref<16x64xf32, #tpu.memory_space<vmem>>, %arg5: memref<1x64xf32, #tpu.memory_space<vmem>>, %arg6: memref<16x128xf32, #tpu.memory_space<vmem>>, %arg7: memref<1x128xf32, #tpu.memory_space<vmem>>, %arg8: memref<128x8xf32, #tpu.memory_space<vmem>>, %arg9: memref<1x8xf32, #tpu.memory_space<vmem>>, %arg10: memref<8x2x128xf32, #tpu.memory_space<vmem>>, %arg11: memref<8x2x1xf32, #tpu.memory_space<vmem>>, %arg12: memref<2x16xf32, #tpu.memory_space<vmem>>, %arg13: memref<2x16xf32, #tpu.memory_space<vmem>>, %arg14: memref<2x8xf32, #tpu.memory_space<vmem>>) attributes {dimension_semantics = [#tpu.dimension_semantics<arbitrary>], iteration_bounds = array<i64: 1>, scalar_prefetch = 0 : i64, scratch_operands = 3 : i64, tpu.core_type = #tpu.core_type<tc>, window_params = [{transform_indices = @transform_0, window_bounds = array<i64: 8, 2, 32>}, {pipeline_mode = #tpu.pipeline_mode<synchronous>, transform_indices = @transform_1, window_bounds = array<i64: 32, 64>}, {pipeline_mode = #tpu.pipeline_mode<synchronous>, transform_indices = @transform_2, window_bounds = array<i64: 8, 64>}, {pipeline_mode = #tpu.pipeline_mode<synchronous>, transform_indices = @transform_3, window_bounds = array<i64: 16, 64>}, {pipeline_mode = #tpu.pipeline_mode<synchronous>, transform_indices = @transform_4, window_bounds = array<i64: 1, 64>}, {pipeline_mode = #tpu.pipeline_mode<synchronous>, transform_indices = @transform_5, window_bounds = array<i64: 16, 128>}, {pipeline_mode = #tpu.pipeline_mode<synchronous>, transform_indices = @transform_6, window_bounds = array<i64: 1, 128>}, {pipeline_mode = #tpu.pipeline_mode<synchronous>, transform_indices = @transform_7, window_bounds = array<i64: 128, 8>}, {pipeline_mode = #tpu.pipeline_mode<synchronous>, transform_indices = @transform_8, window_bounds = array<i64: 1, 8>}, {transform_indices = @transform_9, window_bounds = array<i64: 8, 2, 128>}, {transform_indices = @transform_10, window_bounds = array<i64: 8, 2, 1>}]} {
    %c0_i32 = arith.constant 0 : i32
    %0 = arith.cmpi eq, %arg0, %c0_i32 : i32
    %1 = arith.extui %0 : i1 to i32
    %c0_i32_0 = arith.constant 0 : i32
    %2 = arith.cmpi ne, %1, %c0_i32_0 : i32
    scf.if %2 {
      %cst_177 = arith.constant 0.000000e+00 : f32
      %480 = vector.broadcast %cst_177 : f32 to vector<2x16xf32>
      %c0_178 = arith.constant 0 : index
      %c0_179 = arith.constant 0 : index
      %481 = vector.load %arg12[%c0_178, %c0_179] : memref<2x16xf32, #tpu.memory_space<vmem>>, vector<2x16xf32>
      tpu.vector_store %arg12[%c0_178, %c0_179], %480 {strides = array<i32>} : memref<2x16xf32, #tpu.memory_space<vmem>>, vector<2x16xf32>,
      %cst_180 = arith.constant 0.000000e+00 : f32
      %482 = vector.broadcast %cst_180 : f32 to vector<2x16xf32>
      %c0_181 = arith.constant 0 : index
      %c0_182 = arith.constant 0 : index
      %483 = vector.load %arg13[%c0_181, %c0_182] : memref<2x16xf32, #tpu.memory_space<vmem>>, vector<2x16xf32>
      tpu.vector_store %arg13[%c0_181, %c0_182], %482 {strides = array<i32>} : memref<2x16xf32, #tpu.memory_space<vmem>>, vector<2x16xf32>,
      %cst_183 = arith.constant 0.000000e+00 : f32
      %484 = vector.broadcast %cst_183 : f32 to vector<2x8xf32>
      %c0_184 = arith.constant 0 : index
      %c0_185 = arith.constant 0 : index
      %485 = vector.load %arg9[%c0_184, %c0_185] : memref<1x8xf32, #tpu.memory_space<vmem>>, vector<1x8xf32>
      %486 = vector.broadcast %485 : vector<1x8xf32> to vector<2x8xf32>
      %487 = arith.addf %484, %486 : vector<2x8xf32>
      %c0_186 = arith.constant 0 : index
      %c0_187 = arith.constant 0 : index
      %488 = vector.load %arg14[%c0_186, %c0_187] : memref<2x8xf32, #tpu.memory_space<vmem>>, vector<2x8xf32>
      tpu.vector_store %arg14[%c0_186, %c0_187], %487 {strides = array<i32>} : memref<2x8xf32, #tpu.memory_space<vmem>>, vector<2x8xf32>,
    } else {
    }
    %c0 = arith.constant 0 : index
    %c0_1 = arith.constant 0 : index
    %3 = vector.load %arg2[%c0, %c0_1] : memref<32x64xf32, #tpu.memory_space<vmem>>, vector<32x64xf32>
    %c0_2 = arith.constant 0 : index
    %c0_3 = arith.constant 0 : index
    %4 = vector.load %arg3[%c0_2, %c0_3] : memref<8x64xf32, #tpu.memory_space<vmem>>, vector<8x64xf32>
    %c0_4 = arith.constant 0 : index
    %c0_5 = arith.constant 0 : index
    %5 = vector.load %arg4[%c0_4, %c0_5] : memref<16x64xf32, #tpu.memory_space<vmem>>, vector<16x64xf32>
    %c0_6 = arith.constant 0 : index
    %c0_7 = arith.constant 0 : index
    %6 = vector.load %arg5[%c0_6, %c0_7] : memref<1x64xf32, #tpu.memory_space<vmem>>, vector<1x64xf32>
    %c0_8 = arith.constant 0 : index
    %c0_9 = arith.constant 0 : index
    %7 = vector.load %arg6[%c0_8, %c0_9] : memref<16x128xf32, #tpu.memory_space<vmem>>, vector<16x128xf32>
    %c0_10 = arith.constant 0 : index
    %c0_11 = arith.constant 0 : index
    %8 = vector.load %arg7[%c0_10, %c0_11] : memref<1x128xf32, #tpu.memory_space<vmem>>, vector<1x128xf32>
    %c0_12 = arith.constant 0 : index
    %c0_13 = arith.constant 0 : index
    %9 = vector.load %arg8[%c0_12, %c0_13] : memref<128x8xf32, #tpu.memory_space<vmem>>, vector<128x8xf32>
    %c0_14 = arith.constant 0 : index
    %c0_15 = arith.constant 0 : index
    %10 = vector.load %arg12[%c0_14, %c0_15] : memref<2x16xf32, #tpu.memory_space<vmem>>, vector<2x16xf32>
    %c0_16 = arith.constant 0 : index
    %c0_17 = arith.constant 0 : index
    %11 = vector.load %arg13[%c0_16, %c0_17] : memref<2x16xf32, #tpu.memory_space<vmem>>, vector<2x16xf32>
    %c0_18 = arith.constant 0 : index
    %c0_19 = arith.constant 0 : index
    %12 = vector.load %arg14[%c0_18, %c0_19] : memref<2x8xf32, #tpu.memory_space<vmem>>, vector<2x8xf32>
    %c0_20 = arith.constant 0 : index
    %c0_21 = arith.constant 0 : index
    %c0_22 = arith.constant 0 : index
    %13 = vector.load %arg1[%c0_20, %c0_21, %c0_22] : memref<8x2x32xf32, #tpu.memory_space<vmem>>, vector<1x2x32xf32>
    %14 = vector.shape_cast %13 : vector<1x2x32xf32> to vector<2x32xf32>
    %cst = arith.constant dense<0.000000e+00> : vector<2x64xf32>
    %15 = tpu.matmul %14, %3, %cst {dimension_numbers = #tpu.dot_dimension_numbers<[1], [0], [0], [1], [0, 0, 1, 1], [], []>} : vector<2x32xf32>, vector<32x64xf32>, vector<2x64xf32> -> vector<2x64xf32>
    %16 = vector.broadcast %6 : vector<1x64xf32> to vector<2x64xf32>
    %17 = arith.addf %16, %15 : vector<2x64xf32>
    %cst_23 = arith.constant dense<0.000000e+00> : vector<2x64xf32>
    %18 = tpu.matmul %12, %4, %cst_23 {dimension_numbers = #tpu.dot_dimension_numbers<[1], [0], [0], [1], [0, 0, 1, 1], [], []>} : vector<2x8xf32>, vector<8x64xf32>, vector<2x64xf32> -> vector<2x64xf32>
    %19 = arith.addf %17, %18 : vector<2x64xf32>
    %cst_24 = arith.constant dense<0.000000e+00> : vector<2x64xf32>
    %20 = tpu.matmul %10, %5, %cst_24 {dimension_numbers = #tpu.dot_dimension_numbers<[1], [0], [0], [1], [0, 0, 1, 1], [], []>} : vector<2x16xf32>, vector<16x64xf32>, vector<2x64xf32> -> vector<2x64xf32>
    %21 = arith.addf %19, %20 : vector<2x64xf32>
    %22 = vector.extract_strided_slice %21 {offsets = [0, 0], sizes = [2, 16], strides = [1, 1]} : vector<2x64xf32> to vector<2x16xf32>
    %23 = arith.negf %22 : vector<2x16xf32>
    %24 = math.exp %23 : vector<2x16xf32>
    %cst_25 = arith.constant 1.000000e+00 : f32
    %25 = vector.broadcast %cst_25 : f32 to vector<2x16xf32>
    %26 = arith.addf %25, %24 : vector<2x16xf32>
    %27 = arith.divf %25, %26 : vector<2x16xf32>
    %28 = vector.extract_strided_slice %21 {offsets = [0, 16], sizes = [2, 16], strides = [1, 1]} : vector<2x64xf32> to vector<2x16xf32>
    %29 = arith.negf %28 : vector<2x16xf32>
    %30 = math.exp %29 : vector<2x16xf32>
    %cst_26 = arith.constant 1.000000e+00 : f32
    %31 = vector.broadcast %cst_26 : f32 to vector<2x16xf32>
    %32 = arith.addf %31, %30 : vector<2x16xf32>
    %33 = arith.divf %31, %32 : vector<2x16xf32>
    %34 = vector.extract_strided_slice %21 {offsets = [0, 32], sizes = [2, 16], strides = [1, 1]} : vector<2x64xf32> to vector<2x16xf32>
    %35 = math.tanh %34 : vector<2x16xf32>
    %36 = vector.extract_strided_slice %21 {offsets = [0, 48], sizes = [2, 16], strides = [1, 1]} : vector<2x64xf32> to vector<2x16xf32>
    %37 = arith.negf %36 : vector<2x16xf32>
    %38 = math.exp %37 : vector<2x16xf32>
    %cst_27 = arith.constant 1.000000e+00 : f32
    %39 = vector.broadcast %cst_27 : f32 to vector<2x16xf32>
    %40 = arith.addf %39, %38 : vector<2x16xf32>
    %41 = arith.divf %39, %40 : vector<2x16xf32>
    %42 = arith.mulf %33, %11 : vector<2x16xf32>
    %43 = arith.mulf %27, %35 : vector<2x16xf32>
    %44 = arith.addf %42, %43 : vector<2x16xf32>
    %45 = math.tanh %44 : vector<2x16xf32>
    %46 = arith.mulf %41, %45 : vector<2x16xf32>
    %cst_28 = arith.constant dense<0.000000e+00> : vector<2x128xf32>
    %47 = tpu.matmul %46, %7, %cst_28 {dimension_numbers = #tpu.dot_dimension_numbers<[1], [0], [0], [1], [0, 0, 1, 1], [], []>} : vector<2x16xf32>, vector<16x128xf32>, vector<2x128xf32> -> vector<2x128xf32>
    %48 = vector.broadcast %8 : vector<1x128xf32> to vector<2x128xf32>
    %49 = arith.addf %47, %48 : vector<2x128xf32>
    %c0_29 = arith.constant 0 : index
    %c0_30 = arith.constant 0 : index
    %c0_31 = arith.constant 0 : index
    %50 = vector.load %arg10[%c0_29, %c0_30, %c0_31] : memref<8x2x128xf32, #tpu.memory_space<vmem>>, vector<1x2x128xf32>
    %51 = vector.shape_cast %50 : vector<1x2x128xf32> to vector<2x128xf32>
    %52 = vector.shape_cast %49 : vector<2x128xf32> to vector<1x2x128xf32>
    tpu.vector_store %arg10[%c0_29, %c0_30, %c0_31], %52 {strides = array<i32>} : memref<8x2x128xf32, #tpu.memory_space<vmem>>, vector<1x2x128xf32>,
    %cst_32 = arith.constant dense<0xFF800000> : vector<2xf32>
    %53 = vector.multi_reduction <maximumf>, %49, %cst_32 [1] : vector<2x128xf32> to vector<2xf32>
    %54 = vector.shape_cast %53 : vector<2xf32> to vector<2x1xf32>
    %55 = tpu.iota {dimensions = array<i32: 1>} : vector<2x128xi32>
    %56 = vector.broadcast %54 : vector<2x1xf32> to vector<2x128xf32>
    %57 = arith.cmpf oge, %49, %56 : vector<2x128xf32>
    %c128_i32 = arith.constant 128 : i32
    %58 = vector.broadcast %c128_i32 : i32 to vector<2x128xi32>
    %59 = arith.select %57, %55, %58 : vector<2x128xi1>, vector<2x128xi32>
    %cst_33 = arith.constant dense<2147483647> : vector<2xi32>
    %60 = vector.multi_reduction <minsi>, %59, %cst_33 [1] : vector<2x128xi32> to vector<2xi32>
    %61 = vector.shape_cast %60 : vector<2xi32> to vector<2x1xi32>
    %62 = arith.sitofp %61 : vector<2x1xi32> to vector<2x1xf32>
    %c0_34 = arith.constant 0 : index
    %c0_35 = arith.constant 0 : index
    %c0_36 = arith.constant 0 : index
    %63 = vector.load %arg11[%c0_34, %c0_35, %c0_36] : memref<8x2x1xf32, #tpu.memory_space<vmem>>, vector<1x2x1xf32>
    %64 = vector.shape_cast %63 : vector<1x2x1xf32> to vector<2x1xf32>
    %65 = vector.shape_cast %62 : vector<2x1xf32> to vector<1x2x1xf32>
    tpu.vector_store %arg11[%c0_34, %c0_35, %c0_36], %65 {strides = array<i32>} : memref<8x2x1xf32, #tpu.memory_space<vmem>>, vector<1x2x1xf32>,
    %66 = vector.broadcast %61 : vector<2x1xi32> to vector<2x128xi32>
    %67 = arith.cmpi eq, %55, %66 : vector<2x128xi32>
    %68 = arith.extui %67 : vector<2x128xi1> to vector<2x128xi32>
    %69 = arith.sitofp %68 : vector<2x128xi32> to vector<2x128xf32>
    %cst_37 = arith.constant dense<0.000000e+00> : vector<2x8xf32>
    %70 = tpu.matmul %69, %9, %cst_37 {dimension_numbers = #tpu.dot_dimension_numbers<[1], [0], [0], [1], [0, 0, 1, 1], [], []>} : vector<2x128xf32>, vector<128x8xf32>, vector<2x8xf32> -> vector<2x8xf32>
    %c1 = arith.constant 1 : index
    %c0_38 = arith.constant 0 : index
    %c0_39 = arith.constant 0 : index
    %71 = vector.load %arg1[%c1, %c0_38, %c0_39] : memref<8x2x32xf32, #tpu.memory_space<vmem>>, vector<1x2x32xf32>
    %72 = vector.shape_cast %71 : vector<1x2x32xf32> to vector<2x32xf32>
    %cst_40 = arith.constant dense<0.000000e+00> : vector<2x64xf32>
    %73 = tpu.matmul %72, %3, %cst_40 {dimension_numbers = #tpu.dot_dimension_numbers<[1], [0], [0], [1], [0, 0, 1, 1], [], []>} : vector<2x32xf32>, vector<32x64xf32>, vector<2x64xf32> -> vector<2x64xf32>
    %74 = vector.broadcast %6 : vector<1x64xf32> to vector<2x64xf32>
    %75 = arith.addf %74, %73 : vector<2x64xf32>
    %cst_41 = arith.constant dense<0.000000e+00> : vector<2x64xf32>
    %76 = tpu.matmul %70, %4, %cst_41 {dimension_numbers = #tpu.dot_dimension_numbers<[1], [0], [0], [1], [0, 0, 1, 1], [], []>} : vector<2x8xf32>, vector<8x64xf32>, vector<2x64xf32> -> vector<2x64xf32>
    %77 = arith.addf %75, %76 : vector<2x64xf32>
    %cst_42 = arith.constant dense<0.000000e+00> : vector<2x64xf32>
    %78 = tpu.matmul %46, %5, %cst_42 {dimension_numbers = #tpu.dot_dimension_numbers<[1], [0], [0], [1], [0, 0, 1, 1], [], []>} : vector<2x16xf32>, vector<16x64xf32>, vector<2x64xf32> -> vector<2x64xf32>
    %79 = arith.addf %77, %78 : vector<2x64xf32>
    %80 = vector.extract_strided_slice %79 {offsets = [0, 0], sizes = [2, 16], strides = [1, 1]} : vector<2x64xf32> to vector<2x16xf32>
    %81 = arith.negf %80 : vector<2x16xf32>
    %82 = math.exp %81 : vector<2x16xf32>
    %cst_43 = arith.constant 1.000000e+00 : f32
    %83 = vector.broadcast %cst_43 : f32 to vector<2x16xf32>
    %84 = arith.addf %83, %82 : vector<2x16xf32>
    %85 = arith.divf %83, %84 : vector<2x16xf32>
    %86 = vector.extract_strided_slice %79 {offsets = [0, 16], sizes = [2, 16], strides = [1, 1]} : vector<2x64xf32> to vector<2x16xf32>
    %87 = arith.negf %86 : vector<2x16xf32>
    %88 = math.exp %87 : vector<2x16xf32>
    %cst_44 = arith.constant 1.000000e+00 : f32
    %89 = vector.broadcast %cst_44 : f32 to vector<2x16xf32>
    %90 = arith.addf %89, %88 : vector<2x16xf32>
    %91 = arith.divf %89, %90 : vector<2x16xf32>
    %92 = vector.extract_strided_slice %79 {offsets = [0, 32], sizes = [2, 16], strides = [1, 1]} : vector<2x64xf32> to vector<2x16xf32>
    %93 = math.tanh %92 : vector<2x16xf32>
    %94 = vector.extract_strided_slice %79 {offsets = [0, 48], sizes = [2, 16], strides = [1, 1]} : vector<2x64xf32> to vector<2x16xf32>
    %95 = arith.negf %94 : vector<2x16xf32>
    %96 = math.exp %95 : vector<2x16xf32>
    %cst_45 = arith.constant 1.000000e+00 : f32
    %97 = vector.broadcast %cst_45 : f32 to vector<2x16xf32>
    %98 = arith.addf %97, %96 : vector<2x16xf32>
    %99 = arith.divf %97, %98 : vector<2x16xf32>
    %100 = arith.mulf %91, %44 : vector<2x16xf32>
    %101 = arith.mulf %85, %93 : vector<2x16xf32>
    %102 = arith.addf %100, %101 : vector<2x16xf32>
    %103 = math.tanh %102 : vector<2x16xf32>
    %104 = arith.mulf %99, %103 : vector<2x16xf32>
    %cst_46 = arith.constant dense<0.000000e+00> : vector<2x128xf32>
    %105 = tpu.matmul %104, %7, %cst_46 {dimension_numbers = #tpu.dot_dimension_numbers<[1], [0], [0], [1], [0, 0, 1, 1], [], []>} : vector<2x16xf32>, vector<16x128xf32>, vector<2x128xf32> -> vector<2x128xf32>
    %106 = vector.broadcast %8 : vector<1x128xf32> to vector<2x128xf32>
    %107 = arith.addf %105, %106 : vector<2x128xf32>
    %c1_47 = arith.constant 1 : index
    %c0_48 = arith.constant 0 : index
    %c0_49 = arith.constant 0 : index
    %108 = vector.load %arg10[%c1_47, %c0_48, %c0_49] : memref<8x2x128xf32, #tpu.memory_space<vmem>>, vector<1x2x128xf32>
    %109 = vector.shape_cast %108 : vector<1x2x128xf32> to vector<2x128xf32>
    %110 = vector.shape_cast %107 : vector<2x128xf32> to vector<1x2x128xf32>
    tpu.vector_store %arg10[%c1_47, %c0_48, %c0_49], %110 {strides = array<i32>} : memref<8x2x128xf32, #tpu.memory_space<vmem>>, vector<1x2x128xf32>,
    %cst_50 = arith.constant dense<0xFF800000> : vector<2xf32>
    %111 = vector.multi_reduction <maximumf>, %107, %cst_50 [1] : vector<2x128xf32> to vector<2xf32>
    %112 = vector.shape_cast %111 : vector<2xf32> to vector<2x1xf32>
    %113 = tpu.iota {dimensions = array<i32: 1>} : vector<2x128xi32>
    %114 = vector.broadcast %112 : vector<2x1xf32> to vector<2x128xf32>
    %115 = arith.cmpf oge, %107, %114 : vector<2x128xf32>
    %c128_i32_51 = arith.constant 128 : i32
    %116 = vector.broadcast %c128_i32_51 : i32 to vector<2x128xi32>
    %117 = arith.select %115, %113, %116 : vector<2x128xi1>, vector<2x128xi32>
    %cst_52 = arith.constant dense<2147483647> : vector<2xi32>
    %118 = vector.multi_reduction <minsi>, %117, %cst_52 [1] : vector<2x128xi32> to vector<2xi32>
    %119 = vector.shape_cast %118 : vector<2xi32> to vector<2x1xi32>
    %120 = arith.sitofp %119 : vector<2x1xi32> to vector<2x1xf32>
    %c1_53 = arith.constant 1 : index
    %c0_54 = arith.constant 0 : index
    %c0_55 = arith.constant 0 : index
    %121 = vector.load %arg11[%c1_53, %c0_54, %c0_55] : memref<8x2x1xf32, #tpu.memory_space<vmem>>, vector<1x2x1xf32>
    %122 = vector.shape_cast %121 : vector<1x2x1xf32> to vector<2x1xf32>
    %123 = vector.shape_cast %120 : vector<2x1xf32> to vector<1x2x1xf32>
    tpu.vector_store %arg11[%c1_53, %c0_54, %c0_55], %123 {strides = array<i32>} : memref<8x2x1xf32, #tpu.memory_space<vmem>>, vector<1x2x1xf32>,
    %124 = vector.broadcast %119 : vector<2x1xi32> to vector<2x128xi32>
    %125 = arith.cmpi eq, %113, %124 : vector<2x128xi32>
    %126 = arith.extui %125 : vector<2x128xi1> to vector<2x128xi32>
    %127 = arith.sitofp %126 : vector<2x128xi32> to vector<2x128xf32>
    %cst_56 = arith.constant dense<0.000000e+00> : vector<2x8xf32>
    %128 = tpu.matmul %127, %9, %cst_56 {dimension_numbers = #tpu.dot_dimension_numbers<[1], [0], [0], [1], [0, 0, 1, 1], [], []>} : vector<2x128xf32>, vector<128x8xf32>, vector<2x8xf32> -> vector<2x8xf32>
    %c2 = arith.constant 2 : index
    %c0_57 = arith.constant 0 : index
    %c0_58 = arith.constant 0 : index
    %129 = vector.load %arg1[%c2, %c0_57, %c0_58] : memref<8x2x32xf32, #tpu.memory_space<vmem>>, vector<1x2x32xf32>
    %130 = vector.shape_cast %129 : vector<1x2x32xf32> to vector<2x32xf32>
    %cst_59 = arith.constant dense<0.000000e+00> : vector<2x64xf32>
    %131 = tpu.matmul %130, %3, %cst_59 {dimension_numbers = #tpu.dot_dimension_numbers<[1], [0], [0], [1], [0, 0, 1, 1], [], []>} : vector<2x32xf32>, vector<32x64xf32>, vector<2x64xf32> -> vector<2x64xf32>
    %132 = vector.broadcast %6 : vector<1x64xf32> to vector<2x64xf32>
    %133 = arith.addf %132, %131 : vector<2x64xf32>
    %cst_60 = arith.constant dense<0.000000e+00> : vector<2x64xf32>
    %134 = tpu.matmul %128, %4, %cst_60 {dimension_numbers = #tpu.dot_dimension_numbers<[1], [0], [0], [1], [0, 0, 1, 1], [], []>} : vector<2x8xf32>, vector<8x64xf32>, vector<2x64xf32> -> vector<2x64xf32>
    %135 = arith.addf %133, %134 : vector<2x64xf32>
    %cst_61 = arith.constant dense<0.000000e+00> : vector<2x64xf32>
    %136 = tpu.matmul %104, %5, %cst_61 {dimension_numbers = #tpu.dot_dimension_numbers<[1], [0], [0], [1], [0, 0, 1, 1], [], []>} : vector<2x16xf32>, vector<16x64xf32>, vector<2x64xf32> -> vector<2x64xf32>
    %137 = arith.addf %135, %136 : vector<2x64xf32>
    %138 = vector.extract_strided_slice %137 {offsets = [0, 0], sizes = [2, 16], strides = [1, 1]} : vector<2x64xf32> to vector<2x16xf32>
    %139 = arith.negf %138 : vector<2x16xf32>
    %140 = math.exp %139 : vector<2x16xf32>
    %cst_62 = arith.constant 1.000000e+00 : f32
    %141 = vector.broadcast %cst_62 : f32 to vector<2x16xf32>
    %142 = arith.addf %141, %140 : vector<2x16xf32>
    %143 = arith.divf %141, %142 : vector<2x16xf32>
    %144 = vector.extract_strided_slice %137 {offsets = [0, 16], sizes = [2, 16], strides = [1, 1]} : vector<2x64xf32> to vector<2x16xf32>
    %145 = arith.negf %144 : vector<2x16xf32>
    %146 = math.exp %145 : vector<2x16xf32>
    %cst_63 = arith.constant 1.000000e+00 : f32
    %147 = vector.broadcast %cst_63 : f32 to vector<2x16xf32>
    %148 = arith.addf %147, %146 : vector<2x16xf32>
    %149 = arith.divf %147, %148 : vector<2x16xf32>
    %150 = vector.extract_strided_slice %137 {offsets = [0, 32], sizes = [2, 16], strides = [1, 1]} : vector<2x64xf32> to vector<2x16xf32>
    %151 = math.tanh %150 : vector<2x16xf32>
    %152 = vector.extract_strided_slice %137 {offsets = [0, 48], sizes = [2, 16], strides = [1, 1]} : vector<2x64xf32> to vector<2x16xf32>
    %153 = arith.negf %152 : vector<2x16xf32>
    %154 = math.exp %153 : vector<2x16xf32>
    %cst_64 = arith.constant 1.000000e+00 : f32
    %155 = vector.broadcast %cst_64 : f32 to vector<2x16xf32>
    %156 = arith.addf %155, %154 : vector<2x16xf32>
    %157 = arith.divf %155, %156 : vector<2x16xf32>
    %158 = arith.mulf %149, %102 : vector<2x16xf32>
    %159 = arith.mulf %143, %151 : vector<2x16xf32>
    %160 = arith.addf %158, %159 : vector<2x16xf32>
    %161 = math.tanh %160 : vector<2x16xf32>
    %162 = arith.mulf %157, %161 : vector<2x16xf32>
    %cst_65 = arith.constant dense<0.000000e+00> : vector<2x128xf32>
    %163 = tpu.matmul %162, %7, %cst_65 {dimension_numbers = #tpu.dot_dimension_numbers<[1], [0], [0], [1], [0, 0, 1, 1], [], []>} : vector<2x16xf32>, vector<16x128xf32>, vector<2x128xf32> -> vector<2x128xf32>
    %164 = vector.broadcast %8 : vector<1x128xf32> to vector<2x128xf32>
    %165 = arith.addf %163, %164 : vector<2x128xf32>
    %c2_66 = arith.constant 2 : index
    %c0_67 = arith.constant 0 : index
    %c0_68 = arith.constant 0 : index
    %166 = vector.load %arg10[%c2_66, %c0_67, %c0_68] : memref<8x2x128xf32, #tpu.memory_space<vmem>>, vector<1x2x128xf32>
    %167 = vector.shape_cast %166 : vector<1x2x128xf32> to vector<2x128xf32>
    %168 = vector.shape_cast %165 : vector<2x128xf32> to vector<1x2x128xf32>
    tpu.vector_store %arg10[%c2_66, %c0_67, %c0_68], %168 {strides = array<i32>} : memref<8x2x128xf32, #tpu.memory_space<vmem>>, vector<1x2x128xf32>,
    %cst_69 = arith.constant dense<0xFF800000> : vector<2xf32>
    %169 = vector.multi_reduction <maximumf>, %165, %cst_69 [1] : vector<2x128xf32> to vector<2xf32>
    %170 = vector.shape_cast %169 : vector<2xf32> to vector<2x1xf32>
    %171 = tpu.iota {dimensions = array<i32: 1>} : vector<2x128xi32>
    %172 = vector.broadcast %170 : vector<2x1xf32> to vector<2x128xf32>
    %173 = arith.cmpf oge, %165, %172 : vector<2x128xf32>
    %c128_i32_70 = arith.constant 128 : i32
    %174 = vector.broadcast %c128_i32_70 : i32 to vector<2x128xi32>
    %175 = arith.select %173, %171, %174 : vector<2x128xi1>, vector<2x128xi32>
    %cst_71 = arith.constant dense<2147483647> : vector<2xi32>
    %176 = vector.multi_reduction <minsi>, %175, %cst_71 [1] : vector<2x128xi32> to vector<2xi32>
    %177 = vector.shape_cast %176 : vector<2xi32> to vector<2x1xi32>
    %178 = arith.sitofp %177 : vector<2x1xi32> to vector<2x1xf32>
    %c2_72 = arith.constant 2 : index
    %c0_73 = arith.constant 0 : index
    %c0_74 = arith.constant 0 : index
    %179 = vector.load %arg11[%c2_72, %c0_73, %c0_74] : memref<8x2x1xf32, #tpu.memory_space<vmem>>, vector<1x2x1xf32>
    %180 = vector.shape_cast %179 : vector<1x2x1xf32> to vector<2x1xf32>
    %181 = vector.shape_cast %178 : vector<2x1xf32> to vector<1x2x1xf32>
    tpu.vector_store %arg11[%c2_72, %c0_73, %c0_74], %181 {strides = array<i32>} : memref<8x2x1xf32, #tpu.memory_space<vmem>>, vector<1x2x1xf32>,
    %182 = vector.broadcast %177 : vector<2x1xi32> to vector<2x128xi32>
    %183 = arith.cmpi eq, %171, %182 : vector<2x128xi32>
    %184 = arith.extui %183 : vector<2x128xi1> to vector<2x128xi32>
    %185 = arith.sitofp %184 : vector<2x128xi32> to vector<2x128xf32>
    %cst_75 = arith.constant dense<0.000000e+00> : vector<2x8xf32>
    %186 = tpu.matmul %185, %9, %cst_75 {dimension_numbers = #tpu.dot_dimension_numbers<[1], [0], [0], [1], [0, 0, 1, 1], [], []>} : vector<2x128xf32>, vector<128x8xf32>, vector<2x8xf32> -> vector<2x8xf32>
    %c3 = arith.constant 3 : index
    %c0_76 = arith.constant 0 : index
    %c0_77 = arith.constant 0 : index
    %187 = vector.load %arg1[%c3, %c0_76, %c0_77] : memref<8x2x32xf32, #tpu.memory_space<vmem>>, vector<1x2x32xf32>
    %188 = vector.shape_cast %187 : vector<1x2x32xf32> to vector<2x32xf32>
    %cst_78 = arith.constant dense<0.000000e+00> : vector<2x64xf32>
    %189 = tpu.matmul %188, %3, %cst_78 {dimension_numbers = #tpu.dot_dimension_numbers<[1], [0], [0], [1], [0, 0, 1, 1], [], []>} : vector<2x32xf32>, vector<32x64xf32>, vector<2x64xf32> -> vector<2x64xf32>
    %190 = vector.broadcast %6 : vector<1x64xf32> to vector<2x64xf32>
    %191 = arith.addf %190, %189 : vector<2x64xf32>
    %cst_79 = arith.constant dense<0.000000e+00> : vector<2x64xf32>
    %192 = tpu.matmul %186, %4, %cst_79 {dimension_numbers = #tpu.dot_dimension_numbers<[1], [0], [0], [1], [0, 0, 1, 1], [], []>} : vector<2x8xf32>, vector<8x64xf32>, vector<2x64xf32> -> vector<2x64xf32>
    %193 = arith.addf %191, %192 : vector<2x64xf32>
    %cst_80 = arith.constant dense<0.000000e+00> : vector<2x64xf32>
    %194 = tpu.matmul %162, %5, %cst_80 {dimension_numbers = #tpu.dot_dimension_numbers<[1], [0], [0], [1], [0, 0, 1, 1], [], []>} : vector<2x16xf32>, vector<16x64xf32>, vector<2x64xf32> -> vector<2x64xf32>
    %195 = arith.addf %193, %194 : vector<2x64xf32>
    %196 = vector.extract_strided_slice %195 {offsets = [0, 0], sizes = [2, 16], strides = [1, 1]} : vector<2x64xf32> to vector<2x16xf32>
    %197 = arith.negf %196 : vector<2x16xf32>
    %198 = math.exp %197 : vector<2x16xf32>
    %cst_81 = arith.constant 1.000000e+00 : f32
    %199 = vector.broadcast %cst_81 : f32 to vector<2x16xf32>
    %200 = arith.addf %199, %198 : vector<2x16xf32>
    %201 = arith.divf %199, %200 : vector<2x16xf32>
    %202 = vector.extract_strided_slice %195 {offsets = [0, 16], sizes = [2, 16], strides = [1, 1]} : vector<2x64xf32> to vector<2x16xf32>
    %203 = arith.negf %202 : vector<2x16xf32>
    %204 = math.exp %203 : vector<2x16xf32>
    %cst_82 = arith.constant 1.000000e+00 : f32
    %205 = vector.broadcast %cst_82 : f32 to vector<2x16xf32>
    %206 = arith.addf %205, %204 : vector<2x16xf32>
    %207 = arith.divf %205, %206 : vector<2x16xf32>
    %208 = vector.extract_strided_slice %195 {offsets = [0, 32], sizes = [2, 16], strides = [1, 1]} : vector<2x64xf32> to vector<2x16xf32>
    %209 = math.tanh %208 : vector<2x16xf32>
    %210 = vector.extract_strided_slice %195 {offsets = [0, 48], sizes = [2, 16], strides = [1, 1]} : vector<2x64xf32> to vector<2x16xf32>
    %211 = arith.negf %210 : vector<2x16xf32>
    %212 = math.exp %211 : vector<2x16xf32>
    %cst_83 = arith.constant 1.000000e+00 : f32
    %213 = vector.broadcast %cst_83 : f32 to vector<2x16xf32>
    %214 = arith.addf %213, %212 : vector<2x16xf32>
    %215 = arith.divf %213, %214 : vector<2x16xf32>
    %216 = arith.mulf %207, %160 : vector<2x16xf32>
    %217 = arith.mulf %201, %209 : vector<2x16xf32>
    %218 = arith.addf %216, %217 : vector<2x16xf32>
    %219 = math.tanh %218 : vector<2x16xf32>
    %220 = arith.mulf %215, %219 : vector<2x16xf32>
    %cst_84 = arith.constant dense<0.000000e+00> : vector<2x128xf32>
    %221 = tpu.matmul %220, %7, %cst_84 {dimension_numbers = #tpu.dot_dimension_numbers<[1], [0], [0], [1], [0, 0, 1, 1], [], []>} : vector<2x16xf32>, vector<16x128xf32>, vector<2x128xf32> -> vector<2x128xf32>
    %222 = vector.broadcast %8 : vector<1x128xf32> to vector<2x128xf32>
    %223 = arith.addf %221, %222 : vector<2x128xf32>
    %c3_85 = arith.constant 3 : index
    %c0_86 = arith.constant 0 : index
    %c0_87 = arith.constant 0 : index
    %224 = vector.load %arg10[%c3_85, %c0_86, %c0_87] : memref<8x2x128xf32, #tpu.memory_space<vmem>>, vector<1x2x128xf32>
    %225 = vector.shape_cast %224 : vector<1x2x128xf32> to vector<2x128xf32>
    %226 = vector.shape_cast %223 : vector<2x128xf32> to vector<1x2x128xf32>
    tpu.vector_store %arg10[%c3_85, %c0_86, %c0_87], %226 {strides = array<i32>} : memref<8x2x128xf32, #tpu.memory_space<vmem>>, vector<1x2x128xf32>,
    %cst_88 = arith.constant dense<0xFF800000> : vector<2xf32>
    %227 = vector.multi_reduction <maximumf>, %223, %cst_88 [1] : vector<2x128xf32> to vector<2xf32>
    %228 = vector.shape_cast %227 : vector<2xf32> to vector<2x1xf32>
    %229 = tpu.iota {dimensions = array<i32: 1>} : vector<2x128xi32>
    %230 = vector.broadcast %228 : vector<2x1xf32> to vector<2x128xf32>
    %231 = arith.cmpf oge, %223, %230 : vector<2x128xf32>
    %c128_i32_89 = arith.constant 128 : i32
    %232 = vector.broadcast %c128_i32_89 : i32 to vector<2x128xi32>
    %233 = arith.select %231, %229, %232 : vector<2x128xi1>, vector<2x128xi32>
    %cst_90 = arith.constant dense<2147483647> : vector<2xi32>
    %234 = vector.multi_reduction <minsi>, %233, %cst_90 [1] : vector<2x128xi32> to vector<2xi32>
    %235 = vector.shape_cast %234 : vector<2xi32> to vector<2x1xi32>
    %236 = arith.sitofp %235 : vector<2x1xi32> to vector<2x1xf32>
    %c3_91 = arith.constant 3 : index
    %c0_92 = arith.constant 0 : index
    %c0_93 = arith.constant 0 : index
    %237 = vector.load %arg11[%c3_91, %c0_92, %c0_93] : memref<8x2x1xf32, #tpu.memory_space<vmem>>, vector<1x2x1xf32>
    %238 = vector.shape_cast %237 : vector<1x2x1xf32> to vector<2x1xf32>
    %239 = vector.shape_cast %236 : vector<2x1xf32> to vector<1x2x1xf32>
    tpu.vector_store %arg11[%c3_91, %c0_92, %c0_93], %239 {strides = array<i32>} : memref<8x2x1xf32, #tpu.memory_space<vmem>>, vector<1x2x1xf32>,
    %240 = vector.broadcast %235 : vector<2x1xi32> to vector<2x128xi32>
    %241 = arith.cmpi eq, %229, %240 : vector<2x128xi32>
    %242 = arith.extui %241 : vector<2x128xi1> to vector<2x128xi32>
    %243 = arith.sitofp %242 : vector<2x128xi32> to vector<2x128xf32>
    %cst_94 = arith.constant dense<0.000000e+00> : vector<2x8xf32>
    %244 = tpu.matmul %243, %9, %cst_94 {dimension_numbers = #tpu.dot_dimension_numbers<[1], [0], [0], [1], [0, 0, 1, 1], [], []>} : vector<2x128xf32>, vector<128x8xf32>, vector<2x8xf32> -> vector<2x8xf32>
    %c4 = arith.constant 4 : index
    %c0_95 = arith.constant 0 : index
    %c0_96 = arith.constant 0 : index
    %245 = vector.load %arg1[%c4, %c0_95, %c0_96] : memref<8x2x32xf32, #tpu.memory_space<vmem>>, vector<1x2x32xf32>
    %246 = vector.shape_cast %245 : vector<1x2x32xf32> to vector<2x32xf32>
    %cst_97 = arith.constant dense<0.000000e+00> : vector<2x64xf32>
    %247 = tpu.matmul %246, %3, %cst_97 {dimension_numbers = #tpu.dot_dimension_numbers<[1], [0], [0], [1], [0, 0, 1, 1], [], []>} : vector<2x32xf32>, vector<32x64xf32>, vector<2x64xf32> -> vector<2x64xf32>
    %248 = vector.broadcast %6 : vector<1x64xf32> to vector<2x64xf32>
    %249 = arith.addf %248, %247 : vector<2x64xf32>
    %cst_98 = arith.constant dense<0.000000e+00> : vector<2x64xf32>
    %250 = tpu.matmul %244, %4, %cst_98 {dimension_numbers = #tpu.dot_dimension_numbers<[1], [0], [0], [1], [0, 0, 1, 1], [], []>} : vector<2x8xf32>, vector<8x64xf32>, vector<2x64xf32> -> vector<2x64xf32>
    %251 = arith.addf %249, %250 : vector<2x64xf32>
    %cst_99 = arith.constant dense<0.000000e+00> : vector<2x64xf32>
    %252 = tpu.matmul %220, %5, %cst_99 {dimension_numbers = #tpu.dot_dimension_numbers<[1], [0], [0], [1], [0, 0, 1, 1], [], []>} : vector<2x16xf32>, vector<16x64xf32>, vector<2x64xf32> -> vector<2x64xf32>
    %253 = arith.addf %251, %252 : vector<2x64xf32>
    %254 = vector.extract_strided_slice %253 {offsets = [0, 0], sizes = [2, 16], strides = [1, 1]} : vector<2x64xf32> to vector<2x16xf32>
    %255 = arith.negf %254 : vector<2x16xf32>
    %256 = math.exp %255 : vector<2x16xf32>
    %cst_100 = arith.constant 1.000000e+00 : f32
    %257 = vector.broadcast %cst_100 : f32 to vector<2x16xf32>
    %258 = arith.addf %257, %256 : vector<2x16xf32>
    %259 = arith.divf %257, %258 : vector<2x16xf32>
    %260 = vector.extract_strided_slice %253 {offsets = [0, 16], sizes = [2, 16], strides = [1, 1]} : vector<2x64xf32> to vector<2x16xf32>
    %261 = arith.negf %260 : vector<2x16xf32>
    %262 = math.exp %261 : vector<2x16xf32>
    %cst_101 = arith.constant 1.000000e+00 : f32
    %263 = vector.broadcast %cst_101 : f32 to vector<2x16xf32>
    %264 = arith.addf %263, %262 : vector<2x16xf32>
    %265 = arith.divf %263, %264 : vector<2x16xf32>
    %266 = vector.extract_strided_slice %253 {offsets = [0, 32], sizes = [2, 16], strides = [1, 1]} : vector<2x64xf32> to vector<2x16xf32>
    %267 = math.tanh %266 : vector<2x16xf32>
    %268 = vector.extract_strided_slice %253 {offsets = [0, 48], sizes = [2, 16], strides = [1, 1]} : vector<2x64xf32> to vector<2x16xf32>
    %269 = arith.negf %268 : vector<2x16xf32>
    %270 = math.exp %269 : vector<2x16xf32>
    %cst_102 = arith.constant 1.000000e+00 : f32
    %271 = vector.broadcast %cst_102 : f32 to vector<2x16xf32>
    %272 = arith.addf %271, %270 : vector<2x16xf32>
    %273 = arith.divf %271, %272 : vector<2x16xf32>
    %274 = arith.mulf %265, %218 : vector<2x16xf32>
    %275 = arith.mulf %259, %267 : vector<2x16xf32>
    %276 = arith.addf %274, %275 : vector<2x16xf32>
    %277 = math.tanh %276 : vector<2x16xf32>
    %278 = arith.mulf %273, %277 : vector<2x16xf32>
    %cst_103 = arith.constant dense<0.000000e+00> : vector<2x128xf32>
    %279 = tpu.matmul %278, %7, %cst_103 {dimension_numbers = #tpu.dot_dimension_numbers<[1], [0], [0], [1], [0, 0, 1, 1], [], []>} : vector<2x16xf32>, vector<16x128xf32>, vector<2x128xf32> -> vector<2x128xf32>
    %280 = vector.broadcast %8 : vector<1x128xf32> to vector<2x128xf32>
    %281 = arith.addf %279, %280 : vector<2x128xf32>
    %c4_104 = arith.constant 4 : index
    %c0_105 = arith.constant 0 : index
    %c0_106 = arith.constant 0 : index
    %282 = vector.load %arg10[%c4_104, %c0_105, %c0_106] : memref<8x2x128xf32, #tpu.memory_space<vmem>>, vector<1x2x128xf32>
    %283 = vector.shape_cast %282 : vector<1x2x128xf32> to vector<2x128xf32>
    %284 = vector.shape_cast %281 : vector<2x128xf32> to vector<1x2x128xf32>
    tpu.vector_store %arg10[%c4_104, %c0_105, %c0_106], %284 {strides = array<i32>} : memref<8x2x128xf32, #tpu.memory_space<vmem>>, vector<1x2x128xf32>,
    %cst_107 = arith.constant dense<0xFF800000> : vector<2xf32>
    %285 = vector.multi_reduction <maximumf>, %281, %cst_107 [1] : vector<2x128xf32> to vector<2xf32>
    %286 = vector.shape_cast %285 : vector<2xf32> to vector<2x1xf32>
    %287 = tpu.iota {dimensions = array<i32: 1>} : vector<2x128xi32>
    %288 = vector.broadcast %286 : vector<2x1xf32> to vector<2x128xf32>
    %289 = arith.cmpf oge, %281, %288 : vector<2x128xf32>
    %c128_i32_108 = arith.constant 128 : i32
    %290 = vector.broadcast %c128_i32_108 : i32 to vector<2x128xi32>
    %291 = arith.select %289, %287, %290 : vector<2x128xi1>, vector<2x128xi32>
    %cst_109 = arith.constant dense<2147483647> : vector<2xi32>
    %292 = vector.multi_reduction <minsi>, %291, %cst_109 [1] : vector<2x128xi32> to vector<2xi32>
    %293 = vector.shape_cast %292 : vector<2xi32> to vector<2x1xi32>
    %294 = arith.sitofp %293 : vector<2x1xi32> to vector<2x1xf32>
    %c4_110 = arith.constant 4 : index
    %c0_111 = arith.constant 0 : index
    %c0_112 = arith.constant 0 : index
    %295 = vector.load %arg11[%c4_110, %c0_111, %c0_112] : memref<8x2x1xf32, #tpu.memory_space<vmem>>, vector<1x2x1xf32>
    %296 = vector.shape_cast %295 : vector<1x2x1xf32> to vector<2x1xf32>
    %297 = vector.shape_cast %294 : vector<2x1xf32> to vector<1x2x1xf32>
    tpu.vector_store %arg11[%c4_110, %c0_111, %c0_112], %297 {strides = array<i32>} : memref<8x2x1xf32, #tpu.memory_space<vmem>>, vector<1x2x1xf32>,
    %298 = vector.broadcast %293 : vector<2x1xi32> to vector<2x128xi32>
    %299 = arith.cmpi eq, %287, %298 : vector<2x128xi32>
    %300 = arith.extui %299 : vector<2x128xi1> to vector<2x128xi32>
    %301 = arith.sitofp %300 : vector<2x128xi32> to vector<2x128xf32>
    %cst_113 = arith.constant dense<0.000000e+00> : vector<2x8xf32>
    %302 = tpu.matmul %301, %9, %cst_113 {dimension_numbers = #tpu.dot_dimension_numbers<[1], [0], [0], [1], [0, 0, 1, 1], [], []>} : vector<2x128xf32>, vector<128x8xf32>, vector<2x8xf32> -> vector<2x8xf32>
    %c5 = arith.constant 5 : index
    %c0_114 = arith.constant 0 : index
    %c0_115 = arith.constant 0 : index
    %303 = vector.load %arg1[%c5, %c0_114, %c0_115] : memref<8x2x32xf32, #tpu.memory_space<vmem>>, vector<1x2x32xf32>
    %304 = vector.shape_cast %303 : vector<1x2x32xf32> to vector<2x32xf32>
    %cst_116 = arith.constant dense<0.000000e+00> : vector<2x64xf32>
    %305 = tpu.matmul %304, %3, %cst_116 {dimension_numbers = #tpu.dot_dimension_numbers<[1], [0], [0], [1], [0, 0, 1, 1], [], []>} : vector<2x32xf32>, vector<32x64xf32>, vector<2x64xf32> -> vector<2x64xf32>
    %306 = vector.broadcast %6 : vector<1x64xf32> to vector<2x64xf32>
    %307 = arith.addf %306, %305 : vector<2x64xf32>
    %cst_117 = arith.constant dense<0.000000e+00> : vector<2x64xf32>
    %308 = tpu.matmul %302, %4, %cst_117 {dimension_numbers = #tpu.dot_dimension_numbers<[1], [0], [0], [1], [0, 0, 1, 1], [], []>} : vector<2x8xf32>, vector<8x64xf32>, vector<2x64xf32> -> vector<2x64xf32>
    %309 = arith.addf %307, %308 : vector<2x64xf32>
    %cst_118 = arith.constant dense<0.000000e+00> : vector<2x64xf32>
    %310 = tpu.matmul %278, %5, %cst_118 {dimension_numbers = #tpu.dot_dimension_numbers<[1], [0], [0], [1], [0, 0, 1, 1], [], []>} : vector<2x16xf32>, vector<16x64xf32>, vector<2x64xf32> -> vector<2x64xf32>
    %311 = arith.addf %309, %310 : vector<2x64xf32>
    %312 = vector.extract_strided_slice %311 {offsets = [0, 0], sizes = [2, 16], strides = [1, 1]} : vector<2x64xf32> to vector<2x16xf32>
    %313 = arith.negf %312 : vector<2x16xf32>
    %314 = math.exp %313 : vector<2x16xf32>
    %cst_119 = arith.constant 1.000000e+00 : f32
    %315 = vector.broadcast %cst_119 : f32 to vector<2x16xf32>
    %316 = arith.addf %315, %314 : vector<2x16xf32>
    %317 = arith.divf %315, %316 : vector<2x16xf32>
    %318 = vector.extract_strided_slice %311 {offsets = [0, 16], sizes = [2, 16], strides = [1, 1]} : vector<2x64xf32> to vector<2x16xf32>
    %319 = arith.negf %318 : vector<2x16xf32>
    %320 = math.exp %319 : vector<2x16xf32>
    %cst_120 = arith.constant 1.000000e+00 : f32
    %321 = vector.broadcast %cst_120 : f32 to vector<2x16xf32>
    %322 = arith.addf %321, %320 : vector<2x16xf32>
    %323 = arith.divf %321, %322 : vector<2x16xf32>
    %324 = vector.extract_strided_slice %311 {offsets = [0, 32], sizes = [2, 16], strides = [1, 1]} : vector<2x64xf32> to vector<2x16xf32>
    %325 = math.tanh %324 : vector<2x16xf32>
    %326 = vector.extract_strided_slice %311 {offsets = [0, 48], sizes = [2, 16], strides = [1, 1]} : vector<2x64xf32> to vector<2x16xf32>
    %327 = arith.negf %326 : vector<2x16xf32>
    %328 = math.exp %327 : vector<2x16xf32>
    %cst_121 = arith.constant 1.000000e+00 : f32
    %329 = vector.broadcast %cst_121 : f32 to vector<2x16xf32>
    %330 = arith.addf %329, %328 : vector<2x16xf32>
    %331 = arith.divf %329, %330 : vector<2x16xf32>
    %332 = arith.mulf %323, %276 : vector<2x16xf32>
    %333 = arith.mulf %317, %325 : vector<2x16xf32>
    %334 = arith.addf %332, %333 : vector<2x16xf32>
    %335 = math.tanh %334 : vector<2x16xf32>
    %336 = arith.mulf %331, %335 : vector<2x16xf32>
    %cst_122 = arith.constant dense<0.000000e+00> : vector<2x128xf32>
    %337 = tpu.matmul %336, %7, %cst_122 {dimension_numbers = #tpu.dot_dimension_numbers<[1], [0], [0], [1], [0, 0, 1, 1], [], []>} : vector<2x16xf32>, vector<16x128xf32>, vector<2x128xf32> -> vector<2x128xf32>
    %338 = vector.broadcast %8 : vector<1x128xf32> to vector<2x128xf32>
    %339 = arith.addf %337, %338 : vector<2x128xf32>
    %c5_123 = arith.constant 5 : index
    %c0_124 = arith.constant 0 : index
    %c0_125 = arith.constant 0 : index
    %340 = vector.load %arg10[%c5_123, %c0_124, %c0_125] : memref<8x2x128xf32, #tpu.memory_space<vmem>>, vector<1x2x128xf32>
    %341 = vector.shape_cast %340 : vector<1x2x128xf32> to vector<2x128xf32>
    %342 = vector.shape_cast %339 : vector<2x128xf32> to vector<1x2x128xf32>
    tpu.vector_store %arg10[%c5_123, %c0_124, %c0_125], %342 {strides = array<i32>} : memref<8x2x128xf32, #tpu.memory_space<vmem>>, vector<1x2x128xf32>,
    %cst_126 = arith.constant dense<0xFF800000> : vector<2xf32>
    %343 = vector.multi_reduction <maximumf>, %339, %cst_126 [1] : vector<2x128xf32> to vector<2xf32>
    %344 = vector.shape_cast %343 : vector<2xf32> to vector<2x1xf32>
    %345 = tpu.iota {dimensions = array<i32: 1>} : vector<2x128xi32>
    %346 = vector.broadcast %344 : vector<2x1xf32> to vector<2x128xf32>
    %347 = arith.cmpf oge, %339, %346 : vector<2x128xf32>
    %c128_i32_127 = arith.constant 128 : i32
    %348 = vector.broadcast %c128_i32_127 : i32 to vector<2x128xi32>
    %349 = arith.select %347, %345, %348 : vector<2x128xi1>, vector<2x128xi32>
    %cst_128 = arith.constant dense<2147483647> : vector<2xi32>
    %350 = vector.multi_reduction <minsi>, %349, %cst_128 [1] : vector<2x128xi32> to vector<2xi32>
    %351 = vector.shape_cast %350 : vector<2xi32> to vector<2x1xi32>
    %352 = arith.sitofp %351 : vector<2x1xi32> to vector<2x1xf32>
    %c5_129 = arith.constant 5 : index
    %c0_130 = arith.constant 0 : index
    %c0_131 = arith.constant 0 : index
    %353 = vector.load %arg11[%c5_129, %c0_130, %c0_131] : memref<8x2x1xf32, #tpu.memory_space<vmem>>, vector<1x2x1xf32>
    %354 = vector.shape_cast %353 : vector<1x2x1xf32> to vector<2x1xf32>
    %355 = vector.shape_cast %352 : vector<2x1xf32> to vector<1x2x1xf32>
    tpu.vector_store %arg11[%c5_129, %c0_130, %c0_131], %355 {strides = array<i32>} : memref<8x2x1xf32, #tpu.memory_space<vmem>>, vector<1x2x1xf32>,
    %356 = vector.broadcast %351 : vector<2x1xi32> to vector<2x128xi32>
    %357 = arith.cmpi eq, %345, %356 : vector<2x128xi32>
    %358 = arith.extui %357 : vector<2x128xi1> to vector<2x128xi32>
    %359 = arith.sitofp %358 : vector<2x128xi32> to vector<2x128xf32>
    %cst_132 = arith.constant dense<0.000000e+00> : vector<2x8xf32>
    %360 = tpu.matmul %359, %9, %cst_132 {dimension_numbers = #tpu.dot_dimension_numbers<[1], [0], [0], [1], [0, 0, 1, 1], [], []>} : vector<2x128xf32>, vector<128x8xf32>, vector<2x8xf32> -> vector<2x8xf32>
    %c6 = arith.constant 6 : index
    %c0_133 = arith.constant 0 : index
    %c0_134 = arith.constant 0 : index
    %361 = vector.load %arg1[%c6, %c0_133, %c0_134] : memref<8x2x32xf32, #tpu.memory_space<vmem>>, vector<1x2x32xf32>
    %362 = vector.shape_cast %361 : vector<1x2x32xf32> to vector<2x32xf32>
    %cst_135 = arith.constant dense<0.000000e+00> : vector<2x64xf32>
    %363 = tpu.matmul %362, %3, %cst_135 {dimension_numbers = #tpu.dot_dimension_numbers<[1], [0], [0], [1], [0, 0, 1, 1], [], []>} : vector<2x32xf32>, vector<32x64xf32>, vector<2x64xf32> -> vector<2x64xf32>
    %364 = vector.broadcast %6 : vector<1x64xf32> to vector<2x64xf32>
    %365 = arith.addf %364, %363 : vector<2x64xf32>
    %cst_136 = arith.constant dense<0.000000e+00> : vector<2x64xf32>
    %366 = tpu.matmul %360, %4, %cst_136 {dimension_numbers = #tpu.dot_dimension_numbers<[1], [0], [0], [1], [0, 0, 1, 1], [], []>} : vector<2x8xf32>, vector<8x64xf32>, vector<2x64xf32> -> vector<2x64xf32>
    %367 = arith.addf %365, %366 : vector<2x64xf32>
    %cst_137 = arith.constant dense<0.000000e+00> : vector<2x64xf32>
    %368 = tpu.matmul %336, %5, %cst_137 {dimension_numbers = #tpu.dot_dimension_numbers<[1], [0], [0], [1], [0, 0, 1, 1], [], []>} : vector<2x16xf32>, vector<16x64xf32>, vector<2x64xf32> -> vector<2x64xf32>
    %369 = arith.addf %367, %368 : vector<2x64xf32>
    %370 = vector.extract_strided_slice %369 {offsets = [0, 0], sizes = [2, 16], strides = [1, 1]} : vector<2x64xf32> to vector<2x16xf32>
    %371 = arith.negf %370 : vector<2x16xf32>
    %372 = math.exp %371 : vector<2x16xf32>
    %cst_138 = arith.constant 1.000000e+00 : f32
    %373 = vector.broadcast %cst_138 : f32 to vector<2x16xf32>
    %374 = arith.addf %373, %372 : vector<2x16xf32>
    %375 = arith.divf %373, %374 : vector<2x16xf32>
    %376 = vector.extract_strided_slice %369 {offsets = [0, 16], sizes = [2, 16], strides = [1, 1]} : vector<2x64xf32> to vector<2x16xf32>
    %377 = arith.negf %376 : vector<2x16xf32>
    %378 = math.exp %377 : vector<2x16xf32>
    %cst_139 = arith.constant 1.000000e+00 : f32
    %379 = vector.broadcast %cst_139 : f32 to vector<2x16xf32>
    %380 = arith.addf %379, %378 : vector<2x16xf32>
    %381 = arith.divf %379, %380 : vector<2x16xf32>
    %382 = vector.extract_strided_slice %369 {offsets = [0, 32], sizes = [2, 16], strides = [1, 1]} : vector<2x64xf32> to vector<2x16xf32>
    %383 = math.tanh %382 : vector<2x16xf32>
    %384 = vector.extract_strided_slice %369 {offsets = [0, 48], sizes = [2, 16], strides = [1, 1]} : vector<2x64xf32> to vector<2x16xf32>
    %385 = arith.negf %384 : vector<2x16xf32>
    %386 = math.exp %385 : vector<2x16xf32>
    %cst_140 = arith.constant 1.000000e+00 : f32
    %387 = vector.broadcast %cst_140 : f32 to vector<2x16xf32>
    %388 = arith.addf %387, %386 : vector<2x16xf32>
    %389 = arith.divf %387, %388 : vector<2x16xf32>
    %390 = arith.mulf %381, %334 : vector<2x16xf32>
    %391 = arith.mulf %375, %383 : vector<2x16xf32>
    %392 = arith.addf %390, %391 : vector<2x16xf32>
    %393 = math.tanh %392 : vector<2x16xf32>
    %394 = arith.mulf %389, %393 : vector<2x16xf32>
    %cst_141 = arith.constant dense<0.000000e+00> : vector<2x128xf32>
    %395 = tpu.matmul %394, %7, %cst_141 {dimension_numbers = #tpu.dot_dimension_numbers<[1], [0], [0], [1], [0, 0, 1, 1], [], []>} : vector<2x16xf32>, vector<16x128xf32>, vector<2x128xf32> -> vector<2x128xf32>
    %396 = vector.broadcast %8 : vector<1x128xf32> to vector<2x128xf32>
    %397 = arith.addf %395, %396 : vector<2x128xf32>
    %c6_142 = arith.constant 6 : index
    %c0_143 = arith.constant 0 : index
    %c0_144 = arith.constant 0 : index
    %398 = vector.load %arg10[%c6_142, %c0_143, %c0_144] : memref<8x2x128xf32, #tpu.memory_space<vmem>>, vector<1x2x128xf32>
    %399 = vector.shape_cast %398 : vector<1x2x128xf32> to vector<2x128xf32>
    %400 = vector.shape_cast %397 : vector<2x128xf32> to vector<1x2x128xf32>
    tpu.vector_store %arg10[%c6_142, %c0_143, %c0_144], %400 {strides = array<i32>} : memref<8x2x128xf32, #tpu.memory_space<vmem>>, vector<1x2x128xf32>,
    %cst_145 = arith.constant dense<0xFF800000> : vector<2xf32>
    %401 = vector.multi_reduction <maximumf>, %397, %cst_145 [1] : vector<2x128xf32> to vector<2xf32>
    %402 = vector.shape_cast %401 : vector<2xf32> to vector<2x1xf32>
    %403 = tpu.iota {dimensions = array<i32: 1>} : vector<2x128xi32>
    %404 = vector.broadcast %402 : vector<2x1xf32> to vector<2x128xf32>
    %405 = arith.cmpf oge, %397, %404 : vector<2x128xf32>
    %c128_i32_146 = arith.constant 128 : i32
    %406 = vector.broadcast %c128_i32_146 : i32 to vector<2x128xi32>
    %407 = arith.select %405, %403, %406 : vector<2x128xi1>, vector<2x128xi32>
    %cst_147 = arith.constant dense<2147483647> : vector<2xi32>
    %408 = vector.multi_reduction <minsi>, %407, %cst_147 [1] : vector<2x128xi32> to vector<2xi32>
    %409 = vector.shape_cast %408 : vector<2xi32> to vector<2x1xi32>
    %410 = arith.sitofp %409 : vector<2x1xi32> to vector<2x1xf32>
    %c6_148 = arith.constant 6 : index
    %c0_149 = arith.constant 0 : index
    %c0_150 = arith.constant 0 : index
    %411 = vector.load %arg11[%c6_148, %c0_149, %c0_150] : memref<8x2x1xf32, #tpu.memory_space<vmem>>, vector<1x2x1xf32>
    %412 = vector.shape_cast %411 : vector<1x2x1xf32> to vector<2x1xf32>
    %413 = vector.shape_cast %410 : vector<2x1xf32> to vector<1x2x1xf32>
    tpu.vector_store %arg11[%c6_148, %c0_149, %c0_150], %413 {strides = array<i32>} : memref<8x2x1xf32, #tpu.memory_space<vmem>>, vector<1x2x1xf32>,
    %414 = vector.broadcast %409 : vector<2x1xi32> to vector<2x128xi32>
    %415 = arith.cmpi eq, %403, %414 : vector<2x128xi32>
    %416 = arith.extui %415 : vector<2x128xi1> to vector<2x128xi32>
    %417 = arith.sitofp %416 : vector<2x128xi32> to vector<2x128xf32>
    %cst_151 = arith.constant dense<0.000000e+00> : vector<2x8xf32>
    %418 = tpu.matmul %417, %9, %cst_151 {dimension_numbers = #tpu.dot_dimension_numbers<[1], [0], [0], [1], [0, 0, 1, 1], [], []>} : vector<2x128xf32>, vector<128x8xf32>, vector<2x8xf32> -> vector<2x8xf32>
    %c7 = arith.constant 7 : index
    %c0_152 = arith.constant 0 : index
    %c0_153 = arith.constant 0 : index
    %419 = vector.load %arg1[%c7, %c0_152, %c0_153] : memref<8x2x32xf32, #tpu.memory_space<vmem>>, vector<1x2x32xf32>
    %420 = vector.shape_cast %419 : vector<1x2x32xf32> to vector<2x32xf32>
    %cst_154 = arith.constant dense<0.000000e+00> : vector<2x64xf32>
    %421 = tpu.matmul %420, %3, %cst_154 {dimension_numbers = #tpu.dot_dimension_numbers<[1], [0], [0], [1], [0, 0, 1, 1], [], []>} : vector<2x32xf32>, vector<32x64xf32>, vector<2x64xf32> -> vector<2x64xf32>
    %422 = vector.broadcast %6 : vector<1x64xf32> to vector<2x64xf32>
    %423 = arith.addf %422, %421 : vector<2x64xf32>
    %cst_155 = arith.constant dense<0.000000e+00> : vector<2x64xf32>
    %424 = tpu.matmul %418, %4, %cst_155 {dimension_numbers = #tpu.dot_dimension_numbers<[1], [0], [0], [1], [0, 0, 1, 1], [], []>} : vector<2x8xf32>, vector<8x64xf32>, vector<2x64xf32> -> vector<2x64xf32>
    %425 = arith.addf %423, %424 : vector<2x64xf32>
    %cst_156 = arith.constant dense<0.000000e+00> : vector<2x64xf32>
    %426 = tpu.matmul %394, %5, %cst_156 {dimension_numbers = #tpu.dot_dimension_numbers<[1], [0], [0], [1], [0, 0, 1, 1], [], []>} : vector<2x16xf32>, vector<16x64xf32>, vector<2x64xf32> -> vector<2x64xf32>
    %427 = arith.addf %425, %426 : vector<2x64xf32>
    %428 = vector.extract_strided_slice %427 {offsets = [0, 0], sizes = [2, 16], strides = [1, 1]} : vector<2x64xf32> to vector<2x16xf32>
    %429 = arith.negf %428 : vector<2x16xf32>
    %430 = math.exp %429 : vector<2x16xf32>
    %cst_157 = arith.constant 1.000000e+00 : f32
    %431 = vector.broadcast %cst_157 : f32 to vector<2x16xf32>
    %432 = arith.addf %431, %430 : vector<2x16xf32>
    %433 = arith.divf %431, %432 : vector<2x16xf32>
    %434 = vector.extract_strided_slice %427 {offsets = [0, 16], sizes = [2, 16], strides = [1, 1]} : vector<2x64xf32> to vector<2x16xf32>
    %435 = arith.negf %434 : vector<2x16xf32>
    %436 = math.exp %435 : vector<2x16xf32>
    %cst_158 = arith.constant 1.000000e+00 : f32
    %437 = vector.broadcast %cst_158 : f32 to vector<2x16xf32>
    %438 = arith.addf %437, %436 : vector<2x16xf32>
    %439 = arith.divf %437, %438 : vector<2x16xf32>
    %440 = vector.extract_strided_slice %427 {offsets = [0, 32], sizes = [2, 16], strides = [1, 1]} : vector<2x64xf32> to vector<2x16xf32>
    %441 = math.tanh %440 : vector<2x16xf32>
    %442 = vector.extract_strided_slice %427 {offsets = [0, 48], sizes = [2, 16], strides = [1, 1]} : vector<2x64xf32> to vector<2x16xf32>
    %443 = arith.negf %442 : vector<2x16xf32>
    %444 = math.exp %443 : vector<2x16xf32>
    %cst_159 = arith.constant 1.000000e+00 : f32
    %445 = vector.broadcast %cst_159 : f32 to vector<2x16xf32>
    %446 = arith.addf %445, %444 : vector<2x16xf32>
    %447 = arith.divf %445, %446 : vector<2x16xf32>
    %448 = arith.mulf %439, %392 : vector<2x16xf32>
    %449 = arith.mulf %433, %441 : vector<2x16xf32>
    %450 = arith.addf %448, %449 : vector<2x16xf32>
    %451 = math.tanh %450 : vector<2x16xf32>
    %452 = arith.mulf %447, %451 : vector<2x16xf32>
    %cst_160 = arith.constant dense<0.000000e+00> : vector<2x128xf32>
    %453 = tpu.matmul %452, %7, %cst_160 {dimension_numbers = #tpu.dot_dimension_numbers<[1], [0], [0], [1], [0, 0, 1, 1], [], []>} : vector<2x16xf32>, vector<16x128xf32>, vector<2x128xf32> -> vector<2x128xf32>
    %454 = vector.broadcast %8 : vector<1x128xf32> to vector<2x128xf32>
    %455 = arith.addf %453, %454 : vector<2x128xf32>
    %c7_161 = arith.constant 7 : index
    %c0_162 = arith.constant 0 : index
    %c0_163 = arith.constant 0 : index
    %456 = vector.load %arg10[%c7_161, %c0_162, %c0_163] : memref<8x2x128xf32, #tpu.memory_space<vmem>>, vector<1x2x128xf32>
    %457 = vector.shape_cast %456 : vector<1x2x128xf32> to vector<2x128xf32>
    %458 = vector.shape_cast %455 : vector<2x128xf32> to vector<1x2x128xf32>
    tpu.vector_store %arg10[%c7_161, %c0_162, %c0_163], %458 {strides = array<i32>} : memref<8x2x128xf32, #tpu.memory_space<vmem>>, vector<1x2x128xf32>,
    %cst_164 = arith.constant dense<0xFF800000> : vector<2xf32>
    %459 = vector.multi_reduction <maximumf>, %455, %cst_164 [1] : vector<2x128xf32> to vector<2xf32>
    %460 = vector.shape_cast %459 : vector<2xf32> to vector<2x1xf32>
    %461 = tpu.iota {dimensions = array<i32: 1>} : vector<2x128xi32>
    %462 = vector.broadcast %460 : vector<2x1xf32> to vector<2x128xf32>
    %463 = arith.cmpf oge, %455, %462 : vector<2x128xf32>
    %c128_i32_165 = arith.constant 128 : i32
    %464 = vector.broadcast %c128_i32_165 : i32 to vector<2x128xi32>
    %465 = arith.select %463, %461, %464 : vector<2x128xi1>, vector<2x128xi32>
    %cst_166 = arith.constant dense<2147483647> : vector<2xi32>
    %466 = vector.multi_reduction <minsi>, %465, %cst_166 [1] : vector<2x128xi32> to vector<2xi32>
    %467 = vector.shape_cast %466 : vector<2xi32> to vector<2x1xi32>
    %468 = arith.sitofp %467 : vector<2x1xi32> to vector<2x1xf32>
    %c7_167 = arith.constant 7 : index
    %c0_168 = arith.constant 0 : index
    %c0_169 = arith.constant 0 : index
    %469 = vector.load %arg11[%c7_167, %c0_168, %c0_169] : memref<8x2x1xf32, #tpu.memory_space<vmem>>, vector<1x2x1xf32>
    %470 = vector.shape_cast %469 : vector<1x2x1xf32> to vector<2x1xf32>
    %471 = vector.shape_cast %468 : vector<2x1xf32> to vector<1x2x1xf32>
    tpu.vector_store %arg11[%c7_167, %c0_168, %c0_169], %471 {strides = array<i32>} : memref<8x2x1xf32, #tpu.memory_space<vmem>>, vector<1x2x1xf32>,
    %472 = vector.broadcast %467 : vector<2x1xi32> to vector<2x128xi32>
    %473 = arith.cmpi eq, %461, %472 : vector<2x128xi32>
    %474 = arith.extui %473 : vector<2x128xi1> to vector<2x128xi32>
    %475 = arith.sitofp %474 : vector<2x128xi32> to vector<2x128xf32>
    %cst_170 = arith.constant dense<0.000000e+00> : vector<2x8xf32>
    %476 = tpu.matmul %475, %9, %cst_170 {dimension_numbers = #tpu.dot_dimension_numbers<[1], [0], [0], [1], [0, 0, 1, 1], [], []>} : vector<2x128xf32>, vector<128x8xf32>, vector<2x8xf32> -> vector<2x8xf32>
    %c0_171 = arith.constant 0 : index
    %c0_172 = arith.constant 0 : index
    %477 = vector.load %arg12[%c0_171, %c0_172] : memref<2x16xf32, #tpu.memory_space<vmem>>, vector<2x16xf32>
    tpu.vector_store %arg12[%c0_171, %c0_172], %452 {strides = array<i32>} : memref<2x16xf32, #tpu.memory_space<vmem>>, vector<2x16xf32>,
    %c0_173 = arith.constant 0 : index
    %c0_174 = arith.constant 0 : index
    %478 = vector.load %arg13[%c0_173, %c0_174] : memref<2x16xf32, #tpu.memory_space<vmem>>, vector<2x16xf32>
    tpu.vector_store %arg13[%c0_173, %c0_174], %450 {strides = array<i32>} : memref<2x16xf32, #tpu.memory_space<vmem>>, vector<2x16xf32>,
    %c0_175 = arith.constant 0 : index
    %c0_176 = arith.constant 0 : index
    %479 = vector.load %arg14[%c0_175, %c0_176] : memref<2x8xf32, #tpu.memory_space<vmem>>, vector<2x8xf32>
    tpu.vector_store %arg14[%c0_175, %c0_176], %476 {strides = array<i32>} : memref<2x8xf32, #tpu.memory_space<vmem>>, vector<2x8xf32>,
    return
  }
  func.func @transform_0(%arg0: i32) -> (i32, i32, i32) {
    %c0_i32 = arith.constant 0 : i32
    %c0_i32_0 = arith.constant 0 : i32
    %c0_i32_1 = arith.constant 0 : i32
    return %arg0, %c0_i32, %c0_i32_0 : i32, i32, i32
  }
  func.func @transform_1(%arg0: i32) -> (i32, i32) {
    %c0_i32 = arith.constant 0 : i32
    %c0_i32_0 = arith.constant 0 : i32
    %c0_i32_1 = arith.constant 0 : i32
    return %c0_i32, %c0_i32_0 : i32, i32
  }
  func.func @transform_2(%arg0: i32) -> (i32, i32) {
    %c0_i32 = arith.constant 0 : i32
    %c0_i32_0 = arith.constant 0 : i32
    %c0_i32_1 = arith.constant 0 : i32
    return %c0_i32, %c0_i32_0 : i32, i32
  }
  func.func @transform_3(%arg0: i32) -> (i32, i32) {
    %c0_i32 = arith.constant 0 : i32
    %c0_i32_0 = arith.constant 0 : i32
    %c0_i32_1 = arith.constant 0 : i32
    return %c0_i32, %c0_i32_0 : i32, i32
  }
  func.func @transform_4(%arg0: i32) -> (i32, i32) {
    %c0_i32 = arith.constant 0 : i32
    %c0_i32_0 = arith.constant 0 : i32
    %c0_i32_1 = arith.constant 0 : i32
    return %c0_i32, %c0_i32_0 : i32, i32
  }
  func.func @transform_5(%arg0: i32) -> (i32, i32) {
    %c0_i32 = arith.constant 0 : i32
    %c0_i32_0 = arith.constant 0 : i32
    %c0_i32_1 = arith.constant 0 : i32
    return %c0_i32, %c0_i32_0 : i32, i32
  }
  func.func @transform_6(%arg0: i32) -> (i32, i32) {
    %c0_i32 = arith.constant 0 : i32
    %c0_i32_0 = arith.constant 0 : i32
    %c0_i32_1 = arith.constant 0 : i32
    return %c0_i32, %c0_i32_0 : i32, i32
  }
  func.func @transform_7(%arg0: i32) -> (i32, i32) {
    %c0_i32 = arith.constant 0 : i32
    %c0_i32_0 = arith.constant 0 : i32
    %c0_i32_1 = arith.constant 0 : i32
    return %c0_i32, %c0_i32_0 : i32, i32
  }
  func.func @transform_8(%arg0: i32) -> (i32, i32) {
    %c0_i32 = arith.constant 0 : i32
    %c0_i32_0 = arith.constant 0 : i32
    %c0_i32_1 = arith.constant 0 : i32
    return %c0_i32, %c0_i32_0 : i32, i32
  }
  func.func @transform_9(%arg0: i32) -> (i32, i32, i32) {
    %c0_i32 = arith.constant 0 : i32
    %c0_i32_0 = arith.constant 0 : i32
    %c0_i32_1 = arith.constant 0 : i32
    return %arg0, %c0_i32, %c0_i32_0 : i32, i32, i32
  }
  func.func @transform_10(%arg0: i32) -> (i32, i32, i32) {
    %c0_i32 = arith.constant 0 : i32
    %c0_i32_0 = arith.constant 0 : i32
    %c0_i32_1 = arith.constant 0 : i32
    return %arg0, %c0_i32, %c0_i32_0 : i32, i32, i32
  }
}

module attributes {stable_mosaic.version = 11 : i64} {
  func.func @kernel(%arg0: i32, %arg1: memref<8x2x128xf32, #tpu.memory_space<vmem>>, %arg2: memref<8x2x32xf32, #tpu.memory_space<vmem>>, %arg3: memref<128x64xf32, #tpu.memory_space<vmem>>, %arg4: memref<32x64xf32, #tpu.memory_space<vmem>>, %arg5: memref<8x64xf32, #tpu.memory_space<vmem>>, %arg6: memref<16x64xf32, #tpu.memory_space<vmem>>, %arg7: memref<1x64xf32, #tpu.memory_space<vmem>>, %arg8: memref<16x128xf32, #tpu.memory_space<vmem>>, %arg9: memref<1x128xf32, #tpu.memory_space<vmem>>, %arg10: memref<128x8xf32, #tpu.memory_space<vmem>>, %arg11: memref<1x8xf32, #tpu.memory_space<vmem>>, %arg12: memref<8x2x128xf32, #tpu.memory_space<vmem>>, %arg13: memref<8x2x1xf32, #tpu.memory_space<vmem>>, %arg14: memref<2x16xf32, #tpu.memory_space<vmem>>, %arg15: memref<2x16xf32, #tpu.memory_space<vmem>>, %arg16: memref<2x8xf32, #tpu.memory_space<vmem>>) attributes {dimension_semantics = [#tpu.dimension_semantics<arbitrary>], iteration_bounds = array<i64: 1>, scalar_prefetch = 0 : i64, scratch_operands = 3 : i64, tpu.core_type = #tpu.core_type<tc>, window_params = [{transform_indices = @transform_0, window_bounds = array<i64: 8, 2, 128>}, {transform_indices = @transform_1, window_bounds = array<i64: 8, 2, 32>}, {pipeline_mode = #tpu.pipeline_mode<synchronous>, transform_indices = @transform_2, window_bounds = array<i64: 128, 64>}, {pipeline_mode = #tpu.pipeline_mode<synchronous>, transform_indices = @transform_3, window_bounds = array<i64: 32, 64>}, {pipeline_mode = #tpu.pipeline_mode<synchronous>, transform_indices = @transform_4, window_bounds = array<i64: 8, 64>}, {pipeline_mode = #tpu.pipeline_mode<synchronous>, transform_indices = @transform_5, window_bounds = array<i64: 16, 64>}, {pipeline_mode = #tpu.pipeline_mode<synchronous>, transform_indices = @transform_6, window_bounds = array<i64: 1, 64>}, {pipeline_mode = #tpu.pipeline_mode<synchronous>, transform_indices = @transform_7, window_bounds = array<i64: 16, 128>}, {pipeline_mode = #tpu.pipeline_mode<synchronous>, transform_indices = @transform_8, window_bounds = array<i64: 1, 128>}, {pipeline_mode = #tpu.pipeline_mode<synchronous>, transform_indices = @transform_9, window_bounds = array<i64: 128, 8>}, {pipeline_mode = #tpu.pipeline_mode<synchronous>, transform_indices = @transform_10, window_bounds = array<i64: 1, 8>}, {transform_indices = @transform_11, window_bounds = array<i64: 8, 2, 128>}, {transform_indices = @transform_12, window_bounds = array<i64: 8, 2, 1>}]} {
    %c0_i32 = arith.constant 0 : i32
    %0 = arith.cmpi eq, %arg0, %c0_i32 : i32
    %1 = arith.extui %0 : i1 to i32
    %c0_i32_0 = arith.constant 0 : i32
    %2 = arith.cmpi ne, %1, %c0_i32_0 : i32
    scf.if %2 {
      %cst_211 = arith.constant 0.000000e+00 : f32
      %513 = vector.broadcast %cst_211 : f32 to vector<2x16xf32>
      %c0_212 = arith.constant 0 : index
      %c0_213 = arith.constant 0 : index
      %514 = vector.load %arg14[%c0_212, %c0_213] : memref<2x16xf32, #tpu.memory_space<vmem>>, vector<2x16xf32>
      tpu.vector_store %arg14[%c0_212, %c0_213], %513 {strides = array<i32>} : memref<2x16xf32, #tpu.memory_space<vmem>>, vector<2x16xf32>,
      %cst_214 = arith.constant 0.000000e+00 : f32
      %515 = vector.broadcast %cst_214 : f32 to vector<2x16xf32>
      %c0_215 = arith.constant 0 : index
      %c0_216 = arith.constant 0 : index
      %516 = vector.load %arg15[%c0_215, %c0_216] : memref<2x16xf32, #tpu.memory_space<vmem>>, vector<2x16xf32>
      tpu.vector_store %arg15[%c0_215, %c0_216], %515 {strides = array<i32>} : memref<2x16xf32, #tpu.memory_space<vmem>>, vector<2x16xf32>,
      %cst_217 = arith.constant 0.000000e+00 : f32
      %517 = vector.broadcast %cst_217 : f32 to vector<2x8xf32>
      %c0_218 = arith.constant 0 : index
      %c0_219 = arith.constant 0 : index
      %518 = vector.load %arg11[%c0_218, %c0_219] : memref<1x8xf32, #tpu.memory_space<vmem>>, vector<1x8xf32>
      %519 = vector.broadcast %518 : vector<1x8xf32> to vector<2x8xf32>
      %520 = arith.addf %517, %519 : vector<2x8xf32>
      %c0_220 = arith.constant 0 : index
      %c0_221 = arith.constant 0 : index
      %521 = vector.load %arg16[%c0_220, %c0_221] : memref<2x8xf32, #tpu.memory_space<vmem>>, vector<2x8xf32>
      tpu.vector_store %arg16[%c0_220, %c0_221], %520 {strides = array<i32>} : memref<2x8xf32, #tpu.memory_space<vmem>>, vector<2x8xf32>,
    } else {
    }
    %c0 = arith.constant 0 : index
    %c0_1 = arith.constant 0 : index
    %3 = vector.load %arg3[%c0, %c0_1] : memref<128x64xf32, #tpu.memory_space<vmem>>, vector<128x64xf32>
    %c0_2 = arith.constant 0 : index
    %c0_3 = arith.constant 0 : index
    %4 = vector.load %arg4[%c0_2, %c0_3] : memref<32x64xf32, #tpu.memory_space<vmem>>, vector<32x64xf32>
    %c0_4 = arith.constant 0 : index
    %c0_5 = arith.constant 0 : index
    %5 = vector.load %arg5[%c0_4, %c0_5] : memref<8x64xf32, #tpu.memory_space<vmem>>, vector<8x64xf32>
    %c0_6 = arith.constant 0 : index
    %c0_7 = arith.constant 0 : index
    %6 = vector.load %arg6[%c0_6, %c0_7] : memref<16x64xf32, #tpu.memory_space<vmem>>, vector<16x64xf32>
    %c0_8 = arith.constant 0 : index
    %c0_9 = arith.constant 0 : index
    %7 = vector.load %arg7[%c0_8, %c0_9] : memref<1x64xf32, #tpu.memory_space<vmem>>, vector<1x64xf32>
    %c0_10 = arith.constant 0 : index
    %c0_11 = arith.constant 0 : index
    %8 = vector.load %arg8[%c0_10, %c0_11] : memref<16x128xf32, #tpu.memory_space<vmem>>, vector<16x128xf32>
    %c0_12 = arith.constant 0 : index
    %c0_13 = arith.constant 0 : index
    %9 = vector.load %arg9[%c0_12, %c0_13] : memref<1x128xf32, #tpu.memory_space<vmem>>, vector<1x128xf32>
    %c0_14 = arith.constant 0 : index
    %c0_15 = arith.constant 0 : index
    %10 = vector.load %arg10[%c0_14, %c0_15] : memref<128x8xf32, #tpu.memory_space<vmem>>, vector<128x8xf32>
    %c0_16 = arith.constant 0 : index
    %c0_17 = arith.constant 0 : index
    %11 = vector.load %arg14[%c0_16, %c0_17] : memref<2x16xf32, #tpu.memory_space<vmem>>, vector<2x16xf32>
    %c0_18 = arith.constant 0 : index
    %c0_19 = arith.constant 0 : index
    %12 = vector.load %arg15[%c0_18, %c0_19] : memref<2x16xf32, #tpu.memory_space<vmem>>, vector<2x16xf32>
    %c0_20 = arith.constant 0 : index
    %c0_21 = arith.constant 0 : index
    %13 = vector.load %arg16[%c0_20, %c0_21] : memref<2x8xf32, #tpu.memory_space<vmem>>, vector<2x8xf32>
    %c0_22 = arith.constant 0 : index
    %c0_23 = arith.constant 0 : index
    %c0_24 = arith.constant 0 : index
    %14 = vector.load %arg1[%c0_22, %c0_23, %c0_24] : memref<8x2x128xf32, #tpu.memory_space<vmem>>, vector<1x2x128xf32>
    %15 = vector.shape_cast %14 : vector<1x2x128xf32> to vector<2x128xf32>
    %cst = arith.constant dense<0.000000e+00> : vector<2x64xf32>
    %16 = tpu.matmul %15, %3, %cst {dimension_numbers = #tpu.dot_dimension_numbers<[1], [0], [0], [1], [0, 0, 1, 1], [], []>} : vector<2x128xf32>, vector<128x64xf32>, vector<2x64xf32> -> vector<2x64xf32>
    %17 = vector.broadcast %7 : vector<1x64xf32> to vector<2x64xf32>
    %18 = arith.addf %17, %16 : vector<2x64xf32>
    %c0_25 = arith.constant 0 : index
    %c0_26 = arith.constant 0 : index
    %c0_27 = arith.constant 0 : index
    %19 = vector.load %arg2[%c0_25, %c0_26, %c0_27] : memref<8x2x32xf32, #tpu.memory_space<vmem>>, vector<1x2x32xf32>
    %20 = vector.shape_cast %19 : vector<1x2x32xf32> to vector<2x32xf32>
    %cst_28 = arith.constant dense<0.000000e+00> : vector<2x64xf32>
    %21 = tpu.matmul %20, %4, %cst_28 {dimension_numbers = #tpu.dot_dimension_numbers<[1], [0], [0], [1], [0, 0, 1, 1], [], []>} : vector<2x32xf32>, vector<32x64xf32>, vector<2x64xf32> -> vector<2x64xf32>
    %22 = arith.addf %18, %21 : vector<2x64xf32>
    %cst_29 = arith.constant dense<0.000000e+00> : vector<2x64xf32>
    %23 = tpu.matmul %13, %5, %cst_29 {dimension_numbers = #tpu.dot_dimension_numbers<[1], [0], [0], [1], [0, 0, 1, 1], [], []>} : vector<2x8xf32>, vector<8x64xf32>, vector<2x64xf32> -> vector<2x64xf32>
    %24 = arith.addf %22, %23 : vector<2x64xf32>
    %cst_30 = arith.constant dense<0.000000e+00> : vector<2x64xf32>
    %25 = tpu.matmul %11, %6, %cst_30 {dimension_numbers = #tpu.dot_dimension_numbers<[1], [0], [0], [1], [0, 0, 1, 1], [], []>} : vector<2x16xf32>, vector<16x64xf32>, vector<2x64xf32> -> vector<2x64xf32>
    %26 = arith.addf %24, %25 : vector<2x64xf32>
    %27 = vector.extract_strided_slice %26 {offsets = [0, 0], sizes = [2, 16], strides = [1, 1]} : vector<2x64xf32> to vector<2x16xf32>
    %28 = arith.negf %27 : vector<2x16xf32>
    %29 = math.exp %28 : vector<2x16xf32>
    %cst_31 = arith.constant 1.000000e+00 : f32
    %30 = vector.broadcast %cst_31 : f32 to vector<2x16xf32>
    %31 = arith.addf %30, %29 : vector<2x16xf32>
    %32 = arith.divf %30, %31 : vector<2x16xf32>
    %33 = vector.extract_strided_slice %26 {offsets = [0, 16], sizes = [2, 16], strides = [1, 1]} : vector<2x64xf32> to vector<2x16xf32>
    %34 = arith.negf %33 : vector<2x16xf32>
    %35 = math.exp %34 : vector<2x16xf32>
    %cst_32 = arith.constant 1.000000e+00 : f32
    %36 = vector.broadcast %cst_32 : f32 to vector<2x16xf32>
    %37 = arith.addf %36, %35 : vector<2x16xf32>
    %38 = arith.divf %36, %37 : vector<2x16xf32>
    %39 = vector.extract_strided_slice %26 {offsets = [0, 32], sizes = [2, 16], strides = [1, 1]} : vector<2x64xf32> to vector<2x16xf32>
    %40 = math.tanh %39 : vector<2x16xf32>
    %41 = vector.extract_strided_slice %26 {offsets = [0, 48], sizes = [2, 16], strides = [1, 1]} : vector<2x64xf32> to vector<2x16xf32>
    %42 = arith.negf %41 : vector<2x16xf32>
    %43 = math.exp %42 : vector<2x16xf32>
    %cst_33 = arith.constant 1.000000e+00 : f32
    %44 = vector.broadcast %cst_33 : f32 to vector<2x16xf32>
    %45 = arith.addf %44, %43 : vector<2x16xf32>
    %46 = arith.divf %44, %45 : vector<2x16xf32>
    %47 = arith.mulf %38, %12 : vector<2x16xf32>
    %48 = arith.mulf %32, %40 : vector<2x16xf32>
    %49 = arith.addf %47, %48 : vector<2x16xf32>
    %50 = math.tanh %49 : vector<2x16xf32>
    %51 = arith.mulf %46, %50 : vector<2x16xf32>
    %cst_34 = arith.constant dense<0.000000e+00> : vector<2x128xf32>
    %52 = tpu.matmul %51, %8, %cst_34 {dimension_numbers = #tpu.dot_dimension_numbers<[1], [0], [0], [1], [0, 0, 1, 1], [], []>} : vector<2x16xf32>, vector<16x128xf32>, vector<2x128xf32> -> vector<2x128xf32>
    %53 = vector.broadcast %9 : vector<1x128xf32> to vector<2x128xf32>
    %54 = arith.addf %52, %53 : vector<2x128xf32>
    %c0_35 = arith.constant 0 : index
    %c0_36 = arith.constant 0 : index
    %c0_37 = arith.constant 0 : index
    %55 = vector.load %arg12[%c0_35, %c0_36, %c0_37] : memref<8x2x128xf32, #tpu.memory_space<vmem>>, vector<1x2x128xf32>
    %56 = vector.shape_cast %55 : vector<1x2x128xf32> to vector<2x128xf32>
    %57 = vector.shape_cast %54 : vector<2x128xf32> to vector<1x2x128xf32>
    tpu.vector_store %arg12[%c0_35, %c0_36, %c0_37], %57 {strides = array<i32>} : memref<8x2x128xf32, #tpu.memory_space<vmem>>, vector<1x2x128xf32>,
    %cst_38 = arith.constant dense<0xFF800000> : vector<2xf32>
    %58 = vector.multi_reduction <maximumf>, %54, %cst_38 [1] : vector<2x128xf32> to vector<2xf32>
    %59 = vector.shape_cast %58 : vector<2xf32> to vector<2x1xf32>
    %60 = tpu.iota {dimensions = array<i32: 1>} : vector<2x128xi32>
    %61 = vector.broadcast %59 : vector<2x1xf32> to vector<2x128xf32>
    %62 = arith.cmpf oge, %54, %61 : vector<2x128xf32>
    %c128_i32 = arith.constant 128 : i32
    %63 = vector.broadcast %c128_i32 : i32 to vector<2x128xi32>
    %64 = arith.select %62, %60, %63 : vector<2x128xi1>, vector<2x128xi32>
    %cst_39 = arith.constant dense<2147483647> : vector<2xi32>
    %65 = vector.multi_reduction <minsi>, %64, %cst_39 [1] : vector<2x128xi32> to vector<2xi32>
    %66 = vector.shape_cast %65 : vector<2xi32> to vector<2x1xi32>
    %67 = arith.sitofp %66 : vector<2x1xi32> to vector<2x1xf32>
    %c0_40 = arith.constant 0 : index
    %c0_41 = arith.constant 0 : index
    %c0_42 = arith.constant 0 : index
    %68 = vector.load %arg13[%c0_40, %c0_41, %c0_42] : memref<8x2x1xf32, #tpu.memory_space<vmem>>, vector<1x2x1xf32>
    %69 = vector.shape_cast %68 : vector<1x2x1xf32> to vector<2x1xf32>
    %70 = vector.shape_cast %67 : vector<2x1xf32> to vector<1x2x1xf32>
    tpu.vector_store %arg13[%c0_40, %c0_41, %c0_42], %70 {strides = array<i32>} : memref<8x2x1xf32, #tpu.memory_space<vmem>>, vector<1x2x1xf32>,
    %71 = vector.broadcast %66 : vector<2x1xi32> to vector<2x128xi32>
    %72 = arith.cmpi eq, %60, %71 : vector<2x128xi32>
    %73 = arith.extui %72 : vector<2x128xi1> to vector<2x128xi32>
    %74 = arith.sitofp %73 : vector<2x128xi32> to vector<2x128xf32>
    %cst_43 = arith.constant dense<0.000000e+00> : vector<2x8xf32>
    %75 = tpu.matmul %74, %10, %cst_43 {dimension_numbers = #tpu.dot_dimension_numbers<[1], [0], [0], [1], [0, 0, 1, 1], [], []>} : vector<2x128xf32>, vector<128x8xf32>, vector<2x8xf32> -> vector<2x8xf32>
    %c1 = arith.constant 1 : index
    %c0_44 = arith.constant 0 : index
    %c0_45 = arith.constant 0 : index
    %76 = vector.load %arg1[%c1, %c0_44, %c0_45] : memref<8x2x128xf32, #tpu.memory_space<vmem>>, vector<1x2x128xf32>
    %77 = vector.shape_cast %76 : vector<1x2x128xf32> to vector<2x128xf32>
    %cst_46 = arith.constant dense<0.000000e+00> : vector<2x64xf32>
    %78 = tpu.matmul %77, %3, %cst_46 {dimension_numbers = #tpu.dot_dimension_numbers<[1], [0], [0], [1], [0, 0, 1, 1], [], []>} : vector<2x128xf32>, vector<128x64xf32>, vector<2x64xf32> -> vector<2x64xf32>
    %79 = vector.broadcast %7 : vector<1x64xf32> to vector<2x64xf32>
    %80 = arith.addf %79, %78 : vector<2x64xf32>
    %c1_47 = arith.constant 1 : index
    %c0_48 = arith.constant 0 : index
    %c0_49 = arith.constant 0 : index
    %81 = vector.load %arg2[%c1_47, %c0_48, %c0_49] : memref<8x2x32xf32, #tpu.memory_space<vmem>>, vector<1x2x32xf32>
    %82 = vector.shape_cast %81 : vector<1x2x32xf32> to vector<2x32xf32>
    %cst_50 = arith.constant dense<0.000000e+00> : vector<2x64xf32>
    %83 = tpu.matmul %82, %4, %cst_50 {dimension_numbers = #tpu.dot_dimension_numbers<[1], [0], [0], [1], [0, 0, 1, 1], [], []>} : vector<2x32xf32>, vector<32x64xf32>, vector<2x64xf32> -> vector<2x64xf32>
    %84 = arith.addf %80, %83 : vector<2x64xf32>
    %cst_51 = arith.constant dense<0.000000e+00> : vector<2x64xf32>
    %85 = tpu.matmul %75, %5, %cst_51 {dimension_numbers = #tpu.dot_dimension_numbers<[1], [0], [0], [1], [0, 0, 1, 1], [], []>} : vector<2x8xf32>, vector<8x64xf32>, vector<2x64xf32> -> vector<2x64xf32>
    %86 = arith.addf %84, %85 : vector<2x64xf32>
    %cst_52 = arith.constant dense<0.000000e+00> : vector<2x64xf32>
    %87 = tpu.matmul %51, %6, %cst_52 {dimension_numbers = #tpu.dot_dimension_numbers<[1], [0], [0], [1], [0, 0, 1, 1], [], []>} : vector<2x16xf32>, vector<16x64xf32>, vector<2x64xf32> -> vector<2x64xf32>
    %88 = arith.addf %86, %87 : vector<2x64xf32>
    %89 = vector.extract_strided_slice %88 {offsets = [0, 0], sizes = [2, 16], strides = [1, 1]} : vector<2x64xf32> to vector<2x16xf32>
    %90 = arith.negf %89 : vector<2x16xf32>
    %91 = math.exp %90 : vector<2x16xf32>
    %cst_53 = arith.constant 1.000000e+00 : f32
    %92 = vector.broadcast %cst_53 : f32 to vector<2x16xf32>
    %93 = arith.addf %92, %91 : vector<2x16xf32>
    %94 = arith.divf %92, %93 : vector<2x16xf32>
    %95 = vector.extract_strided_slice %88 {offsets = [0, 16], sizes = [2, 16], strides = [1, 1]} : vector<2x64xf32> to vector<2x16xf32>
    %96 = arith.negf %95 : vector<2x16xf32>
    %97 = math.exp %96 : vector<2x16xf32>
    %cst_54 = arith.constant 1.000000e+00 : f32
    %98 = vector.broadcast %cst_54 : f32 to vector<2x16xf32>
    %99 = arith.addf %98, %97 : vector<2x16xf32>
    %100 = arith.divf %98, %99 : vector<2x16xf32>
    %101 = vector.extract_strided_slice %88 {offsets = [0, 32], sizes = [2, 16], strides = [1, 1]} : vector<2x64xf32> to vector<2x16xf32>
    %102 = math.tanh %101 : vector<2x16xf32>
    %103 = vector.extract_strided_slice %88 {offsets = [0, 48], sizes = [2, 16], strides = [1, 1]} : vector<2x64xf32> to vector<2x16xf32>
    %104 = arith.negf %103 : vector<2x16xf32>
    %105 = math.exp %104 : vector<2x16xf32>
    %cst_55 = arith.constant 1.000000e+00 : f32
    %106 = vector.broadcast %cst_55 : f32 to vector<2x16xf32>
    %107 = arith.addf %106, %105 : vector<2x16xf32>
    %108 = arith.divf %106, %107 : vector<2x16xf32>
    %109 = arith.mulf %100, %49 : vector<2x16xf32>
    %110 = arith.mulf %94, %102 : vector<2x16xf32>
    %111 = arith.addf %109, %110 : vector<2x16xf32>
    %112 = math.tanh %111 : vector<2x16xf32>
    %113 = arith.mulf %108, %112 : vector<2x16xf32>
    %cst_56 = arith.constant dense<0.000000e+00> : vector<2x128xf32>
    %114 = tpu.matmul %113, %8, %cst_56 {dimension_numbers = #tpu.dot_dimension_numbers<[1], [0], [0], [1], [0, 0, 1, 1], [], []>} : vector<2x16xf32>, vector<16x128xf32>, vector<2x128xf32> -> vector<2x128xf32>
    %115 = vector.broadcast %9 : vector<1x128xf32> to vector<2x128xf32>
    %116 = arith.addf %114, %115 : vector<2x128xf32>
    %c1_57 = arith.constant 1 : index
    %c0_58 = arith.constant 0 : index
    %c0_59 = arith.constant 0 : index
    %117 = vector.load %arg12[%c1_57, %c0_58, %c0_59] : memref<8x2x128xf32, #tpu.memory_space<vmem>>, vector<1x2x128xf32>
    %118 = vector.shape_cast %117 : vector<1x2x128xf32> to vector<2x128xf32>
    %119 = vector.shape_cast %116 : vector<2x128xf32> to vector<1x2x128xf32>
    tpu.vector_store %arg12[%c1_57, %c0_58, %c0_59], %119 {strides = array<i32>} : memref<8x2x128xf32, #tpu.memory_space<vmem>>, vector<1x2x128xf32>,
    %cst_60 = arith.constant dense<0xFF800000> : vector<2xf32>
    %120 = vector.multi_reduction <maximumf>, %116, %cst_60 [1] : vector<2x128xf32> to vector<2xf32>
    %121 = vector.shape_cast %120 : vector<2xf32> to vector<2x1xf32>
    %122 = tpu.iota {dimensions = array<i32: 1>} : vector<2x128xi32>
    %123 = vector.broadcast %121 : vector<2x1xf32> to vector<2x128xf32>
    %124 = arith.cmpf oge, %116, %123 : vector<2x128xf32>
    %c128_i32_61 = arith.constant 128 : i32
    %125 = vector.broadcast %c128_i32_61 : i32 to vector<2x128xi32>
    %126 = arith.select %124, %122, %125 : vector<2x128xi1>, vector<2x128xi32>
    %cst_62 = arith.constant dense<2147483647> : vector<2xi32>
    %127 = vector.multi_reduction <minsi>, %126, %cst_62 [1] : vector<2x128xi32> to vector<2xi32>
    %128 = vector.shape_cast %127 : vector<2xi32> to vector<2x1xi32>
    %129 = arith.sitofp %128 : vector<2x1xi32> to vector<2x1xf32>
    %c1_63 = arith.constant 1 : index
    %c0_64 = arith.constant 0 : index
    %c0_65 = arith.constant 0 : index
    %130 = vector.load %arg13[%c1_63, %c0_64, %c0_65] : memref<8x2x1xf32, #tpu.memory_space<vmem>>, vector<1x2x1xf32>
    %131 = vector.shape_cast %130 : vector<1x2x1xf32> to vector<2x1xf32>
    %132 = vector.shape_cast %129 : vector<2x1xf32> to vector<1x2x1xf32>
    tpu.vector_store %arg13[%c1_63, %c0_64, %c0_65], %132 {strides = array<i32>} : memref<8x2x1xf32, #tpu.memory_space<vmem>>, vector<1x2x1xf32>,
    %133 = vector.broadcast %128 : vector<2x1xi32> to vector<2x128xi32>
    %134 = arith.cmpi eq, %122, %133 : vector<2x128xi32>
    %135 = arith.extui %134 : vector<2x128xi1> to vector<2x128xi32>
    %136 = arith.sitofp %135 : vector<2x128xi32> to vector<2x128xf32>
    %cst_66 = arith.constant dense<0.000000e+00> : vector<2x8xf32>
    %137 = tpu.matmul %136, %10, %cst_66 {dimension_numbers = #tpu.dot_dimension_numbers<[1], [0], [0], [1], [0, 0, 1, 1], [], []>} : vector<2x128xf32>, vector<128x8xf32>, vector<2x8xf32> -> vector<2x8xf32>
    %c2 = arith.constant 2 : index
    %c0_67 = arith.constant 0 : index
    %c0_68 = arith.constant 0 : index
    %138 = vector.load %arg1[%c2, %c0_67, %c0_68] : memref<8x2x128xf32, #tpu.memory_space<vmem>>, vector<1x2x128xf32>
    %139 = vector.shape_cast %138 : vector<1x2x128xf32> to vector<2x128xf32>
    %cst_69 = arith.constant dense<0.000000e+00> : vector<2x64xf32>
    %140 = tpu.matmul %139, %3, %cst_69 {dimension_numbers = #tpu.dot_dimension_numbers<[1], [0], [0], [1], [0, 0, 1, 1], [], []>} : vector<2x128xf32>, vector<128x64xf32>, vector<2x64xf32> -> vector<2x64xf32>
    %141 = vector.broadcast %7 : vector<1x64xf32> to vector<2x64xf32>
    %142 = arith.addf %141, %140 : vector<2x64xf32>
    %c2_70 = arith.constant 2 : index
    %c0_71 = arith.constant 0 : index
    %c0_72 = arith.constant 0 : index
    %143 = vector.load %arg2[%c2_70, %c0_71, %c0_72] : memref<8x2x32xf32, #tpu.memory_space<vmem>>, vector<1x2x32xf32>
    %144 = vector.shape_cast %143 : vector<1x2x32xf32> to vector<2x32xf32>
    %cst_73 = arith.constant dense<0.000000e+00> : vector<2x64xf32>
    %145 = tpu.matmul %144, %4, %cst_73 {dimension_numbers = #tpu.dot_dimension_numbers<[1], [0], [0], [1], [0, 0, 1, 1], [], []>} : vector<2x32xf32>, vector<32x64xf32>, vector<2x64xf32> -> vector<2x64xf32>
    %146 = arith.addf %142, %145 : vector<2x64xf32>
    %cst_74 = arith.constant dense<0.000000e+00> : vector<2x64xf32>
    %147 = tpu.matmul %137, %5, %cst_74 {dimension_numbers = #tpu.dot_dimension_numbers<[1], [0], [0], [1], [0, 0, 1, 1], [], []>} : vector<2x8xf32>, vector<8x64xf32>, vector<2x64xf32> -> vector<2x64xf32>
    %148 = arith.addf %146, %147 : vector<2x64xf32>
    %cst_75 = arith.constant dense<0.000000e+00> : vector<2x64xf32>
    %149 = tpu.matmul %113, %6, %cst_75 {dimension_numbers = #tpu.dot_dimension_numbers<[1], [0], [0], [1], [0, 0, 1, 1], [], []>} : vector<2x16xf32>, vector<16x64xf32>, vector<2x64xf32> -> vector<2x64xf32>
    %150 = arith.addf %148, %149 : vector<2x64xf32>
    %151 = vector.extract_strided_slice %150 {offsets = [0, 0], sizes = [2, 16], strides = [1, 1]} : vector<2x64xf32> to vector<2x16xf32>
    %152 = arith.negf %151 : vector<2x16xf32>
    %153 = math.exp %152 : vector<2x16xf32>
    %cst_76 = arith.constant 1.000000e+00 : f32
    %154 = vector.broadcast %cst_76 : f32 to vector<2x16xf32>
    %155 = arith.addf %154, %153 : vector<2x16xf32>
    %156 = arith.divf %154, %155 : vector<2x16xf32>
    %157 = vector.extract_strided_slice %150 {offsets = [0, 16], sizes = [2, 16], strides = [1, 1]} : vector<2x64xf32> to vector<2x16xf32>
    %158 = arith.negf %157 : vector<2x16xf32>
    %159 = math.exp %158 : vector<2x16xf32>
    %cst_77 = arith.constant 1.000000e+00 : f32
    %160 = vector.broadcast %cst_77 : f32 to vector<2x16xf32>
    %161 = arith.addf %160, %159 : vector<2x16xf32>
    %162 = arith.divf %160, %161 : vector<2x16xf32>
    %163 = vector.extract_strided_slice %150 {offsets = [0, 32], sizes = [2, 16], strides = [1, 1]} : vector<2x64xf32> to vector<2x16xf32>
    %164 = math.tanh %163 : vector<2x16xf32>
    %165 = vector.extract_strided_slice %150 {offsets = [0, 48], sizes = [2, 16], strides = [1, 1]} : vector<2x64xf32> to vector<2x16xf32>
    %166 = arith.negf %165 : vector<2x16xf32>
    %167 = math.exp %166 : vector<2x16xf32>
    %cst_78 = arith.constant 1.000000e+00 : f32
    %168 = vector.broadcast %cst_78 : f32 to vector<2x16xf32>
    %169 = arith.addf %168, %167 : vector<2x16xf32>
    %170 = arith.divf %168, %169 : vector<2x16xf32>
    %171 = arith.mulf %162, %111 : vector<2x16xf32>
    %172 = arith.mulf %156, %164 : vector<2x16xf32>
    %173 = arith.addf %171, %172 : vector<2x16xf32>
    %174 = math.tanh %173 : vector<2x16xf32>
    %175 = arith.mulf %170, %174 : vector<2x16xf32>
    %cst_79 = arith.constant dense<0.000000e+00> : vector<2x128xf32>
    %176 = tpu.matmul %175, %8, %cst_79 {dimension_numbers = #tpu.dot_dimension_numbers<[1], [0], [0], [1], [0, 0, 1, 1], [], []>} : vector<2x16xf32>, vector<16x128xf32>, vector<2x128xf32> -> vector<2x128xf32>
    %177 = vector.broadcast %9 : vector<1x128xf32> to vector<2x128xf32>
    %178 = arith.addf %176, %177 : vector<2x128xf32>
    %c2_80 = arith.constant 2 : index
    %c0_81 = arith.constant 0 : index
    %c0_82 = arith.constant 0 : index
    %179 = vector.load %arg12[%c2_80, %c0_81, %c0_82] : memref<8x2x128xf32, #tpu.memory_space<vmem>>, vector<1x2x128xf32>
    %180 = vector.shape_cast %179 : vector<1x2x128xf32> to vector<2x128xf32>
    %181 = vector.shape_cast %178 : vector<2x128xf32> to vector<1x2x128xf32>
    tpu.vector_store %arg12[%c2_80, %c0_81, %c0_82], %181 {strides = array<i32>} : memref<8x2x128xf32, #tpu.memory_space<vmem>>, vector<1x2x128xf32>,
    %cst_83 = arith.constant dense<0xFF800000> : vector<2xf32>
    %182 = vector.multi_reduction <maximumf>, %178, %cst_83 [1] : vector<2x128xf32> to vector<2xf32>
    %183 = vector.shape_cast %182 : vector<2xf32> to vector<2x1xf32>
    %184 = tpu.iota {dimensions = array<i32: 1>} : vector<2x128xi32>
    %185 = vector.broadcast %183 : vector<2x1xf32> to vector<2x128xf32>
    %186 = arith.cmpf oge, %178, %185 : vector<2x128xf32>
    %c128_i32_84 = arith.constant 128 : i32
    %187 = vector.broadcast %c128_i32_84 : i32 to vector<2x128xi32>
    %188 = arith.select %186, %184, %187 : vector<2x128xi1>, vector<2x128xi32>
    %cst_85 = arith.constant dense<2147483647> : vector<2xi32>
    %189 = vector.multi_reduction <minsi>, %188, %cst_85 [1] : vector<2x128xi32> to vector<2xi32>
    %190 = vector.shape_cast %189 : vector<2xi32> to vector<2x1xi32>
    %191 = arith.sitofp %190 : vector<2x1xi32> to vector<2x1xf32>
    %c2_86 = arith.constant 2 : index
    %c0_87 = arith.constant 0 : index
    %c0_88 = arith.constant 0 : index
    %192 = vector.load %arg13[%c2_86, %c0_87, %c0_88] : memref<8x2x1xf32, #tpu.memory_space<vmem>>, vector<1x2x1xf32>
    %193 = vector.shape_cast %192 : vector<1x2x1xf32> to vector<2x1xf32>
    %194 = vector.shape_cast %191 : vector<2x1xf32> to vector<1x2x1xf32>
    tpu.vector_store %arg13[%c2_86, %c0_87, %c0_88], %194 {strides = array<i32>} : memref<8x2x1xf32, #tpu.memory_space<vmem>>, vector<1x2x1xf32>,
    %195 = vector.broadcast %190 : vector<2x1xi32> to vector<2x128xi32>
    %196 = arith.cmpi eq, %184, %195 : vector<2x128xi32>
    %197 = arith.extui %196 : vector<2x128xi1> to vector<2x128xi32>
    %198 = arith.sitofp %197 : vector<2x128xi32> to vector<2x128xf32>
    %cst_89 = arith.constant dense<0.000000e+00> : vector<2x8xf32>
    %199 = tpu.matmul %198, %10, %cst_89 {dimension_numbers = #tpu.dot_dimension_numbers<[1], [0], [0], [1], [0, 0, 1, 1], [], []>} : vector<2x128xf32>, vector<128x8xf32>, vector<2x8xf32> -> vector<2x8xf32>
    %c3 = arith.constant 3 : index
    %c0_90 = arith.constant 0 : index
    %c0_91 = arith.constant 0 : index
    %200 = vector.load %arg1[%c3, %c0_90, %c0_91] : memref<8x2x128xf32, #tpu.memory_space<vmem>>, vector<1x2x128xf32>
    %201 = vector.shape_cast %200 : vector<1x2x128xf32> to vector<2x128xf32>
    %cst_92 = arith.constant dense<0.000000e+00> : vector<2x64xf32>
    %202 = tpu.matmul %201, %3, %cst_92 {dimension_numbers = #tpu.dot_dimension_numbers<[1], [0], [0], [1], [0, 0, 1, 1], [], []>} : vector<2x128xf32>, vector<128x64xf32>, vector<2x64xf32> -> vector<2x64xf32>
    %203 = vector.broadcast %7 : vector<1x64xf32> to vector<2x64xf32>
    %204 = arith.addf %203, %202 : vector<2x64xf32>
    %c3_93 = arith.constant 3 : index
    %c0_94 = arith.constant 0 : index
    %c0_95 = arith.constant 0 : index
    %205 = vector.load %arg2[%c3_93, %c0_94, %c0_95] : memref<8x2x32xf32, #tpu.memory_space<vmem>>, vector<1x2x32xf32>
    %206 = vector.shape_cast %205 : vector<1x2x32xf32> to vector<2x32xf32>
    %cst_96 = arith.constant dense<0.000000e+00> : vector<2x64xf32>
    %207 = tpu.matmul %206, %4, %cst_96 {dimension_numbers = #tpu.dot_dimension_numbers<[1], [0], [0], [1], [0, 0, 1, 1], [], []>} : vector<2x32xf32>, vector<32x64xf32>, vector<2x64xf32> -> vector<2x64xf32>
    %208 = arith.addf %204, %207 : vector<2x64xf32>
    %cst_97 = arith.constant dense<0.000000e+00> : vector<2x64xf32>
    %209 = tpu.matmul %199, %5, %cst_97 {dimension_numbers = #tpu.dot_dimension_numbers<[1], [0], [0], [1], [0, 0, 1, 1], [], []>} : vector<2x8xf32>, vector<8x64xf32>, vector<2x64xf32> -> vector<2x64xf32>
    %210 = arith.addf %208, %209 : vector<2x64xf32>
    %cst_98 = arith.constant dense<0.000000e+00> : vector<2x64xf32>
    %211 = tpu.matmul %175, %6, %cst_98 {dimension_numbers = #tpu.dot_dimension_numbers<[1], [0], [0], [1], [0, 0, 1, 1], [], []>} : vector<2x16xf32>, vector<16x64xf32>, vector<2x64xf32> -> vector<2x64xf32>
    %212 = arith.addf %210, %211 : vector<2x64xf32>
    %213 = vector.extract_strided_slice %212 {offsets = [0, 0], sizes = [2, 16], strides = [1, 1]} : vector<2x64xf32> to vector<2x16xf32>
    %214 = arith.negf %213 : vector<2x16xf32>
    %215 = math.exp %214 : vector<2x16xf32>
    %cst_99 = arith.constant 1.000000e+00 : f32
    %216 = vector.broadcast %cst_99 : f32 to vector<2x16xf32>
    %217 = arith.addf %216, %215 : vector<2x16xf32>
    %218 = arith.divf %216, %217 : vector<2x16xf32>
    %219 = vector.extract_strided_slice %212 {offsets = [0, 16], sizes = [2, 16], strides = [1, 1]} : vector<2x64xf32> to vector<2x16xf32>
    %220 = arith.negf %219 : vector<2x16xf32>
    %221 = math.exp %220 : vector<2x16xf32>
    %cst_100 = arith.constant 1.000000e+00 : f32
    %222 = vector.broadcast %cst_100 : f32 to vector<2x16xf32>
    %223 = arith.addf %222, %221 : vector<2x16xf32>
    %224 = arith.divf %222, %223 : vector<2x16xf32>
    %225 = vector.extract_strided_slice %212 {offsets = [0, 32], sizes = [2, 16], strides = [1, 1]} : vector<2x64xf32> to vector<2x16xf32>
    %226 = math.tanh %225 : vector<2x16xf32>
    %227 = vector.extract_strided_slice %212 {offsets = [0, 48], sizes = [2, 16], strides = [1, 1]} : vector<2x64xf32> to vector<2x16xf32>
    %228 = arith.negf %227 : vector<2x16xf32>
    %229 = math.exp %228 : vector<2x16xf32>
    %cst_101 = arith.constant 1.000000e+00 : f32
    %230 = vector.broadcast %cst_101 : f32 to vector<2x16xf32>
    %231 = arith.addf %230, %229 : vector<2x16xf32>
    %232 = arith.divf %230, %231 : vector<2x16xf32>
    %233 = arith.mulf %224, %173 : vector<2x16xf32>
    %234 = arith.mulf %218, %226 : vector<2x16xf32>
    %235 = arith.addf %233, %234 : vector<2x16xf32>
    %236 = math.tanh %235 : vector<2x16xf32>
    %237 = arith.mulf %232, %236 : vector<2x16xf32>
    %cst_102 = arith.constant dense<0.000000e+00> : vector<2x128xf32>
    %238 = tpu.matmul %237, %8, %cst_102 {dimension_numbers = #tpu.dot_dimension_numbers<[1], [0], [0], [1], [0, 0, 1, 1], [], []>} : vector<2x16xf32>, vector<16x128xf32>, vector<2x128xf32> -> vector<2x128xf32>
    %239 = vector.broadcast %9 : vector<1x128xf32> to vector<2x128xf32>
    %240 = arith.addf %238, %239 : vector<2x128xf32>
    %c3_103 = arith.constant 3 : index
    %c0_104 = arith.constant 0 : index
    %c0_105 = arith.constant 0 : index
    %241 = vector.load %arg12[%c3_103, %c0_104, %c0_105] : memref<8x2x128xf32, #tpu.memory_space<vmem>>, vector<1x2x128xf32>
    %242 = vector.shape_cast %241 : vector<1x2x128xf32> to vector<2x128xf32>
    %243 = vector.shape_cast %240 : vector<2x128xf32> to vector<1x2x128xf32>
    tpu.vector_store %arg12[%c3_103, %c0_104, %c0_105], %243 {strides = array<i32>} : memref<8x2x128xf32, #tpu.memory_space<vmem>>, vector<1x2x128xf32>,
    %cst_106 = arith.constant dense<0xFF800000> : vector<2xf32>
    %244 = vector.multi_reduction <maximumf>, %240, %cst_106 [1] : vector<2x128xf32> to vector<2xf32>
    %245 = vector.shape_cast %244 : vector<2xf32> to vector<2x1xf32>
    %246 = tpu.iota {dimensions = array<i32: 1>} : vector<2x128xi32>
    %247 = vector.broadcast %245 : vector<2x1xf32> to vector<2x128xf32>
    %248 = arith.cmpf oge, %240, %247 : vector<2x128xf32>
    %c128_i32_107 = arith.constant 128 : i32
    %249 = vector.broadcast %c128_i32_107 : i32 to vector<2x128xi32>
    %250 = arith.select %248, %246, %249 : vector<2x128xi1>, vector<2x128xi32>
    %cst_108 = arith.constant dense<2147483647> : vector<2xi32>
    %251 = vector.multi_reduction <minsi>, %250, %cst_108 [1] : vector<2x128xi32> to vector<2xi32>
    %252 = vector.shape_cast %251 : vector<2xi32> to vector<2x1xi32>
    %253 = arith.sitofp %252 : vector<2x1xi32> to vector<2x1xf32>
    %c3_109 = arith.constant 3 : index
    %c0_110 = arith.constant 0 : index
    %c0_111 = arith.constant 0 : index
    %254 = vector.load %arg13[%c3_109, %c0_110, %c0_111] : memref<8x2x1xf32, #tpu.memory_space<vmem>>, vector<1x2x1xf32>
    %255 = vector.shape_cast %254 : vector<1x2x1xf32> to vector<2x1xf32>
    %256 = vector.shape_cast %253 : vector<2x1xf32> to vector<1x2x1xf32>
    tpu.vector_store %arg13[%c3_109, %c0_110, %c0_111], %256 {strides = array<i32>} : memref<8x2x1xf32, #tpu.memory_space<vmem>>, vector<1x2x1xf32>,
    %257 = vector.broadcast %252 : vector<2x1xi32> to vector<2x128xi32>
    %258 = arith.cmpi eq, %246, %257 : vector<2x128xi32>
    %259 = arith.extui %258 : vector<2x128xi1> to vector<2x128xi32>
    %260 = arith.sitofp %259 : vector<2x128xi32> to vector<2x128xf32>
    %cst_112 = arith.constant dense<0.000000e+00> : vector<2x8xf32>
    %261 = tpu.matmul %260, %10, %cst_112 {dimension_numbers = #tpu.dot_dimension_numbers<[1], [0], [0], [1], [0, 0, 1, 1], [], []>} : vector<2x128xf32>, vector<128x8xf32>, vector<2x8xf32> -> vector<2x8xf32>
    %c4 = arith.constant 4 : index
    %c0_113 = arith.constant 0 : index
    %c0_114 = arith.constant 0 : index
    %262 = vector.load %arg1[%c4, %c0_113, %c0_114] : memref<8x2x128xf32, #tpu.memory_space<vmem>>, vector<1x2x128xf32>
    %263 = vector.shape_cast %262 : vector<1x2x128xf32> to vector<2x128xf32>
    %cst_115 = arith.constant dense<0.000000e+00> : vector<2x64xf32>
    %264 = tpu.matmul %263, %3, %cst_115 {dimension_numbers = #tpu.dot_dimension_numbers<[1], [0], [0], [1], [0, 0, 1, 1], [], []>} : vector<2x128xf32>, vector<128x64xf32>, vector<2x64xf32> -> vector<2x64xf32>
    %265 = vector.broadcast %7 : vector<1x64xf32> to vector<2x64xf32>
    %266 = arith.addf %265, %264 : vector<2x64xf32>
    %c4_116 = arith.constant 4 : index
    %c0_117 = arith.constant 0 : index
    %c0_118 = arith.constant 0 : index
    %267 = vector.load %arg2[%c4_116, %c0_117, %c0_118] : memref<8x2x32xf32, #tpu.memory_space<vmem>>, vector<1x2x32xf32>
    %268 = vector.shape_cast %267 : vector<1x2x32xf32> to vector<2x32xf32>
    %cst_119 = arith.constant dense<0.000000e+00> : vector<2x64xf32>
    %269 = tpu.matmul %268, %4, %cst_119 {dimension_numbers = #tpu.dot_dimension_numbers<[1], [0], [0], [1], [0, 0, 1, 1], [], []>} : vector<2x32xf32>, vector<32x64xf32>, vector<2x64xf32> -> vector<2x64xf32>
    %270 = arith.addf %266, %269 : vector<2x64xf32>
    %cst_120 = arith.constant dense<0.000000e+00> : vector<2x64xf32>
    %271 = tpu.matmul %261, %5, %cst_120 {dimension_numbers = #tpu.dot_dimension_numbers<[1], [0], [0], [1], [0, 0, 1, 1], [], []>} : vector<2x8xf32>, vector<8x64xf32>, vector<2x64xf32> -> vector<2x64xf32>
    %272 = arith.addf %270, %271 : vector<2x64xf32>
    %cst_121 = arith.constant dense<0.000000e+00> : vector<2x64xf32>
    %273 = tpu.matmul %237, %6, %cst_121 {dimension_numbers = #tpu.dot_dimension_numbers<[1], [0], [0], [1], [0, 0, 1, 1], [], []>} : vector<2x16xf32>, vector<16x64xf32>, vector<2x64xf32> -> vector<2x64xf32>
    %274 = arith.addf %272, %273 : vector<2x64xf32>
    %275 = vector.extract_strided_slice %274 {offsets = [0, 0], sizes = [2, 16], strides = [1, 1]} : vector<2x64xf32> to vector<2x16xf32>
    %276 = arith.negf %275 : vector<2x16xf32>
    %277 = math.exp %276 : vector<2x16xf32>
    %cst_122 = arith.constant 1.000000e+00 : f32
    %278 = vector.broadcast %cst_122 : f32 to vector<2x16xf32>
    %279 = arith.addf %278, %277 : vector<2x16xf32>
    %280 = arith.divf %278, %279 : vector<2x16xf32>
    %281 = vector.extract_strided_slice %274 {offsets = [0, 16], sizes = [2, 16], strides = [1, 1]} : vector<2x64xf32> to vector<2x16xf32>
    %282 = arith.negf %281 : vector<2x16xf32>
    %283 = math.exp %282 : vector<2x16xf32>
    %cst_123 = arith.constant 1.000000e+00 : f32
    %284 = vector.broadcast %cst_123 : f32 to vector<2x16xf32>
    %285 = arith.addf %284, %283 : vector<2x16xf32>
    %286 = arith.divf %284, %285 : vector<2x16xf32>
    %287 = vector.extract_strided_slice %274 {offsets = [0, 32], sizes = [2, 16], strides = [1, 1]} : vector<2x64xf32> to vector<2x16xf32>
    %288 = math.tanh %287 : vector<2x16xf32>
    %289 = vector.extract_strided_slice %274 {offsets = [0, 48], sizes = [2, 16], strides = [1, 1]} : vector<2x64xf32> to vector<2x16xf32>
    %290 = arith.negf %289 : vector<2x16xf32>
    %291 = math.exp %290 : vector<2x16xf32>
    %cst_124 = arith.constant 1.000000e+00 : f32
    %292 = vector.broadcast %cst_124 : f32 to vector<2x16xf32>
    %293 = arith.addf %292, %291 : vector<2x16xf32>
    %294 = arith.divf %292, %293 : vector<2x16xf32>
    %295 = arith.mulf %286, %235 : vector<2x16xf32>
    %296 = arith.mulf %280, %288 : vector<2x16xf32>
    %297 = arith.addf %295, %296 : vector<2x16xf32>
    %298 = math.tanh %297 : vector<2x16xf32>
    %299 = arith.mulf %294, %298 : vector<2x16xf32>
    %cst_125 = arith.constant dense<0.000000e+00> : vector<2x128xf32>
    %300 = tpu.matmul %299, %8, %cst_125 {dimension_numbers = #tpu.dot_dimension_numbers<[1], [0], [0], [1], [0, 0, 1, 1], [], []>} : vector<2x16xf32>, vector<16x128xf32>, vector<2x128xf32> -> vector<2x128xf32>
    %301 = vector.broadcast %9 : vector<1x128xf32> to vector<2x128xf32>
    %302 = arith.addf %300, %301 : vector<2x128xf32>
    %c4_126 = arith.constant 4 : index
    %c0_127 = arith.constant 0 : index
    %c0_128 = arith.constant 0 : index
    %303 = vector.load %arg12[%c4_126, %c0_127, %c0_128] : memref<8x2x128xf32, #tpu.memory_space<vmem>>, vector<1x2x128xf32>
    %304 = vector.shape_cast %303 : vector<1x2x128xf32> to vector<2x128xf32>
    %305 = vector.shape_cast %302 : vector<2x128xf32> to vector<1x2x128xf32>
    tpu.vector_store %arg12[%c4_126, %c0_127, %c0_128], %305 {strides = array<i32>} : memref<8x2x128xf32, #tpu.memory_space<vmem>>, vector<1x2x128xf32>,
    %cst_129 = arith.constant dense<0xFF800000> : vector<2xf32>
    %306 = vector.multi_reduction <maximumf>, %302, %cst_129 [1] : vector<2x128xf32> to vector<2xf32>
    %307 = vector.shape_cast %306 : vector<2xf32> to vector<2x1xf32>
    %308 = tpu.iota {dimensions = array<i32: 1>} : vector<2x128xi32>
    %309 = vector.broadcast %307 : vector<2x1xf32> to vector<2x128xf32>
    %310 = arith.cmpf oge, %302, %309 : vector<2x128xf32>
    %c128_i32_130 = arith.constant 128 : i32
    %311 = vector.broadcast %c128_i32_130 : i32 to vector<2x128xi32>
    %312 = arith.select %310, %308, %311 : vector<2x128xi1>, vector<2x128xi32>
    %cst_131 = arith.constant dense<2147483647> : vector<2xi32>
    %313 = vector.multi_reduction <minsi>, %312, %cst_131 [1] : vector<2x128xi32> to vector<2xi32>
    %314 = vector.shape_cast %313 : vector<2xi32> to vector<2x1xi32>
    %315 = arith.sitofp %314 : vector<2x1xi32> to vector<2x1xf32>
    %c4_132 = arith.constant 4 : index
    %c0_133 = arith.constant 0 : index
    %c0_134 = arith.constant 0 : index
    %316 = vector.load %arg13[%c4_132, %c0_133, %c0_134] : memref<8x2x1xf32, #tpu.memory_space<vmem>>, vector<1x2x1xf32>
    %317 = vector.shape_cast %316 : vector<1x2x1xf32> to vector<2x1xf32>
    %318 = vector.shape_cast %315 : vector<2x1xf32> to vector<1x2x1xf32>
    tpu.vector_store %arg13[%c4_132, %c0_133, %c0_134], %318 {strides = array<i32>} : memref<8x2x1xf32, #tpu.memory_space<vmem>>, vector<1x2x1xf32>,
    %319 = vector.broadcast %314 : vector<2x1xi32> to vector<2x128xi32>
    %320 = arith.cmpi eq, %308, %319 : vector<2x128xi32>
    %321 = arith.extui %320 : vector<2x128xi1> to vector<2x128xi32>
    %322 = arith.sitofp %321 : vector<2x128xi32> to vector<2x128xf32>
    %cst_135 = arith.constant dense<0.000000e+00> : vector<2x8xf32>
    %323 = tpu.matmul %322, %10, %cst_135 {dimension_numbers = #tpu.dot_dimension_numbers<[1], [0], [0], [1], [0, 0, 1, 1], [], []>} : vector<2x128xf32>, vector<128x8xf32>, vector<2x8xf32> -> vector<2x8xf32>
    %c5 = arith.constant 5 : index
    %c0_136 = arith.constant 0 : index
    %c0_137 = arith.constant 0 : index
    %324 = vector.load %arg1[%c5, %c0_136, %c0_137] : memref<8x2x128xf32, #tpu.memory_space<vmem>>, vector<1x2x128xf32>
    %325 = vector.shape_cast %324 : vector<1x2x128xf32> to vector<2x128xf32>
    %cst_138 = arith.constant dense<0.000000e+00> : vector<2x64xf32>
    %326 = tpu.matmul %325, %3, %cst_138 {dimension_numbers = #tpu.dot_dimension_numbers<[1], [0], [0], [1], [0, 0, 1, 1], [], []>} : vector<2x128xf32>, vector<128x64xf32>, vector<2x64xf32> -> vector<2x64xf32>
    %327 = vector.broadcast %7 : vector<1x64xf32> to vector<2x64xf32>
    %328 = arith.addf %327, %326 : vector<2x64xf32>
    %c5_139 = arith.constant 5 : index
    %c0_140 = arith.constant 0 : index
    %c0_141 = arith.constant 0 : index
    %329 = vector.load %arg2[%c5_139, %c0_140, %c0_141] : memref<8x2x32xf32, #tpu.memory_space<vmem>>, vector<1x2x32xf32>
    %330 = vector.shape_cast %329 : vector<1x2x32xf32> to vector<2x32xf32>
    %cst_142 = arith.constant dense<0.000000e+00> : vector<2x64xf32>
    %331 = tpu.matmul %330, %4, %cst_142 {dimension_numbers = #tpu.dot_dimension_numbers<[1], [0], [0], [1], [0, 0, 1, 1], [], []>} : vector<2x32xf32>, vector<32x64xf32>, vector<2x64xf32> -> vector<2x64xf32>
    %332 = arith.addf %328, %331 : vector<2x64xf32>
    %cst_143 = arith.constant dense<0.000000e+00> : vector<2x64xf32>
    %333 = tpu.matmul %323, %5, %cst_143 {dimension_numbers = #tpu.dot_dimension_numbers<[1], [0], [0], [1], [0, 0, 1, 1], [], []>} : vector<2x8xf32>, vector<8x64xf32>, vector<2x64xf32> -> vector<2x64xf32>
    %334 = arith.addf %332, %333 : vector<2x64xf32>
    %cst_144 = arith.constant dense<0.000000e+00> : vector<2x64xf32>
    %335 = tpu.matmul %299, %6, %cst_144 {dimension_numbers = #tpu.dot_dimension_numbers<[1], [0], [0], [1], [0, 0, 1, 1], [], []>} : vector<2x16xf32>, vector<16x64xf32>, vector<2x64xf32> -> vector<2x64xf32>
    %336 = arith.addf %334, %335 : vector<2x64xf32>
    %337 = vector.extract_strided_slice %336 {offsets = [0, 0], sizes = [2, 16], strides = [1, 1]} : vector<2x64xf32> to vector<2x16xf32>
    %338 = arith.negf %337 : vector<2x16xf32>
    %339 = math.exp %338 : vector<2x16xf32>
    %cst_145 = arith.constant 1.000000e+00 : f32
    %340 = vector.broadcast %cst_145 : f32 to vector<2x16xf32>
    %341 = arith.addf %340, %339 : vector<2x16xf32>
    %342 = arith.divf %340, %341 : vector<2x16xf32>
    %343 = vector.extract_strided_slice %336 {offsets = [0, 16], sizes = [2, 16], strides = [1, 1]} : vector<2x64xf32> to vector<2x16xf32>
    %344 = arith.negf %343 : vector<2x16xf32>
    %345 = math.exp %344 : vector<2x16xf32>
    %cst_146 = arith.constant 1.000000e+00 : f32
    %346 = vector.broadcast %cst_146 : f32 to vector<2x16xf32>
    %347 = arith.addf %346, %345 : vector<2x16xf32>
    %348 = arith.divf %346, %347 : vector<2x16xf32>
    %349 = vector.extract_strided_slice %336 {offsets = [0, 32], sizes = [2, 16], strides = [1, 1]} : vector<2x64xf32> to vector<2x16xf32>
    %350 = math.tanh %349 : vector<2x16xf32>
    %351 = vector.extract_strided_slice %336 {offsets = [0, 48], sizes = [2, 16], strides = [1, 1]} : vector<2x64xf32> to vector<2x16xf32>
    %352 = arith.negf %351 : vector<2x16xf32>
    %353 = math.exp %352 : vector<2x16xf32>
    %cst_147 = arith.constant 1.000000e+00 : f32
    %354 = vector.broadcast %cst_147 : f32 to vector<2x16xf32>
    %355 = arith.addf %354, %353 : vector<2x16xf32>
    %356 = arith.divf %354, %355 : vector<2x16xf32>
    %357 = arith.mulf %348, %297 : vector<2x16xf32>
    %358 = arith.mulf %342, %350 : vector<2x16xf32>
    %359 = arith.addf %357, %358 : vector<2x16xf32>
    %360 = math.tanh %359 : vector<2x16xf32>
    %361 = arith.mulf %356, %360 : vector<2x16xf32>
    %cst_148 = arith.constant dense<0.000000e+00> : vector<2x128xf32>
    %362 = tpu.matmul %361, %8, %cst_148 {dimension_numbers = #tpu.dot_dimension_numbers<[1], [0], [0], [1], [0, 0, 1, 1], [], []>} : vector<2x16xf32>, vector<16x128xf32>, vector<2x128xf32> -> vector<2x128xf32>
    %363 = vector.broadcast %9 : vector<1x128xf32> to vector<2x128xf32>
    %364 = arith.addf %362, %363 : vector<2x128xf32>
    %c5_149 = arith.constant 5 : index
    %c0_150 = arith.constant 0 : index
    %c0_151 = arith.constant 0 : index
    %365 = vector.load %arg12[%c5_149, %c0_150, %c0_151] : memref<8x2x128xf32, #tpu.memory_space<vmem>>, vector<1x2x128xf32>
    %366 = vector.shape_cast %365 : vector<1x2x128xf32> to vector<2x128xf32>
    %367 = vector.shape_cast %364 : vector<2x128xf32> to vector<1x2x128xf32>
    tpu.vector_store %arg12[%c5_149, %c0_150, %c0_151], %367 {strides = array<i32>} : memref<8x2x128xf32, #tpu.memory_space<vmem>>, vector<1x2x128xf32>,
    %cst_152 = arith.constant dense<0xFF800000> : vector<2xf32>
    %368 = vector.multi_reduction <maximumf>, %364, %cst_152 [1] : vector<2x128xf32> to vector<2xf32>
    %369 = vector.shape_cast %368 : vector<2xf32> to vector<2x1xf32>
    %370 = tpu.iota {dimensions = array<i32: 1>} : vector<2x128xi32>
    %371 = vector.broadcast %369 : vector<2x1xf32> to vector<2x128xf32>
    %372 = arith.cmpf oge, %364, %371 : vector<2x128xf32>
    %c128_i32_153 = arith.constant 128 : i32
    %373 = vector.broadcast %c128_i32_153 : i32 to vector<2x128xi32>
    %374 = arith.select %372, %370, %373 : vector<2x128xi1>, vector<2x128xi32>
    %cst_154 = arith.constant dense<2147483647> : vector<2xi32>
    %375 = vector.multi_reduction <minsi>, %374, %cst_154 [1] : vector<2x128xi32> to vector<2xi32>
    %376 = vector.shape_cast %375 : vector<2xi32> to vector<2x1xi32>
    %377 = arith.sitofp %376 : vector<2x1xi32> to vector<2x1xf32>
    %c5_155 = arith.constant 5 : index
    %c0_156 = arith.constant 0 : index
    %c0_157 = arith.constant 0 : index
    %378 = vector.load %arg13[%c5_155, %c0_156, %c0_157] : memref<8x2x1xf32, #tpu.memory_space<vmem>>, vector<1x2x1xf32>
    %379 = vector.shape_cast %378 : vector<1x2x1xf32> to vector<2x1xf32>
    %380 = vector.shape_cast %377 : vector<2x1xf32> to vector<1x2x1xf32>
    tpu.vector_store %arg13[%c5_155, %c0_156, %c0_157], %380 {strides = array<i32>} : memref<8x2x1xf32, #tpu.memory_space<vmem>>, vector<1x2x1xf32>,
    %381 = vector.broadcast %376 : vector<2x1xi32> to vector<2x128xi32>
    %382 = arith.cmpi eq, %370, %381 : vector<2x128xi32>
    %383 = arith.extui %382 : vector<2x128xi1> to vector<2x128xi32>
    %384 = arith.sitofp %383 : vector<2x128xi32> to vector<2x128xf32>
    %cst_158 = arith.constant dense<0.000000e+00> : vector<2x8xf32>
    %385 = tpu.matmul %384, %10, %cst_158 {dimension_numbers = #tpu.dot_dimension_numbers<[1], [0], [0], [1], [0, 0, 1, 1], [], []>} : vector<2x128xf32>, vector<128x8xf32>, vector<2x8xf32> -> vector<2x8xf32>
    %c6 = arith.constant 6 : index
    %c0_159 = arith.constant 0 : index
    %c0_160 = arith.constant 0 : index
    %386 = vector.load %arg1[%c6, %c0_159, %c0_160] : memref<8x2x128xf32, #tpu.memory_space<vmem>>, vector<1x2x128xf32>
    %387 = vector.shape_cast %386 : vector<1x2x128xf32> to vector<2x128xf32>
    %cst_161 = arith.constant dense<0.000000e+00> : vector<2x64xf32>
    %388 = tpu.matmul %387, %3, %cst_161 {dimension_numbers = #tpu.dot_dimension_numbers<[1], [0], [0], [1], [0, 0, 1, 1], [], []>} : vector<2x128xf32>, vector<128x64xf32>, vector<2x64xf32> -> vector<2x64xf32>
    %389 = vector.broadcast %7 : vector<1x64xf32> to vector<2x64xf32>
    %390 = arith.addf %389, %388 : vector<2x64xf32>
    %c6_162 = arith.constant 6 : index
    %c0_163 = arith.constant 0 : index
    %c0_164 = arith.constant 0 : index
    %391 = vector.load %arg2[%c6_162, %c0_163, %c0_164] : memref<8x2x32xf32, #tpu.memory_space<vmem>>, vector<1x2x32xf32>
    %392 = vector.shape_cast %391 : vector<1x2x32xf32> to vector<2x32xf32>
    %cst_165 = arith.constant dense<0.000000e+00> : vector<2x64xf32>
    %393 = tpu.matmul %392, %4, %cst_165 {dimension_numbers = #tpu.dot_dimension_numbers<[1], [0], [0], [1], [0, 0, 1, 1], [], []>} : vector<2x32xf32>, vector<32x64xf32>, vector<2x64xf32> -> vector<2x64xf32>
    %394 = arith.addf %390, %393 : vector<2x64xf32>
    %cst_166 = arith.constant dense<0.000000e+00> : vector<2x64xf32>
    %395 = tpu.matmul %385, %5, %cst_166 {dimension_numbers = #tpu.dot_dimension_numbers<[1], [0], [0], [1], [0, 0, 1, 1], [], []>} : vector<2x8xf32>, vector<8x64xf32>, vector<2x64xf32> -> vector<2x64xf32>
    %396 = arith.addf %394, %395 : vector<2x64xf32>
    %cst_167 = arith.constant dense<0.000000e+00> : vector<2x64xf32>
    %397 = tpu.matmul %361, %6, %cst_167 {dimension_numbers = #tpu.dot_dimension_numbers<[1], [0], [0], [1], [0, 0, 1, 1], [], []>} : vector<2x16xf32>, vector<16x64xf32>, vector<2x64xf32> -> vector<2x64xf32>
    %398 = arith.addf %396, %397 : vector<2x64xf32>
    %399 = vector.extract_strided_slice %398 {offsets = [0, 0], sizes = [2, 16], strides = [1, 1]} : vector<2x64xf32> to vector<2x16xf32>
    %400 = arith.negf %399 : vector<2x16xf32>
    %401 = math.exp %400 : vector<2x16xf32>
    %cst_168 = arith.constant 1.000000e+00 : f32
    %402 = vector.broadcast %cst_168 : f32 to vector<2x16xf32>
    %403 = arith.addf %402, %401 : vector<2x16xf32>
    %404 = arith.divf %402, %403 : vector<2x16xf32>
    %405 = vector.extract_strided_slice %398 {offsets = [0, 16], sizes = [2, 16], strides = [1, 1]} : vector<2x64xf32> to vector<2x16xf32>
    %406 = arith.negf %405 : vector<2x16xf32>
    %407 = math.exp %406 : vector<2x16xf32>
    %cst_169 = arith.constant 1.000000e+00 : f32
    %408 = vector.broadcast %cst_169 : f32 to vector<2x16xf32>
    %409 = arith.addf %408, %407 : vector<2x16xf32>
    %410 = arith.divf %408, %409 : vector<2x16xf32>
    %411 = vector.extract_strided_slice %398 {offsets = [0, 32], sizes = [2, 16], strides = [1, 1]} : vector<2x64xf32> to vector<2x16xf32>
    %412 = math.tanh %411 : vector<2x16xf32>
    %413 = vector.extract_strided_slice %398 {offsets = [0, 48], sizes = [2, 16], strides = [1, 1]} : vector<2x64xf32> to vector<2x16xf32>
    %414 = arith.negf %413 : vector<2x16xf32>
    %415 = math.exp %414 : vector<2x16xf32>
    %cst_170 = arith.constant 1.000000e+00 : f32
    %416 = vector.broadcast %cst_170 : f32 to vector<2x16xf32>
    %417 = arith.addf %416, %415 : vector<2x16xf32>
    %418 = arith.divf %416, %417 : vector<2x16xf32>
    %419 = arith.mulf %410, %359 : vector<2x16xf32>
    %420 = arith.mulf %404, %412 : vector<2x16xf32>
    %421 = arith.addf %419, %420 : vector<2x16xf32>
    %422 = math.tanh %421 : vector<2x16xf32>
    %423 = arith.mulf %418, %422 : vector<2x16xf32>
    %cst_171 = arith.constant dense<0.000000e+00> : vector<2x128xf32>
    %424 = tpu.matmul %423, %8, %cst_171 {dimension_numbers = #tpu.dot_dimension_numbers<[1], [0], [0], [1], [0, 0, 1, 1], [], []>} : vector<2x16xf32>, vector<16x128xf32>, vector<2x128xf32> -> vector<2x128xf32>
    %425 = vector.broadcast %9 : vector<1x128xf32> to vector<2x128xf32>
    %426 = arith.addf %424, %425 : vector<2x128xf32>
    %c6_172 = arith.constant 6 : index
    %c0_173 = arith.constant 0 : index
    %c0_174 = arith.constant 0 : index
    %427 = vector.load %arg12[%c6_172, %c0_173, %c0_174] : memref<8x2x128xf32, #tpu.memory_space<vmem>>, vector<1x2x128xf32>
    %428 = vector.shape_cast %427 : vector<1x2x128xf32> to vector<2x128xf32>
    %429 = vector.shape_cast %426 : vector<2x128xf32> to vector<1x2x128xf32>
    tpu.vector_store %arg12[%c6_172, %c0_173, %c0_174], %429 {strides = array<i32>} : memref<8x2x128xf32, #tpu.memory_space<vmem>>, vector<1x2x128xf32>,
    %cst_175 = arith.constant dense<0xFF800000> : vector<2xf32>
    %430 = vector.multi_reduction <maximumf>, %426, %cst_175 [1] : vector<2x128xf32> to vector<2xf32>
    %431 = vector.shape_cast %430 : vector<2xf32> to vector<2x1xf32>
    %432 = tpu.iota {dimensions = array<i32: 1>} : vector<2x128xi32>
    %433 = vector.broadcast %431 : vector<2x1xf32> to vector<2x128xf32>
    %434 = arith.cmpf oge, %426, %433 : vector<2x128xf32>
    %c128_i32_176 = arith.constant 128 : i32
    %435 = vector.broadcast %c128_i32_176 : i32 to vector<2x128xi32>
    %436 = arith.select %434, %432, %435 : vector<2x128xi1>, vector<2x128xi32>
    %cst_177 = arith.constant dense<2147483647> : vector<2xi32>
    %437 = vector.multi_reduction <minsi>, %436, %cst_177 [1] : vector<2x128xi32> to vector<2xi32>
    %438 = vector.shape_cast %437 : vector<2xi32> to vector<2x1xi32>
    %439 = arith.sitofp %438 : vector<2x1xi32> to vector<2x1xf32>
    %c6_178 = arith.constant 6 : index
    %c0_179 = arith.constant 0 : index
    %c0_180 = arith.constant 0 : index
    %440 = vector.load %arg13[%c6_178, %c0_179, %c0_180] : memref<8x2x1xf32, #tpu.memory_space<vmem>>, vector<1x2x1xf32>
    %441 = vector.shape_cast %440 : vector<1x2x1xf32> to vector<2x1xf32>
    %442 = vector.shape_cast %439 : vector<2x1xf32> to vector<1x2x1xf32>
    tpu.vector_store %arg13[%c6_178, %c0_179, %c0_180], %442 {strides = array<i32>} : memref<8x2x1xf32, #tpu.memory_space<vmem>>, vector<1x2x1xf32>,
    %443 = vector.broadcast %438 : vector<2x1xi32> to vector<2x128xi32>
    %444 = arith.cmpi eq, %432, %443 : vector<2x128xi32>
    %445 = arith.extui %444 : vector<2x128xi1> to vector<2x128xi32>
    %446 = arith.sitofp %445 : vector<2x128xi32> to vector<2x128xf32>
    %cst_181 = arith.constant dense<0.000000e+00> : vector<2x8xf32>
    %447 = tpu.matmul %446, %10, %cst_181 {dimension_numbers = #tpu.dot_dimension_numbers<[1], [0], [0], [1], [0, 0, 1, 1], [], []>} : vector<2x128xf32>, vector<128x8xf32>, vector<2x8xf32> -> vector<2x8xf32>
    %c7 = arith.constant 7 : index
    %c0_182 = arith.constant 0 : index
    %c0_183 = arith.constant 0 : index
    %448 = vector.load %arg1[%c7, %c0_182, %c0_183] : memref<8x2x128xf32, #tpu.memory_space<vmem>>, vector<1x2x128xf32>
    %449 = vector.shape_cast %448 : vector<1x2x128xf32> to vector<2x128xf32>
    %cst_184 = arith.constant dense<0.000000e+00> : vector<2x64xf32>
    %450 = tpu.matmul %449, %3, %cst_184 {dimension_numbers = #tpu.dot_dimension_numbers<[1], [0], [0], [1], [0, 0, 1, 1], [], []>} : vector<2x128xf32>, vector<128x64xf32>, vector<2x64xf32> -> vector<2x64xf32>
    %451 = vector.broadcast %7 : vector<1x64xf32> to vector<2x64xf32>
    %452 = arith.addf %451, %450 : vector<2x64xf32>
    %c7_185 = arith.constant 7 : index
    %c0_186 = arith.constant 0 : index
    %c0_187 = arith.constant 0 : index
    %453 = vector.load %arg2[%c7_185, %c0_186, %c0_187] : memref<8x2x32xf32, #tpu.memory_space<vmem>>, vector<1x2x32xf32>
    %454 = vector.shape_cast %453 : vector<1x2x32xf32> to vector<2x32xf32>
    %cst_188 = arith.constant dense<0.000000e+00> : vector<2x64xf32>
    %455 = tpu.matmul %454, %4, %cst_188 {dimension_numbers = #tpu.dot_dimension_numbers<[1], [0], [0], [1], [0, 0, 1, 1], [], []>} : vector<2x32xf32>, vector<32x64xf32>, vector<2x64xf32> -> vector<2x64xf32>
    %456 = arith.addf %452, %455 : vector<2x64xf32>
    %cst_189 = arith.constant dense<0.000000e+00> : vector<2x64xf32>
    %457 = tpu.matmul %447, %5, %cst_189 {dimension_numbers = #tpu.dot_dimension_numbers<[1], [0], [0], [1], [0, 0, 1, 1], [], []>} : vector<2x8xf32>, vector<8x64xf32>, vector<2x64xf32> -> vector<2x64xf32>
    %458 = arith.addf %456, %457 : vector<2x64xf32>
    %cst_190 = arith.constant dense<0.000000e+00> : vector<2x64xf32>
    %459 = tpu.matmul %423, %6, %cst_190 {dimension_numbers = #tpu.dot_dimension_numbers<[1], [0], [0], [1], [0, 0, 1, 1], [], []>} : vector<2x16xf32>, vector<16x64xf32>, vector<2x64xf32> -> vector<2x64xf32>
    %460 = arith.addf %458, %459 : vector<2x64xf32>
    %461 = vector.extract_strided_slice %460 {offsets = [0, 0], sizes = [2, 16], strides = [1, 1]} : vector<2x64xf32> to vector<2x16xf32>
    %462 = arith.negf %461 : vector<2x16xf32>
    %463 = math.exp %462 : vector<2x16xf32>
    %cst_191 = arith.constant 1.000000e+00 : f32
    %464 = vector.broadcast %cst_191 : f32 to vector<2x16xf32>
    %465 = arith.addf %464, %463 : vector<2x16xf32>
    %466 = arith.divf %464, %465 : vector<2x16xf32>
    %467 = vector.extract_strided_slice %460 {offsets = [0, 16], sizes = [2, 16], strides = [1, 1]} : vector<2x64xf32> to vector<2x16xf32>
    %468 = arith.negf %467 : vector<2x16xf32>
    %469 = math.exp %468 : vector<2x16xf32>
    %cst_192 = arith.constant 1.000000e+00 : f32
    %470 = vector.broadcast %cst_192 : f32 to vector<2x16xf32>
    %471 = arith.addf %470, %469 : vector<2x16xf32>
    %472 = arith.divf %470, %471 : vector<2x16xf32>
    %473 = vector.extract_strided_slice %460 {offsets = [0, 32], sizes = [2, 16], strides = [1, 1]} : vector<2x64xf32> to vector<2x16xf32>
    %474 = math.tanh %473 : vector<2x16xf32>
    %475 = vector.extract_strided_slice %460 {offsets = [0, 48], sizes = [2, 16], strides = [1, 1]} : vector<2x64xf32> to vector<2x16xf32>
    %476 = arith.negf %475 : vector<2x16xf32>
    %477 = math.exp %476 : vector<2x16xf32>
    %cst_193 = arith.constant 1.000000e+00 : f32
    %478 = vector.broadcast %cst_193 : f32 to vector<2x16xf32>
    %479 = arith.addf %478, %477 : vector<2x16xf32>
    %480 = arith.divf %478, %479 : vector<2x16xf32>
    %481 = arith.mulf %472, %421 : vector<2x16xf32>
    %482 = arith.mulf %466, %474 : vector<2x16xf32>
    %483 = arith.addf %481, %482 : vector<2x16xf32>
    %484 = math.tanh %483 : vector<2x16xf32>
    %485 = arith.mulf %480, %484 : vector<2x16xf32>
    %cst_194 = arith.constant dense<0.000000e+00> : vector<2x128xf32>
    %486 = tpu.matmul %485, %8, %cst_194 {dimension_numbers = #tpu.dot_dimension_numbers<[1], [0], [0], [1], [0, 0, 1, 1], [], []>} : vector<2x16xf32>, vector<16x128xf32>, vector<2x128xf32> -> vector<2x128xf32>
    %487 = vector.broadcast %9 : vector<1x128xf32> to vector<2x128xf32>
    %488 = arith.addf %486, %487 : vector<2x128xf32>
    %c7_195 = arith.constant 7 : index
    %c0_196 = arith.constant 0 : index
    %c0_197 = arith.constant 0 : index
    %489 = vector.load %arg12[%c7_195, %c0_196, %c0_197] : memref<8x2x128xf32, #tpu.memory_space<vmem>>, vector<1x2x128xf32>
    %490 = vector.shape_cast %489 : vector<1x2x128xf32> to vector<2x128xf32>
    %491 = vector.shape_cast %488 : vector<2x128xf32> to vector<1x2x128xf32>
    tpu.vector_store %arg12[%c7_195, %c0_196, %c0_197], %491 {strides = array<i32>} : memref<8x2x128xf32, #tpu.memory_space<vmem>>, vector<1x2x128xf32>,
    %cst_198 = arith.constant dense<0xFF800000> : vector<2xf32>
    %492 = vector.multi_reduction <maximumf>, %488, %cst_198 [1] : vector<2x128xf32> to vector<2xf32>
    %493 = vector.shape_cast %492 : vector<2xf32> to vector<2x1xf32>
    %494 = tpu.iota {dimensions = array<i32: 1>} : vector<2x128xi32>
    %495 = vector.broadcast %493 : vector<2x1xf32> to vector<2x128xf32>
    %496 = arith.cmpf oge, %488, %495 : vector<2x128xf32>
    %c128_i32_199 = arith.constant 128 : i32
    %497 = vector.broadcast %c128_i32_199 : i32 to vector<2x128xi32>
    %498 = arith.select %496, %494, %497 : vector<2x128xi1>, vector<2x128xi32>
    %cst_200 = arith.constant dense<2147483647> : vector<2xi32>
    %499 = vector.multi_reduction <minsi>, %498, %cst_200 [1] : vector<2x128xi32> to vector<2xi32>
    %500 = vector.shape_cast %499 : vector<2xi32> to vector<2x1xi32>
    %501 = arith.sitofp %500 : vector<2x1xi32> to vector<2x1xf32>
    %c7_201 = arith.constant 7 : index
    %c0_202 = arith.constant 0 : index
    %c0_203 = arith.constant 0 : index
    %502 = vector.load %arg13[%c7_201, %c0_202, %c0_203] : memref<8x2x1xf32, #tpu.memory_space<vmem>>, vector<1x2x1xf32>
    %503 = vector.shape_cast %502 : vector<1x2x1xf32> to vector<2x1xf32>
    %504 = vector.shape_cast %501 : vector<2x1xf32> to vector<1x2x1xf32>
    tpu.vector_store %arg13[%c7_201, %c0_202, %c0_203], %504 {strides = array<i32>} : memref<8x2x1xf32, #tpu.memory_space<vmem>>, vector<1x2x1xf32>,
    %505 = vector.broadcast %500 : vector<2x1xi32> to vector<2x128xi32>
    %506 = arith.cmpi eq, %494, %505 : vector<2x128xi32>
    %507 = arith.extui %506 : vector<2x128xi1> to vector<2x128xi32>
    %508 = arith.sitofp %507 : vector<2x128xi32> to vector<2x128xf32>
    %cst_204 = arith.constant dense<0.000000e+00> : vector<2x8xf32>
    %509 = tpu.matmul %508, %10, %cst_204 {dimension_numbers = #tpu.dot_dimension_numbers<[1], [0], [0], [1], [0, 0, 1, 1], [], []>} : vector<2x128xf32>, vector<128x8xf32>, vector<2x8xf32> -> vector<2x8xf32>
    %c0_205 = arith.constant 0 : index
    %c0_206 = arith.constant 0 : index
    %510 = vector.load %arg14[%c0_205, %c0_206] : memref<2x16xf32, #tpu.memory_space<vmem>>, vector<2x16xf32>
    tpu.vector_store %arg14[%c0_205, %c0_206], %485 {strides = array<i32>} : memref<2x16xf32, #tpu.memory_space<vmem>>, vector<2x16xf32>,
    %c0_207 = arith.constant 0 : index
    %c0_208 = arith.constant 0 : index
    %511 = vector.load %arg15[%c0_207, %c0_208] : memref<2x16xf32, #tpu.memory_space<vmem>>, vector<2x16xf32>
    tpu.vector_store %arg15[%c0_207, %c0_208], %483 {strides = array<i32>} : memref<2x16xf32, #tpu.memory_space<vmem>>, vector<2x16xf32>,
    %c0_209 = arith.constant 0 : index
    %c0_210 = arith.constant 0 : index
    %512 = vector.load %arg16[%c0_209, %c0_210] : memref<2x8xf32, #tpu.memory_space<vmem>>, vector<2x8xf32>
    tpu.vector_store %arg16[%c0_209, %c0_210], %509 {strides = array<i32>} : memref<2x8xf32, #tpu.memory_space<vmem>>, vector<2x8xf32>,
    return
  }
  func.func @transform_0(%arg0: i32) -> (i32, i32, i32) {
    %c0_i32 = arith.constant 0 : i32
    %c0_i32_0 = arith.constant 0 : i32
    %c0_i32_1 = arith.constant 0 : i32
    return %arg0, %c0_i32, %c0_i32_0 : i32, i32, i32
  }
  func.func @transform_1(%arg0: i32) -> (i32, i32, i32) {
    %c0_i32 = arith.constant 0 : i32
    %c0_i32_0 = arith.constant 0 : i32
    %c0_i32_1 = arith.constant 0 : i32
    return %arg0, %c0_i32, %c0_i32_0 : i32, i32, i32
  }
  func.func @transform_2(%arg0: i32) -> (i32, i32) {
    %c0_i32 = arith.constant 0 : i32
    %c0_i32_0 = arith.constant 0 : i32
    %c0_i32_1 = arith.constant 0 : i32
    return %c0_i32, %c0_i32_0 : i32, i32
  }
  func.func @transform_3(%arg0: i32) -> (i32, i32) {
    %c0_i32 = arith.constant 0 : i32
    %c0_i32_0 = arith.constant 0 : i32
    %c0_i32_1 = arith.constant 0 : i32
    return %c0_i32, %c0_i32_0 : i32, i32
  }
  func.func @transform_4(%arg0: i32) -> (i32, i32) {
    %c0_i32 = arith.constant 0 : i32
    %c0_i32_0 = arith.constant 0 : i32
    %c0_i32_1 = arith.constant 0 : i32
    return %c0_i32, %c0_i32_0 : i32, i32
  }
  func.func @transform_5(%arg0: i32) -> (i32, i32) {
    %c0_i32 = arith.constant 0 : i32
    %c0_i32_0 = arith.constant 0 : i32
    %c0_i32_1 = arith.constant 0 : i32
    return %c0_i32, %c0_i32_0 : i32, i32
  }
  func.func @transform_6(%arg0: i32) -> (i32, i32) {
    %c0_i32 = arith.constant 0 : i32
    %c0_i32_0 = arith.constant 0 : i32
    %c0_i32_1 = arith.constant 0 : i32
    return %c0_i32, %c0_i32_0 : i32, i32
  }
  func.func @transform_7(%arg0: i32) -> (i32, i32) {
    %c0_i32 = arith.constant 0 : i32
    %c0_i32_0 = arith.constant 0 : i32
    %c0_i32_1 = arith.constant 0 : i32
    return %c0_i32, %c0_i32_0 : i32, i32
  }
  func.func @transform_8(%arg0: i32) -> (i32, i32) {
    %c0_i32 = arith.constant 0 : i32
    %c0_i32_0 = arith.constant 0 : i32
    %c0_i32_1 = arith.constant 0 : i32
    return %c0_i32, %c0_i32_0 : i32, i32
  }
  func.func @transform_9(%arg0: i32) -> (i32, i32) {
    %c0_i32 = arith.constant 0 : i32
    %c0_i32_0 = arith.constant 0 : i32
    %c0_i32_1 = arith.constant 0 : i32
    return %c0_i32, %c0_i32_0 : i32, i32
  }
  func.func @transform_10(%arg0: i32) -> (i32, i32) {
    %c0_i32 = arith.constant 0 : i32
    %c0_i32_0 = arith.constant 0 : i32
    %c0_i32_1 = arith.constant 0 : i32
    return %c0_i32, %c0_i32_0 : i32, i32
  }
  func.func @transform_11(%arg0: i32) -> (i32, i32, i32) {
    %c0_i32 = arith.constant 0 : i32
    %c0_i32_0 = arith.constant 0 : i32
    %c0_i32_1 = arith.constant 0 : i32
    return %arg0, %c0_i32, %c0_i32_0 : i32, i32, i32
  }
  func.func @transform_12(%arg0: i32) -> (i32, i32, i32) {
    %c0_i32 = arith.constant 0 : i32
    %c0_i32_0 = arith.constant 0 : i32
    %c0_i32_1 = arith.constant 0 : i32
    return %arg0, %c0_i32, %c0_i32_0 : i32, i32, i32
  }
}

</mosaic_0001>

<bundles_post_ra>
// kernel: cpos_forward.4
= control target key start
LH: loop header
LB: loop body
LE: loop exit
PB: predicated region body
PF: predicated region fallthrough
CT: control target
= control target key end

     0   :  { %v1941_v0 = vmov 0   ;;  %v1942_v4 = vmov 0.0   ;;  %vm118_vm0 = vcmask 261120   ;;  %vm1943_vm1 = vmmov 0   ;;  %s2557_s2 = inlined_call_operand.vmem [shape: f32[2,8,1], index: 2, kind: input, shape index: {}]   ;;  %s2558_s5 = inlined_call_operand.vmem [shape: f32[32,256], index: 5, kind: input, shape index: {}]   ;;  %s2559_s9 = inlined_call_operand.vmem [shape: f32[32,256], index: 9, kind: input, shape index: {}]   ;;  %s2560_s1 = inlined_call_operand.vmem [shape: f32[2,8,32], index: 1, kind: input, shape index: {}]   ;;  %s2561_s3 = inlined_call_operand.vmem [shape: f32[32,128], index: 3, kind: input, shape index: {}]   ;;  %s2562_s0 = inlined_call_operand.vmem [shape: f32[2,32], index: 0, kind: input, shape index: {}]   ;;  %s2563_s10 = inlined_call_operand.vmem [shape: f32[1,256], index: 10, kind: input, shape index: {}]   ;;  %s2564_s6 = inlined_call_operand.vmem [shape: f32[1,256], index: 6, kind: input, shape index: {}]   ;;  %s2565_s4 = inlined_call_operand.vmem [shape: f32[1,128], index: 4, kind: input, shape index: {}]   ;;  %s2566_s12 = inlined_call_operand.vmem [shape: f32[128,128], index: 12, kind: input, shape index: {}]   ;;  %s2567_s11 = inlined_call_operand.vmem [shape: f32[32,128], index: 11, kind: input, shape index: {}]   ;;  %s2568_s7 = inlined_call_operand.vmem [shape: f32[32,128], index: 7, kind: input, shape index: {}]   ;;  %s2569_s8 = inlined_call_operand.vmem [shape: f32[1,128], index: 8, kind: input, shape index: {}]   ;;  %s2570_s13 = inlined_call_operand.vmem [shape: f32[1,128], index: 13, kind: input, shape index: {}]   ;;  %s2571_s14 = inlined_call_operand.vmem [shape: f32[2,128], index: 14, kind: output, shape index: {0}]   ;;  %s2572_s15 = inlined_call_operand.vmem [shape: f32[2,8,128], index: 15, kind: output, shape index: {1}]  }
   0x1   :  { %1923 = vset.pattern.permute.xlu0 %v1941_v0  ;;  %v99_v1 = vld [vmem:[%s2557_s2] sm:$0xff]  ;;  %v2030_v2 = vld [vmem:[%s2558_s5 + $0x38] sm:$0xff]  ;;  %v2035_v3 = vld [vmem:[%s2558_s5 + $0x30] sm:$0xff]  ;;  %186 = vmatprep.mubr.f32.mxu0 %v1942_v4  ;;  %v108_v27 = vlaneseq  ;;  %vm418_vm2 = vcmask 57344   ;;  %vm431_vm3 = vcmask 64512  }
   0x2   :  { %102 = vperm.xlu0 %1923, %v99_v1   ;;  %146 = vmatprep.subr.mxu0 %v2030_v2  ;;  %v2042_v5 = vld [vmem:[%s2559_s9 + $0x38] sm:$0xff]  ;;  %v2047_v6 = vld [vmem:[%s2558_s5 + $0x28] sm:$0xff]  ;;  %v2052_v7 = vld [vmem:[%s2559_s9 + $0x30] sm:$0xff] }
   0x3   :  { %147 = vmatpush1.msra.mxu0 %v2035_v3  ;;  %228 = vmatprep.subr.mxu1 %v2042_v5  ;;  %v2059_v8 = vld [vmem:[%s2558_s5 + $0x20] sm:$0xff]  ;;  %v2064_v9 = vld [vmem:[%s2559_s9 + $0x28] sm:$0xff]  ;;  %v2069_v10 = vld [vmem:[%s2558_s5 + $0x18] sm:$0xff]  ;;  %v2176_v28 = vshrl.u32 %v108_v27, 7 }
   0x4   :  { %148 = vmatprep.subr.mxu0 %v2047_v6  ;;  %229 = vmatpush1.msra.mxu1 %v2052_v7  ;;  %v2076_v11 = vld [vmem:[%s2559_s9 + $0x20] sm:$0xff]  ;;  %v2081_v12 = vld [vmem:[%s2558_s5 + $0x10] sm:$0xff]  ;;  %v2086_v13 = vld [vmem:[%s2559_s9 + $0x18] sm:$0xff] }
   0x5   :  { %149 = vmatpush1.msra.mxu0 %v2059_v8  ;;  %230 = vmatprep.subr.mxu1 %v2064_v9  ;;  %v2093_v14 = vld [vmem:[%s2558_s5 + $0x8] sm:$0xff]  ;;  %v2098_v15 = vld [vmem:[%s2559_s9 + $0x10] sm:$0xff]  ;;  %v2105_v16 = vld [vmem:[%s2558_s5] sm:$0xff]  ;;  %v114_v29 = vsub.s32 1, %v2176_v28  ;;  %v110_v32 = vsub.s32 0, %v2176_v28 }
   0x6   :  { %150 = vmatprep.subr.mxu0 %v2069_v10  ;;  %231 = vmatpush1.msra.mxu1 %v2076_v11  ;;  %v2110_v17 = vld [vmem:[%s2559_s9 + $0x8] sm:$0xff]  ;;  %v2117_v18 = vld [vmem:[%s2559_s9] sm:$0xff]  ;;  %v2136_v22 = vld [vmem:[%s2561_s3 + $0x18] sm:$0xff] }
   0x7   :  { %151 = vmatpush1.msra.mxu0 %v2081_v12  ;;  %232 = vmatprep.subr.mxu1 %v2086_v13  ;;  %v2130_v19 = vld [vmem:[%s2560_s1] sm:$0xff]  ;;  %v2143_v23 = vld [vmem:[%s2561_s3 + $0x10] sm:$0xff]  ;;  %v2152_v24 = vld [vmem:[%s2561_s3 + $0x8] sm:$0xff] }
   0x8   :  { %152 = vmatprep.subr.mxu0 %v2093_v14  ;;  %233 = vmatpush1.msra.mxu1 %v2098_v15  ;;  %v2161_v25 = vld [vmem:[%s2561_s3] sm:$0xff]  ;;  %v2218_v54 = vld [vmem:[%s2566_s12 + $0x78] sm:$0xff]  ;;  %v2223_v55 = vld [vmem:[%s2566_s12 + $0x70] sm:$0xff] }
   0x9   :  { %153 = vmatpush1.msra.mxu0 %v2105_v16  ;;  %234 = vmatprep.subr.mxu1 %v2110_v17  ;;  %v2167_v26 = vld [vmem:[%s2562_s0] sm:$0x1]  ;;  %v2230_v56 = vld [vmem:[%s2566_s12 + $0x68] sm:$0xff]  ;;  %v2244_v58 = vld [vmem:[%s2566_s12 + $0x58] sm:$0xff] }
   0xa   :  { %235 = vmatpush1.msra.mxu1 %v2117_v18  ;;  %268 = vmatprep.mubr.f32.mxu1 %v1942_v4  ;;  %v2182_v30 = vld [vmem:[%s2563_s10] sm:$0x3]  ;;  %v2251_v59 = vld [vmem:[%s2566_s12 + $0x50] sm:$0xff]  ;;  %v2258_v60 = vld [vmem:[%s2566_s12 + $0x48] sm:$0xff] }
   0xb   :  { %1744 = vmatprep.subr.mxu0 %v1942_v4  ;;  %1755 = vmatprep.subr.mxu1 %v1942_v4  ;;  %v2185_v31 = vrot.slane %v2182_v30, %v114_v29  ;;  %v62_v33 = vld [vmem:[%s2564_s6] sm:$0x3]  ;;  %v2272_v62 = vld [vmem:[%s2566_s12 + $0x38] sm:$0xff]  ;;  %v2279_v63 = vld [vmem:[%s2566_s12 + $0x30] sm:$0xff] }
   0xc   :  { %1924 = vset.pattern.permute.xlu1 %v1941_v0  ;;  %v2193_v34 = vrot.slane %v62_v33, %v110_v32  ;;  %v2197_v37 = vrot.slane %v62_v33, %v114_v29  ;;  %v2202_v39 = vld [vmem:[%s2565_s4] sm:$0x1]  ;;  %v2286_v0 = vld [vmem:[%s2566_s12 + $0x28] sm:$0xff] }
   0xd   :  { %v2237_v57 = vld [vmem:[%s2566_s12 + $0x60] sm:$0xff]  ;;  %v2314_v27 = vld [vmem:[%s2566_s12 + $0x8] sm:$0xff] }
   0xe   :  { %v2265_v61 = vld [vmem:[%s2566_s12 + $0x40] sm:$0xff] }
   0xf   :  { %v2293_v1 = vld [vmem:[%s2566_s12 + $0x20] sm:$0xff] }
  0x10   :  { %v2398_v28 = vld [vmem:[%s2566_s12] sm:$0xff] }
  0x7d   :  { %v103_v20 = vpop.permute.xlu0 %102 }
  0x7e   :  { %v105_v21 = vmul.f32 %v103_v20, %v2130_v19  ;;  %v2300_v20 = vld [vmem:[%s2566_s12 + $0x18] sm:$0xff] }
  0x80   :  { %1646 = vmatmul.mubr.msk.f32.vlgmr.msra.gmra.mxu0 %vm118_vm0, %v105_v21  ;;  %1647 = vmatmul.mubr.msk.f32.vlgmr.msra.gmra.mxu1 %vm118_vm0, %v105_v21  ;;  %v2307_v21 = vld [vmem:[%s2566_s12 + $0x10] sm:$0xff] }
  0x81   :  { %1745 = vmatpush3.msra.mxu0 %v2136_v22  ;;  %1752 = vmatprep.mubr.msk.f32.mxu0 %vm1943_vm1, %v1942_v4 }
  0x82   :  { %1746 = vmatprep.subr.mxu0 %v1942_v4  ;;  %1757 = vmatprep.mubr.msk.f32.mxu1 %vm1943_vm1, %v1942_v4 }
  0x83   :  { %1747 = vmatpush3.msra.mxu0 %v2143_v23 }
  0x84   :  { %1748 = vmatprep.subr.mxu0 %v1942_v4 }
  0x85   :  { %1749 = vmatpush3.msra.mxu0 %v2152_v24 }
  0x86   :  { %1750 = vmatprep.subr.mxu0 %v1942_v4 }
  0x87   :  { %1751 = vmatpush3.msra.mxu0 %v2161_v25 }
  0x88   :  { %1753 = vmatmul.mubr.msk.f32.vlgmr.msra.gmra.mxu0 %vm118_vm0, %v2167_v26  ;;  %1765 = vmatprep.subr.mxu0 %v1942_v4 }
  0x89   :  { %1797 = vmatprep.mubr.msk.f32.mxu0 %vm1943_vm1, %v1942_v4  ;;  %1766 = vmatpush3.msra.mxu0 %v2218_v54 }
  0x8a   :  { %1767 = vmatprep.subr.mxu0 %v1942_v4 }
  0x8b   :  { %1768 = vmatpush3.msra.mxu0 %v2223_v55 }
  0x8c   :  { %1769 = vmatprep.subr.mxu0 %v1942_v4 }
  0x8d   :  { %1770 = vmatpush3.msra.mxu0 %v2230_v56 }
  0x8e   :  { %1771 = vmatprep.subr.mxu0 %v1942_v4 }
  0x8f   :  { %1772 = vmatpush3.msra.mxu0 %v2237_v57 }
  0x90   :  { %1773 = vmatprep.subr.mxu0 %v1942_v4 }
  0x91   :  { %1774 = vmatpush3.msra.mxu0 %v2244_v58 }
  0x92   :  { %1775 = vmatprep.subr.mxu0 %v1942_v4 }
  0x93   :  { %1776 = vmatpush3.msra.mxu0 %v2251_v59 }
  0x94   :  { %1777 = vmatprep.subr.mxu0 %v1942_v4 }
  0x95   :  { %1778 = vmatpush3.msra.mxu0 %v2258_v60 }
  0x96   :  { %1779 = vmatprep.subr.mxu0 %v1942_v4 }
  0x97   :  { %1780 = vmatpush3.msra.mxu0 %v2265_v61 }
  0x98   :  { %1781 = vmatprep.subr.mxu0 %v1942_v4 }
  0x99   :  { %1782 = vmatpush3.msra.mxu0 %v2272_v62 }
  0x9a   :  { %1783 = vmatprep.subr.mxu0 %v1942_v4 }
  0x9b   :  { %1784 = vmatpush3.msra.mxu0 %v2279_v63 }
  0x9c   :  { %1785 = vmatprep.subr.mxu0 %v1942_v4 }
  0x9d   :  { %1786 = vmatpush3.msra.mxu0 %v2286_v0 }
  0x9e   :  { %1787 = vmatprep.subr.mxu0 %v1942_v4 }
  0x9f   :  { %1788 = vmatpush3.msra.mxu0 %v2293_v1 }
  0xa0   :  { %1789 = vmatprep.subr.mxu0 %v1942_v4 }
  0xa1   :  { %1790 = vmatpush3.msra.mxu0 %v2300_v20 }
  0xa2   :  { %1791 = vmatprep.subr.mxu0 %v1942_v4 }
  0xa3   :  { %1792 = vmatpush3.msra.mxu0 %v2307_v21 }
  0xa4   :  { %1793 = vmatprep.subr.mxu0 %v1942_v4 }
  0xa5   :  { %1794 = vmatpush3.msra.mxu0 %v2314_v27 }
  0xa6   :  { %1795 = vmatprep.subr.mxu0 %v1942_v4 }
  0xa7   :  { %1796 = vmatpush3.msra.mxu0 %v2398_v28 }
  0xa8   :  { %991 = vmatprep.subr.mxu0 %v2042_v5 }
 0x140   :  { %v188_v35 = vpop.f32.mrf.mxu0  ;;  %v2209_v44 = vpop.f32.mrf.mxu1 }
 0x141   :  { %v189_v36 = vadd.f32 %v188_v35, %v2193_v34 }
 0x142   :  { %v190_v38 = vpop.f32.mrf.mxu0  ;;  %v2211_v45 = vpop.f32.mrf.mxu1 }
 0x143   :  { %1756 = vmatpush3.xpose.msra.mxu1 %v189_v36  ;;  %v191_v42 = vadd.f32 %v190_v38, %v2197_v37  ;;  %v2323_v38 = vld [vmem:[%s2567_s11 + $0x18] sm:$0xff] }
 0x144   :  { %1760 = vmatprep.subr.mxu1 %v1942_v4 }
 0x148   :  { %v344_v40 = vpop.f32.mrf.mxu0 }
 0x149   :  { %v345_v41 = vadd.f32 %v344_v40, %v2202_v39  ;;  %v2329_v40 = vld [vmem:[%s2567_s11 + $0x10] sm:$0xff] }
 0x14a   :  { %v1754_v43 = vpop.f32.mrf.mxu0 }
 0x14b   :  { %1758 = vmatmul.mubr.f32.vlgmr.msra.gmra.mxu1 %v345_v41  ;;  %v2338_v41 = vld [vmem:[%s2567_s11 + $0x8] sm:$0xff]  ;;  %v2352_v43 = vld [vmem:[%s2568_s7 + $0x18] sm:$0xff] }
 0x14c   :  { %1761 = vmatpush3.msra.mxu1 %v191_v42  ;;  %1762 = vmatprep.mubr.msk.f32.mxu1 %vm1943_vm1, %v1942_v4  ;;  %v2345_v42 = vld [vmem:[%s2567_s11] sm:$0xff] }
 0x14d   :  { %1800 = vmatprep.subr.mxu1 %v1942_v4 }
 0x20b   :  { %v414_v46 = vpop.f32.mrf.mxu1 }
 0x20c   :  { %v419_v47 = vsel %vm418_vm2, %v414_v46, -inf }
 0x20d   :  { %420 = vmax.xlane.f32.xlu0 %v419_v47  ;;  %v1759_v48 = vpop.f32.mrf.mxu1  ;;  %v2370_v47 = vld [vmem:[%s2568_s7 + $0x8] sm:$0xff] }
 0x20e   :  { %v2382_v48 = vld [vmem:[%s2568_s7] sm:$0xff] }
 0x296   :  { %v421_v49 = vpop.xlane.xlu0 %420 }
 0x297   :  { %v422_v50 = vsub.f32 %v414_v46, %v421_v49  ;;  %v2361_v46 = vld [vmem:[%s2568_s7 + $0x10] sm:$0xff] }
 0x299   :  { %v423_v51 = vmul.f32 1.442695, %v422_v50 }
 0x29b   :  { %1925 = vpow2.f32 %v423_v51 }
 0x2a8   :  { %v1926_v52 = vpop.eup %1925 }
 0x2a9   :  { %v425_v53 = vsel %vm418_vm2, %v1926_v52, 0.0 }
 0x2aa   :  { %426 = vadd.xlane.f32.xlu1 %v425_v53 }
 0x333   :  { %v427_v29 = vpop.xlane.xlu1 %426 }
 0x334   :  { %1927 = vrcp.f32 %v427_v29 }
 0x341   :  { %v1928_v33 = vpop.eup %1927 }
 0x342   :  { %v429_v35 = vmul.f32 0.25, %v1928_v33 }
 0x344   :  { %v430_v36 = vmul.f32 %v1926_v52, %v429_v35 }
 0x346   :  { %1763 = vmatmul.mubr.msk.f32.vlgmr.msra.gmra.mxu1 %vm431_vm3, %v430_v36 }
 0x347   :  { %1801 = vmatpush3.msra.mxu1 %v2323_v38  ;;  %1808 = vmatprep.mubr.msk.f32.mxu1 %vm1943_vm1, %v1942_v4 }
 0x348   :  { %1802 = vmatprep.subr.mxu1 %v1942_v4 }
 0x349   :  { %1803 = vmatpush3.msra.mxu1 %v2329_v40 }
 0x34a   :  { %1804 = vmatprep.subr.mxu1 %v1942_v4 }
 0x34b   :  { %1805 = vmatpush3.msra.mxu1 %v2338_v41 }
 0x34c   :  { %1806 = vmatprep.subr.mxu1 %v1942_v4 }
 0x34d   :  { %1807 = vmatpush3.msra.mxu1 %v2345_v42 }
 0x34e   :  { %1809 = vmatmul.mubr.msk.f32.vlgmr.msra.gmra.mxu1 %vm118_vm0, %v2167_v26  ;;  %1811 = vmatprep.subr.mxu1 %v1942_v4  ;;  %v2375_v26 = vrot.slane %v2182_v30, %v110_v32 }
 0x34f   :  { %1812 = vmatpush3.msra.mxu1 %v2352_v43  ;;  %1819 = vmatprep.mubr.msk.f32.mxu1 %vm1943_vm1, %v1942_v4 }
 0x350   :  { %1813 = vmatprep.subr.mxu1 %v1942_v4  ;;  %v271_v49 = vadd.f32 %v2209_v44, %v2375_v26 }
 0x351   :  { %1814 = vmatpush3.msra.mxu1 %v2361_v46 }
 0x352   :  { %1815 = vmatprep.subr.mxu1 %v1942_v4 }
 0x353   :  { %1816 = vmatpush3.msra.mxu1 %v2370_v47 }
 0x354   :  { %1817 = vmatprep.subr.mxu1 %v1942_v4 }
 0x355   :  { %1818 = vmatpush3.msra.mxu1 %v2382_v48 }
 0x356   :  { %1820 = vmatmul.mubr.msk.f32.vlgmr.msra.gmra.mxu1 %vm118_vm0, %v2130_v19  ;;  %1822 = vmatprep.subr.mxu1 %v1942_v4 }
 0x357   :  { %1823 = vmatpush3.xpose.msra.mxu1 %v271_v49  ;;  %1824 = vmatprep.mubr.msk.f32.mxu1 %vm1943_vm1, %v1942_v4  ;;  %v1655_v49 = vld [vmem:[%s2557_s2 + $0x8] sm:$0xff] }
 0x358   :  { %1827 = vmatprep.subr.mxu1 %v1942_v4 }
 0x406   :  { %v501_v30 = vpop.f32.mrf.mxu1 }
 0x407   :  { %1798 = vmatmul.mubr.f32.vlgmr.msra.gmra.mxu0 %v501_v30 }
 0x408   :  { %v1764_v19 = vpop.f32.mrf.mxu1  ;;  %992 = vmatpush1.msra.mxu0 %v2052_v7  ;;  %1031 = vmatprep.mubr.f32.mxu0 %v1942_v4  ;;  %v2414_v7 = vld [vmem:[%s2569_s8] ss:$0 sm:$0xff] }
 0x409   :  { %993 = vmatprep.subr.mxu0 %v2064_v9  ;;  %v2439_v19 = vld [vmem:[%s2560_s1 + $0x8] sm:$0xff] }
 0x40a   :  { %994 = vmatpush1.msra.mxu0 %v2076_v11 }
 0x40b   :  { %995 = vmatprep.subr.mxu0 %v2086_v13  ;;  %v273_v13 = vadd.f32 %v2211_v45, %v2185_v31 }
 0x40c   :  { %996 = vmatpush1.msra.mxu0 %v2098_v15 }
 0x40d   :  { %997 = vmatprep.subr.mxu0 %v2110_v17  ;;  %v2425_v17 = vld [vmem:[%s2570_s13] sm:$0x1] }
 0x40e   :  { %v641_v32 = vpop.f32.mrf.mxu1  ;;  %998 = vmatpush1.msra.mxu0 %v2117_v18 }
 0x40f   :  { %1853 = vmatprep.subr.mxu0 %v1942_v4 }
 0x410   :  { %v1810_v5 = vpop.f32.mrf.mxu1 }
 0x416   :  { %v722_v9 = vpop.f32.mrf.mxu1 }
 0x417   :  { %v723_v11 = vadd.f32 %v2414_v7, %v722_v9 }
 0x418   :  { %v1821_v15 = vpop.f32.mrf.mxu1 }
 0x419   :  { %1825 = vmatmul.mubr.f32.vlgmr.msra.gmra.mxu1 %v723_v11 }
 0x41a   :  { %1828 = vmatpush3.msra.mxu1 %v273_v13  ;;  %1829 = vmatprep.mubr.msk.f32.mxu1 %vm1943_vm1, %v1942_v4 }
 0x41b   :  { %920 = vmatprep.subr.mxu1 %v2030_v2 }
 0x4c7   :  { %v571_v18 = vpop.f32.mrf.mxu0 }
 0x4c8   :  { %v642_v44 = vadd.f32 %v641_v32, %v571_v18 }
 0x4c9   :  { %v1799_v50 = vpop.f32.mrf.mxu0 }
 0x4ca   :  { %v645_v51 = vadd.f32 %v642_v44, %v2425_v17 }
 0x4cc   :  { %646 = vst [vmem:[%s2571_s14] sm:$0x1] %v645_v51 }
 0x4d9   :  { %v792_v45 = vpop.f32.mrf.mxu1 }
 0x4da   :  { %v796_v52 = vsel %vm431_vm3, %v792_v45, -inf }
 0x4db   :  { %797 = vmax.xlane.f32.xlu1 %v796_v52  ;;  %v1826_v53 = vpop.f32.mrf.mxu1 }
 0x564   :  { %v798_v2 = vpop.xlane.xlu1 %797 }
 0x565   :  { %v799_v29 = vsub.f32 %v792_v45, %v798_v2 }
 0x567   :  { %v800_v33 = vmul.f32 1.442695, %v799_v29 }
 0x569   :  { %1929 = vpow2.f32 %v800_v33 }
 0x576   :  { %v1930_v35 = vpop.eup %1929 }
 0x577   :  { %v802_v36 = vsel %vm431_vm3, %v1930_v35, 0.0 }
 0x578   :  { %803 = vadd.xlane.f32.xlu1 %v802_v36 }
 0x589   :  { %888 = vperm.xlu1 %1924, %v1655_v49  }
 0x601   :  { %v804_v30 = vpop.xlane.xlu1 %803 }
 0x602   :  { %1931 = vrcp.f32 %v804_v30 }
 0x605   :  { %v889_v32 = vpop.permute.xlu1 %888 }
 0x606   :  { %v891_v5 = vmul.f32 %v2439_v19, %v889_v32 }
 0x608   :  { %1657 = vmatmul.mubr.msk.f32.vlgmr.msra.gmra.mxu0 %vm118_vm0, %v891_v5 }
 0x609   :  { %1854 = vmatpush3.msra.mxu0 %v2218_v54  ;;  %1885 = vmatprep.mubr.msk.f32.mxu0 %vm1943_vm1, %v1942_v4 }
 0x60a   :  { %1855 = vmatprep.subr.mxu0 %v1942_v4 }
 0x60b   :  { %1856 = vmatpush3.msra.mxu0 %v2223_v55 }
 0x60c   :  { %1857 = vmatprep.subr.mxu0 %v1942_v4 }
 0x60d   :  { %1858 = vmatpush3.msra.mxu0 %v2230_v56 }
 0x60e   :  { %1859 = vmatprep.subr.mxu0 %v1942_v4 }
 0x60f   :  { %v1932_v9 = vpop.eup %1931  ;;  %1860 = vmatpush3.msra.mxu0 %v2237_v57 }
 0x610   :  { %v806_v11 = vmul.f32 0.25, %v1932_v9  ;;  %1861 = vmatprep.subr.mxu0 %v1942_v4 }
 0x611   :  { %1862 = vmatpush3.msra.mxu0 %v2244_v58 }
 0x612   :  { %v807_v54 = vmul.f32 %v1930_v35, %v806_v11  ;;  %1863 = vmatprep.subr.mxu0 %v1942_v4 }
 0x613   :  { %1864 = vmatpush3.msra.mxu0 %v2251_v59 }
 0x614   :  { %1830 = vmatmul.mubr.msk.f32.vlgmr.msra.gmra.mxu1 %vm431_vm3, %v807_v54  ;;  %1865 = vmatprep.subr.mxu0 %v1942_v4 }
 0x615   :  { %921 = vmatpush1.msra.mxu1 %v2035_v3  ;;  %960 = vmatprep.mubr.f32.mxu1 %v1942_v4  ;;  %v892_v3 = vld [vmem:[%s2562_s0 + $0x1] sm:$0x1] }
 0x616   :  { %922 = vmatprep.subr.mxu1 %v2047_v6  ;;  %1866 = vmatpush3.msra.mxu0 %v2258_v60 }
 0x617   :  { %923 = vmatpush1.msra.mxu1 %v2059_v8  ;;  %1867 = vmatprep.subr.mxu0 %v1942_v4 }
 0x618   :  { %924 = vmatprep.subr.mxu1 %v2069_v10  ;;  %1868 = vmatpush3.msra.mxu0 %v2265_v61 }
 0x619   :  { %925 = vmatpush1.msra.mxu1 %v2081_v12  ;;  %1869 = vmatprep.subr.mxu0 %v1942_v4 }
 0x61a   :  { %926 = vmatprep.subr.mxu1 %v2093_v14  ;;  %1870 = vmatpush3.msra.mxu0 %v2272_v62 }
 0x61b   :  { %927 = vmatpush1.msra.mxu1 %v2105_v16  ;;  %1871 = vmatprep.subr.mxu0 %v1942_v4 }
 0x61c   :  { %1656 = vmatmul.mubr.msk.f32.vlgmr.msra.gmra.mxu1 %vm118_vm0, %v891_v5  ;;  %1832 = vmatprep.subr.mxu1 %v1942_v4 }
 0x61d   :  { %1833 = vmatpush3.msra.mxu1 %v2136_v22  ;;  %1840 = vmatprep.mubr.msk.f32.mxu1 %vm1943_vm1, %v1942_v4 }
 0x61e   :  { %1834 = vmatprep.subr.mxu1 %v1942_v4  ;;  %1872 = vmatpush3.msra.mxu0 %v2279_v63 }
 0x61f   :  { %1835 = vmatpush3.msra.mxu1 %v2143_v23  ;;  %1873 = vmatprep.subr.mxu0 %v1942_v4 }
 0x620   :  { %1836 = vmatprep.subr.mxu1 %v1942_v4  ;;  %1874 = vmatpush3.msra.mxu0 %v2286_v0 }
 0x621   :  { %1837 = vmatpush3.msra.mxu1 %v2152_v24  ;;  %1875 = vmatprep.subr.mxu0 %v1942_v4 }
 0x622   :  { %1838 = vmatprep.subr.mxu1 %v1942_v4  ;;  %1876 = vmatpush3.msra.mxu0 %v2293_v1 }
 0x623   :  { %1839 = vmatpush3.msra.mxu1 %v2161_v25  ;;  %1877 = vmatprep.subr.mxu0 %v1942_v4 }
 0x624   :  { %1841 = vmatmul.mubr.msk.f32.vlgmr.msra.gmra.mxu1 %vm118_vm0, %v892_v3  ;;  %1843 = vmatprep.subr.mxu1 %v1942_v4 }
 0x625   :  { %1845 = vmatprep.mubr.msk.f32.mxu1 %vm1943_vm1, %v1942_v4  ;;  %1878 = vmatpush3.msra.mxu0 %v2300_v20 }
 0x626   :  { %1879 = vmatprep.subr.mxu0 %v1942_v4 }
 0x627   :  { %1880 = vmatpush3.msra.mxu0 %v2307_v21 }
 0x628   :  { %1881 = vmatprep.subr.mxu0 %v1942_v4 }
 0x629   :  { %1882 = vmatpush3.msra.mxu0 %v2314_v27 }
 0x62a   :  { %1883 = vmatprep.subr.mxu0 %v1942_v4 }
 0x62b   :  { %1884 = vmatpush3.msra.mxu0 %v2398_v28 }
 0x6c8   :  { %v1033_v63 = vpop.f32.mrf.mxu0 }
 0x6c9   :  { %v1034_v0 = vadd.f32 %v1033_v63, %v2375_v26 }
 0x6d4   :  { %v877_v6 = vpop.f32.mrf.mxu1 }
 0x6d5   :  { %881 = vst [vmem:[%s2572_s15] sm:$0xff] %v877_v6 }
 0x6d6   :  { %v1831_v8 = vpop.f32.mrf.mxu1 }
 0x6dc   :  { %v962_v10 = vpop.f32.mrf.mxu1 }
 0x6dd   :  { %v963_v12 = vadd.f32 %v962_v10, %v2193_v34 }
 0x6de   :  { %v964_v14 = vpop.f32.mrf.mxu1 }
 0x6df   :  { %1844 = vmatpush3.xpose.msra.mxu1 %v963_v12  ;;  %v965_v23 = vadd.f32 %v964_v14, %v2197_v37 }
 0x6e0   :  { %1848 = vmatprep.subr.mxu1 %v1942_v4 }
 0x6e4   :  { %v1107_v16 = vpop.f32.mrf.mxu1 }
 0x6e5   :  { %v1108_v22 = vadd.f32 %v1107_v16, %v2202_v39 }
 0x6e6   :  { %v1842_v24 = vpop.f32.mrf.mxu1 }
 0x6e7   :  { %1846 = vmatmul.mubr.f32.vlgmr.msra.gmra.mxu1 %v1108_v22 }
 0x6e8   :  { %1849 = vmatpush3.msra.mxu1 %v965_v23  ;;  %1850 = vmatprep.mubr.msk.f32.mxu1 %vm1943_vm1, %v1942_v4 }
 0x6e9   :  { %1888 = vmatprep.subr.mxu1 %v1942_v4 }
 0x7a7   :  { %v1177_v25 = vpop.f32.mrf.mxu1 }
 0x7a8   :  { %v1181_v34 = vsel %vm418_vm2, %v1177_v25, -inf }
 0x7a9   :  { %1182 = vmax.xlane.f32.xlu1 %v1181_v34  ;;  %v1847_v55 = vpop.f32.mrf.mxu1 }
 0x832   :  { %v1183_v56 = vpop.xlane.xlu1 %1182 }
 0x833   :  { %v1184_v57 = vsub.f32 %v1177_v25, %v1183_v56 }
 0x835   :  { %v1185_v58 = vmul.f32 1.442695, %v1184_v57 }
 0x837   :  { %1933 = vpow2.f32 %v1185_v58 }
 0x844   :  { %v1934_v39 = vpop.eup %1933 }
 0x845   :  { %v1187_v37 = vsel %vm418_vm2, %v1934_v39, 0.0 }
 0x846   :  { %1188 = vadd.xlane.f32.xlu0 %v1187_v37 }
 0x8cf   :  { %v1189_v59 = vpop.xlane.xlu0 %1188 }
 0x8d0   :  { %1935 = vrcp.f32 %v1189_v59 }
 0x8dd   :  { %v1936_v60 = vpop.eup %1935 }
 0x8de   :  { %v1191_v61 = vmul.f32 0.25, %v1936_v60 }
 0x8e0   :  { %v1192_v62 = vmul.f32 %v1934_v39, %v1191_v61 }
 0x8e2   :  { %1851 = vmatmul.mubr.msk.f32.vlgmr.msra.gmra.mxu1 %vm431_vm3, %v1192_v62 }
 0x8e3   :  { %1889 = vmatpush3.msra.mxu1 %v2323_v38  ;;  %1896 = vmatprep.mubr.msk.f32.mxu1 %vm1943_vm1, %v1942_v4  ;;  %v1035_v38 = vpop.f32.mrf.mxu0 }
 0x8e4   :  { %1890 = vmatprep.subr.mxu1 %v1942_v4 }
 0x8e5   :  { %1891 = vmatpush3.msra.mxu1 %v2329_v40 }
 0x8e6   :  { %1892 = vmatprep.subr.mxu1 %v1942_v4 }
 0x8e7   :  { %1893 = vmatpush3.msra.mxu1 %v2338_v41 }
 0x8e8   :  { %1894 = vmatprep.subr.mxu1 %v1942_v4 }
 0x8e9   :  { %1895 = vmatpush3.msra.mxu1 %v2345_v42  ;;  %v1036_v42 = vadd.f32 %v1035_v38, %v2185_v31 }
 0x8ea   :  { %1897 = vmatmul.mubr.msk.f32.vlgmr.msra.gmra.mxu1 %vm118_vm0, %v892_v3  ;;  %1899 = vmatprep.subr.mxu1 %v1942_v4 }
 0x8eb   :  { %1900 = vmatpush3.msra.mxu1 %v2352_v43  ;;  %1907 = vmatprep.mubr.msk.f32.mxu1 %vm1943_vm1, %v1942_v4 }
 0x8ec   :  { %1901 = vmatprep.subr.mxu1 %v1942_v4 }
 0x8ed   :  { %1902 = vmatpush3.msra.mxu1 %v2361_v46 }
 0x8ee   :  { %1903 = vmatprep.subr.mxu1 %v1942_v4 }
 0x8ef   :  { %1904 = vmatpush3.msra.mxu1 %v2370_v47 }
 0x8f0   :  { %1905 = vmatprep.subr.mxu1 %v1942_v4 }
 0x8f1   :  { %1906 = vmatpush3.msra.mxu1 %v2382_v48 }
 0x8f2   :  { %1908 = vmatmul.mubr.msk.f32.vlgmr.msra.gmra.mxu1 %vm118_vm0, %v2439_v19  ;;  %1910 = vmatprep.subr.mxu1 %v1942_v4 }
 0x8f3   :  { %1911 = vmatpush3.xpose.msra.mxu1 %v1034_v0  ;;  %1912 = vmatprep.mubr.msk.f32.mxu1 %vm1943_vm1, %v1942_v4 }
 0x8f4   :  { %1915 = vmatprep.subr.mxu1 %v1942_v4 }
 0x9a2   :  { %v1262_v1 = vpop.f32.mrf.mxu1 }
 0x9a3   :  { %1886 = vmatmul.mubr.f32.vlgmr.msra.gmra.mxu0 %v1262_v1 }
 0x9a4   :  { %v1852_v20 = vpop.f32.mrf.mxu1 }
 0x9aa   :  { %v1402_v21 = vpop.f32.mrf.mxu1 }
 0x9ac   :  { %v1898_v27 = vpop.f32.mrf.mxu1 }
 0x9b2   :  { %v1477_v40 = vpop.f32.mrf.mxu1 }
 0x9b3   :  { %v1478_v41 = vadd.f32 %v2414_v7, %v1477_v40 }
 0x9b4   :  { %v1909_v43 = vpop.f32.mrf.mxu1 }
 0x9b5   :  { %1913 = vmatmul.mubr.f32.vlgmr.msra.gmra.mxu1 %v1478_v41 }
 0x9b6   :  { %1916 = vmatpush3.msra.mxu1 %v1036_v42  ;;  %1917 = vmatprep.mubr.msk.f32.mxu1 %vm1943_vm1, %v1942_v4 }
 0xa63   :  { %v1332_v46 = vpop.f32.mrf.mxu0 }
 0xa64   :  { %v1403_v47 = vadd.f32 %v1402_v21, %v1332_v46 }
 0xa65   :  { %v1887_v26 = vpop.f32.mrf.mxu0 }
 0xa66   :  { %v1406_v48 = vadd.f32 %v1403_v47, %v2425_v17 }
 0xa68   :  { %1407 = vst [vmem:[%s2571_s14 + $0x1] sm:$0x1] %v1406_v48 }
 0xa75   :  { %v1547_v28 = vpop.f32.mrf.mxu1 }
 0xa76   :  { %v1551_v7 = vsel %vm431_vm3, %v1547_v28, -inf }
 0xa77   :  { %1552 = vmax.xlane.f32.xlu0 %v1551_v7  ;;  %v1914_v31 = vpop.f32.mrf.mxu1 }
 0xb00   :  { %v1553_v13 = vpop.xlane.xlu0 %1552 }
 0xb01   :  { %v1554_v15 = vsub.f32 %v1547_v28, %v1553_v13 }
 0xb03   :  { %v1555_v18 = vmul.f32 1.442695, %v1554_v15 }
 0xb05   :  { %1937 = vpow2.f32 %v1555_v18 }
 0xb12   :  { %v1938_v44 = vpop.eup %1937 }
 0xb13   :  { %v1557_v4 = vsel %vm431_vm3, %v1938_v44, 0.0 }
 0xb14   :  { %1558 = vadd.xlane.f32.xlu0 %v1557_v4 }
 0xb9d   :  { %v1559_v50 = vpop.xlane.xlu0 %1558 }
 0xb9e   :  { %1939 = vrcp.f32 %v1559_v50 }
 0xbab   :  { %v1940_v17 = vpop.eup %1939 }
 0xbac   :  { %v1561_v51 = vmul.f32 0.25, %v1940_v17 }
 0xbae   :  { %v1562_v45 = vmul.f32 %v1938_v44, %v1561_v51 }
 0xbb0   :  { %1918 = vmatmul.mubr.msk.f32.vlgmr.msra.gmra.mxu1 %vm431_vm3, %v1562_v45 }
 0xc70   :  { %v1632_v52 = vpop.f32.mrf.mxu1 }
 0xc71   :  { %1663 = vst [vmem:[%s2572_s15 + $0x8] sm:$0xff] %v1632_v52 }
 0xc72   :  { %v1919_v53 = vpop.f32.mrf.mxu1 }

// kernel: cpos_forward.5
= control target key start
LH: loop header
LB: loop body
LE: loop exit
PB: predicated region body
PF: predicated region fallthrough
CT: control target
= control target key end

     0   :  { %v5489_v1 = vmov 0.0   ;;  %vm45_vm0 = vcmask 123904   ;;  %vm5490_vm1 = vmmov 0   ;;  %vm56_vm2 = vcmask 58368   ;;  %s7051_s0 = inlined_call_operand.vmem [shape: f32[8,2,128], index: 0, kind: input, shape index: {}]   ;;  %s7052_s1 = inlined_call_operand.vmem [shape: f32[8,2,32], index: 1, kind: input, shape index: {}]   ;;  %s7053_s2 = inlined_call_operand.vmem [shape: f32[128,64], index: 2, kind: input, shape index: {}]   ;;  %s7054_s3 = inlined_call_operand.vmem [shape: f32[32,64], index: 3, kind: input, shape index: {}]   ;;  %s7055_s4 = inlined_call_operand.vmem [shape: f32[8,64], index: 4, kind: input, shape index: {}]   ;;  %s7056_s5 = inlined_call_operand.vmem [shape: f32[16,64], index: 5, kind: input, shape index: {}]   ;;  %s7057_s6 = inlined_call_operand.vmem [shape: f32[1,64], index: 6, kind: input, shape index: {}]   ;;  %s7058_s7 = inlined_call_operand.vmem [shape: f32[16,128], index: 7, kind: input, shape index: {}]   ;;  %s7059_s8 = inlined_call_operand.vmem [shape: f32[1,128], index: 8, kind: input, shape index: {}]   ;;  %s7060_s9 = inlined_call_operand.vmem [shape: f32[128,8], index: 9, kind: input, shape index: {}]   ;;  %s7061_s10 = inlined_call_operand.vmem [shape: f32[1,8], index: 10, kind: input, shape index: {}]   ;;  %s7062_s11 = inlined_call_operand.vmem [shape: f32[8,2,128], index: 11, kind: output, shape index: {0}]   ;;  %s7063_s12 = inlined_call_operand.hbm [shape: f32[8,2,1], index: 12, kind: output, shape index: {1}]  }
   0x1   :  { %v5567_v0 = vld [vmem:[%s7053_s2 + $0x78] sm:$0xff]  ;;  %4540 = vmatprep.subr.mxu0 %v5489_v1  ;;  %v5573_v2 = vld [vmem:[%s7053_s2 + $0x70] sm:$0xff]  ;;  %4575 = vmatprep.subr.mxu1 %v5489_v1  ;;  %46 = vst.msk [vmem:[#allocation2] sm:$0x3] %vm45_vm0, %v5489_v1  ;;  %47 = vst.msk [vmem:[#allocation3] sm:$0x3] %vm45_vm0, %v5489_v1 }
   0x2   :  { %4541 = vmatpush3.msra.mxu0 %v5567_v0  ;;  %4583 = vmatprep.mubr.msk.f32.mxu1 %vm5490_vm1, %v5489_v1  ;;  %v5587_v3 = vld [vmem:[%s7053_s2 + $0x68] sm:$0xff]  ;;  %v5592_v4 = vld [vmem:[%s7054_s3 + $0x18] sm:$0xff]  ;;  %v5601_v5 = vld [vmem:[%s7054_s3 + $0x10] sm:$0xff]  ;;  %vm183_vm3 = vcmask 261120  }
   0x3   :  { %4542 = vmatprep.subr.mxu0 %v5489_v1  ;;  %4572 = vmatprep.mubr.msk.f32.mxu0 %vm5490_vm1, %v5489_v1  ;;  %v5607_v6 = vld [vmem:[%s7053_s2 + $0x60] sm:$0xff]  ;;  %v5613_v7 = vld [vmem:[%s7054_s3 + $0x8] sm:$0xff]  ;;  %v5621_v8 = vld [vmem:[%s7053_s2 + $0x58] sm:$0xff] }
   0x4   :  { %4543 = vmatpush3.msra.mxu0 %v5573_v2  ;;  %4576 = vmatpush3.msra.mxu1 %v5592_v4  ;;  %v5627_v9 = vld [vmem:[%s7054_s3] sm:$0xff] }
   0x5   :  { %4544 = vmatprep.subr.mxu0 %v5489_v1  ;;  %4577 = vmatprep.subr.mxu1 %v5489_v1  ;;  %v4084_v10 = vld [vmem:[%s7061_s10] ss:$0 sm:$0xff] }
   0x6   :  { %4545 = vmatpush3.msra.mxu0 %v5587_v3  ;;  %4578 = vmatpush3.msra.mxu1 %v5601_v5  ;;  %v182_v11 = vld [vmem:[%s7052_s1] sm:$0x3]  ;;  %57 = vst.msk [vmem:[#allocation4] sm:$0x3] %vm56_vm2, %v4084_v10 }
   0x7   :  { %4546 = vmatprep.subr.mxu0 %v5489_v1  ;;  %4579 = vmatprep.subr.mxu1 %v5489_v1 }
   0x8   :  { %4547 = vmatpush3.msra.mxu0 %v5607_v6  ;;  %4580 = vmatpush3.msra.mxu1 %v5613_v7 }
   0x9   :  { %18 = vsyncpa [#allocation6], 0  ;;  %4548 = vmatprep.subr.mxu0 %v5489_v1  ;;  %v5642_v12 = vld [vmem:[%s7053_s2 + $0x50] sm:$0xff]  ;;  %4581 = vmatprep.subr.mxu1 %v5489_v1  ;;  %v5650_v13 = vld [vmem:[%s7055_s4] sm:$0xff]  ;;  %vm258_vm4 = vcmask 64512   ;;  %vm333_vm5 = vcmask 130048  }
   0xa   :  { %4549 = vmatpush3.msra.mxu0 %v5621_v8  ;;  %4582 = vmatpush3.msra.mxu1 %v5627_v9  ;;  %v5656_v14 = vld [vmem:[%s7053_s2 + $0x48] sm:$0xff]  ;;  %v5665_v15 = vld [vmem:[%s7053_s2 + $0x40] sm:$0xff]  ;;  %v5680_v17 = vld [vmem:[%s7053_s2 + $0x38] sm:$0xff]  ;;  %s5491_s19 = smov 96   ;;  %s5492_s20 = smov 16   ;;  %vm518_vm6 = vcmask 1041408  }
   0xb   :  { %4550 = vmatprep.subr.mxu0 %v5489_v1  ;;  %4584 = vmatmul.mubr.msk.f32.vlgmr.msra.gmra.mxu1 %vm183_vm3, %v182_v11  ;;  %v5674_v16 = vld [vmem:[%s7056_s5 + $0x8] sm:$0xff]  ;;  %v5688_v19 = vld [vmem:[%s7056_s5] sm:$0xff]  ;;  %v5694_v20 = vld [vmem:[%s7053_s2 + $0x30] sm:$0xff]  ;;  %s5493_s10 = smov 32   ;;  %s5494_s27 = smov 80   ;;  %vm542_vm9 = vcmask 1024  }
   0xc   :  { %4551 = vmatpush3.msra.mxu0 %v5642_v12  ;;  %4586 = vmatprep.subr.mxu1 %v5489_v1  ;;  %v101_v21 = vld [vmem:[#allocation2] sm:$0x3]  ;;  %v5703_v22 = vld [vmem:[%s7053_s2 + $0x28] sm:$0xff]  ;;  %v5722_v24 = vld [vmem:[%s7053_s2 + $0x18] sm:$0xff] }
   0xd   :  { %4552 = vmatprep.subr.mxu0 %v5489_v1  ;;  %4587 = vmatpush3.msra.mxu1 %v5650_v13  ;;  %v103_v18 = vld [vmem:[#allocation4] sm:$0x3]  ;;  %v5731_v25 = vld [vmem:[%s7053_s2 + $0x10] sm:$0xff]  ;;  %v5738_v26 = vld [vmem:[%s7053_s2 + $0x8] sm:$0xff] }
   0xe   :  { %4553 = vmatpush3.msra.mxu0 %v5656_v14  ;;  %4588 = vmatprep.mubr.msk.f32.mxu1 %vm5490_vm1, %v5489_v1  ;;  %v5713_v23 = vld [vmem:[%s7053_s2 + $0x20] sm:$0xff]  ;;  %v5803_v54 = vld [vmem:[%s7058_s7 + $0x8] sm:$0xff] }
   0xf   :  { %4554 = vmatprep.subr.mxu0 %v5489_v1  ;;  %4591 = vmatprep.subr.mxu1 %v5489_v1  ;;  %v5745_v27 = vld [vmem:[%s7053_s2] sm:$0xff] }
  0x10   :  { %4555 = vmatpush3.msra.mxu0 %v5665_v15  ;;  %4589 = vmatmul.mubr.msk.f32.vlgmr.msra.gmra.mxu1 %vm258_vm4, %v103_v18  ;;  %v104_v28 = vld [vmem:[%s7051_s0] sm:$0x3]  ;;  %v102_v43 = vld [vmem:[#allocation3] sm:$0x3] }
  0x11   :  { %4556 = vmatprep.subr.mxu0 %v5489_v1  ;;  %4592 = vmatpush3.msra.mxu1 %v5674_v16  ;;  %v5791_v35 = vld [vmem:[%s7057_s6] ss:$0 sm:$0xff]  ;;  %v4094_v55 = vld [vmem:[%s7051_s0 + $0x2] sm:$0x3] }
  0x12   :  { %4557 = vmatpush3.msra.mxu0 %v5680_v17  ;;  %4593 = vmatprep.subr.mxu1 %v5489_v1  ;;  %v5811_v56 = vld [vmem:[%s7058_s7] sm:$0xff] }
  0x13   :  { %4558 = vmatprep.subr.mxu0 %v5489_v1  ;;  %4594 = vmatpush3.msra.mxu1 %v5688_v19  ;;  %v5836_v63 = vld [vmem:[%s7059_s8] ss:$0 sm:$0xff] }
  0x14   :  { %4559 = vmatpush3.msra.mxu0 %v5694_v20  ;;  %4595 = vmatprep.mubr.msk.f32.mxu1 %vm5490_vm1, %v5489_v1 }
  0x15   :  { %4560 = vmatprep.subr.mxu0 %v5489_v1  ;;  %4596 = vmatmul.mubr.msk.f32.vlgmr.msra.gmra.mxu1 %vm333_vm5, %v101_v21 }
  0x16   :  { %4561 = vmatpush3.msra.mxu0 %v5703_v22  ;;  %4598 = vmatprep.subr.mxu1 %v5489_v1 }
  0x17   :  { %4562 = vmatprep.subr.mxu0 %v5489_v1  ;;  %4602 = vmatprep.mubr.msk.f32.mxu1 %vm5490_vm1, %v5489_v1 }
  0x18   :  { %4563 = vmatpush3.msra.mxu0 %v5713_v23  ;;  %4599 = vmatpush3.msra.mxu1 %v5803_v54 }
  0x19   :  { %4564 = vmatprep.subr.mxu0 %v5489_v1  ;;  %4600 = vmatprep.subr.mxu1 %v5489_v1 }
  0x1a   :  { %4565 = vmatpush3.msra.mxu0 %v5722_v24  ;;  %4601 = vmatpush3.msra.mxu1 %v5811_v56 }
  0x1b   :  { %4566 = vmatprep.subr.mxu0 %v5489_v1  ;;  %4605 = vmatprep.subr.mxu1 %v5489_v1 }
  0x1c   :  { %4567 = vmatpush3.msra.mxu0 %v5731_v25 }
  0x1d   :  { %4568 = vmatprep.subr.mxu0 %v5489_v1 }
  0x1e   :  { %4569 = vmatpush3.msra.mxu0 %v5738_v26 }
  0x1f   :  { %4570 = vmatprep.subr.mxu0 %v5489_v1 }
  0x20   :  { %4571 = vmatpush3.msra.mxu0 %v5745_v27 }
  0x21   :  { %4573 = vmatmul.mubr.f32.vlgmr.msra.gmra.mxu0 %v104_v28  ;;  %4640 = vmatprep.subr.mxu0 %v5489_v1 }
  0x22   :  { %4641 = vmatpush3.msra.mxu0 %v5567_v0  ;;  %4672 = vmatprep.mubr.msk.f32.mxu0 %vm5490_vm1, %v5489_v1 }
  0x23   :  { %4642 = vmatprep.subr.mxu0 %v5489_v1 }
  0x24   :  { %4643 = vmatpush3.msra.mxu0 %v5573_v2 }
  0x25   :  { %4644 = vmatprep.subr.mxu0 %v5489_v1 }
  0x26   :  { %4645 = vmatpush3.msra.mxu0 %v5587_v3 }
  0x27   :  { %4646 = vmatprep.subr.mxu0 %v5489_v1 }
  0x28   :  { %4647 = vmatpush3.msra.mxu0 %v5607_v6 }
  0x29   :  { %4648 = vmatprep.subr.mxu0 %v5489_v1 }
  0x2a   :  { %4649 = vmatpush3.msra.mxu0 %v5621_v8 }
  0x2b   :  { %4650 = vmatprep.subr.mxu0 %v5489_v1 }
  0x2c   :  { %4651 = vmatpush3.msra.mxu0 %v5642_v12 }
  0x2d   :  { %4652 = vmatprep.subr.mxu0 %v5489_v1 }
  0x2e   :  { %4653 = vmatpush3.msra.mxu0 %v5656_v14 }
  0x2f   :  { %4654 = vmatprep.subr.mxu0 %v5489_v1 }
  0x30   :  { %4655 = vmatpush3.msra.mxu0 %v5665_v15 }
  0x31   :  { %4656 = vmatprep.subr.mxu0 %v5489_v1 }
  0x32   :  { %4657 = vmatpush3.msra.mxu0 %v5680_v17 }
  0x33   :  { %4658 = vmatprep.subr.mxu0 %v5489_v1 }
  0x34   :  { %4659 = vmatpush3.msra.mxu0 %v5694_v20 }
  0x35   :  { %4660 = vmatprep.subr.mxu0 %v5489_v1 }
  0x36   :  { %4661 = vmatpush3.msra.mxu0 %v5703_v22 }
  0x37   :  { %4662 = vmatprep.subr.mxu0 %v5489_v1 }
  0x38   :  { %4663 = vmatpush3.msra.mxu0 %v5713_v23 }
  0x39   :  { %4664 = vmatprep.subr.mxu0 %v5489_v1 }
  0x3a   :  { %4665 = vmatpush3.msra.mxu0 %v5722_v24 }
  0x3b   :  { %4666 = vmatprep.subr.mxu0 %v5489_v1 }
  0x3c   :  { %4667 = vmatpush3.msra.mxu0 %v5731_v25 }
  0x3d   :  { %4668 = vmatprep.subr.mxu0 %v5489_v1 }
  0x3e   :  { %4669 = vmatpush3.msra.mxu0 %v5738_v26 }
  0x3f   :  { %4670 = vmatprep.subr.mxu0 %v5489_v1 }
  0x40   :  { %4671 = vmatpush3.msra.mxu0 %v5745_v27 }
  0x41   :  { %4691 = vmatprep.subr.mxu0 %v5489_v1  ;;  %4673 = vmatmul.mubr.f32.vlgmr.msra.gmra.mxu0 %v4094_v55 }
  0x42   :  { %4692 = vmatpush3.msra.mxu0 %v5674_v16  ;;  %4695 = vmatprep.mubr.msk.f32.mxu0 %vm5490_vm1, %v5489_v1 }
  0x43   :  { %4693 = vmatprep.subr.mxu0 %v5489_v1 }
  0x44   :  { %4694 = vmatpush3.msra.mxu0 %v5688_v19 }
  0x45   :  { %4705 = vmatprep.subr.mxu0 %v5489_v1 }
  0xcb   :  { %v253_v29 = vpop.f32.mrf.mxu1 }
  0xcd   :  { %v4585_v30 = vpop.f32.mrf.mxu1 }
  0xce   :  { %v522_v30 = vlaneseq }
  0xd0   :  { %v328_v31 = vpop.f32.mrf.mxu1 }
  0xd2   :  { %v4590_v32 = vpop.f32.mrf.mxu1 }
  0xd5   :  { %v403_v33 = vpop.f32.mrf.mxu1 }
  0xd7   :  { %v4597_v34 = vpop.f32.mrf.mxu1 }
  0xe1   :  { %v171_v36 = vpop.f32.mrf.mxu0 }
  0xe2   :  { %v181_v37 = vadd.f32 %v5791_v35, %v171_v36 }
  0xe3   :  { %v4574_v38 = vpop.f32.mrf.mxu0 }
  0xe4   :  { %v257_v39 = vadd.f32 %v253_v29, %v181_v37  ;;  %v5858_v38 = vld [vmem:[%s7060_s9 + $0x78] sm:$0xff] }
  0xe6   :  { %v332_v40 = vadd.f32 %v328_v31, %v257_v39  ;;  %v5845_v31 = vand.u32 127, %v522_v30  ;;  %v5863_v39 = vld [vmem:[%s7060_s9 + $0x70] sm:$0xff]  ;;  %v5495_v30 = vmov 1.0  }
  0xe8   :  { %v407_v41 = vadd.f32 %v403_v33, %v332_v40  ;;  %v5871_v40 = vld [vmem:[%s7060_s9 + $0x68] sm:$0xff] }
  0xea   :  { %5350 = vtanh.f32 %v407_v41  ;;  %v4089_v44 = vmul.f32 -1.442695, %v407_v41  ;;  %v5880_v41 = vld [vmem:[%s7060_s9 + $0x60] sm:$0xff] }
  0xec   :  { %5352 = vpow2.f32 %v4089_v44  ;;  %v5907_v44 = vld [vmem:[%s7060_s9 + $0x48] sm:$0xff] }
  0xf7   :  { %v5351_v42 = vpop.eup %5350 }
  0xf8   :  { %421 = vrot.lane.b32.xlu0 %v5351_v42, %s5491_s19  ;;  %v5889_v42 = vld [vmem:[%s7060_s9 + $0x58] sm:$0xff] }
  0xf9   :  { %v5353_v45 = vpop.eup %5352 }
  0xfa   :  { %v411_v46 = vadd.f32 1.0, %v5353_v45  ;;  %v5916_v45 = vld [vmem:[%s7060_s9 + $0x40] sm:$0xff] }
  0xfc   :  { %416 = vrot.lane.b32.xlu0 %v102_v43, %s5492_s20  ;;  %5354 = vrcp.f32 %v411_v46  ;;  %v5898_v43 = vld [vmem:[%s7060_s9 + $0x50] sm:$0xff]  ;;  %v5925_v46 = vld [vmem:[%s7060_s9 + $0x38] sm:$0xff] }
 0x101   :  { %v5825_v60 = vpop.f32.mrf.mxu0 }
 0x103   :  { %v4674_v61 = vpop.f32.mrf.mxu0 }
 0x104   :  { %v5994_v61 = vld [vmem:[%s7060_s9] sm:$0xff] }
 0x109   :  { %v5355_v47 = vpop.eup %5354 }
 0x16a   :  { %v422_v48 = vpop.permute.xlu0 %421 }
 0x16b   :  { %v424_v49 = vmul.f32 %v5355_v47, %v422_v48  ;;  %v5943_v48 = vld [vmem:[%s7060_s9 + $0x28] sm:$0xff] }
 0x16d   :  { %426 = vrot.lane.b32.xlu1 %v424_v49, %s5492_s20  ;;  %v5952_v49 = vld [vmem:[%s7060_s9 + $0x20] sm:$0xff] }
 0x16e   :  { %v417_v50 = vpop.permute.xlu0 %416 }
 0x16f   :  { %v419_v51 = vmul.f32 %v5355_v47, %v417_v50  ;;  %v5961_v50 = vld [vmem:[%s7060_s9 + $0x18] sm:$0xff] }
 0x1df   :  { %v427_v52 = vpop.permute.xlu1 %426 }
 0x1e0   :  { %v5797_v53 = vadd.f32 %v427_v52, %v419_v51 }
 0x1e2   :  { %5356 = vtanh.f32 %v5797_v53 }
 0x1ef   :  { %v5357_v57 = vpop.eup %5356 }
 0x1f0   :  { %432 = vrot.lane.b32.xlu1 %v5357_v57, %s5493_s10 }
 0x262   :  { %v433_v58 = vpop.permute.xlu1 %432 }
 0x263   :  { %v435_v59 = vmul.f32 %v5355_v47, %v433_v58  ;;  %v5934_v47 = vld [vmem:[%s7060_s9 + $0x30] sm:$0xff] }
 0x264   :  { %v5977_v58 = vld [vmem:[%s7060_s9 + $0x10] sm:$0xff] }
 0x265   :  { %443 = vrot.lane.b32.xlu0 %v435_v59, %s5494_s27  ;;  %v5985_v59 = vld [vmem:[%s7060_s9 + $0x8] sm:$0xff] }
 0x2d7   :  { %v444_v62 = vpop.permute.xlu0 %443 }
 0x2d8   :  { %4603 = vmatmul.mubr.msk.f32.vlgmr.msra.gmra.mxu1 %vm333_vm5, %v444_v62  ;;  %4696 = vmatmul.mubr.msk.f32.vlgmr.msra.gmra.mxu0 %vm333_vm5, %v444_v62 }
 0x2d9   :  { %4637 = vmatprep.mubr.msk.f32.mxu1 %vm5490_vm1, %v5489_v1  ;;  %4737 = vmatprep.mubr.msk.f32.mxu0 %vm5490_vm1, %v5489_v1 }
 0x2da   :  { %4606 = vmatpush3.msra.mxu1 %v5858_v38  ;;  %4706 = vmatpush3.msra.mxu0 %v5858_v38 }
 0x2db   :  { %4607 = vmatprep.subr.mxu1 %v5489_v1  ;;  %4707 = vmatprep.subr.mxu0 %v5489_v1 }
 0x2dc   :  { %4608 = vmatpush3.msra.mxu1 %v5863_v39  ;;  %4708 = vmatpush3.msra.mxu0 %v5863_v39 }
 0x2dd   :  { %4609 = vmatprep.subr.mxu1 %v5489_v1  ;;  %4709 = vmatprep.subr.mxu0 %v5489_v1 }
 0x2de   :  { %4610 = vmatpush3.msra.mxu1 %v5871_v40  ;;  %4710 = vmatpush3.msra.mxu0 %v5871_v40 }
 0x2df   :  { %4611 = vmatprep.subr.mxu1 %v5489_v1  ;;  %4711 = vmatprep.subr.mxu0 %v5489_v1 }
 0x2e0   :  { %4612 = vmatpush3.msra.mxu1 %v5880_v41  ;;  %4712 = vmatpush3.msra.mxu0 %v5880_v41 }
 0x2e1   :  { %4613 = vmatprep.subr.mxu1 %v5489_v1  ;;  %4713 = vmatprep.subr.mxu0 %v5489_v1 }
 0x2e2   :  { %4614 = vmatpush3.msra.mxu1 %v5889_v42  ;;  %4714 = vmatpush3.msra.mxu0 %v5889_v42 }
 0x2e3   :  { %4615 = vmatprep.subr.mxu1 %v5489_v1  ;;  %4715 = vmatprep.subr.mxu0 %v5489_v1 }
 0x2e4   :  { %4616 = vmatpush3.msra.mxu1 %v5898_v43  ;;  %4716 = vmatpush3.msra.mxu0 %v5898_v43 }
 0x2e5   :  { %4617 = vmatprep.subr.mxu1 %v5489_v1  ;;  %4717 = vmatprep.subr.mxu0 %v5489_v1 }
 0x2e6   :  { %4618 = vmatpush3.msra.mxu1 %v5907_v44  ;;  %4718 = vmatpush3.msra.mxu0 %v5907_v44 }
 0x2e7   :  { %4619 = vmatprep.subr.mxu1 %v5489_v1  ;;  %4719 = vmatprep.subr.mxu0 %v5489_v1 }
 0x2e8   :  { %4620 = vmatpush3.msra.mxu1 %v5916_v45  ;;  %4720 = vmatpush3.msra.mxu0 %v5916_v45 }
 0x2e9   :  { %4621 = vmatprep.subr.mxu1 %v5489_v1  ;;  %4721 = vmatprep.subr.mxu0 %v5489_v1 }
 0x2ea   :  { %4622 = vmatpush3.msra.mxu1 %v5925_v46  ;;  %4722 = vmatpush3.msra.mxu0 %v5925_v46 }
 0x2eb   :  { %4623 = vmatprep.subr.mxu1 %v5489_v1  ;;  %4723 = vmatprep.subr.mxu0 %v5489_v1 }
 0x2ec   :  { %4624 = vmatpush3.msra.mxu1 %v5934_v47  ;;  %4724 = vmatpush3.msra.mxu0 %v5934_v47 }
 0x2ed   :  { %4625 = vmatprep.subr.mxu1 %v5489_v1  ;;  %4725 = vmatprep.subr.mxu0 %v5489_v1 }
 0x2ee   :  { %4626 = vmatpush3.msra.mxu1 %v5943_v48  ;;  %4726 = vmatpush3.msra.mxu0 %v5943_v48 }
 0x2ef   :  { %4627 = vmatprep.subr.mxu1 %v5489_v1  ;;  %4727 = vmatprep.subr.mxu0 %v5489_v1 }
 0x2f0   :  { %4628 = vmatpush3.msra.mxu1 %v5952_v49  ;;  %4728 = vmatpush3.msra.mxu0 %v5952_v49 }
 0x2f1   :  { %4629 = vmatprep.subr.mxu1 %v5489_v1  ;;  %4729 = vmatprep.subr.mxu0 %v5489_v1 }
 0x2f2   :  { %4630 = vmatpush3.msra.mxu1 %v5961_v50  ;;  %4730 = vmatpush3.msra.mxu0 %v5961_v50 }
 0x2f3   :  { %4631 = vmatprep.subr.mxu1 %v5489_v1  ;;  %4731 = vmatprep.subr.mxu0 %v5489_v1 }
 0x2f4   :  { %4632 = vmatpush3.msra.mxu1 %v5977_v58  ;;  %4732 = vmatpush3.msra.mxu0 %v5977_v58 }
 0x2f5   :  { %4633 = vmatprep.subr.mxu1 %v5489_v1  ;;  %4733 = vmatprep.subr.mxu0 %v5489_v1 }
 0x2f6   :  { %4634 = vmatpush3.msra.mxu1 %v5985_v59  ;;  %4734 = vmatpush3.msra.mxu0 %v5985_v59 }
 0x2f7   :  { %4635 = vmatprep.subr.mxu1 %v5489_v1  ;;  %4735 = vmatprep.subr.mxu0 %v5489_v1 }
 0x2f8   :  { %4636 = vmatpush3.msra.mxu1 %v5994_v61  ;;  %4736 = vmatpush3.msra.mxu0 %v5994_v61 }
 0x2f9   :  { %4675 = vmatprep.subr.mxu1 %v5489_v1  ;;  %4798 = vmatprep.subr.mxu0 %v5489_v1 }
 0x398   :  { %v513_v10 = vpop.f32.mrf.mxu1  ;;  %v5838_v11 = vpop.f32.mrf.mxu0 }
 0x399   :  { %v514_v18 = vadd.f32 %v5836_v63, %v513_v10 }
 0x39a   :  { %v4604_v21 = vpop.f32.mrf.mxu1  ;;  %v4697_v28 = vpop.f32.mrf.mxu0 }
 0x39b   :  { %517 = vst [vmem:[%s7062_s11] sm:$0x3] %v514_v18  ;;  %v519_v29 = vsel %vm518_vm6, %v514_v18, -inf }
 0x39c   :  { %520 = vmax.xlane.f32.xlu1 %v519_v29 }
 0x425   :  { %v521_v32 = vpop.xlane.xlu1 %520 }
 0x426   :  { %vm524_vm7 = vcmp.ge.f32.partialorder %v514_v18, %v521_v32  ;;  %v4095_v32 = vld [vmem:[%s7052_s1 + $0x2] sm:$0x3] }
 0x427   :  { %v525_v33 = vsel %vm524_vm7, %v5845_v31, 128 }
 0x428   :  { %v5849_v34 = vsel %vm518_vm6, %v525_v33, 2147483647 }
 0x429   :  { %v528_v36 = vshra.s32 %v5849_v34, 16  ;;  %v527_v51 = vand.u32 65535, %v5849_v34 }
 0x42b   :  { %v5852_v37 = vcvt.s32.f32 %v528_v36  ;;  %v529_v55 = vcvt.s32.f32 %v527_v51  ;;  %v689_v36 = vadd.f32 %v5791_v35, %v5825_v60 }
 0x42d   :  { %531 = vmin.xlane.f32.xlu0 %v5852_v37 }
 0x4b6   :  { %v532_v52 = vpop.xlane.xlu0 %531 }
 0x4b7   :  { %vm533_vm8 = vcmp.eq.f32.partialorder %v5852_v37, %v532_v52  ;;  %v538_v62 = vcvt.f32.s32 %v532_v52 }
 0x4b8   :  { %v534_v57 = vsel %vm533_vm8, %v529_v55, inf }
 0x4b9   :  { %535 = vmin.xlane.f32.xlu0 %v534_v57  ;;  %v539_v18 = vshll.u32 %v538_v62, 16 }
 0x542   :  { %v536_v10 = vpop.xlane.xlu0 %535 }
 0x543   :  { %v537_v21 = vcvt.f32.s32 %v536_v10 }
 0x545   :  { %v540_v28 = vadd.s32 %v539_v18, %v537_v21 }
 0x547   :  { %v541_v29 = vcvt.s32.f32 %v540_v28  ;;  %vm544_vm10 = vcmp.eq.s32.totalorder %v5845_v31, %v540_v28 }
 0x548   :  { %4638 = vmatmul.mubr.msk.f32.vlgmr.msra.gmra.mxu1 %vm544_vm10, %v5495_v30 }
 0x549   :  { %543 = vst.msk [vmem:[#allocation5] sm:$0x3] %vm542_vm9, %v541_v29  ;;  %4676 = vmatpush3.msra.mxu1 %v5592_v4  ;;  %4683 = vmatprep.mubr.msk.f32.mxu1 %vm5490_vm1, %v5489_v1 }
 0x54a   :  { %4677 = vmatprep.subr.mxu1 %v5489_v1 }
 0x54b   :  { %4678 = vmatpush3.msra.mxu1 %v5601_v5 }
 0x54c   :  { %4679 = vmatprep.subr.mxu1 %v5489_v1 }
 0x54d   :  { %4680 = vmatpush3.msra.mxu1 %v5613_v7 }
 0x54e   :  { %4681 = vmatprep.subr.mxu1 %v5489_v1 }
 0x54f   :  { %4682 = vmatpush3.msra.mxu1 %v5627_v9 }
 0x550   :  { %4684 = vmatmul.mubr.msk.f32.vlgmr.msra.gmra.mxu1 %vm183_vm3, %v4095_v32  ;;  %4686 = vmatprep.subr.mxu1 %v5489_v1 }
 0x551   :  { %4687 = vmatpush3.msra.mxu1 %v5650_v13  ;;  %4688 = vmatprep.mubr.msk.f32.mxu1 %vm5490_vm1, %v5489_v1 }
 0x552   :  { %4698 = vmatprep.subr.mxu1 %v5489_v1 }
 0x608   :  { %v613_v33 = vpop.f32.mrf.mxu1 }
 0x609   :  { %4689 = vmatmul.mubr.msk.f32.vlgmr.msra.gmra.mxu1 %vm258_vm4, %v613_v33 }
 0x60a   :  { %v4639_v34 = vpop.f32.mrf.mxu1  ;;  %4699 = vmatpush3.msra.mxu1 %v5803_v54  ;;  %4702 = vmatprep.mubr.msk.f32.mxu1 %vm5490_vm1, %v5489_v1 }
 0x60b   :  { %4700 = vmatprep.subr.mxu1 %v5489_v1 }
 0x60c   :  { %4701 = vmatpush3.msra.mxu1 %v5811_v56 }
 0x60d   :  { %4740 = vmatprep.subr.mxu1 %v5489_v1 }
 0x610   :  { %v761_v37 = vpop.f32.mrf.mxu1 }
 0x611   :  { %v765_v51 = vadd.f32 %v761_v37, %v689_v36 }
 0x612   :  { %v4685_v52 = vpop.f32.mrf.mxu1 }
 0x6c9   :  { %v835_v55 = vpop.f32.mrf.mxu1 }
 0x6ca   :  { %v839_v57 = vadd.f32 %v835_v55, %v765_v51 }
 0x6cb   :  { %v4690_v62 = vpop.f32.mrf.mxu1 }
 0x6cc   :  { %v910_v10 = vadd.f32 %v5838_v11, %v839_v57 }
 0x6ce   :  { %5358 = vtanh.f32 %v910_v10  ;;  %v4099_v21 = vmul.f32 -1.442695, %v910_v10 }
 0x6d0   :  { %5360 = vpow2.f32 %v4099_v21 }
 0x6db   :  { %v5359_v18 = vpop.eup %5358 }
 0x6dc   :  { %920 = vrot.lane.b32.xlu1 %v5359_v18, %s5491_s19 }
 0x6dd   :  { %v5361_v28 = vpop.eup %5360 }
 0x6de   :  { %v914_v29 = vadd.f32 1.0, %v5361_v28 }
 0x6e0   :  { %5362 = vrcp.f32 %v914_v29 }
 0x6ed   :  { %v5363_v60 = vpop.eup %5362 }
 0x6ee   :  { %v918_v34 = vmul.f32 %v5363_v60, %v5797_v53 }
 0x74e   :  { %v921_v32 = vpop.permute.xlu1 %920 }
 0x74f   :  { %v923_v33 = vmul.f32 %v5363_v60, %v921_v32 }
 0x751   :  { %925 = vrot.lane.b32.xlu0 %v923_v33, %s5492_s20 }
 0x7c3   :  { %v926_v36 = vpop.permute.xlu0 %925 }
 0x7c4   :  { %v6035_v37 = vadd.f32 %v926_v36, %v918_v34  ;;  %v4104_v34 = vld [vmem:[%s7051_s0 + $0x4] sm:$0x3] }
 0x7c5   :  { %v4105_v36 = vld [vmem:[%s7052_s1 + $0x4] sm:$0x3] }
 0x7c6   :  { %5364 = vtanh.f32 %v6035_v37 }
 0x7d3   :  { %v5365_v11 = vpop.eup %5364 }
 0x7d4   :  { %931 = vrot.lane.b32.xlu1 %v5365_v11, %s5493_s10 }
 0x846   :  { %v932_v51 = vpop.permute.xlu1 %931 }
 0x847   :  { %v934_v52 = vmul.f32 %v5363_v60, %v932_v51 }
 0x849   :  { %936 = vrot.lane.b32.xlu1 %v934_v52, %s5494_s27 }
 0x8bb   :  { %v6040_v55 = vpop.permute.xlu1 %936 }
 0x8bc   :  { %4703 = vmatmul.mubr.msk.f32.vlgmr.msra.gmra.mxu1 %vm333_vm5, %v6040_v55 }
 0x8bd   :  { %4741 = vmatpush3.msra.mxu1 %v5567_v0  ;;  %4772 = vmatprep.mubr.msk.f32.mxu1 %vm5490_vm1, %v5489_v1 }
 0x8be   :  { %4742 = vmatprep.subr.mxu1 %v5489_v1 }
 0x8bf   :  { %4743 = vmatpush3.msra.mxu1 %v5573_v2 }
 0x8c0   :  { %4744 = vmatprep.subr.mxu1 %v5489_v1 }
 0x8c1   :  { %4745 = vmatpush3.msra.mxu1 %v5587_v3 }
 0x8c2   :  { %4746 = vmatprep.subr.mxu1 %v5489_v1 }
 0x8c3   :  { %4747 = vmatpush3.msra.mxu1 %v5607_v6 }
 0x8c4   :  { %4748 = vmatprep.subr.mxu1 %v5489_v1 }
 0x8c5   :  { %4749 = vmatpush3.msra.mxu1 %v5621_v8 }
 0x8c6   :  { %4750 = vmatprep.subr.mxu1 %v5489_v1 }
 0x8c7   :  { %4751 = vmatpush3.msra.mxu1 %v5642_v12 }
 0x8c8   :  { %4752 = vmatprep.subr.mxu1 %v5489_v1 }
 0x8c9   :  { %4753 = vmatpush3.msra.mxu1 %v5656_v14 }
 0x8ca   :  { %4754 = vmatprep.subr.mxu1 %v5489_v1 }
 0x8cb   :  { %4755 = vmatpush3.msra.mxu1 %v5665_v15 }
 0x8cc   :  { %4756 = vmatprep.subr.mxu1 %v5489_v1 }
 0x8cd   :  { %4757 = vmatpush3.msra.mxu1 %v5680_v17 }
 0x8ce   :  { %4758 = vmatprep.subr.mxu1 %v5489_v1 }
 0x8cf   :  { %4759 = vmatpush3.msra.mxu1 %v5694_v20 }
 0x8d0   :  { %4760 = vmatprep.subr.mxu1 %v5489_v1 }
 0x8d1   :  { %4761 = vmatpush3.msra.mxu1 %v5703_v22 }
 0x8d2   :  { %4762 = vmatprep.subr.mxu1 %v5489_v1 }
 0x8d3   :  { %4763 = vmatpush3.msra.mxu1 %v5713_v23 }
 0x8d4   :  { %4764 = vmatprep.subr.mxu1 %v5489_v1 }
 0x8d5   :  { %4765 = vmatpush3.msra.mxu1 %v5722_v24 }
 0x8d6   :  { %4766 = vmatprep.subr.mxu1 %v5489_v1 }
 0x8d7   :  { %4767 = vmatpush3.msra.mxu1 %v5731_v25 }
 0x8d8   :  { %4768 = vmatprep.subr.mxu1 %v5489_v1 }
 0x8d9   :  { %4769 = vmatpush3.msra.mxu1 %v5738_v26 }
 0x8da   :  { %4770 = vmatprep.subr.mxu1 %v5489_v1 }
 0x8db   :  { %4771 = vmatpush3.msra.mxu1 %v5745_v27 }
 0x8dc   :  { %4775 = vmatprep.subr.mxu1 %v5489_v1  ;;  %4773 = vmatmul.mubr.f32.vlgmr.msra.gmra.mxu1 %v4104_v34 }
 0x8dd   :  { %4776 = vmatpush3.msra.mxu1 %v5592_v4  ;;  %4783 = vmatprep.mubr.msk.f32.mxu1 %vm5490_vm1, %v5489_v1 }
 0x8de   :  { %4777 = vmatprep.subr.mxu1 %v5489_v1 }
 0x8df   :  { %4778 = vmatpush3.msra.mxu1 %v5601_v5 }
 0x8e0   :  { %4779 = vmatprep.subr.mxu1 %v5489_v1 }
 0x8e1   :  { %4780 = vmatpush3.msra.mxu1 %v5613_v7 }
 0x8e2   :  { %4781 = vmatprep.subr.mxu1 %v5489_v1 }
 0x8e3   :  { %4782 = vmatpush3.msra.mxu1 %v5627_v9 }
 0x8e4   :  { %4784 = vmatmul.mubr.msk.f32.vlgmr.msra.gmra.mxu1 %vm183_vm3, %v4105_v36  ;;  %4786 = vmatprep.subr.mxu1 %v5489_v1 }
 0x8e5   :  { %4787 = vmatpush3.msra.mxu1 %v5650_v13  ;;  %4788 = vmatprep.mubr.msk.f32.mxu1 %vm5490_vm1, %v5489_v1 }
 0x8e6   :  { %4791 = vmatprep.subr.mxu1 %v5489_v1 }
 0x97c   :  { %v1006_v0 = vpop.f32.mrf.mxu1 }
 0x97d   :  { %v1007_v2 = vadd.f32 %v5836_v63, %v1006_v0 }
 0x97e   :  { %v4704_v53 = vpop.f32.mrf.mxu1 }
 0x97f   :  { %4101 = vst [vmem:[%s7062_s11 + $0x2] sm:$0x3] %v1007_v2  ;;  %v1012_v57 = vsel %vm518_vm6, %v1007_v2, -inf }
 0x980   :  { %1013 = vmax.xlane.f32.xlu0 %v1012_v57 }
 0x99c   :  { %v1176_v9 = vpop.f32.mrf.mxu1 }
 0x99d   :  { %v1180_v13 = vadd.f32 %v5791_v35, %v1176_v9 }
 0x99e   :  { %v4774_v0 = vpop.f32.mrf.mxu1 }
 0x99f   :  { %v6183_v0 = vld [vmem:[%s7053_s2 + $0x70] sm:$0xff] }
 0xa09   :  { %v1014_v62 = vpop.xlane.xlu0 %1013 }
 0xa0a   :  { %vm1015_vm11 = vcmp.ge.f32.partialorder %v1007_v2, %v1014_v62  ;;  %v1252_v2 = vpop.f32.mrf.mxu1 }
 0xa0b   :  { %v1016_v10 = vsel %vm1015_vm11, %v5845_v31, 128  ;;  %v1256_v53 = vadd.f32 %v1252_v2, %v1180_v13 }
 0xa0c   :  { %v1017_v18 = vsel %vm518_vm6, %v1016_v10, 2147483647  ;;  %v4785_v57 = vpop.f32.mrf.mxu1 }
 0xa0d   :  { %v1019_v21 = vshra.s32 %v1017_v18, 16  ;;  %v1018_v29 = vand.u32 65535, %v1017_v18 }
 0xa0f   :  { %v1021_v28 = vcvt.s32.f32 %v1019_v21  ;;  %v1020_v32 = vcvt.s32.f32 %v1018_v29 }
 0xa11   :  { %1022 = vmin.xlane.f32.xlu1 %v1021_v28 }
 0xa9a   :  { %v1023_v60 = vpop.xlane.xlu1 %1022 }
 0xa9b   :  { %vm1024_vm12 = vcmp.eq.f32.partialorder %v1021_v28, %v1023_v60  ;;  %v1029_v4 = vcvt.f32.s32 %v1023_v60 }
 0xa9c   :  { %v1025_v33 = vsel %vm1024_vm12, %v1020_v32, inf }
 0xa9d   :  { %1026 = vmin.xlane.f32.xlu0 %v1025_v33  ;;  %v1030_v7 = vshll.u32 %v1029_v4, 16 }
 0xb26   :  { %v1027_v5 = vpop.xlane.xlu0 %1026 }
 0xb27   :  { %v1028_v11 = vcvt.f32.s32 %v1027_v5 }
 0xb29   :  { %v1031_v51 = vadd.s32 %v1030_v7, %v1028_v11 }
 0xb2b   :  { %v1032_v52 = vcvt.s32.f32 %v1031_v51  ;;  %vm1035_vm13 = vcmp.eq.s32.totalorder %v5845_v31, %v1031_v51 }
 0xb2c   :  { %4738 = vmatmul.mubr.msk.f32.vlgmr.msra.gmra.mxu0 %vm1035_vm13, %v5495_v30 }
 0xb2d   :  { %1034 = vst.msk [vmem:[#allocation5 + $0x2] sm:$0x3] %vm542_vm9, %v1032_v52  ;;  %4799 = vmatpush3.msra.mxu0 %v5803_v54  ;;  %4802 = vmatprep.mubr.msk.f32.mxu0 %vm5490_vm1, %v5489_v1 }
 0xb2e   :  { %4800 = vmatprep.subr.mxu0 %v5489_v1 }
 0xb2f   :  { %4801 = vmatpush3.msra.mxu0 %v5811_v56 }
 0xb30   :  { %4840 = vmatprep.subr.mxu0 %v5489_v1 }
 0xbec   :  { %v1104_v62 = vpop.f32.mrf.mxu0 }
 0xbed   :  { %4789 = vmatmul.mubr.msk.f32.vlgmr.msra.gmra.mxu1 %vm258_vm4, %v1104_v62 }
 0xbee   :  { %4792 = vmatpush3.msra.mxu1 %v5674_v16  ;;  %v4739_v10 = vpop.f32.mrf.mxu0  ;;  %4795 = vmatprep.mubr.msk.f32.mxu1 %vm5490_vm1, %v5489_v1 }
 0xbef   :  { %4793 = vmatprep.subr.mxu1 %v5489_v1 }
 0xbf0   :  { %4794 = vmatpush3.msra.mxu1 %v5688_v19 }
 0xbf1   :  { %4796 = vmatmul.mubr.msk.f32.vlgmr.msra.gmra.mxu1 %vm333_vm5, %v6040_v55  ;;  %4805 = vmatprep.subr.mxu1 %v5489_v1 }
 0xbf2   :  { %4806 = vmatpush3.msra.mxu1 %v5858_v38  ;;  %4837 = vmatprep.mubr.msk.f32.mxu1 %vm5490_vm1, %v5489_v1 }
 0xbf3   :  { %4807 = vmatprep.subr.mxu1 %v5489_v1 }
 0xbf4   :  { %4808 = vmatpush3.msra.mxu1 %v5863_v39 }
 0xbf5   :  { %4809 = vmatprep.subr.mxu1 %v5489_v1 }
 0xbf6   :  { %4810 = vmatpush3.msra.mxu1 %v5871_v40 }
 0xbf7   :  { %4811 = vmatprep.subr.mxu1 %v5489_v1 }
 0xbf8   :  { %4812 = vmatpush3.msra.mxu1 %v5880_v41 }
 0xbf9   :  { %4813 = vmatprep.subr.mxu1 %v5489_v1 }
 0xbfa   :  { %4814 = vmatpush3.msra.mxu1 %v5889_v42 }
 0xbfb   :  { %4815 = vmatprep.subr.mxu1 %v5489_v1 }
 0xbfc   :  { %4816 = vmatpush3.msra.mxu1 %v5898_v43 }
 0xbfd   :  { %4817 = vmatprep.subr.mxu1 %v5489_v1 }
 0xbfe   :  { %4818 = vmatpush3.msra.mxu1 %v5907_v44 }
 0xbff   :  { %4819 = vmatprep.subr.mxu1 %v5489_v1 }
 0xc00   :  { %4820 = vmatpush3.msra.mxu1 %v5916_v45 }
 0xc01   :  { %4821 = vmatprep.subr.mxu1 %v5489_v1 }
 0xc02   :  { %4822 = vmatpush3.msra.mxu1 %v5925_v46 }
 0xc03   :  { %4823 = vmatprep.subr.mxu1 %v5489_v1 }
 0xc04   :  { %4824 = vmatpush3.msra.mxu1 %v5934_v47 }
 0xc05   :  { %4825 = vmatprep.subr.mxu1 %v5489_v1 }
 0xc06   :  { %4826 = vmatpush3.msra.mxu1 %v5943_v48 }
 0xc07   :  { %4827 = vmatprep.subr.mxu1 %v5489_v1 }
 0xc08   :  { %4828 = vmatpush3.msra.mxu1 %v5952_v49 }
 0xc09   :  { %4829 = vmatprep.subr.mxu1 %v5489_v1 }
 0xc0a   :  { %4830 = vmatpush3.msra.mxu1 %v5961_v50 }
 0xc0b   :  { %4831 = vmatprep.subr.mxu1 %v5489_v1 }
 0xc0c   :  { %4832 = vmatpush3.msra.mxu1 %v5977_v58 }
 0xc0d   :  { %4833 = vmatprep.subr.mxu1 %v5489_v1 }
 0xc0e   :  { %4834 = vmatpush3.msra.mxu1 %v5985_v59 }
 0xc0f   :  { %4835 = vmatprep.subr.mxu1 %v5489_v1 }
 0xc10   :  { %4836 = vmatpush3.msra.mxu1 %v5994_v61 }
 0xc11   :  { %4875 = vmatprep.subr.mxu1 %v5489_v1 }
 0xcad   :  { %v1326_v16 = vpop.f32.mrf.mxu1 }
 0xcae   :  { %v1330_v55 = vadd.f32 %v1326_v16, %v1256_v53 }
 0xcaf   :  { %v4790_v19 = vpop.f32.mrf.mxu1 }
 0xcb0   :  { %v6240_v19 = vld [vmem:[%s7054_s3 + $0x18] sm:$0xff] }
 0xcb1   :  { %v1397_v18 = vpop.f32.mrf.mxu1 }
 0xcb2   :  { %v1401_v21 = vadd.f32 %v1397_v18, %v1330_v55  ;;  %v6249_v55 = vld [vmem:[%s7054_s3 + $0x10] sm:$0xff]  ;;  %v6256_v18 = vld [vmem:[%s7054_s3 + $0x8] sm:$0xff] }
 0xcb3   :  { %v4797_v28 = vpop.f32.mrf.mxu1 }
 0xcb4   :  { %5366 = vtanh.f32 %v1401_v21  ;;  %v4109_v60 = vmul.f32 -1.442695, %v1401_v21  ;;  %v4115_v21 = vld [vmem:[%s7052_s1 + $0x6] sm:$0x3] }
 0xcb5   :  { %v6266_v28 = vld [vmem:[%s7054_s3] sm:$0xff] }
 0xcb6   :  { %5368 = vpow2.f32 %v4109_v60 }
 0xcc1   :  { %v5367_v29 = vpop.eup %5366 }
 0xcc2   :  { %1411 = vrot.lane.b32.xlu0 %v5367_v29, %s5491_s19 }
 0xcc3   :  { %v5369_v32 = vpop.eup %5368 }
 0xcc4   :  { %v1405_v33 = vadd.f32 1.0, %v5369_v32 }
 0xcc6   :  { %5370 = vrcp.f32 %v1405_v33  ;;  %v6281_v33 = vld [vmem:[%s7056_s5 + $0x8] sm:$0xff] }
 0xcd3   :  { %v5371_v34 = vpop.eup %5370 }
 0xcd4   :  { %v1409_v5 = vmul.f32 %v5371_v34, %v6035_v37  ;;  %v6174_v37 = vld [vmem:[%s7053_s2 + $0x78] sm:$0xff] }
 0xd34   :  { %v1412_v36 = vpop.permute.xlu0 %1411 }
 0xd35   :  { %v1414_v4 = vmul.f32 %v5371_v34, %v1412_v36 }
 0xd37   :  { %1416 = vrot.lane.b32.xlu1 %v1414_v4, %s5492_s20 }
 0xda9   :  { %v1417_v7 = vpop.permute.xlu1 %1416 }
 0xdaa   :  { %v6162_v11 = vadd.f32 %v1417_v7, %v1409_v5 }
 0xdac   :  { %5372 = vtanh.f32 %v6162_v11 }
 0xdb9   :  { %v5373_v51 = vpop.eup %5372 }
 0xdba   :  { %1422 = vrot.lane.b32.xlu1 %v5373_v51, %s5493_s10 }
 0xe2c   :  { %v1423_v52 = vpop.permute.xlu1 %1422 }
 0xe2d   :  { %v1425_v9 = vmul.f32 %v5371_v34, %v1423_v52 }
 0xe2f   :  { %1427 = vrot.lane.b32.xlu0 %v1425_v9, %s5494_s27  ;;  %v6359_v9 = vld [vmem:[%s7053_s2 + $0x60] sm:$0xff] }
 0xea1   :  { %v6167_v13 = vpop.permute.xlu0 %1427 }
 0xea2   :  { %4803 = vmatmul.mubr.msk.f32.vlgmr.msra.gmra.mxu0 %vm333_vm5, %v6167_v13 }
 0xea3   :  { %4841 = vmatpush3.msra.mxu0 %v6174_v37  ;;  %4872 = vmatprep.mubr.msk.f32.mxu0 %vm5490_vm1, %v5489_v1 }
 0xea4   :  { %4842 = vmatprep.subr.mxu0 %v5489_v1 }
 0xea5   :  { %4843 = vmatpush3.msra.mxu0 %v6183_v0 }
 0xea6   :  { %4844 = vmatprep.subr.mxu0 %v5489_v1 }
 0xea7   :  { %4845 = vmatpush3.msra.mxu0 %v5587_v3 }
 0xea8   :  { %4846 = vmatprep.subr.mxu0 %v5489_v1 }
 0xea9   :  { %4847 = vmatpush3.msra.mxu0 %v5607_v6 }
 0xeaa   :  { %4848 = vmatprep.subr.mxu0 %v5489_v1 }
 0xeab   :  { %4849 = vmatpush3.msra.mxu0 %v5621_v8 }
 0xeac   :  { %4850 = vmatprep.subr.mxu0 %v5489_v1 }
 0xead   :  { %4851 = vmatpush3.msra.mxu0 %v5642_v12 }
 0xeae   :  { %4852 = vmatprep.subr.mxu0 %v5489_v1 }
 0xeaf   :  { %4853 = vmatpush3.msra.mxu0 %v5656_v14 }
 0xeb0   :  { %4854 = vmatprep.subr.mxu0 %v5489_v1 }
 0xeb1   :  { %4855 = vmatpush3.msra.mxu0 %v5665_v15 }
 0xeb2   :  { %4856 = vmatprep.subr.mxu0 %v5489_v1 }
 0xeb3   :  { %4857 = vmatpush3.msra.mxu0 %v5680_v17 }
 0xeb4   :  { %4858 = vmatprep.subr.mxu0 %v5489_v1 }
 0xeb5   :  { %4859 = vmatpush3.msra.mxu0 %v5694_v20 }
 0xeb6   :  { %4860 = vmatprep.subr.mxu0 %v5489_v1 }
 0xeb7   :  { %4861 = vmatpush3.msra.mxu0 %v5703_v22 }
 0xeb8   :  { %4862 = vmatprep.subr.mxu0 %v5489_v1 }
 0xeb9   :  { %4863 = vmatpush3.msra.mxu0 %v5713_v23 }
 0xeba   :  { %4864 = vmatprep.subr.mxu0 %v5489_v1 }
 0xebb   :  { %4865 = vmatpush3.msra.mxu0 %v5722_v24 }
 0xebc   :  { %4866 = vmatprep.subr.mxu0 %v5489_v1 }
 0xebd   :  { %4867 = vmatpush3.msra.mxu0 %v5731_v25 }
 0xebe   :  { %4868 = vmatprep.subr.mxu0 %v5489_v1 }
 0xebf   :  { %4869 = vmatpush3.msra.mxu0 %v5738_v26 }
 0xec0   :  { %4870 = vmatprep.subr.mxu0 %v5489_v1 }
 0xec1   :  { %4871 = vmatpush3.msra.mxu0 %v5745_v27  ;;  %v4114_v27 = vld [vmem:[%s7051_s0 + $0x6] sm:$0x3] }
 0xec2   :  { %4886 = vmatprep.subr.mxu0 %v5489_v1  ;;  %4873 = vmatmul.mubr.f32.vlgmr.msra.gmra.mxu0 %v4114_v27 }
 0xec3   :  { %4888 = vmatprep.mubr.msk.f32.mxu0 %vm5490_vm1, %v5489_v1 }
 0xf62   :  { %v1497_v3 = vpop.f32.mrf.mxu0 }
 0xf63   :  { %v1498_v6 = vadd.f32 %v5836_v63, %v1497_v3  ;;  %v6228_v63 = vld [vmem:[%s7055_s4] sm:$0xff]  ;;  %v6373_v3 = vld [vmem:[%s7053_s2 + $0x50] sm:$0xff] }
 0xf64   :  { %v4804_v8 = vpop.f32.mrf.mxu0  ;;  %4887 = vmatpush3.msra.mxu0 %v6228_v63 }
 0xf65   :  { %4111 = vst [vmem:[%s7062_s11 + $0x4] sm:$0x3] %v1498_v6  ;;  %v1503_v12 = vsel %vm518_vm6, %v1498_v6, -inf  ;;  %4891 = vmatprep.subr.mxu0 %v5489_v1  ;;  %v6387_v8 = vld [vmem:[%s7053_s2 + $0x40] sm:$0xff] }
 0xf66   :  { %1504 = vmax.xlane.f32.xlu1 %v1503_v12  ;;  %v6394_v12 = vld [vmem:[%s7053_s2 + $0x38] sm:$0xff] }
 0xf82   :  { %v1667_v29 = vpop.f32.mrf.mxu0 }
 0xf83   :  { %v1671_v34 = vadd.f32 %v5791_v35, %v1667_v29 }
 0xf84   :  { %v4874_v60 = vpop.f32.mrf.mxu0 }
 0xfef   :  { %v1505_v14 = vpop.xlane.xlu1 %1504 }
 0xff0   :  { %vm1506_vm14 = vcmp.ge.f32.partialorder %v1498_v6, %v1505_v14  ;;  %v6380_v6 = vld [vmem:[%s7053_s2 + $0x48] sm:$0xff]  ;;  %v6401_v14 = vld [vmem:[%s7053_s2 + $0x30] sm:$0xff] }
 0xff1   :  { %v1507_v15 = vsel %vm1506_vm14, %v5845_v31, 128 }
 0xff2   :  { %v1508_v17 = vsel %vm518_vm6, %v1507_v15, 2147483647  ;;  %v6408_v15 = vld [vmem:[%s7053_s2 + $0x28] sm:$0xff] }
 0xff3   :  { %v1510_v20 = vshra.s32 %v1508_v17, 16  ;;  %v1509_v23 = vand.u32 65535, %v1508_v17  ;;  %v6415_v17 = vld [vmem:[%s7053_s2 + $0x20] sm:$0xff] }
 0xff5   :  { %v1512_v22 = vcvt.s32.f32 %v1510_v20  ;;  %v1511_v25 = vcvt.s32.f32 %v1509_v23  ;;  %v6422_v20 = vld [vmem:[%s7053_s2 + $0x18] sm:$0xff]  ;;  %v6436_v23 = vld [vmem:[%s7053_s2 + $0x8] sm:$0xff] }
 0xff7   :  { %1513 = vmin.xlane.f32.xlu0 %v1512_v22 }
0x1080   :  { %v1514_v24 = vpop.xlane.xlu0 %1513 }
0x1081   :  { %vm1515_vm15 = vcmp.eq.f32.partialorder %v1512_v22, %v1514_v24  ;;  %v1520_v2 = vcvt.f32.s32 %v1514_v24  ;;  %v6429_v22 = vld [vmem:[%s7053_s2 + $0x10] sm:$0xff]  ;;  %v6443_v24 = vld [vmem:[%s7053_s2] sm:$0xff] }
0x1082   :  { %v1516_v26 = vsel %vm1515_vm15, %v1511_v25, inf }
0x1083   :  { %1517 = vmin.xlane.f32.xlu0 %v1516_v26  ;;  %v1521_v57 = vshll.u32 %v1520_v2, 16  ;;  %v6450_v26 = vld [vmem:[%s7059_s8] ss:$0 sm:$0xff] }
0x110c   :  { %v1518_v53 = vpop.xlane.xlu0 %1517 }
0x110d   :  { %v1519_v62 = vcvt.f32.s32 %v1518_v53 }
0x110f   :  { %v1522_v10 = vadd.s32 %v1521_v57, %v1519_v62 }
0x1111   :  { %v1523_v16 = vcvt.s32.f32 %v1522_v10  ;;  %vm1526_vm7 = vcmp.eq.s32.totalorder %v5845_v31, %v1522_v10 }
0x1112   :  { %4838 = vmatmul.mubr.msk.f32.vlgmr.msra.gmra.mxu1 %vm1526_vm7, %v5495_v30 }
0x1113   :  { %1525 = vst.msk [vmem:[#allocation5 + $0x4] sm:$0x3] %vm542_vm9, %v1523_v16  ;;  %4876 = vmatpush3.msra.mxu1 %v6240_v19  ;;  %4883 = vmatprep.mubr.msk.f32.mxu1 %vm5490_vm1, %v5489_v1 }
0x1114   :  { %4877 = vmatprep.subr.mxu1 %v5489_v1 }
0x1115   :  { %4878 = vmatpush3.msra.mxu1 %v6249_v55 }
0x1116   :  { %4879 = vmatprep.subr.mxu1 %v5489_v1 }
0x1117   :  { %4880 = vmatpush3.msra.mxu1 %v6256_v18 }
0x1118   :  { %4881 = vmatprep.subr.mxu1 %v5489_v1 }
0x1119   :  { %4882 = vmatpush3.msra.mxu1 %v6266_v28 }
0x111a   :  { %4884 = vmatmul.mubr.msk.f32.vlgmr.msra.gmra.mxu1 %vm183_vm3, %v4115_v21  ;;  %4898 = vmatprep.subr.mxu1 %v5489_v1 }
0x111b   :  { %4899 = vmatpush3.msra.mxu1 %v5803_v54  ;;  %4902 = vmatprep.mubr.msk.f32.mxu1 %vm5490_vm1, %v5489_v1 }
0x111c   :  { %4900 = vmatprep.subr.mxu1 %v5489_v1 }
0x111d   :  { %4901 = vmatpush3.msra.mxu1 %v5811_v56  ;;  %v6290_v56 = vld [vmem:[%s7056_s5] sm:$0xff] }
0x111e   :  { %4940 = vmatprep.subr.mxu1 %v5489_v1 }
0x11d2   :  { %v1595_v32 = vpop.f32.mrf.mxu1 }
0x11d3   :  { %4889 = vmatmul.mubr.msk.f32.vlgmr.msra.gmra.mxu0 %vm258_vm4, %v1595_v32 }
0x11d4   :  { %4892 = vmatpush3.msra.mxu0 %v6281_v33  ;;  %v4839_v54 = vpop.f32.mrf.mxu1  ;;  %4895 = vmatprep.mubr.msk.f32.mxu0 %vm5490_vm1, %v5489_v1 }
0x11d5   :  { %4893 = vmatprep.subr.mxu0 %v5489_v1 }
0x11d6   :  { %4894 = vmatpush3.msra.mxu0 %v6290_v56 }
0x11d7   :  { %4896 = vmatmul.mubr.msk.f32.vlgmr.msra.gmra.mxu0 %vm333_vm5, %v6167_v13  ;;  %4905 = vmatprep.subr.mxu0 %v5489_v1  ;;  %v6366_v13 = vld [vmem:[%s7053_s2 + $0x58] sm:$0xff] }
0x11d8   :  { %4906 = vmatpush3.msra.mxu0 %v5858_v38  ;;  %4937 = vmatprep.mubr.msk.f32.mxu0 %vm5490_vm1, %v5489_v1 }
0x11d9   :  { %4907 = vmatprep.subr.mxu0 %v5489_v1 }
0x11da   :  { %v1743_v36 = vpop.f32.mrf.mxu1  ;;  %4908 = vmatpush3.msra.mxu0 %v5863_v39 }
0x11db   :  { %v1747_v4 = vadd.f32 %v1743_v36, %v1671_v34  ;;  %4909 = vmatprep.subr.mxu0 %v5489_v1  ;;  %v4124_v34 = vld [vmem:[%s7051_s0 + $0x8] sm:$0x3] }
0x11dc   :  { %v4885_v5 = vpop.f32.mrf.mxu1  ;;  %4910 = vmatpush3.msra.mxu0 %v5871_v40  ;;  %v4125_v36 = vld [vmem:[%s7052_s1 + $0x8] sm:$0x3] }
0x11dd   :  { %4911 = vmatprep.subr.mxu0 %v5489_v1 }
0x11de   :  { %4912 = vmatpush3.msra.mxu0 %v5880_v41 }
0x11df   :  { %4913 = vmatprep.subr.mxu0 %v5489_v1 }
0x11e0   :  { %4914 = vmatpush3.msra.mxu0 %v5889_v42 }
0x11e1   :  { %4915 = vmatprep.subr.mxu0 %v5489_v1 }
0x11e2   :  { %4916 = vmatpush3.msra.mxu0 %v5898_v43 }
0x11e3   :  { %4917 = vmatprep.subr.mxu0 %v5489_v1 }
0x11e4   :  { %4918 = vmatpush3.msra.mxu0 %v5907_v44 }
0x11e5   :  { %4919 = vmatprep.subr.mxu0 %v5489_v1 }
0x11e6   :  { %4920 = vmatpush3.msra.mxu0 %v5916_v45 }
0x11e7   :  { %4921 = vmatprep.subr.mxu0 %v5489_v1 }
0x11e8   :  { %4922 = vmatpush3.msra.mxu0 %v5925_v46 }
0x11e9   :  { %4923 = vmatprep.subr.mxu0 %v5489_v1 }
0x11ea   :  { %4924 = vmatpush3.msra.mxu0 %v5934_v47 }
0x11eb   :  { %4925 = vmatprep.subr.mxu0 %v5489_v1 }
0x11ec   :  { %4926 = vmatpush3.msra.mxu0 %v5943_v48 }
0x11ed   :  { %4927 = vmatprep.subr.mxu0 %v5489_v1 }
0x11ee   :  { %4928 = vmatpush3.msra.mxu0 %v5952_v49 }
0x11ef   :  { %4929 = vmatprep.subr.mxu0 %v5489_v1 }
0x11f0   :  { %4930 = vmatpush3.msra.mxu0 %v5961_v50 }
0x11f1   :  { %4931 = vmatprep.subr.mxu0 %v5489_v1 }
0x11f2   :  { %4932 = vmatpush3.msra.mxu0 %v5977_v58 }
0x11f3   :  { %4933 = vmatprep.subr.mxu0 %v5489_v1 }
0x11f4   :  { %4934 = vmatpush3.msra.mxu0 %v5985_v59 }
0x11f5   :  { %4935 = vmatprep.subr.mxu0 %v5489_v1 }
0x11f6   :  { %4936 = vmatpush3.msra.mxu0 %v5994_v61 }
0x11f7   :  { %4998 = vmatprep.subr.mxu0 %v5489_v1 }
0x1293   :  { %v1817_v35 = vpop.f32.mrf.mxu0 }
0x1294   :  { %v1821_v39 = vadd.f32 %v1817_v35, %v1747_v4 }
0x1295   :  { %v4890_v38 = vpop.f32.mrf.mxu0 }
0x1297   :  { %v1888_v40 = vpop.f32.mrf.mxu0 }
0x1298   :  { %v1892_v41 = vadd.f32 %v1888_v40, %v1821_v39 }
0x1299   :  { %v4897_v42 = vpop.f32.mrf.mxu0 }
0x129a   :  { %5374 = vtanh.f32 %v1892_v41  ;;  %v4119_v44 = vmul.f32 -1.442695, %v1892_v41  ;;  %v6486_v41 = vld [vmem:[%s7058_s7 + $0x8] sm:$0xff]  ;;  %v6495_v42 = vld [vmem:[%s7058_s7] sm:$0xff] }
0x129c   :  { %5376 = vpow2.f32 %v4119_v44  ;;  %v6502_v44 = vld [vmem:[%s7057_s6] ss:$0 sm:$0xff] }
0x12a7   :  { %v5375_v43 = vpop.eup %5374 }
0x12a8   :  { %1902 = vrot.lane.b32.xlu1 %v5375_v43, %s5491_s19 }
0x12a9   :  { %v5377_v45 = vpop.eup %5376 }
0x12aa   :  { %v1896_v46 = vadd.f32 1.0, %v5377_v45 }
0x12ac   :  { %5378 = vrcp.f32 %v1896_v46 }
0x12b9   :  { %v5379_v47 = vpop.eup %5378 }
0x12ba   :  { %v1900_v50 = vmul.f32 %v5379_v47, %v6162_v11  ;;  %v6352_v11 = vld [vmem:[%s7053_s2 + $0x68] sm:$0xff] }
0x131a   :  { %v1903_v48 = vpop.permute.xlu1 %1902 }
0x131b   :  { %v1905_v49 = vmul.f32 %v5379_v47, %v1903_v48 }
0x131d   :  { %1907 = vrot.lane.b32.xlu0 %v1905_v49, %s5492_s20 }
0x138f   :  { %v1908_v58 = vpop.permute.xlu0 %1907 }
0x1390   :  { %v6334_v59 = vadd.f32 %v1908_v58, %v1900_v50 }
0x1392   :  { %5380 = vtanh.f32 %v6334_v59 }
0x139f   :  { %v5381_v61 = vpop.eup %5380 }
0x13a0   :  { %1913 = vrot.lane.b32.xlu1 %v5381_v61, %s5493_s10  ;;  %v6517_v61 = vld [vmem:[%s7060_s9 + $0x78] sm:$0xff] }
0x1412   :  { %v1914_v7 = vpop.permute.xlu1 %1913 }
0x1413   :  { %v1916_v51 = vmul.f32 %v5379_v47, %v1914_v7  ;;  %v6526_v7 = vld [vmem:[%s7060_s9 + $0x70] sm:$0xff] }
0x1415   :  { %1918 = vrot.lane.b32.xlu1 %v1916_v51, %s5494_s27  ;;  %v6533_v51 = vld [vmem:[%s7060_s9 + $0x68] sm:$0xff] }
0x1487   :  { %v6339_v52 = vpop.permute.xlu1 %1918 }
0x1488   :  { %4903 = vmatmul.mubr.msk.f32.vlgmr.msra.gmra.mxu1 %vm333_vm5, %v6339_v52 }
0x1489   :  { %4941 = vmatpush3.msra.mxu1 %v6174_v37  ;;  %4972 = vmatprep.mubr.msk.f32.mxu1 %vm5490_vm1, %v5489_v1 }
0x148a   :  { %4942 = vmatprep.subr.mxu1 %v5489_v1 }
0x148b   :  { %4943 = vmatpush3.msra.mxu1 %v6183_v0 }
0x148c   :  { %4944 = vmatprep.subr.mxu1 %v5489_v1 }
0x148d   :  { %4945 = vmatpush3.msra.mxu1 %v6352_v11 }
0x148e   :  { %4946 = vmatprep.subr.mxu1 %v5489_v1 }
0x148f   :  { %4947 = vmatpush3.msra.mxu1 %v6359_v9 }
0x1490   :  { %4948 = vmatprep.subr.mxu1 %v5489_v1 }
0x1491   :  { %4949 = vmatpush3.msra.mxu1 %v6366_v13 }
0x1492   :  { %4950 = vmatprep.subr.mxu1 %v5489_v1 }
0x1493   :  { %4951 = vmatpush3.msra.mxu1 %v6373_v3 }
0x1494   :  { %4952 = vmatprep.subr.mxu1 %v5489_v1 }
0x1495   :  { %4953 = vmatpush3.msra.mxu1 %v6380_v6 }
0x1496   :  { %4954 = vmatprep.subr.mxu1 %v5489_v1 }
0x1497   :  { %4955 = vmatpush3.msra.mxu1 %v6387_v8 }
0x1498   :  { %4956 = vmatprep.subr.mxu1 %v5489_v1 }
0x1499   :  { %4957 = vmatpush3.msra.mxu1 %v6394_v12 }
0x149a   :  { %4958 = vmatprep.subr.mxu1 %v5489_v1 }
0x149b   :  { %4959 = vmatpush3.msra.mxu1 %v6401_v14 }
0x149c   :  { %4960 = vmatprep.subr.mxu1 %v5489_v1 }
0x149d   :  { %4961 = vmatpush3.msra.mxu1 %v6408_v15 }
0x149e   :  { %4962 = vmatprep.subr.mxu1 %v5489_v1 }
0x149f   :  { %4963 = vmatpush3.msra.mxu1 %v6415_v17 }
0x14a0   :  { %4964 = vmatprep.subr.mxu1 %v5489_v1 }
0x14a1   :  { %4965 = vmatpush3.msra.mxu1 %v6422_v20 }
0x14a2   :  { %4966 = vmatprep.subr.mxu1 %v5489_v1 }
0x14a3   :  { %4967 = vmatpush3.msra.mxu1 %v6429_v22 }
0x14a4   :  { %4968 = vmatprep.subr.mxu1 %v5489_v1 }
0x14a5   :  { %4969 = vmatpush3.msra.mxu1 %v6436_v23 }
0x14a6   :  { %4970 = vmatprep.subr.mxu1 %v5489_v1 }
0x14a7   :  { %4971 = vmatpush3.msra.mxu1 %v6443_v24 }
0x14a8   :  { %4975 = vmatprep.subr.mxu1 %v5489_v1  ;;  %4973 = vmatmul.mubr.f32.vlgmr.msra.gmra.mxu1 %v4124_v34 }
0x14a9   :  { %4976 = vmatpush3.msra.mxu1 %v6240_v19  ;;  %4983 = vmatprep.mubr.msk.f32.mxu1 %vm5490_vm1, %v5489_v1 }
0x14aa   :  { %4977 = vmatprep.subr.mxu1 %v5489_v1 }
0x14ab   :  { %4978 = vmatpush3.msra.mxu1 %v6249_v55 }
0x14ac   :  { %4979 = vmatprep.subr.mxu1 %v5489_v1 }
0x14ad   :  { %4980 = vmatpush3.msra.mxu1 %v6256_v18 }
0x14ae   :  { %4981 = vmatprep.subr.mxu1 %v5489_v1 }
0x14af   :  { %4982 = vmatpush3.msra.mxu1 %v6266_v28 }
0x14b0   :  { %4984 = vmatmul.mubr.msk.f32.vlgmr.msra.gmra.mxu1 %vm183_vm3, %v4125_v36  ;;  %4986 = vmatprep.subr.mxu1 %v5489_v1 }
0x14b1   :  { %4987 = vmatpush3.msra.mxu1 %v6228_v63  ;;  %4988 = vmatprep.mubr.msk.f32.mxu1 %vm5490_vm1, %v5489_v1 }
0x14b2   :  { %4991 = vmatprep.subr.mxu1 %v5489_v1 }
0x1548   :  { %v1988_v25 = vpop.f32.mrf.mxu1 }
0x1549   :  { %v1989_v27 = vadd.f32 %v6450_v26, %v1988_v25  ;;  %v6547_v25 = vld [vmem:[%s7060_s9 + $0x58] sm:$0xff] }
0x154a   :  { %v4904_v2 = vpop.f32.mrf.mxu1 }
0x154b   :  { %4121 = vst [vmem:[%s7062_s11 + $0x6] sm:$0x3] %v1989_v27  ;;  %v1994_v53 = vsel %vm518_vm6, %v1989_v27, -inf  ;;  %v6561_v2 = vld [vmem:[%s7060_s9 + $0x48] sm:$0xff] }
0x154c   :  { %1995 = vmax.xlane.f32.xlu0 %v1994_v53  ;;  %v6568_v53 = vld [vmem:[%s7060_s9 + $0x40] sm:$0xff] }
0x1568   :  { %v2158_v43 = vpop.f32.mrf.mxu1 }
0x1569   :  { %v2162_v45 = vadd.f32 %v6502_v44, %v2158_v43 }
0x156a   :  { %v4974_v46 = vpop.f32.mrf.mxu1 }
0x1570   :  { %v2234_v47 = vpop.f32.mrf.mxu1 }
0x1571   :  { %v2238_v48 = vadd.f32 %v2234_v47, %v2162_v45 }
0x1572   :  { %v4985_v49 = vpop.f32.mrf.mxu1 }
0x15d5   :  { %v1996_v57 = vpop.xlane.xlu0 %1995 }
0x15d6   :  { %vm1997_vm8 = vcmp.ge.f32.partialorder %v1989_v27, %v1996_v57  ;;  %v6554_v27 = vld [vmem:[%s7060_s9 + $0x50] sm:$0xff]  ;;  %v6575_v57 = vld [vmem:[%s7060_s9 + $0x38] sm:$0xff] }
0x15d7   :  { %v1998_v62 = vsel %vm1997_vm8, %v5845_v31, 128 }
0x15d8   :  { %v1999_v10 = vsel %vm518_vm6, %v1998_v62, 2147483647  ;;  %v6582_v62 = vld [vmem:[%s7060_s9 + $0x30] sm:$0xff] }
0x15d9   :  { %v2001_v16 = vshra.s32 %v1999_v10, 16  ;;  %v2000_v29 = vand.u32 65535, %v1999_v10  ;;  %v6589_v10 = vld [vmem:[%s7060_s9 + $0x28] sm:$0xff] }
0x15db   :  { %v2003_v21 = vcvt.s32.f32 %v2001_v16  ;;  %v2002_v32 = vcvt.s32.f32 %v2000_v29  ;;  %v6596_v16 = vld [vmem:[%s7060_s9 + $0x20] sm:$0xff]  ;;  %v6610_v29 = vld [vmem:[%s7060_s9 + $0x10] sm:$0xff] }
0x15dd   :  { %2004 = vmin.xlane.f32.xlu1 %v2003_v21 }
0x1666   :  { %v2005_v60 = vpop.xlane.xlu1 %2004 }
0x1667   :  { %vm2006_vm10 = vcmp.eq.f32.partialorder %v2003_v21, %v2005_v60  ;;  %v2011_v4 = vcvt.f32.s32 %v2005_v60  ;;  %v6603_v21 = vld [vmem:[%s7060_s9 + $0x18] sm:$0xff]  ;;  %v6617_v60 = vld [vmem:[%s7060_s9 + $0x8] sm:$0xff] }
0x1668   :  { %v2007_v54 = vsel %vm2006_vm10, %v2002_v32, inf  ;;  %v6624_v32 = vld [vmem:[%s7060_s9] sm:$0xff] }
0x1669   :  { %2008 = vmin.xlane.f32.xlu0 %v2007_v54  ;;  %v2012_v35 = vshll.u32 %v2011_v4, 16 }
0x16f2   :  { %v2009_v5 = vpop.xlane.xlu0 %2008 }
0x16f3   :  { %v2010_v38 = vcvt.f32.s32 %v2009_v5 }
0x16f5   :  { %v2013_v39 = vadd.s32 %v2012_v35, %v2010_v38 }
0x16f7   :  { %v2014_v40 = vcvt.s32.f32 %v2013_v39  ;;  %vm2017_vm11 = vcmp.eq.s32.totalorder %v5845_v31, %v2013_v39 }
0x16f8   :  { %4938 = vmatmul.mubr.msk.f32.vlgmr.msra.gmra.mxu0 %vm2017_vm11, %v5495_v30 }
0x16f9   :  { %2016 = vst.msk [vmem:[#allocation5 + $0x6] sm:$0x3] %vm542_vm9, %v2014_v40  ;;  %4999 = vmatpush3.msra.mxu0 %v6486_v41  ;;  %5002 = vmatprep.mubr.msk.f32.mxu0 %vm5490_vm1, %v5489_v1 }
0x16fa   :  { %5000 = vmatprep.subr.mxu0 %v5489_v1 }
0x16fb   :  { %5001 = vmatpush3.msra.mxu0 %v6495_v42 }
0x16fc   :  { %5040 = vmatprep.subr.mxu0 %v5489_v1 }
0x17b8   :  { %v2086_v50 = vpop.f32.mrf.mxu0 }
0x17b9   :  { %4989 = vmatmul.mubr.msk.f32.vlgmr.msra.gmra.mxu1 %vm258_vm4, %v2086_v50 }
0x17ba   :  { %4992 = vmatpush3.msra.mxu1 %v6281_v33  ;;  %v4939_v58 = vpop.f32.mrf.mxu0  ;;  %4995 = vmatprep.mubr.msk.f32.mxu1 %vm5490_vm1, %v5489_v1 }
0x17bb   :  { %4993 = vmatprep.subr.mxu1 %v5489_v1 }
0x17bc   :  { %4994 = vmatpush3.msra.mxu1 %v6290_v56 }
0x17bd   :  { %4996 = vmatmul.mubr.msk.f32.vlgmr.msra.gmra.mxu1 %vm333_vm5, %v6339_v52  ;;  %5005 = vmatprep.subr.mxu1 %v5489_v1  ;;  %v6540_v52 = vld [vmem:[%s7060_s9 + $0x60] sm:$0xff] }
0x17be   :  { %5006 = vmatpush3.msra.mxu1 %v6517_v61  ;;  %5037 = vmatprep.mubr.msk.f32.mxu1 %vm5490_vm1, %v5489_v1 }
0x17bf   :  { %5007 = vmatprep.subr.mxu1 %v5489_v1 }
0x17c0   :  { %5008 = vmatpush3.msra.mxu1 %v6526_v7 }
0x17c1   :  { %5009 = vmatprep.subr.mxu1 %v5489_v1 }
0x17c2   :  { %5010 = vmatpush3.msra.mxu1 %v6533_v51 }
0x17c3   :  { %5011 = vmatprep.subr.mxu1 %v5489_v1 }
0x17c4   :  { %5012 = vmatpush3.msra.mxu1 %v6540_v52 }
0x17c5   :  { %5013 = vmatprep.subr.mxu1 %v5489_v1 }
0x17c6   :  { %5014 = vmatpush3.msra.mxu1 %v6547_v25 }
0x17c7   :  { %5015 = vmatprep.subr.mxu1 %v5489_v1 }
0x17c8   :  { %5016 = vmatpush3.msra.mxu1 %v6554_v27 }
0x17c9   :  { %5017 = vmatprep.subr.mxu1 %v5489_v1 }
0x17ca   :  { %5018 = vmatpush3.msra.mxu1 %v6561_v2 }
0x17cb   :  { %5019 = vmatprep.subr.mxu1 %v5489_v1 }
0x17cc   :  { %5020 = vmatpush3.msra.mxu1 %v6568_v53 }
0x17cd   :  { %5021 = vmatprep.subr.mxu1 %v5489_v1 }
0x17ce   :  { %5022 = vmatpush3.msra.mxu1 %v6575_v57 }
0x17cf   :  { %5023 = vmatprep.subr.mxu1 %v5489_v1 }
0x17d0   :  { %5024 = vmatpush3.msra.mxu1 %v6582_v62 }
0x17d1   :  { %5025 = vmatprep.subr.mxu1 %v5489_v1 }
0x17d2   :  { %5026 = vmatpush3.msra.mxu1 %v6589_v10 }
0x17d3   :  { %5027 = vmatprep.subr.mxu1 %v5489_v1 }
0x17d4   :  { %5028 = vmatpush3.msra.mxu1 %v6596_v16 }
0x17d5   :  { %5029 = vmatprep.subr.mxu1 %v5489_v1 }
0x17d6   :  { %5030 = vmatpush3.msra.mxu1 %v6603_v21 }
0x17d7   :  { %5031 = vmatprep.subr.mxu1 %v5489_v1 }
0x17d8   :  { %5032 = vmatpush3.msra.mxu1 %v6610_v29 }
0x17d9   :  { %5033 = vmatprep.subr.mxu1 %v5489_v1 }
0x17da   :  { %5034 = vmatpush3.msra.mxu1 %v6617_v60 }
0x17db   :  { %5035 = vmatprep.subr.mxu1 %v5489_v1 }
0x17dc   :  { %5036 = vmatpush3.msra.mxu1 %v6624_v32 }
0x17dd   :  { %5075 = vmatprep.subr.mxu1 %v5489_v1 }
0x1879   :  { %v2308_v54 = vpop.f32.mrf.mxu1 }
0x187a   :  { %v2312_v36 = vadd.f32 %v2308_v54, %v2238_v48 }
0x187b   :  { %v4990_v34 = vpop.f32.mrf.mxu1 }
0x187d   :  { %v2379_v4 = vpop.f32.mrf.mxu1 }
0x187e   :  { %v2383_v5 = vadd.f32 %v2379_v4, %v2312_v36 }
0x187f   :  { %v4997_v35 = vpop.f32.mrf.mxu1 }
0x1880   :  { %5382 = vtanh.f32 %v2383_v5  ;;  %v4129_v39 = vmul.f32 -1.442695, %v2383_v5 }
0x1882   :  { %5384 = vpow2.f32 %v4129_v39 }
0x188d   :  { %v5383_v38 = vpop.eup %5382 }
0x188e   :  { %2393 = vrot.lane.b32.xlu0 %v5383_v38, %s5491_s19 }
0x188f   :  { %v5385_v40 = vpop.eup %5384 }
0x1890   :  { %v2387_v43 = vadd.f32 1.0, %v5385_v40 }
0x1892   :  { %5386 = vrcp.f32 %v2387_v43 }
0x189f   :  { %v5387_v45 = vpop.eup %5386 }
0x18a0   :  { %v2391_v49 = vmul.f32 %v5387_v45, %v6334_v59 }
0x1900   :  { %v2394_v46 = vpop.permute.xlu0 %2393 }
0x1901   :  { %v2396_v47 = vmul.f32 %v5387_v45, %v2394_v46 }
0x1903   :  { %2398 = vrot.lane.b32.xlu1 %v2396_v47, %s5492_s20 }
0x1975   :  { %v2399_v48 = vpop.permute.xlu1 %2398 }
0x1976   :  { %v6631_v50 = vadd.f32 %v2399_v48, %v2391_v49 }
0x1978   :  { %5388 = vtanh.f32 %v6631_v50 }
0x1985   :  { %v5389_v58 = vpop.eup %5388 }
0x1986   :  { %2404 = vrot.lane.b32.xlu1 %v5389_v58, %s5493_s10  ;;  %v4134_v58 = vld [vmem:[%s7051_s0 + $0xa] sm:$0x3] }
0x19f8   :  { %v2405_v54 = vpop.permute.xlu1 %2404 }
0x19f9   :  { %v2407_v34 = vmul.f32 %v5387_v45, %v2405_v54 }
0x19fb   :  { %2409 = vrot.lane.b32.xlu0 %v2407_v34, %s5494_s27 }
0x1a6d   :  { %v6636_v36 = vpop.permute.xlu0 %2409 }
0x1a6e   :  { %5003 = vmatmul.mubr.msk.f32.vlgmr.msra.gmra.mxu0 %vm333_vm5, %v6636_v36 }
0x1a6f   :  { %5041 = vmatpush3.msra.mxu0 %v6174_v37  ;;  %5072 = vmatprep.mubr.msk.f32.mxu0 %vm5490_vm1, %v5489_v1 }
0x1a70   :  { %5042 = vmatprep.subr.mxu0 %v5489_v1 }
0x1a71   :  { %5043 = vmatpush3.msra.mxu0 %v6183_v0 }
0x1a72   :  { %5044 = vmatprep.subr.mxu0 %v5489_v1 }
0x1a73   :  { %5045 = vmatpush3.msra.mxu0 %v6352_v11 }
0x1a74   :  { %5046 = vmatprep.subr.mxu0 %v5489_v1 }
0x1a75   :  { %5047 = vmatpush3.msra.mxu0 %v6359_v9 }
0x1a76   :  { %5048 = vmatprep.subr.mxu0 %v5489_v1 }
0x1a77   :  { %5049 = vmatpush3.msra.mxu0 %v6366_v13 }
0x1a78   :  { %5050 = vmatprep.subr.mxu0 %v5489_v1 }
0x1a79   :  { %5051 = vmatpush3.msra.mxu0 %v6373_v3 }
0x1a7a   :  { %5052 = vmatprep.subr.mxu0 %v5489_v1 }
0x1a7b   :  { %5053 = vmatpush3.msra.mxu0 %v6380_v6 }
0x1a7c   :  { %5054 = vmatprep.subr.mxu0 %v5489_v1 }
0x1a7d   :  { %5055 = vmatpush3.msra.mxu0 %v6387_v8 }
0x1a7e   :  { %5056 = vmatprep.subr.mxu0 %v5489_v1 }
0x1a7f   :  { %5057 = vmatpush3.msra.mxu0 %v6394_v12 }
0x1a80   :  { %5058 = vmatprep.subr.mxu0 %v5489_v1 }
0x1a81   :  { %5059 = vmatpush3.msra.mxu0 %v6401_v14 }
0x1a82   :  { %5060 = vmatprep.subr.mxu0 %v5489_v1 }
0x1a83   :  { %5061 = vmatpush3.msra.mxu0 %v6408_v15 }
0x1a84   :  { %5062 = vmatprep.subr.mxu0 %v5489_v1 }
0x1a85   :  { %5063 = vmatpush3.msra.mxu0 %v6415_v17 }
0x1a86   :  { %5064 = vmatprep.subr.mxu0 %v5489_v1 }
0x1a87   :  { %5065 = vmatpush3.msra.mxu0 %v6422_v20 }
0x1a88   :  { %5066 = vmatprep.subr.mxu0 %v5489_v1 }
0x1a89   :  { %5067 = vmatpush3.msra.mxu0 %v6429_v22 }
0x1a8a   :  { %5068 = vmatprep.subr.mxu0 %v5489_v1 }
0x1a8b   :  { %5069 = vmatpush3.msra.mxu0 %v6436_v23 }
0x1a8c   :  { %5070 = vmatprep.subr.mxu0 %v5489_v1 }
0x1a8d   :  { %5071 = vmatpush3.msra.mxu0 %v6443_v24 }
0x1a8e   :  { %5086 = vmatprep.subr.mxu0 %v5489_v1  ;;  %5073 = vmatmul.mubr.f32.vlgmr.msra.gmra.mxu0 %v4134_v58 }
0x1a8f   :  { %5087 = vmatpush3.msra.mxu0 %v6228_v63  ;;  %5088 = vmatprep.mubr.msk.f32.mxu0 %vm5490_vm1, %v5489_v1 }
0x1a90   :  { %5091 = vmatprep.subr.mxu0 %v5489_v1 }
0x1b2e   :  { %v2479_v59 = vpop.f32.mrf.mxu0 }
0x1b2f   :  { %v2480_v4 = vadd.f32 %v6450_v26, %v2479_v59 }
0x1b30   :  { %v5004_v5 = vpop.f32.mrf.mxu0 }
0x1b31   :  { %4131 = vst [vmem:[%s7062_s11 + $0x8] sm:$0x3] %v2480_v4  ;;  %v2485_v35 = vsel %vm518_vm6, %v2480_v4, -inf }
0x1b32   :  { %2486 = vmax.xlane.f32.xlu1 %v2485_v35 }
0x1bbb   :  { %v2487_v38 = vpop.xlane.xlu1 %2486 }
0x1bbc   :  { %vm2488_vm12 = vcmp.ge.f32.partialorder %v2480_v4, %v2487_v38  ;;  %v4135_v38 = vld [vmem:[%s7052_s1 + $0xa] sm:$0x3] }
0x1bbd   :  { %v2489_v39 = vsel %vm2488_vm12, %v5845_v31, 128 }
0x1bbe   :  { %v2490_v40 = vsel %vm518_vm6, %v2489_v39, 2147483647  ;;  %v2649_v39 = vpop.f32.mrf.mxu0 }
0x1bbf   :  { %v2492_v43 = vshra.s32 %v2490_v40, 16  ;;  %v2491_v46 = vand.u32 65535, %v2490_v40 }
0x1bc0   :  { %v5074_v40 = vpop.f32.mrf.mxu0 }
0x1bc1   :  { %v2494_v45 = vcvt.s32.f32 %v2492_v43  ;;  %v2493_v49 = vcvt.s32.f32 %v2491_v46  ;;  %v2653_v46 = vadd.f32 %v6502_v44, %v2649_v39 }
0x1bc3   :  { %2495 = vmin.xlane.f32.xlu0 %v2494_v45 }
0x1c4c   :  { %v2496_v47 = vpop.xlane.xlu0 %2495 }
0x1c4d   :  { %vm2497_vm13 = vcmp.eq.f32.partialorder %v2494_v45, %v2496_v47  ;;  %v2502_v54 = vcvt.f32.s32 %v2496_v47 }
0x1c4e   :  { %v2498_v48 = vsel %vm2497_vm13, %v2493_v49, inf }
0x1c4f   :  { %2499 = vmin.xlane.f32.xlu0 %v2498_v48  ;;  %v2503_v59 = vshll.u32 %v2502_v54, 16 }
0x1cd8   :  { %v2500_v34 = vpop.xlane.xlu0 %2499 }
0x1cd9   :  { %v2501_v4 = vcvt.f32.s32 %v2500_v34 }
0x1cdb   :  { %v2504_v5 = vadd.s32 %v2503_v59, %v2501_v4 }
0x1cdd   :  { %v2505_v35 = vcvt.s32.f32 %v2504_v5  ;;  %vm2508_vm14 = vcmp.eq.s32.totalorder %v5845_v31, %v2504_v5 }
0x1cde   :  { %5038 = vmatmul.mubr.msk.f32.vlgmr.msra.gmra.mxu1 %vm2508_vm14, %v5495_v30 }
0x1cdf   :  { %2507 = vst.msk [vmem:[#allocation5 + $0x8] sm:$0x3] %vm542_vm9, %v2505_v35  ;;  %5076 = vmatpush3.msra.mxu1 %v6240_v19  ;;  %5083 = vmatprep.mubr.msk.f32.mxu1 %vm5490_vm1, %v5489_v1 }
0x1ce0   :  { %5077 = vmatprep.subr.mxu1 %v5489_v1 }
0x1ce1   :  { %5078 = vmatpush3.msra.mxu1 %v6249_v55 }
0x1ce2   :  { %5079 = vmatprep.subr.mxu1 %v5489_v1 }
0x1ce3   :  { %5080 = vmatpush3.msra.mxu1 %v6256_v18 }
0x1ce4   :  { %5081 = vmatprep.subr.mxu1 %v5489_v1 }
0x1ce5   :  { %5082 = vmatpush3.msra.mxu1 %v6266_v28 }
0x1ce6   :  { %5084 = vmatmul.mubr.msk.f32.vlgmr.msra.gmra.mxu1 %vm183_vm3, %v4135_v38  ;;  %5098 = vmatprep.subr.mxu1 %v5489_v1 }
0x1ce7   :  { %5099 = vmatpush3.msra.mxu1 %v6486_v41  ;;  %5102 = vmatprep.mubr.msk.f32.mxu1 %vm5490_vm1, %v5489_v1 }
0x1ce8   :  { %5100 = vmatprep.subr.mxu1 %v5489_v1 }
0x1ce9   :  { %5101 = vmatpush3.msra.mxu1 %v6495_v42 }
0x1cea   :  { %5140 = vmatprep.subr.mxu1 %v5489_v1 }
0x1d9e   :  { %v2577_v43 = vpop.f32.mrf.mxu1 }
0x1d9f   :  { %5089 = vmatmul.mubr.msk.f32.vlgmr.msra.gmra.mxu0 %vm258_vm4, %v2577_v43 }
0x1da0   :  { %5092 = vmatpush3.msra.mxu0 %v6281_v33  ;;  %v5039_v45 = vpop.f32.mrf.mxu1  ;;  %5095 = vmatprep.mubr.msk.f32.mxu0 %vm5490_vm1, %v5489_v1 }
0x1da1   :  { %5093 = vmatprep.subr.mxu0 %v5489_v1 }
0x1da2   :  { %5094 = vmatpush3.msra.mxu0 %v6290_v56 }
0x1da3   :  { %5096 = vmatmul.mubr.msk.f32.vlgmr.msra.gmra.mxu0 %vm333_vm5, %v6636_v36  ;;  %5105 = vmatprep.subr.mxu0 %v5489_v1 }
0x1da4   :  { %5106 = vmatpush3.msra.mxu0 %v6517_v61  ;;  %5137 = vmatprep.mubr.msk.f32.mxu0 %vm5490_vm1, %v5489_v1 }
0x1da5   :  { %5107 = vmatprep.subr.mxu0 %v5489_v1 }
0x1da6   :  { %v2725_v47 = vpop.f32.mrf.mxu1  ;;  %5108 = vmatpush3.msra.mxu0 %v6526_v7 }
0x1da7   :  { %v2729_v49 = vadd.f32 %v2725_v47, %v2653_v46  ;;  %5109 = vmatprep.subr.mxu0 %v5489_v1 }
0x1da8   :  { %v5085_v48 = vpop.f32.mrf.mxu1  ;;  %5110 = vmatpush3.msra.mxu0 %v6533_v51 }
0x1da9   :  { %5111 = vmatprep.subr.mxu0 %v5489_v1 }
0x1daa   :  { %5112 = vmatpush3.msra.mxu0 %v6540_v52 }
0x1dab   :  { %5113 = vmatprep.subr.mxu0 %v5489_v1 }
0x1dac   :  { %5114 = vmatpush3.msra.mxu0 %v6547_v25 }
0x1dad   :  { %5115 = vmatprep.subr.mxu0 %v5489_v1 }
0x1dae   :  { %5116 = vmatpush3.msra.mxu0 %v6554_v27 }
0x1daf   :  { %5117 = vmatprep.subr.mxu0 %v5489_v1 }
0x1db0   :  { %5118 = vmatpush3.msra.mxu0 %v6561_v2 }
0x1db1   :  { %5119 = vmatprep.subr.mxu0 %v5489_v1 }
0x1db2   :  { %5120 = vmatpush3.msra.mxu0 %v6568_v53 }
0x1db3   :  { %5121 = vmatprep.subr.mxu0 %v5489_v1 }
0x1db4   :  { %5122 = vmatpush3.msra.mxu0 %v6575_v57 }
0x1db5   :  { %5123 = vmatprep.subr.mxu0 %v5489_v1 }
0x1db6   :  { %5124 = vmatpush3.msra.mxu0 %v6582_v62 }
0x1db7   :  { %5125 = vmatprep.subr.mxu0 %v5489_v1 }
0x1db8   :  { %5126 = vmatpush3.msra.mxu0 %v6589_v10 }
0x1db9   :  { %5127 = vmatprep.subr.mxu0 %v5489_v1 }
0x1dba   :  { %5128 = vmatpush3.msra.mxu0 %v6596_v16 }
0x1dbb   :  { %5129 = vmatprep.subr.mxu0 %v5489_v1 }
0x1dbc   :  { %5130 = vmatpush3.msra.mxu0 %v6603_v21 }
0x1dbd   :  { %5131 = vmatprep.subr.mxu0 %v5489_v1 }
0x1dbe   :  { %5132 = vmatpush3.msra.mxu0 %v6610_v29 }
0x1dbf   :  { %5133 = vmatprep.subr.mxu0 %v5489_v1 }
0x1dc0   :  { %5134 = vmatpush3.msra.mxu0 %v6617_v60 }
0x1dc1   :  { %5135 = vmatprep.subr.mxu0 %v5489_v1 }
0x1dc2   :  { %5136 = vmatpush3.msra.mxu0 %v6624_v32 }
0x1dc3   :  { %5175 = vmatprep.subr.mxu0 %v5489_v1 }
0x1e5f   :  { %v2799_v36 = vpop.f32.mrf.mxu0 }
0x1e60   :  { %v2803_v54 = vadd.f32 %v2799_v36, %v2729_v49 }
0x1e61   :  { %v5090_v58 = vpop.f32.mrf.mxu0 }
0x1e63   :  { %v2870_v34 = vpop.f32.mrf.mxu0 }
0x1e64   :  { %v2874_v59 = vadd.f32 %v2870_v34, %v2803_v54 }
0x1e65   :  { %v5097_v4 = vpop.f32.mrf.mxu0 }
0x1e66   :  { %5390 = vtanh.f32 %v2874_v59  ;;  %v4139_v35 = vmul.f32 -1.442695, %v2874_v59 }
0x1e68   :  { %5392 = vpow2.f32 %v4139_v35 }
0x1e73   :  { %v5391_v5 = vpop.eup %5390 }
0x1e74   :  { %2884 = vrot.lane.b32.xlu1 %v5391_v5, %s5491_s19 }
0x1e75   :  { %v5393_v38 = vpop.eup %5392 }
0x1e76   :  { %v2878_v39 = vadd.f32 1.0, %v5393_v38 }
0x1e78   :  { %5394 = vrcp.f32 %v2878_v39 }
0x1e85   :  { %v5395_v40 = vpop.eup %5394 }
0x1e86   :  { %v2882_v46 = vmul.f32 %v5395_v40, %v6631_v50 }
0x1ee6   :  { %v2885_v43 = vpop.permute.xlu1 %2884 }
0x1ee7   :  { %v2887_v45 = vmul.f32 %v5395_v40, %v2885_v43 }
0x1ee9   :  { %2889 = vrot.lane.b32.xlu0 %v2887_v45, %s5492_s20 }
0x1f5b   :  { %v2890_v47 = vpop.permute.xlu0 %2889 }
0x1f5c   :  { %v6758_v49 = vadd.f32 %v2890_v47, %v2882_v46  ;;  %v4144_v46 = vld [vmem:[%s7051_s0 + $0xc] sm:$0x3] }
0x1f5e   :  { %5396 = vtanh.f32 %v6758_v49 }
0x1f6b   :  { %v5397_v48 = vpop.eup %5396 }
0x1f6c   :  { %2895 = vrot.lane.b32.xlu1 %v5397_v48, %s5493_s10 }
0x1fde   :  { %v2896_v36 = vpop.permute.xlu1 %2895 }
0x1fdf   :  { %v2898_v58 = vmul.f32 %v5395_v40, %v2896_v36 }
0x1fe1   :  { %2900 = vrot.lane.b32.xlu1 %v2898_v58, %s5494_s27 }
0x2053   :  { %v6763_v54 = vpop.permute.xlu1 %2900 }
0x2054   :  { %5103 = vmatmul.mubr.msk.f32.vlgmr.msra.gmra.mxu1 %vm333_vm5, %v6763_v54 }
0x2055   :  { %5141 = vmatpush3.msra.mxu1 %v6174_v37  ;;  %5172 = vmatprep.mubr.msk.f32.mxu1 %vm5490_vm1, %v5489_v1 }
0x2056   :  { %5142 = vmatprep.subr.mxu1 %v5489_v1 }
0x2057   :  { %5143 = vmatpush3.msra.mxu1 %v6183_v0 }
0x2058   :  { %5144 = vmatprep.subr.mxu1 %v5489_v1 }
0x2059   :  { %5145 = vmatpush3.msra.mxu1 %v6352_v11 }
0x205a   :  { %5146 = vmatprep.subr.mxu1 %v5489_v1 }
0x205b   :  { %5147 = vmatpush3.msra.mxu1 %v6359_v9 }
0x205c   :  { %5148 = vmatprep.subr.mxu1 %v5489_v1 }
0x205d   :  { %5149 = vmatpush3.msra.mxu1 %v6366_v13 }
0x205e   :  { %5150 = vmatprep.subr.mxu1 %v5489_v1 }
0x205f   :  { %5151 = vmatpush3.msra.mxu1 %v6373_v3 }
0x2060   :  { %5152 = vmatprep.subr.mxu1 %v5489_v1 }
0x2061   :  { %5153 = vmatpush3.msra.mxu1 %v6380_v6 }
0x2062   :  { %5154 = vmatprep.subr.mxu1 %v5489_v1 }
0x2063   :  { %5155 = vmatpush3.msra.mxu1 %v6387_v8 }
0x2064   :  { %5156 = vmatprep.subr.mxu1 %v5489_v1 }
0x2065   :  { %5157 = vmatpush3.msra.mxu1 %v6394_v12 }
0x2066   :  { %5158 = vmatprep.subr.mxu1 %v5489_v1 }
0x2067   :  { %5159 = vmatpush3.msra.mxu1 %v6401_v14 }
0x2068   :  { %5160 = vmatprep.subr.mxu1 %v5489_v1 }
0x2069   :  { %5161 = vmatpush3.msra.mxu1 %v6408_v15 }
0x206a   :  { %5162 = vmatprep.subr.mxu1 %v5489_v1 }
0x206b   :  { %5163 = vmatpush3.msra.mxu1 %v6415_v17 }
0x206c   :  { %5164 = vmatprep.subr.mxu1 %v5489_v1 }
0x206d   :  { %5165 = vmatpush3.msra.mxu1 %v6422_v20 }
0x206e   :  { %5166 = vmatprep.subr.mxu1 %v5489_v1 }
0x206f   :  { %5167 = vmatpush3.msra.mxu1 %v6429_v22 }
0x2070   :  { %5168 = vmatprep.subr.mxu1 %v5489_v1 }
0x2071   :  { %5169 = vmatpush3.msra.mxu1 %v6436_v23 }
0x2072   :  { %5170 = vmatprep.subr.mxu1 %v5489_v1 }
0x2073   :  { %5171 = vmatpush3.msra.mxu1 %v6443_v24 }
0x2074   :  { %5186 = vmatprep.subr.mxu1 %v5489_v1  ;;  %5173 = vmatmul.mubr.f32.vlgmr.msra.gmra.mxu1 %v4144_v46 }
0x2075   :  { %5187 = vmatpush3.msra.mxu1 %v6228_v63  ;;  %5188 = vmatprep.mubr.msk.f32.mxu1 %vm5490_vm1, %v5489_v1  ;;  %v4145_v63 = vld [vmem:[%s7052_s1 + $0xc] sm:$0x3] }
0x2076   :  { %5191 = vmatprep.subr.mxu1 %v5489_v1 }
0x2114   :  { %v2970_v37 = vpop.f32.mrf.mxu1 }
0x2115   :  { %v2971_v0 = vadd.f32 %v6450_v26, %v2970_v37 }
0x2116   :  { %v5104_v50 = vpop.f32.mrf.mxu1 }
0x2117   :  { %4141 = vst [vmem:[%s7062_s11 + $0xa] sm:$0x3] %v2971_v0  ;;  %v2976_v34 = vsel %vm518_vm6, %v2971_v0, -inf }
0x2118   :  { %2977 = vmax.xlane.f32.xlu0 %v2976_v34 }
0x21a1   :  { %v2978_v59 = vpop.xlane.xlu0 %2977 }
0x21a2   :  { %vm2979_vm15 = vcmp.ge.f32.partialorder %v2971_v0, %v2978_v59 }
0x21a3   :  { %v2980_v4 = vsel %vm2979_vm15, %v5845_v31, 128 }
0x21a4   :  { %v2981_v5 = vsel %vm518_vm6, %v2980_v4, 2147483647 }
0x21a5   :  { %v2983_v35 = vshra.s32 %v2981_v5, 16  ;;  %v2982_v39 = vand.u32 65535, %v2981_v5 }
0x21a7   :  { %v2985_v38 = vcvt.s32.f32 %v2983_v35  ;;  %v2984_v43 = vcvt.s32.f32 %v2982_v39 }
0x21a9   :  { %2986 = vmin.xlane.f32.xlu1 %v2985_v38 }
0x2232   :  { %v2987_v40 = vpop.xlane.xlu1 %2986 }
0x2233   :  { %vm2988_vm7 = vcmp.eq.f32.partialorder %v2985_v38, %v2987_v40  ;;  %v2993_v47 = vcvt.f32.s32 %v2987_v40 }
0x2234   :  { %v2989_v45 = vsel %vm2988_vm7, %v2984_v43, inf }
0x2235   :  { %2990 = vmin.xlane.f32.xlu0 %v2989_v45  ;;  %v2994_v36 = vshll.u32 %v2993_v47, 16 }
0x22be   :  { %v2991_v48 = vpop.xlane.xlu0 %2990 }
0x22bf   :  { %v2992_v58 = vcvt.f32.s32 %v2991_v48 }
0x22c1   :  { %v2995_v37 = vadd.s32 %v2994_v36, %v2992_v58 }
0x22c3   :  { %v2996_v0 = vcvt.s32.f32 %v2995_v37  ;;  %vm2999_vm8 = vcmp.eq.s32.totalorder %v5845_v31, %v2995_v37 }
0x22c4   :  { %5138 = vmatmul.mubr.msk.f32.vlgmr.msra.gmra.mxu0 %vm2999_vm8, %v5495_v30 }
0x22c5   :  { %2998 = vst.msk [vmem:[#allocation5 + $0xa] sm:$0x3] %vm542_vm9, %v2996_v0  ;;  %5176 = vmatpush3.msra.mxu0 %v6240_v19  ;;  %5183 = vmatprep.mubr.msk.f32.mxu0 %vm5490_vm1, %v5489_v1  ;;  %v3140_v19 = vpop.f32.mrf.mxu1 }
0x22c6   :  { %5177 = vmatprep.subr.mxu0 %v5489_v1  ;;  %v3144_v50 = vadd.f32 %v6502_v44, %v3140_v19 }
0x22c7   :  { %5178 = vmatpush3.msra.mxu0 %v6249_v55  ;;  %v5174_v55 = vpop.f32.mrf.mxu1 }
0x22c8   :  { %5179 = vmatprep.subr.mxu0 %v5489_v1 }
0x22c9   :  { %5180 = vmatpush3.msra.mxu0 %v6256_v18 }
0x22ca   :  { %5181 = vmatprep.subr.mxu0 %v5489_v1 }
0x22cb   :  { %5182 = vmatpush3.msra.mxu0 %v6266_v28 }
0x22cc   :  { %5184 = vmatmul.mubr.msk.f32.vlgmr.msra.gmra.mxu0 %vm183_vm3, %v4145_v63  ;;  %5198 = vmatprep.subr.mxu0 %v5489_v1 }
0x22cd   :  { %5199 = vmatpush3.msra.mxu0 %v6486_v41  ;;  %5202 = vmatprep.mubr.msk.f32.mxu0 %vm5490_vm1, %v5489_v1 }
0x22ce   :  { %5200 = vmatprep.subr.mxu0 %v5489_v1 }
0x22cf   :  { %5201 = vmatpush3.msra.mxu0 %v6495_v42 }
0x22d0   :  { %5240 = vmatprep.subr.mxu0 %v5489_v1 }
0x2384   :  { %v3068_v18 = vpop.f32.mrf.mxu0 }
0x2385   :  { %5189 = vmatmul.mubr.msk.f32.vlgmr.msra.gmra.mxu1 %vm258_vm4, %v3068_v18  ;;  %v5458_v18 = vld [vmem:[%s7053_s2 + $0x70] sm:$0xff] }
0x2386   :  { %5192 = vmatpush3.msra.mxu1 %v6281_v33  ;;  %v5139_v28 = vpop.f32.mrf.mxu0  ;;  %5195 = vmatprep.mubr.msk.f32.mxu1 %vm5490_vm1, %v5489_v1 }
0x2387   :  { %5193 = vmatprep.subr.mxu1 %v5489_v1 }
0x2388   :  { %5194 = vmatpush3.msra.mxu1 %v6290_v56 }
0x2389   :  { %5196 = vmatmul.mubr.msk.f32.vlgmr.msra.gmra.mxu1 %vm333_vm5, %v6763_v54  ;;  %5205 = vmatprep.subr.mxu1 %v5489_v1 }
0x238a   :  { %5206 = vmatpush3.msra.mxu1 %v6517_v61  ;;  %5237 = vmatprep.mubr.msk.f32.mxu1 %vm5490_vm1, %v5489_v1 }
0x238b   :  { %5207 = vmatprep.subr.mxu1 %v5489_v1 }
0x238c   :  { %v3216_v33 = vpop.f32.mrf.mxu0  ;;  %5208 = vmatpush3.msra.mxu1 %v6526_v7 }
0x238d   :  { %v3220_v34 = vadd.f32 %v3216_v33, %v3144_v50  ;;  %5209 = vmatprep.subr.mxu1 %v5489_v1 }
0x238e   :  { %v5185_v56 = vpop.f32.mrf.mxu0  ;;  %5210 = vmatpush3.msra.mxu1 %v6533_v51 }
0x238f   :  { %5211 = vmatprep.subr.mxu1 %v5489_v1 }
0x2390   :  { %5212 = vmatpush3.msra.mxu1 %v6540_v52 }
0x2391   :  { %5213 = vmatprep.subr.mxu1 %v5489_v1 }
0x2392   :  { %5214 = vmatpush3.msra.mxu1 %v6547_v25 }
0x2393   :  { %5215 = vmatprep.subr.mxu1 %v5489_v1 }
0x2394   :  { %5216 = vmatpush3.msra.mxu1 %v6554_v27 }
0x2395   :  { %5217 = vmatprep.subr.mxu1 %v5489_v1 }
0x2396   :  { %5218 = vmatpush3.msra.mxu1 %v6561_v2 }
0x2397   :  { %5219 = vmatprep.subr.mxu1 %v5489_v1 }
0x2398   :  { %5220 = vmatpush3.msra.mxu1 %v6568_v53 }
0x2399   :  { %5221 = vmatprep.subr.mxu1 %v5489_v1 }
0x239a   :  { %5222 = vmatpush3.msra.mxu1 %v6575_v57 }
0x239b   :  { %5223 = vmatprep.subr.mxu1 %v5489_v1 }
0x239c   :  { %5224 = vmatpush3.msra.mxu1 %v6582_v62 }
0x239d   :  { %5225 = vmatprep.subr.mxu1 %v5489_v1 }
0x239e   :  { %5226 = vmatpush3.msra.mxu1 %v6589_v10 }
0x239f   :  { %5227 = vmatprep.subr.mxu1 %v5489_v1 }
0x23a0   :  { %5228 = vmatpush3.msra.mxu1 %v6596_v16 }
0x23a1   :  { %5229 = vmatprep.subr.mxu1 %v5489_v1 }
0x23a2   :  { %5230 = vmatpush3.msra.mxu1 %v6603_v21 }
0x23a3   :  { %5231 = vmatprep.subr.mxu1 %v5489_v1 }
0x23a4   :  { %5232 = vmatpush3.msra.mxu1 %v6610_v29 }
0x23a5   :  { %5233 = vmatprep.subr.mxu1 %v5489_v1 }
0x23a6   :  { %5234 = vmatpush3.msra.mxu1 %v6617_v60 }
0x23a7   :  { %5235 = vmatprep.subr.mxu1 %v5489_v1 }
0x23a8   :  { %5236 = vmatpush3.msra.mxu1 %v6624_v32 }
0x23a9   :  { %5275 = vmatprep.subr.mxu1 %v5489_v1 }
0x2445   :  { %v3290_v54 = vpop.f32.mrf.mxu1 }
0x2446   :  { %v3294_v4 = vadd.f32 %v3290_v54, %v3220_v34 }
0x2447   :  { %v5190_v59 = vpop.f32.mrf.mxu1 }
0x2448   :  { %v5460_v59 = vld [vmem:[%s7054_s3 + $0x18] sm:$0xff] }
0x2449   :  { %v3361_v5 = vpop.f32.mrf.mxu1 }
0x244a   :  { %v3365_v35 = vadd.f32 %v3361_v5, %v3294_v4  ;;  %v5461_v4 = vld [vmem:[%s7054_s3 + $0x10] sm:$0xff]  ;;  %v5462_v5 = vld [vmem:[%s7054_s3 + $0x8] sm:$0xff] }
0x244b   :  { %v5197_v38 = vpop.f32.mrf.mxu1 }
0x244c   :  { %5398 = vtanh.f32 %v3365_v35  ;;  %v4149_v40 = vmul.f32 -1.442695, %v3365_v35  ;;  %v4155_v35 = vld [vmem:[%s7052_s1 + $0xe] sm:$0x3]  ;;  %v5463_v38 = vld [vmem:[%s7054_s3] sm:$0xff] }
0x244e   :  { %5400 = vpow2.f32 %v4149_v40 }
0x2459   :  { %v5399_v39 = vpop.eup %5398 }
0x245a   :  { %3375 = vrot.lane.b32.xlu0 %v5399_v39, %s5491_s19 }
0x245b   :  { %v5401_v43 = vpop.eup %5400 }
0x245c   :  { %v3369_v45 = vadd.f32 1.0, %v5401_v43 }
0x245e   :  { %5402 = vrcp.f32 %v3369_v45  ;;  %v5464_v45 = vld [vmem:[%s7056_s5 + $0x8] sm:$0xff] }
0x246b   :  { %v5403_v46 = vpop.eup %5402 }
0x246c   :  { %v3373_v36 = vmul.f32 %v5403_v46, %v6758_v49  ;;  %v5457_v49 = vld [vmem:[%s7053_s2 + $0x78] sm:$0xff] }
0x24cc   :  { %v3376_v47 = vpop.permute.xlu0 %3375 }
0x24cd   :  { %v3378_v48 = vmul.f32 %v5403_v46, %v3376_v47 }
0x24cf   :  { %3380 = vrot.lane.b32.xlu1 %v3378_v48, %s5492_s20 }
0x2541   :  { %v3381_v58 = vpop.permute.xlu1 %3380 }
0x2542   :  { %v6885_v37 = vadd.f32 %v3381_v58, %v3373_v36 }
0x2544   :  { %5404 = vtanh.f32 %v6885_v37 }
0x2551   :  { %v5405_v0 = vpop.eup %5404 }
0x2552   :  { %3386 = vrot.lane.b32.xlu1 %v5405_v0, %s5493_s10 }
0x25c4   :  { %v3387_v63 = vpop.permute.xlu1 %3386 }
0x25c5   :  { %v3389_v19 = vmul.f32 %v5403_v46, %v3387_v63 }
0x25c7   :  { %3391 = vrot.lane.b32.xlu0 %v3389_v19, %s5494_s27 }
0x2639   :  { %v6890_v55 = vpop.permute.xlu0 %3391 }
0x263a   :  { %5203 = vmatmul.mubr.msk.f32.vlgmr.msra.gmra.mxu0 %vm333_vm5, %v6890_v55 }
0x263b   :  { %5241 = vmatpush3.msra.mxu0 %v5457_v49  ;;  %5272 = vmatprep.mubr.msk.f32.mxu0 %vm5490_vm1, %v5489_v1 }
0x263c   :  { %5242 = vmatprep.subr.mxu0 %v5489_v1 }
0x263d   :  { %5243 = vmatpush3.msra.mxu0 %v5458_v18 }
0x263e   :  { %5244 = vmatprep.subr.mxu0 %v5489_v1 }
0x263f   :  { %5245 = vmatpush3.msra.mxu0 %v6352_v11 }
0x2640   :  { %5246 = vmatprep.subr.mxu0 %v5489_v1 }
0x2641   :  { %5247 = vmatpush3.msra.mxu0 %v6359_v9 }
0x2642   :  { %5248 = vmatprep.subr.mxu0 %v5489_v1 }
0x2643   :  { %5249 = vmatpush3.msra.mxu0 %v6366_v13 }
0x2644   :  { %5250 = vmatprep.subr.mxu0 %v5489_v1 }
0x2645   :  { %5251 = vmatpush3.msra.mxu0 %v6373_v3 }
0x2646   :  { %5252 = vmatprep.subr.mxu0 %v5489_v1 }
0x2647   :  { %5253 = vmatpush3.msra.mxu0 %v6380_v6 }
0x2648   :  { %5254 = vmatprep.subr.mxu0 %v5489_v1 }
0x2649   :  { %5255 = vmatpush3.msra.mxu0 %v6387_v8 }
0x264a   :  { %5256 = vmatprep.subr.mxu0 %v5489_v1 }
0x264b   :  { %5257 = vmatpush3.msra.mxu0 %v6394_v12 }
0x264c   :  { %5258 = vmatprep.subr.mxu0 %v5489_v1 }
0x264d   :  { %5259 = vmatpush3.msra.mxu0 %v6401_v14 }
0x264e   :  { %5260 = vmatprep.subr.mxu0 %v5489_v1 }
0x264f   :  { %5261 = vmatpush3.msra.mxu0 %v6408_v15 }
0x2650   :  { %5262 = vmatprep.subr.mxu0 %v5489_v1 }
0x2651   :  { %5263 = vmatpush3.msra.mxu0 %v6415_v17 }
0x2652   :  { %5264 = vmatprep.subr.mxu0 %v5489_v1 }
0x2653   :  { %5265 = vmatpush3.msra.mxu0 %v6422_v20 }
0x2654   :  { %5266 = vmatprep.subr.mxu0 %v5489_v1 }
0x2655   :  { %5267 = vmatpush3.msra.mxu0 %v6429_v22 }
0x2656   :  { %5268 = vmatprep.subr.mxu0 %v5489_v1 }
0x2657   :  { %5269 = vmatpush3.msra.mxu0 %v6436_v23 }
0x2658   :  { %5270 = vmatprep.subr.mxu0 %v5489_v1 }
0x2659   :  { %5271 = vmatpush3.msra.mxu0 %v6443_v24  ;;  %v4154_v24 = vld [vmem:[%s7051_s0 + $0xe] sm:$0x3] }
0x265a   :  { %5286 = vmatprep.subr.mxu0 %v5489_v1  ;;  %5273 = vmatmul.mubr.f32.vlgmr.msra.gmra.mxu0 %v4154_v24 }
0x265b   :  { %5288 = vmatprep.mubr.msk.f32.mxu0 %vm5490_vm1, %v5489_v1 }
0x26fa   :  { %v3461_v11 = vpop.f32.mrf.mxu0 }
0x26fb   :  { %v3462_v9 = vadd.f32 %v6450_v26, %v3461_v11  ;;  %v5459_v26 = vld [vmem:[%s7055_s4] sm:$0xff] }
0x26fc   :  { %v5204_v13 = vpop.f32.mrf.mxu0  ;;  %5287 = vmatpush3.msra.mxu0 %v5459_v26 }
0x26fd   :  { %4151 = vst [vmem:[%s7062_s11 + $0xc] sm:$0x3] %v3462_v9  ;;  %v3467_v3 = vsel %vm518_vm6, %v3462_v9, -inf  ;;  %5291 = vmatprep.subr.mxu0 %v5489_v1 }
0x26fe   :  { %3468 = vmax.xlane.f32.xlu1 %v3467_v3 }
0x271a   :  { %v3631_v39 = vpop.f32.mrf.mxu0 }
0x271c   :  { %v5274_v40 = vpop.f32.mrf.mxu0 }
0x2787   :  { %v3469_v6 = vpop.xlane.xlu1 %3468 }
0x2788   :  { %vm3470_vm10 = vcmp.ge.f32.partialorder %v3462_v9, %v3469_v6 }
0x2789   :  { %v3471_v8 = vsel %vm3470_vm10, %v5845_v31, 128 }
0x278a   :  { %v3472_v12 = vsel %vm518_vm6, %v3471_v8, 2147483647 }
0x278b   :  { %v3474_v14 = vshra.s32 %v3472_v12, 16  ;;  %v3473_v17 = vand.u32 65535, %v3472_v12 }
0x278d   :  { %v3476_v15 = vcvt.s32.f32 %v3474_v14  ;;  %v3475_v22 = vcvt.s32.f32 %v3473_v17 }
0x278f   :  { %3477 = vmin.xlane.f32.xlu0 %v3476_v15 }
0x2818   :  { %v3478_v20 = vpop.xlane.xlu0 %3477 }
0x2819   :  { %vm3479_vm11 = vcmp.eq.f32.partialorder %v3476_v15, %v3478_v20  ;;  %v3484_v28 = vcvt.f32.s32 %v3478_v20 }
0x281a   :  { %v3480_v23 = vsel %vm3479_vm11, %v3475_v22, inf }
0x281b   :  { %3481 = vmin.xlane.f32.xlu0 %v3480_v23  ;;  %v3485_v33 = vshll.u32 %v3484_v28, 16 }
0x28a4   :  { %v3482_v50 = vpop.xlane.xlu0 %3481 }
0x28a5   :  { %v3483_v34 = vcvt.f32.s32 %v3482_v50 }
0x28a7   :  { %v3486_v56 = vadd.s32 %v3485_v33, %v3483_v34 }
0x28a9   :  { %v3487_v54 = vcvt.s32.f32 %v3486_v56  ;;  %vm3490_vm12 = vcmp.eq.s32.totalorder %v5845_v31, %v3486_v56 }
0x28aa   :  { %5238 = vmatmul.mubr.msk.f32.vlgmr.msra.gmra.mxu1 %vm3490_vm12, %v5495_v30 }
0x28ab   :  { %3489 = vst.msk [vmem:[#allocation5 + $0xc] sm:$0x3] %vm542_vm9, %v3487_v54  ;;  %5276 = vmatpush3.msra.mxu1 %v5460_v59  ;;  %5283 = vmatprep.mubr.msk.f32.mxu1 %vm5490_vm1, %v5489_v1 }
0x28ac   :  { %5277 = vmatprep.subr.mxu1 %v5489_v1 }
0x28ad   :  { %5278 = vmatpush3.msra.mxu1 %v5461_v4 }
0x28ae   :  { %5279 = vmatprep.subr.mxu1 %v5489_v1 }
0x28af   :  { %5280 = vmatpush3.msra.mxu1 %v5462_v5 }
0x28b0   :  { %5281 = vmatprep.subr.mxu1 %v5489_v1 }
0x28b1   :  { %5282 = vmatpush3.msra.mxu1 %v5463_v38 }
0x28b2   :  { %5284 = vmatmul.mubr.msk.f32.vlgmr.msra.gmra.mxu1 %vm183_vm3, %v4155_v35  ;;  %5298 = vmatprep.subr.mxu1 %v5489_v1 }
0x28b3   :  { %5299 = vmatpush3.msra.mxu1 %v6486_v41  ;;  %5302 = vmatprep.mubr.msk.f32.mxu1 %vm5490_vm1, %v5489_v1  ;;  %v5465_v41 = vld [vmem:[%s7056_s5] sm:$0xff] }
0x28b4   :  { %5300 = vmatprep.subr.mxu1 %v5489_v1 }
0x28b5   :  { %5301 = vmatpush3.msra.mxu1 %v6495_v42  ;;  %v3635_v42 = vadd.f32 %v6502_v44, %v3631_v39 }
0x296a   :  { %v3559_v43 = vpop.f32.mrf.mxu1 }
0x296b   :  { %5289 = vmatmul.mubr.msk.f32.vlgmr.msra.gmra.mxu0 %vm258_vm4, %v3559_v43 }
0x296c   :  { %5292 = vmatpush3.msra.mxu0 %v5464_v45  ;;  %v5239_v46 = vpop.f32.mrf.mxu1  ;;  %5295 = vmatprep.mubr.msk.f32.mxu0 %vm5490_vm1, %v5489_v1 }
0x296d   :  { %5293 = vmatprep.subr.mxu0 %v5489_v1 }
0x296e   :  { %5294 = vmatpush3.msra.mxu0 %v5465_v41 }
0x296f   :  { %5296 = vmatmul.mubr.msk.f32.vlgmr.msra.gmra.mxu0 %vm333_vm5, %v6890_v55  ;;  %5305 = vmatprep.subr.mxu0 %v5489_v1 }
0x2970   :  { %5306 = vmatpush3.msra.mxu0 %v6517_v61  ;;  %5337 = vmatprep.mubr.msk.f32.mxu0 %vm5490_vm1, %v5489_v1 }
0x2971   :  { %5307 = vmatprep.subr.mxu0 %v5489_v1 }
0x2972   :  { %v3707_v47 = vpop.f32.mrf.mxu1  ;;  %5308 = vmatpush3.msra.mxu0 %v6526_v7 }
0x2973   :  { %v3711_v48 = vadd.f32 %v3707_v47, %v3635_v42  ;;  %5309 = vmatprep.subr.mxu0 %v5489_v1 }
0x2974   :  { %v5285_v36 = vpop.f32.mrf.mxu1  ;;  %5310 = vmatpush3.msra.mxu0 %v6533_v51 }
0x2975   :  { %5311 = vmatprep.subr.mxu0 %v5489_v1 }
0x2976   :  { %5312 = vmatpush3.msra.mxu0 %v6540_v52 }
0x2977   :  { %5313 = vmatprep.subr.mxu0 %v5489_v1 }
0x2978   :  { %5314 = vmatpush3.msra.mxu0 %v6547_v25 }
0x2979   :  { %5315 = vmatprep.subr.mxu0 %v5489_v1 }
0x297a   :  { %5316 = vmatpush3.msra.mxu0 %v6554_v27 }
0x297b   :  { %5317 = vmatprep.subr.mxu0 %v5489_v1 }
0x297c   :  { %5318 = vmatpush3.msra.mxu0 %v6561_v2 }
0x297d   :  { %5319 = vmatprep.subr.mxu0 %v5489_v1 }
0x297e   :  { %5320 = vmatpush3.msra.mxu0 %v6568_v53 }
0x297f   :  { %5321 = vmatprep.subr.mxu0 %v5489_v1 }
0x2980   :  { %5322 = vmatpush3.msra.mxu0 %v6575_v57 }
0x2981   :  { %5323 = vmatprep.subr.mxu0 %v5489_v1 }
0x2982   :  { %5324 = vmatpush3.msra.mxu0 %v6582_v62 }
0x2983   :  { %5325 = vmatprep.subr.mxu0 %v5489_v1 }
0x2984   :  { %5326 = vmatpush3.msra.mxu0 %v6589_v10 }
0x2985   :  { %5327 = vmatprep.subr.mxu0 %v5489_v1 }
0x2986   :  { %5328 = vmatpush3.msra.mxu0 %v6596_v16 }
0x2987   :  { %5329 = vmatprep.subr.mxu0 %v5489_v1 }
0x2988   :  { %5330 = vmatpush3.msra.mxu0 %v6603_v21 }
0x2989   :  { %5331 = vmatprep.subr.mxu0 %v5489_v1 }
0x298a   :  { %5332 = vmatpush3.msra.mxu0 %v6610_v29 }
0x298b   :  { %5333 = vmatprep.subr.mxu0 %v5489_v1 }
0x298c   :  { %5334 = vmatpush3.msra.mxu0 %v6617_v60 }
0x298d   :  { %5335 = vmatprep.subr.mxu0 %v5489_v1 }
0x298e   :  { %5336 = vmatpush3.msra.mxu0 %v6624_v32 }
0x2a2b   :  { %v3781_v44 = vpop.f32.mrf.mxu0 }
0x2a2c   :  { %v3785_v7 = vadd.f32 %v3781_v44, %v3711_v48 }
0x2a2d   :  { %v5290_v61 = vpop.f32.mrf.mxu0 }
0x2a2f   :  { %v3852_v51 = vpop.f32.mrf.mxu0 }
0x2a30   :  { %v3856_v52 = vadd.f32 %v3852_v51, %v3785_v7 }
0x2a31   :  { %v5297_v25 = vpop.f32.mrf.mxu0 }
0x2a32   :  { %5406 = vtanh.f32 %v3856_v52  ;;  %v4159_v2 = vmul.f32 -1.442695, %v3856_v52 }
0x2a34   :  { %5408 = vpow2.f32 %v4159_v2 }
0x2a3f   :  { %v5407_v27 = vpop.eup %5406 }
0x2a40   :  { %3866 = vrot.lane.b32.xlu1 %v5407_v27, %s5491_s19 }
0x2a41   :  { %v5409_v53 = vpop.eup %5408 }
0x2a42   :  { %v3860_v57 = vadd.f32 1.0, %v5409_v53 }
0x2a44   :  { %5410 = vrcp.f32 %v3860_v57 }
0x2a51   :  { %v5411_v62 = vpop.eup %5410 }
0x2a52   :  { %v3864_v16 = vmul.f32 %v5411_v62, %v6885_v37  ;;  %v5466_v37 = vld [vmem:[%s7059_s8] ss:$0 sm:$0xff]  ;;  %s5496_s8 = smov 112  }
0x2ab2   :  { %v3867_v10 = vpop.permute.xlu1 %3866 }
0x2ab3   :  { %v3869_v1 = vmul.f32 %v5411_v62, %v3867_v10 }
0x2ab5   :  { %3871 = vrot.lane.b32.xlu0 %v3869_v1, %s5492_s20 }
0x2b27   :  { %v3872_v21 = vpop.permute.xlu0 %3871 }
0x2b28   :  { %v3874_v29 = vadd.f32 %v3872_v21, %v3864_v16 }
0x2b2a   :  { %5412 = vtanh.f32 %v3874_v29 }
0x2b37   :  { %v5413_v60 = vpop.eup %5412 }
0x2b38   :  { %3877 = vrot.lane.b32.xlu1 %v5413_v60, %s5493_s10 }
0x2baa   :  { %v3878_v32 = vpop.permute.xlu1 %3877 }
0x2bab   :  { %v3880_v58 = vmul.f32 %v5411_v62, %v3878_v32 }
0x2bad   :  { %3882 = vrot.lane.b32.xlu1 %v3880_v58, %s5494_s27 }
0x2c1f   :  { %v3883_v0 = vpop.permute.xlu1 %3882 }
0x2c20   :  { %4056 = vst.msk [vmem:[#allocation2] sm:$0x3] %vm45_vm0, %v3883_v0  ;;  %5303 = vmatmul.mubr.msk.f32.vlgmr.msra.gmra.mxu1 %vm333_vm5, %v3883_v0 }
0x2ce0   :  { %v3952_v63 = vpop.f32.mrf.mxu1 }
0x2ce1   :  { %v3953_v19 = vadd.f32 %v5466_v37, %v3952_v63 }
0x2ce2   :  { %v5304_v55 = vpop.f32.mrf.mxu1 }
0x2ce3   :  { %4161 = vst [vmem:[%s7062_s11 + $0xe] sm:$0x3] %v3953_v19  ;;  %v3958_v49 = vsel %vm518_vm6, %v3953_v19, -inf  ;;  %s5497_s11 = smov [#allocation5]  }
0x2ce4   :  { %3959 = vmax.xlane.f32.xlu0 %v3958_v49  ;;  %s4071_s27 = sshll.u32 %s5497_s11, 4  ;;  %s4072_s27 = int_to_ptr.vmem [resolvable:$true] %s4071_s27 }
0x2ce5   :  { %s5467_s26 = scalar_lea.vmem %s4072_s27, 256  ;;  %p5472_p1 = scmp.lt.s32.totalorder %s4072_s27, %s4072_s27 }
0x2ce6   :  { %p5468_p0 = scmp.ne.s32.totalorder %s4072_s27, %s5467_s26  ;;  %p5473_p2 = scmp.lt.s32.totalorder %s5467_s26, %s5467_s26 }
0x2ce8   :  { %p5474_p3 = por %p5473_p2, %p5472_p1 }
0x2cea   :  { %p5475_p4 = pnand %p5474_p3, %p5468_p0 }
0x2d6d   :  { %v3960_v18 = vpop.xlane.xlu0 %3959 }
0x2d6e   :  { %vm3961_vm1 = vcmp.ge.f32.partialorder %v3953_v19, %v3960_v18 }
0x2d6f   :  { %v3962_v11 = vsel %vm3961_vm1, %v5845_v31, 128 }
0x2d70   :  { %v3963_v9 = vsel %vm518_vm6, %v3962_v11, 2147483647 }
0x2d71   :  { %v3965_v13 = vshra.s32 %v3963_v9, 16  ;;  %v3964_v6 = vand.u32 65535, %v3963_v9 }
0x2d73   :  { %v3967_v3 = vcvt.s32.f32 %v3965_v13  ;;  %v3966_v12 = vcvt.s32.f32 %v3964_v6 }
0x2d75   :  { %3968 = vmin.xlane.f32.xlu1 %v3967_v3 }
0x2dfe   :  { %v3969_v8 = vpop.xlane.xlu1 %3968 }
0x2dff   :  { %vm3970_vm3 = vcmp.eq.f32.partialorder %v3967_v3, %v3969_v8  ;;  %v3975_v15 = vcvt.f32.s32 %v3969_v8 }
0x2e00   :  { %v3971_v14 = vsel %vm3970_vm3, %v3966_v12, inf }
0x2e01   :  { %3972 = vmin.xlane.f32.xlu0 %v3971_v14  ;;  %v3976_v20 = vshll.u32 %v3975_v15, 16 }
0x2e17   :  { %4058 = vrot.lane.b32.xlu0 %v3874_v29, %s5496_s8 }
0x2e8a   :  { %v3973_v17 = vpop.xlane.xlu0 %3972 }
0x2e8b   :  { %v3974_v22 = vcvt.f32.s32 %v3973_v17 }
0x2e8d   :  { %v3977_v23 = vadd.s32 %v3976_v20, %v3974_v22 }
0x2e8e   :  { %v4059_v24 = vpop.permute.xlu0 %4058 }
0x2e8f   :  { %v3978_v26 = vcvt.s32.f32 %v3977_v23  ;;  %vm3981_vm4 = vcmp.eq.s32.totalorder %v5845_v31, %v3977_v23  ;;  %4061 = vst.msk [vmem:[#allocation3] sm:$0x3] %vm45_vm0, %v4059_v24 }
0x2e90   :  { %5338 = vmatmul.mubr.msk.f32.vlgmr.msra.gmra.mxu0 %vm3981_vm4, %v5495_v30 }
0x2e91   :  { %3980 = vst.msk [vmem:[#allocation5 + $0xe] sm:$0x3] %vm542_vm9, %v3978_v26 }
0x2e92   :  { %5478 = shalt.err (!%p5475_p4)
}
0x2e93   :  { %s5498_s28 = smov 2  }
0x2e94   :  { %4077 = dma.vmem_to_hbm [thread:$0]  %s4072_s27, 256, %s7063_s12, [#allocation6], %s5493_s10, %s5493_s10, %s5498_s28  }
0x2f50   :  { %v4050_v31 = vpop.f32.mrf.mxu0 }
0x2f51   :  { %4063 = vst.msk [vmem:[#allocation4] sm:$0x3] %vm56_vm2, %v4050_v31 }
0x2f52   :  { %v5339_v30 = vpop.f32.mrf.mxu0 }
0x2f53   :  { %5487 = dma.done.wait [#allocation6], 256  }
0x2f54   :  { %5488 = vsyncadd [#allocation6], 4294967040 }
0x2f55   :  { %4083 = vsyncpa [#allocation6], 1 }

// kernel: cpos_forward.3
= control target key start
LH: loop header
LB: loop body
LE: loop exit
PB: predicated region body
PF: predicated region fallthrough
CT: control target
= control target key end

     0   :  { %v4405_v0 = vmov 0.0   ;;  %vm4406_vm0 = vmmov 0   ;;  %vm49_vm1 = vcmask 58368   ;;  %vm38_vm2 = vcmask 123904   ;;  %s4407_s12 = smov 96   ;;  %s4408_s13 = smov 16   ;;  %s5488_s1 = inlined_call_operand.vmem [shape: f32[32,64], index: 1, kind: input, shape index: {}]   ;;  %s5489_s3 = inlined_call_operand.vmem [shape: f32[16,64], index: 3, kind: input, shape index: {}]   ;;  %s5490_s8 = inlined_call_operand.vmem [shape: f32[1,8], index: 8, kind: input, shape index: {}]   ;;  %s5491_s0 = inlined_call_operand.vmem [shape: f32[8,2,32], index: 0, kind: input, shape index: {}]   ;;  %s5492_s2 = inlined_call_operand.vmem [shape: f32[8,64], index: 2, kind: input, shape index: {}]   ;;  %s5493_s4 = inlined_call_operand.vmem [shape: f32[1,64], index: 4, kind: input, shape index: {}]   ;;  %s5494_s5 = inlined_call_operand.vmem [shape: f32[16,128], index: 5, kind: input, shape index: {}]   ;;  %s5495_s6 = inlined_call_operand.vmem [shape: f32[1,128], index: 6, kind: input, shape index: {}]   ;;  %s5496_s9 = inlined_call_operand.vmem [shape: f32[8,2,128], index: 9, kind: output, shape index: {0}]   ;;  %s5497_s7 = inlined_call_operand.vmem [shape: f32[128,8], index: 7, kind: input, shape index: {}]   ;;  %s5498_s10 = inlined_call_operand.vmem [shape: f32[8,2,1], index: 10, kind: output, shape index: {1}]  }
   0x1   :  { %3786 = vmatprep.subr.mxu0 %v4405_v0  ;;  %v4472_v1 = vld [vmem:[%s5488_s1 + $0x18] sm:$0xff]  ;;  %v4477_v2 = vld [vmem:[%s5488_s1 + $0x10] sm:$0xff]  ;;  %3794 = vmatprep.mubr.msk.f32.mxu0 %vm4406_vm0, %v4405_v0  ;;  %v4485_v3 = vld [vmem:[%s5488_s1 + $0x8] sm:$0xff]  ;;  %39 = vst.msk [vmem:[#allocation2] sm:$0x3] %vm38_vm2, %v4405_v0  ;;  %vm82_vm3 = vcmask 261120   ;;  %v427_v45 = vlaneseq }
   0x2   :  { %3787 = vmatpush3.msra.mxu0 %v4472_v1  ;;  %3802 = vmatprep.subr.mxu1 %v4405_v0  ;;  %40 = vst.msk [vmem:[#allocation3] sm:$0x3] %vm38_vm2, %v4405_v0  ;;  %v4496_v4 = vld [vmem:[%s5489_s3 + $0x8] sm:$0xff]  ;;  %v3466_v5 = vld [vmem:[%s5490_s8] ss:$0 sm:$0xff]  ;;  %vm238_vm4 = vcmask 130048  }
   0x3   :  { %3788 = vmatprep.subr.mxu0 %v4405_v0  ;;  %v4504_v6 = vld [vmem:[%s5489_s3] sm:$0xff]  ;;  %3806 = vmatprep.mubr.msk.f32.mxu1 %vm4406_vm0, %v4405_v0  ;;  %50 = vst.msk [vmem:[#allocation4] sm:$0x3] %vm49_vm1, %v3466_v5  ;;  %vm163_vm5 = vcmask 64512   ;;  %v4558_v34 = vld [vmem:[%s5494_s5 + $0x8] sm:$0xff]  ;;  %s4409_s18 = smov 32  }
   0x4   :  { %3789 = vmatpush3.msra.mxu0 %v4477_v2  ;;  %3803 = vmatpush3.msra.mxu1 %v4496_v4  ;;  %v4515_v7 = vld [vmem:[%s5488_s1] sm:$0xff]  ;;  %s4410_s19 = smov 80   ;;  %vm423_vm6 = vcmask 1041408   ;;  %v4589_v46 = vand.u32 127, %v427_v45  ;;  %v4596_v52 = vld [vmem:[%s5497_s7 + $0x78] sm:$0xff]  ;;  %v4601_v53 = vld [vmem:[%s5497_s7 + $0x70] sm:$0xff] }
   0x5   :  { %3790 = vmatprep.subr.mxu0 %v4405_v0  ;;  %3804 = vmatprep.subr.mxu1 %v4405_v0  ;;  %v81_v8 = vld [vmem:[%s5491_s0] sm:$0x3]  ;;  %v4608_v54 = vld [vmem:[%s5497_s7 + $0x68] sm:$0xff]  ;;  %v4622_v56 = vld [vmem:[%s5497_s7 + $0x58] sm:$0xff]  ;;  %vm447_vm9 = vcmask 1024  }
   0x6   :  { %3791 = vmatpush3.msra.mxu0 %v4485_v3  ;;  %3805 = vmatpush3.msra.mxu1 %v4504_v6  ;;  %v4527_v9 = vld [vmem:[%s5492_s2] sm:$0xff]  ;;  %v4629_v57 = vld [vmem:[%s5497_s7 + $0x50] sm:$0xff]  ;;  %v4636_v58 = vld [vmem:[%s5497_s7 + $0x48] sm:$0xff] }
   0x7   :  { %3792 = vmatprep.subr.mxu0 %v4405_v0  ;;  %3809 = vmatprep.subr.mxu1 %v4405_v0  ;;  %v4546_v12 = vld [vmem:[%s5493_s4] ss:$0 sm:$0xff]  ;;  %v4650_v60 = vld [vmem:[%s5497_s7 + $0x38] sm:$0xff]  ;;  %v4657_v61 = vld [vmem:[%s5497_s7 + $0x30] sm:$0xff] }
   0x8   :  { %3793 = vmatpush3.msra.mxu0 %v4515_v7  ;;  %v78_v10 = vld [vmem:[#allocation2] sm:$0x3]  ;;  %v4664_v62 = vld [vmem:[%s5497_s7 + $0x28] sm:$0xff]  ;;  %v4678_v5 = vld [vmem:[%s5497_s7 + $0x18] sm:$0xff] }
   0x9   :  { %3795 = vmatmul.mubr.msk.f32.vlgmr.msra.gmra.mxu0 %vm82_vm3, %v81_v8  ;;  %3797 = vmatprep.subr.mxu0 %v4405_v0  ;;  %v79_v23 = vld [vmem:[#allocation3] sm:$0x3]  ;;  %v4582_v40 = vld [vmem:[%s5495_s6] ss:$0 sm:$0xff] }
   0xa   :  { %3798 = vmatpush3.msra.mxu0 %v4527_v9  ;;  %3799 = vmatprep.mubr.msk.f32.mxu0 %vm4406_vm0, %v4405_v0  ;;  %v80_v11 = vld [vmem:[#allocation4] sm:$0x3] }
   0xb   :  { %3807 = vmatmul.mubr.msk.f32.vlgmr.msra.gmra.mxu1 %vm238_vm4, %v78_v10  ;;  %3816 = vmatprep.subr.mxu0 %v4405_v0  ;;  %v4563_v35 = vld [vmem:[%s5494_s5] sm:$0xff] }
   0xc   :  { %3813 = vmatprep.mubr.msk.f32.mxu1 %vm4406_vm0, %v4405_v0  ;;  %3810 = vmatpush3.msra.mxu1 %v4558_v34  ;;  %v4615_v55 = vld [vmem:[%s5497_s7 + $0x60] sm:$0xff] }
   0xd   :  { %3800 = vmatmul.mubr.msk.f32.vlgmr.msra.gmra.mxu0 %vm163_vm5, %v80_v11  ;;  %3811 = vmatprep.subr.mxu1 %v4405_v0  ;;  %v4643_v59 = vld [vmem:[%s5497_s7 + $0x40] sm:$0xff] }
   0xe   :  { %3848 = vmatprep.mubr.msk.f32.mxu0 %vm4406_vm0, %v4405_v0  ;;  %3812 = vmatpush3.msra.mxu1 %v4563_v35  ;;  %v4671_v63 = vld [vmem:[%s5497_s7 + $0x20] sm:$0xff] }
   0xf   :  { %3862 = vmatprep.subr.mxu1 %v4405_v0  ;;  %3817 = vmatpush3.msra.mxu0 %v4596_v52 }
  0x10   :  { %3818 = vmatprep.subr.mxu0 %v4405_v0 }
  0x11   :  { %3819 = vmatpush3.msra.mxu0 %v4601_v53 }
  0x12   :  { %3820 = vmatprep.subr.mxu0 %v4405_v0 }
  0x13   :  { %3821 = vmatpush3.msra.mxu0 %v4608_v54 }
  0x14   :  { %3822 = vmatprep.subr.mxu0 %v4405_v0 }
  0x15   :  { %3823 = vmatpush3.msra.mxu0 %v4615_v55 }
  0x16   :  { %3824 = vmatprep.subr.mxu0 %v4405_v0 }
  0x17   :  { %3825 = vmatpush3.msra.mxu0 %v4622_v56 }
  0x18   :  { %3826 = vmatprep.subr.mxu0 %v4405_v0 }
  0x19   :  { %3827 = vmatpush3.msra.mxu0 %v4629_v57 }
  0x1a   :  { %3828 = vmatprep.subr.mxu0 %v4405_v0 }
  0x1b   :  { %3829 = vmatpush3.msra.mxu0 %v4636_v58 }
  0x1c   :  { %3830 = vmatprep.subr.mxu0 %v4405_v0 }
  0x1d   :  { %3831 = vmatpush3.msra.mxu0 %v4643_v59 }
  0x1e   :  { %3832 = vmatprep.subr.mxu0 %v4405_v0 }
  0x1f   :  { %3833 = vmatpush3.msra.mxu0 %v4650_v60 }
  0x20   :  { %3834 = vmatprep.subr.mxu0 %v4405_v0 }
  0x21   :  { %3835 = vmatpush3.msra.mxu0 %v4657_v61 }
  0x22   :  { %3836 = vmatprep.subr.mxu0 %v4405_v0 }
  0x23   :  { %3837 = vmatpush3.msra.mxu0 %v4664_v62 }
  0x24   :  { %3838 = vmatprep.subr.mxu0 %v4405_v0 }
  0x25   :  { %3839 = vmatpush3.msra.mxu0 %v4671_v63 }
  0x26   :  { %3840 = vmatprep.subr.mxu0 %v4405_v0 }
  0x27   :  { %3841 = vmatpush3.msra.mxu0 %v4678_v5 }
  0x28   :  { %3842 = vmatprep.subr.mxu0 %v4405_v0 }
  0xc9   :  { %v152_v13 = vpop.f32.mrf.mxu0 }
  0xca   :  { %v162_v16 = vadd.f32 %v4546_v12, %v152_v13 }
  0xcb   :  { %v3796_v14 = vpop.f32.mrf.mxu0  ;;  %v308_v15 = vpop.f32.mrf.mxu1 }
  0xcc   :  { %v4687_v14 = vld [vmem:[%s5497_s7 + $0x10] sm:$0xff] }
  0xcd   :  { %v233_v17 = vpop.f32.mrf.mxu0  ;;  %v3808_v18 = vpop.f32.mrf.mxu1  ;;  %3843 = vmatpush3.msra.mxu0 %v4687_v14 }
  0xce   :  { %v237_v19 = vadd.f32 %v233_v17, %v162_v16  ;;  %3844 = vmatprep.subr.mxu0 %v4405_v0  ;;  %v4701_v16 = vld [vmem:[%s5497_s7] sm:$0xff] }
  0xcf   :  { %v3801_v20 = vpop.f32.mrf.mxu0 }
  0xd0   :  { %v312_v21 = vadd.f32 %v308_v15, %v237_v19  ;;  %v4694_v15 = vld [vmem:[%s5497_s7 + $0x8] sm:$0xff] }
  0xd1   :  { %3845 = vmatpush3.msra.mxu0 %v4694_v15 }
  0xd2   :  { %4314 = vtanh.f32 %v312_v21  ;;  %v3471_v24 = vmul.f32 -1.442695, %v312_v21  ;;  %3846 = vmatprep.subr.mxu0 %v4405_v0 }
  0xd3   :  { %3847 = vmatpush3.msra.mxu0 %v4701_v16 }
  0xd4   :  { %4316 = vpow2.f32 %v3471_v24  ;;  %3851 = vmatprep.subr.mxu0 %v4405_v0  ;;  %v3476_v24 = vld [vmem:[%s5491_s0 + $0x2] sm:$0x3] }
  0xdf   :  { %v4315_v22 = vpop.eup %4314 }
  0xe0   :  { %326 = vrot.lane.b32.xlu0 %v4315_v22, %s4407_s12 }
  0xe1   :  { %v4317_v25 = vpop.eup %4316 }
  0xe2   :  { %v316_v26 = vadd.f32 1.0, %v4317_v25 }
  0xe4   :  { %321 = vrot.lane.b32.xlu0 %v79_v23, %s4408_s13  ;;  %4318 = vrcp.f32 %v316_v26  ;;  %v4411_v23 = vmov 1.0  }
  0xf1   :  { %v4319_v27 = vpop.eup %4318 }
 0x152   :  { %v327_v28 = vpop.permute.xlu0 %326 }
 0x153   :  { %v329_v29 = vmul.f32 %v4319_v27, %v327_v28 }
 0x155   :  { %331 = vrot.lane.b32.xlu1 %v329_v29, %s4408_s13 }
 0x156   :  { %v322_v30 = vpop.permute.xlu0 %321 }
 0x157   :  { %v324_v31 = vmul.f32 %v4319_v27, %v322_v30 }
 0x1c7   :  { %v332_v32 = vpop.permute.xlu1 %331 }
 0x1c8   :  { %v4552_v33 = vadd.f32 %v332_v32, %v324_v31 }
 0x1ca   :  { %4320 = vtanh.f32 %v4552_v33 }
 0x1d7   :  { %v4321_v36 = vpop.eup %4320 }
 0x1d8   :  { %337 = vrot.lane.b32.xlu1 %v4321_v36, %s4409_s18 }
 0x24a   :  { %v338_v37 = vpop.permute.xlu1 %337 }
 0x24b   :  { %v340_v38 = vmul.f32 %v4319_v27, %v338_v37 }
 0x24d   :  { %348 = vrot.lane.b32.xlu0 %v340_v38, %s4410_s19 }
 0x2bf   :  { %v4571_v39 = vpop.permute.xlu0 %348 }
 0x2c0   :  { %3814 = vmatmul.mubr.msk.f32.vlgmr.msra.gmra.mxu1 %vm238_vm4, %v4571_v39 }
 0x2c1   :  { %3863 = vmatpush3.msra.mxu1 %v4527_v9  ;;  %3864 = vmatprep.mubr.msk.f32.mxu1 %vm4406_vm0, %v4405_v0 }
 0x2c2   :  { %3867 = vmatprep.subr.mxu1 %v4405_v0 }
 0x380   :  { %v418_v41 = vpop.f32.mrf.mxu1 }
 0x381   :  { %v419_v42 = vadd.f32 %v4582_v40, %v418_v41 }
 0x382   :  { %v3815_v43 = vpop.f32.mrf.mxu1 }
 0x383   :  { %422 = vst [vmem:[%s5496_s9] sm:$0x3] %v419_v42  ;;  %v424_v44 = vsel %vm423_vm6, %v419_v42, -inf }
 0x384   :  { %425 = vmax.xlane.f32.xlu1 %v424_v44 }
 0x40d   :  { %v426_v47 = vpop.xlane.xlu1 %425 }
 0x40e   :  { %vm429_vm7 = vcmp.ge.f32.partialorder %v419_v42, %v426_v47 }
 0x40f   :  { %v430_v48 = vsel %vm429_vm7, %v4589_v46, 128 }
 0x410   :  { %v431_v49 = vsel %vm423_vm6, %v430_v48, 2147483647 }
 0x411   :  { %v433_v50 = vshra.s32 %v431_v49, 16  ;;  %v432_v8 = vand.u32 65535, %v431_v49 }
 0x413   :  { %v435_v51 = vcvt.s32.f32 %v433_v50  ;;  %v434_v11 = vcvt.s32.f32 %v432_v8 }
 0x415   :  { %436 = vmin.xlane.f32.xlu0 %v435_v51 }
 0x49e   :  { %v437_v10 = vpop.xlane.xlu0 %436 }
 0x49f   :  { %vm438_vm8 = vcmp.eq.f32.partialorder %v435_v51, %v437_v10  ;;  %v443_v17 = vcvt.f32.s32 %v437_v10 }
 0x4a0   :  { %v439_v13 = vsel %vm438_vm8, %v434_v11, inf }
 0x4a1   :  { %440 = vmin.xlane.f32.xlu0 %v439_v13  ;;  %v444_v19 = vshll.u32 %v443_v17, 16 }
 0x52a   :  { %v441_v18 = vpop.xlane.xlu0 %440 }
 0x52b   :  { %v442_v20 = vcvt.f32.s32 %v441_v18 }
 0x52d   :  { %v445_v21 = vadd.s32 %v444_v19, %v442_v20 }
 0x52f   :  { %v446_v22 = vcvt.s32.f32 %v445_v21  ;;  %vm449_vm10 = vcmp.eq.s32.totalorder %v4589_v46, %v445_v21 }
 0x530   :  { %3849 = vmatmul.mubr.msk.f32.vlgmr.msra.gmra.mxu0 %vm449_vm10, %v4411_v23 }
 0x531   :  { %448 = vst.msk [vmem:[%s5498_s10] sm:$0x3] %vm447_vm9, %v446_v22  ;;  %3852 = vmatpush3.msra.mxu0 %v4472_v1  ;;  %3859 = vmatprep.mubr.msk.f32.mxu0 %vm4406_vm0, %v4405_v0 }
 0x532   :  { %3853 = vmatprep.subr.mxu0 %v4405_v0 }
 0x533   :  { %3854 = vmatpush3.msra.mxu0 %v4477_v2 }
 0x534   :  { %3855 = vmatprep.subr.mxu0 %v4405_v0 }
 0x535   :  { %3856 = vmatpush3.msra.mxu0 %v4485_v3 }
 0x536   :  { %3857 = vmatprep.subr.mxu0 %v4405_v0 }
 0x537   :  { %3858 = vmatpush3.msra.mxu0 %v4515_v7 }
 0x538   :  { %3860 = vmatmul.mubr.msk.f32.vlgmr.msra.gmra.mxu0 %vm82_vm3, %v3476_v24  ;;  %3916 = vmatprep.subr.mxu0 %v4405_v0 }
 0x539   :  { %3917 = vmatpush3.msra.mxu0 %v4472_v1  ;;  %3924 = vmatprep.mubr.msk.f32.mxu0 %vm4406_vm0, %v4405_v0 }
 0x53a   :  { %3918 = vmatprep.subr.mxu0 %v4405_v0 }
 0x53b   :  { %3919 = vmatpush3.msra.mxu0 %v4477_v2 }
 0x53c   :  { %3920 = vmatprep.subr.mxu0 %v4405_v0 }
 0x53d   :  { %3921 = vmatpush3.msra.mxu0 %v4485_v3 }
 0x53e   :  { %3922 = vmatprep.subr.mxu0 %v4405_v0 }
 0x53f   :  { %3923 = vmatpush3.msra.mxu0 %v4515_v7 }
 0x540   :  { %3927 = vmatprep.subr.mxu0 %v4405_v0 }
 0x5f0   :  { %v518_v25 = vpop.f32.mrf.mxu0 }
 0x5f1   :  { %3865 = vmatmul.mubr.msk.f32.vlgmr.msra.gmra.mxu1 %vm163_vm5, %v518_v25 }
 0x5f2   :  { %v3850_v26 = vpop.f32.mrf.mxu0  ;;  %3868 = vmatpush3.msra.mxu1 %v4496_v4  ;;  %3871 = vmatprep.mubr.msk.f32.mxu1 %vm4406_vm0, %v4405_v0 }
 0x5f3   :  { %3869 = vmatprep.subr.mxu1 %v4405_v0 }
 0x5f4   :  { %3870 = vmatpush3.msra.mxu1 %v4504_v6 }
 0x5f5   :  { %3872 = vmatmul.mubr.msk.f32.vlgmr.msra.gmra.mxu1 %vm238_vm4, %v4571_v39  ;;  %3874 = vmatprep.subr.mxu1 %v4405_v0 }
 0x5f6   :  { %3875 = vmatpush3.msra.mxu1 %v4558_v34  ;;  %3878 = vmatprep.mubr.msk.f32.mxu1 %vm4406_vm0, %v4405_v0 }
 0x5f7   :  { %3876 = vmatprep.subr.mxu1 %v4405_v0 }
 0x5f8   :  { %v593_v27 = vpop.f32.mrf.mxu0  ;;  %3877 = vmatpush3.msra.mxu1 %v4563_v35 }
 0x5f9   :  { %3881 = vmatprep.subr.mxu1 %v4405_v0  ;;  %v597_v29 = vadd.f32 %v4546_v12, %v593_v27 }
 0x5fa   :  { %v3861_v28 = vpop.f32.mrf.mxu0 }
 0x6b1   :  { %v667_v30 = vpop.f32.mrf.mxu1 }
 0x6b2   :  { %v671_v32 = vadd.f32 %v667_v30, %v597_v29  ;;  %v3486_v29 = vld [vmem:[%s5491_s0 + $0x4] sm:$0x3] }
 0x6b3   :  { %v3866_v31 = vpop.f32.mrf.mxu1  ;;  %3925 = vmatmul.mubr.msk.f32.vlgmr.msra.gmra.mxu0 %vm82_vm3, %v3486_v29 }
 0x6b4   :  { %3928 = vmatpush3.msra.mxu0 %v4527_v9  ;;  %3929 = vmatprep.mubr.msk.f32.mxu0 %vm4406_vm0, %v4405_v0 }
 0x6b5   :  { %v738_v36 = vpop.f32.mrf.mxu1  ;;  %3932 = vmatprep.subr.mxu0 %v4405_v0 }
 0x6b6   :  { %v742_v37 = vadd.f32 %v738_v36, %v671_v32 }
 0x6b7   :  { %v3873_v38 = vpop.f32.mrf.mxu1 }
 0x6b8   :  { %4322 = vtanh.f32 %v742_v37  ;;  %v3480_v41 = vmul.f32 -1.442695, %v742_v37 }
 0x6ba   :  { %4324 = vpow2.f32 %v3480_v41 }
 0x6c5   :  { %v4323_v39 = vpop.eup %4322 }
 0x6c6   :  { %752 = vrot.lane.b32.xlu1 %v4323_v39, %s4407_s12 }
 0x6c7   :  { %v4325_v42 = vpop.eup %4324 }
 0x6c8   :  { %v746_v43 = vadd.f32 1.0, %v4325_v42 }
 0x6ca   :  { %4326 = vrcp.f32 %v746_v43 }
 0x6d7   :  { %v4327_v44 = vpop.eup %4326 }
 0x6d8   :  { %v750_v48 = vmul.f32 %v4327_v44, %v4552_v33 }
 0x738   :  { %v753_v45 = vpop.permute.xlu1 %752 }
 0x739   :  { %v755_v47 = vmul.f32 %v4327_v44, %v753_v45 }
 0x73b   :  { %757 = vrot.lane.b32.xlu0 %v755_v47, %s4408_s13 }
 0x773   :  { %v1011_v39 = vpop.f32.mrf.mxu0 }
 0x774   :  { %v1015_v45 = vadd.f32 %v4546_v12, %v1011_v39 }
 0x775   :  { %v3926_v41 = vpop.f32.mrf.mxu0 }
 0x7ad   :  { %v758_v49 = vpop.permute.xlu0 %757 }
 0x7ae   :  { %v4754_v50 = vadd.f32 %v758_v49, %v750_v48 }
 0x7b0   :  { %4328 = vtanh.f32 %v4754_v50 }
 0x7bd   :  { %v4329_v51 = vpop.eup %4328 }
 0x7be   :  { %763 = vrot.lane.b32.xlu1 %v4329_v51, %s4409_s18 }
 0x830   :  { %v764_v8 = vpop.permute.xlu1 %763 }
 0x831   :  { %v766_v10 = vmul.f32 %v4327_v44, %v764_v8 }
 0x833   :  { %768 = vrot.lane.b32.xlu1 %v766_v10, %s4410_s19 }
 0x8a5   :  { %v4759_v11 = vpop.permute.xlu1 %768 }
 0x8a6   :  { %3879 = vmatmul.mubr.msk.f32.vlgmr.msra.gmra.mxu1 %vm238_vm4, %v4759_v11 }
 0x8a7   :  { %3882 = vmatpush3.msra.mxu1 %v4596_v52  ;;  %3913 = vmatprep.mubr.msk.f32.mxu1 %vm4406_vm0, %v4405_v0 }
 0x8a8   :  { %3883 = vmatprep.subr.mxu1 %v4405_v0 }
 0x8a9   :  { %3884 = vmatpush3.msra.mxu1 %v4601_v53 }
 0x8aa   :  { %3885 = vmatprep.subr.mxu1 %v4405_v0 }
 0x8ab   :  { %3886 = vmatpush3.msra.mxu1 %v4608_v54 }
 0x8ac   :  { %3887 = vmatprep.subr.mxu1 %v4405_v0 }
 0x8ad   :  { %3888 = vmatpush3.msra.mxu1 %v4615_v55 }
 0x8ae   :  { %3889 = vmatprep.subr.mxu1 %v4405_v0 }
 0x8af   :  { %3890 = vmatpush3.msra.mxu1 %v4622_v56 }
 0x8b0   :  { %3891 = vmatprep.subr.mxu1 %v4405_v0 }
 0x8b1   :  { %3892 = vmatpush3.msra.mxu1 %v4629_v57 }
 0x8b2   :  { %3893 = vmatprep.subr.mxu1 %v4405_v0 }
 0x8b3   :  { %3894 = vmatpush3.msra.mxu1 %v4636_v58 }
 0x8b4   :  { %3895 = vmatprep.subr.mxu1 %v4405_v0 }
 0x8b5   :  { %3896 = vmatpush3.msra.mxu1 %v4643_v59 }
 0x8b6   :  { %3897 = vmatprep.subr.mxu1 %v4405_v0 }
 0x8b7   :  { %3898 = vmatpush3.msra.mxu1 %v4650_v60 }
 0x8b8   :  { %3899 = vmatprep.subr.mxu1 %v4405_v0 }
 0x8b9   :  { %3900 = vmatpush3.msra.mxu1 %v4657_v61 }
 0x8ba   :  { %3901 = vmatprep.subr.mxu1 %v4405_v0 }
 0x8bb   :  { %3902 = vmatpush3.msra.mxu1 %v4664_v62 }
 0x8bc   :  { %3903 = vmatprep.subr.mxu1 %v4405_v0 }
 0x8bd   :  { %3904 = vmatpush3.msra.mxu1 %v4671_v63 }
 0x8be   :  { %3905 = vmatprep.subr.mxu1 %v4405_v0 }
 0x8bf   :  { %3906 = vmatpush3.msra.mxu1 %v4678_v5 }
 0x8c0   :  { %3907 = vmatprep.subr.mxu1 %v4405_v0 }
 0x8c1   :  { %3908 = vmatpush3.msra.mxu1 %v4687_v14 }
 0x8c2   :  { %3909 = vmatprep.subr.mxu1 %v4405_v0 }
 0x8c3   :  { %3910 = vmatpush3.msra.mxu1 %v4694_v15 }
 0x8c4   :  { %3911 = vmatprep.subr.mxu1 %v4405_v0 }
 0x8c5   :  { %3912 = vmatpush3.msra.mxu1 %v4701_v16 }
 0x8c6   :  { %3981 = vmatprep.subr.mxu1 %v4405_v0 }
 0x966   :  { %v838_v33 = vpop.f32.mrf.mxu1 }
 0x967   :  { %v839_v13 = vadd.f32 %v4582_v40, %v838_v33 }
 0x968   :  { %v3880_v17 = vpop.f32.mrf.mxu1 }
 0x969   :  { %3482 = vst [vmem:[%s5496_s9 + $0x2] sm:$0x3] %v839_v13  ;;  %v844_v18 = vsel %vm423_vm6, %v839_v13, -inf }
 0x96a   :  { %845 = vmax.xlane.f32.xlu0 %v844_v18 }
 0x9f3   :  { %v846_v19 = vpop.xlane.xlu0 %845 }
 0x9f4   :  { %vm847_vm11 = vcmp.ge.f32.partialorder %v839_v13, %v846_v19 }
 0x9f5   :  { %v848_v20 = vsel %vm847_vm11, %v4589_v46, 128 }
 0x9f6   :  { %v849_v21 = vsel %vm423_vm6, %v848_v20, 2147483647 }
 0x9f7   :  { %v851_v22 = vshra.s32 %v849_v21, 16  ;;  %v850_v25 = vand.u32 65535, %v849_v21 }
 0x9f9   :  { %v853_v24 = vcvt.s32.f32 %v851_v22  ;;  %v852_v27 = vcvt.s32.f32 %v850_v25 }
 0x9fb   :  { %854 = vmin.xlane.f32.xlu1 %v853_v24 }
 0xa84   :  { %v855_v26 = vpop.xlane.xlu1 %854 }
 0xa85   :  { %vm856_vm12 = vcmp.eq.f32.partialorder %v853_v24, %v855_v26  ;;  %v861_v30 = vcvt.f32.s32 %v855_v26 }
 0xa86   :  { %v857_v28 = vsel %vm856_vm12, %v852_v27, inf }
 0xa87   :  { %858 = vmin.xlane.f32.xlu0 %v857_v28  ;;  %v862_v32 = vshll.u32 %v861_v30, 16 }
 0xb10   :  { %v859_v31 = vpop.xlane.xlu0 %858 }
 0xb11   :  { %v860_v36 = vcvt.f32.s32 %v859_v31 }
 0xb13   :  { %v863_v37 = vadd.s32 %v862_v32, %v860_v36 }
 0xb15   :  { %v864_v38 = vcvt.s32.f32 %v863_v37  ;;  %vm867_vm13 = vcmp.eq.s32.totalorder %v4589_v46, %v863_v37 }
 0xb16   :  { %3914 = vmatmul.mubr.msk.f32.vlgmr.msra.gmra.mxu1 %vm867_vm13, %v4411_v23 }
 0xb17   :  { %3483 = vst.msk [vmem:[%s5498_s10 + $0x2] sm:$0x3] %vm447_vm9, %v864_v38  ;;  %3982 = vmatpush3.msra.mxu1 %v4472_v1  ;;  %3989 = vmatprep.mubr.msk.f32.mxu1 %vm4406_vm0, %v4405_v0 }
 0xb18   :  { %3983 = vmatprep.subr.mxu1 %v4405_v0 }
 0xb19   :  { %3984 = vmatpush3.msra.mxu1 %v4477_v2 }
 0xb1a   :  { %3985 = vmatprep.subr.mxu1 %v4405_v0 }
 0xb1b   :  { %3986 = vmatpush3.msra.mxu1 %v4485_v3 }
 0xb1c   :  { %3987 = vmatprep.subr.mxu1 %v4405_v0 }
 0xb1d   :  { %3988 = vmatpush3.msra.mxu1 %v4515_v7 }
 0xb1e   :  { %3992 = vmatprep.subr.mxu1 %v4405_v0 }
 0xbd6   :  { %v936_v42 = vpop.f32.mrf.mxu1 }
 0xbd7   :  { %3930 = vmatmul.mubr.msk.f32.vlgmr.msra.gmra.mxu0 %vm163_vm5, %v936_v42 }
 0xbd8   :  { %v3915_v43 = vpop.f32.mrf.mxu1  ;;  %3933 = vmatpush3.msra.mxu0 %v4496_v4  ;;  %3936 = vmatprep.mubr.msk.f32.mxu0 %vm4406_vm0, %v4405_v0 }
 0xbd9   :  { %3934 = vmatprep.subr.mxu0 %v4405_v0 }
 0xbda   :  { %3935 = vmatpush3.msra.mxu0 %v4504_v6 }
 0xbdb   :  { %3937 = vmatmul.mubr.msk.f32.vlgmr.msra.gmra.mxu0 %vm238_vm4, %v4759_v11  ;;  %3939 = vmatprep.subr.mxu0 %v4405_v0 }
 0xbdc   :  { %3940 = vmatpush3.msra.mxu0 %v4558_v34  ;;  %3943 = vmatprep.mubr.msk.f32.mxu0 %vm4406_vm0, %v4405_v0 }
 0xbdd   :  { %3941 = vmatprep.subr.mxu0 %v4405_v0 }
 0xbde   :  { %3942 = vmatpush3.msra.mxu0 %v4563_v35 }
 0xbdf   :  { %3946 = vmatprep.subr.mxu0 %v4405_v0 }
 0xc97   :  { %v1085_v44 = vpop.f32.mrf.mxu0 }
 0xc98   :  { %v1089_v48 = vadd.f32 %v1085_v44, %v1015_v45  ;;  %v3496_v44 = vld [vmem:[%s5491_s0 + $0x6] sm:$0x3] }
 0xc99   :  { %v3931_v47 = vpop.f32.mrf.mxu0  ;;  %3990 = vmatmul.mubr.msk.f32.vlgmr.msra.gmra.mxu1 %vm82_vm3, %v3496_v44 }
 0xc9a   :  { %3993 = vmatpush3.msra.mxu1 %v4527_v9  ;;  %3994 = vmatprep.mubr.msk.f32.mxu1 %vm4406_vm0, %v4405_v0 }
 0xc9b   :  { %v1156_v49 = vpop.f32.mrf.mxu0  ;;  %3997 = vmatprep.subr.mxu1 %v4405_v0 }
 0xc9c   :  { %v1160_v51 = vadd.f32 %v1156_v49, %v1089_v48 }
 0xc9d   :  { %v3938_v8 = vpop.f32.mrf.mxu0 }
 0xc9e   :  { %4330 = vtanh.f32 %v1160_v51  ;;  %v3490_v11 = vmul.f32 -1.442695, %v1160_v51 }
 0xca0   :  { %4332 = vpow2.f32 %v3490_v11 }
 0xcab   :  { %v4331_v10 = vpop.eup %4330 }
 0xcac   :  { %1170 = vrot.lane.b32.xlu0 %v4331_v10, %s4407_s12 }
 0xcad   :  { %v4333_v33 = vpop.eup %4332 }
 0xcae   :  { %v1164_v13 = vadd.f32 1.0, %v4333_v33 }
 0xcb0   :  { %4334 = vrcp.f32 %v1164_v13 }
 0xcbd   :  { %v4335_v17 = vpop.eup %4334 }
 0xcbe   :  { %v1168_v20 = vmul.f32 %v4335_v17, %v4754_v50 }
 0xd1e   :  { %v1171_v18 = vpop.permute.xlu0 %1170 }
 0xd1f   :  { %v1173_v19 = vmul.f32 %v4335_v17, %v1171_v18 }
 0xd21   :  { %1175 = vrot.lane.b32.xlu1 %v1173_v19, %s4408_s13 }
 0xd59   :  { %v1429_v9 = vpop.f32.mrf.mxu1 }
 0xd5b   :  { %v3991_v10 = vpop.f32.mrf.mxu1 }
 0xd93   :  { %v1176_v21 = vpop.permute.xlu1 %1175 }
 0xd94   :  { %v4847_v22 = vadd.f32 %v1176_v21, %v1168_v20 }
 0xd96   :  { %4336 = vtanh.f32 %v4847_v22 }
 0xda3   :  { %v4337_v24 = vpop.eup %4336 }
 0xda4   :  { %1181 = vrot.lane.b32.xlu1 %v4337_v24, %s4409_s18 }
 0xe16   :  { %v1182_v25 = vpop.permute.xlu1 %1181 }
 0xe17   :  { %v1184_v26 = vmul.f32 %v4335_v17, %v1182_v25 }
 0xe19   :  { %1186 = vrot.lane.b32.xlu0 %v1184_v26, %s4410_s19 }
 0xe8b   :  { %v4852_v27 = vpop.permute.xlu0 %1186 }
 0xe8c   :  { %3944 = vmatmul.mubr.msk.f32.vlgmr.msra.gmra.mxu0 %vm238_vm4, %v4852_v27 }
 0xe8d   :  { %3947 = vmatpush3.msra.mxu0 %v4596_v52  ;;  %3978 = vmatprep.mubr.msk.f32.mxu0 %vm4406_vm0, %v4405_v0 }
 0xe8e   :  { %3948 = vmatprep.subr.mxu0 %v4405_v0 }
 0xe8f   :  { %3949 = vmatpush3.msra.mxu0 %v4601_v53 }
 0xe90   :  { %3950 = vmatprep.subr.mxu0 %v4405_v0 }
 0xe91   :  { %3951 = vmatpush3.msra.mxu0 %v4608_v54 }
 0xe92   :  { %3952 = vmatprep.subr.mxu0 %v4405_v0 }
 0xe93   :  { %3953 = vmatpush3.msra.mxu0 %v4615_v55 }
 0xe94   :  { %3954 = vmatprep.subr.mxu0 %v4405_v0 }
 0xe95   :  { %3955 = vmatpush3.msra.mxu0 %v4622_v56 }
 0xe96   :  { %3956 = vmatprep.subr.mxu0 %v4405_v0 }
 0xe97   :  { %3957 = vmatpush3.msra.mxu0 %v4629_v57 }
 0xe98   :  { %3958 = vmatprep.subr.mxu0 %v4405_v0 }
 0xe99   :  { %3959 = vmatpush3.msra.mxu0 %v4636_v58 }
 0xe9a   :  { %3960 = vmatprep.subr.mxu0 %v4405_v0 }
 0xe9b   :  { %3961 = vmatpush3.msra.mxu0 %v4643_v59 }
 0xe9c   :  { %3962 = vmatprep.subr.mxu0 %v4405_v0 }
 0xe9d   :  { %3963 = vmatpush3.msra.mxu0 %v4650_v60 }
 0xe9e   :  { %3964 = vmatprep.subr.mxu0 %v4405_v0 }
 0xe9f   :  { %3965 = vmatpush3.msra.mxu0 %v4657_v61 }
 0xea0   :  { %3966 = vmatprep.subr.mxu0 %v4405_v0 }
 0xea1   :  { %3967 = vmatpush3.msra.mxu0 %v4664_v62 }
 0xea2   :  { %3968 = vmatprep.subr.mxu0 %v4405_v0 }
 0xea3   :  { %3969 = vmatpush3.msra.mxu0 %v4671_v63 }
 0xea4   :  { %3970 = vmatprep.subr.mxu0 %v4405_v0 }
 0xea5   :  { %3971 = vmatpush3.msra.mxu0 %v4678_v5 }
 0xea6   :  { %3972 = vmatprep.subr.mxu0 %v4405_v0 }
 0xea7   :  { %3973 = vmatpush3.msra.mxu0 %v4687_v14 }
 0xea8   :  { %3974 = vmatprep.subr.mxu0 %v4405_v0 }
 0xea9   :  { %3975 = vmatpush3.msra.mxu0 %v4694_v15 }
 0xeaa   :  { %3976 = vmatprep.subr.mxu0 %v4405_v0 }
 0xeab   :  { %3977 = vmatpush3.msra.mxu0 %v4701_v16 }
 0xeac   :  { %4046 = vmatprep.subr.mxu0 %v4405_v0 }
 0xf4c   :  { %v1256_v50 = vpop.f32.mrf.mxu0 }
 0xf4d   :  { %v1257_v28 = vadd.f32 %v4582_v40, %v1256_v50 }
 0xf4e   :  { %v3945_v29 = vpop.f32.mrf.mxu0 }
 0xf4f   :  { %3492 = vst [vmem:[%s5496_s9 + $0x4] sm:$0x3] %v1257_v28  ;;  %v1262_v30 = vsel %vm423_vm6, %v1257_v28, -inf }
 0xf50   :  { %1263 = vmax.xlane.f32.xlu1 %v1262_v30 }
 0xfd9   :  { %v1264_v31 = vpop.xlane.xlu1 %1263 }
 0xfda   :  { %vm1265_vm14 = vcmp.ge.f32.partialorder %v1257_v28, %v1264_v31 }
 0xfdb   :  { %v1266_v32 = vsel %vm1265_vm14, %v4589_v46, 128 }
 0xfdc   :  { %v1267_v36 = vsel %vm423_vm6, %v1266_v32, 2147483647 }
 0xfdd   :  { %v1269_v37 = vshra.s32 %v1267_v36, 16  ;;  %v1268_v39 = vand.u32 65535, %v1267_v36 }
 0xfdf   :  { %v1271_v38 = vcvt.s32.f32 %v1269_v37  ;;  %v1270_v42 = vcvt.s32.f32 %v1268_v39 }
 0xfe1   :  { %1272 = vmin.xlane.f32.xlu0 %v1271_v38 }
0x106a   :  { %v1273_v41 = vpop.xlane.xlu0 %1272 }
0x106b   :  { %vm1274_vm15 = vcmp.eq.f32.partialorder %v1271_v38, %v1273_v41  ;;  %v1279_v45 = vcvt.f32.s32 %v1273_v41 }
0x106c   :  { %v1275_v43 = vsel %vm1274_vm15, %v1270_v42, inf }
0x106d   :  { %1276 = vmin.xlane.f32.xlu0 %v1275_v43  ;;  %v1280_v48 = vshll.u32 %v1279_v45, 16 }
0x10f6   :  { %v1277_v47 = vpop.xlane.xlu0 %1276 }
0x10f7   :  { %v1278_v49 = vcvt.f32.s32 %v1277_v47  ;;  %v3506_v47 = vld [vmem:[%s5491_s0 + $0x8] sm:$0x3] }
0x10f9   :  { %v1281_v51 = vadd.s32 %v1280_v48, %v1278_v49  ;;  %v4997_v48 = vld [vmem:[%s5492_s2] sm:$0xff] }
0x10fb   :  { %v1282_v8 = vcvt.s32.f32 %v1281_v51  ;;  %vm1285_vm7 = vcmp.eq.s32.totalorder %v4589_v46, %v1281_v51 }
0x10fc   :  { %3979 = vmatmul.mubr.msk.f32.vlgmr.msra.gmra.mxu0 %vm1285_vm7, %v4411_v23 }
0x10fd   :  { %3493 = vst.msk [vmem:[%s5498_s10 + $0x4] sm:$0x3] %vm447_vm9, %v1282_v8  ;;  %4047 = vmatpush3.msra.mxu0 %v4472_v1  ;;  %4054 = vmatprep.mubr.msk.f32.mxu0 %vm4406_vm0, %v4405_v0 }
0x10fe   :  { %4048 = vmatprep.subr.mxu0 %v4405_v0 }
0x10ff   :  { %4049 = vmatpush3.msra.mxu0 %v4477_v2 }
0x1100   :  { %4050 = vmatprep.subr.mxu0 %v4405_v0 }
0x1101   :  { %4051 = vmatpush3.msra.mxu0 %v4485_v3  ;;  %v1433_v3 = vadd.f32 %v4546_v12, %v1429_v9 }
0x1102   :  { %4052 = vmatprep.subr.mxu0 %v4405_v0 }
0x1103   :  { %4053 = vmatpush3.msra.mxu0 %v4515_v7 }
0x1104   :  { %4057 = vmatprep.subr.mxu0 %v4405_v0  ;;  %4055 = vmatmul.mubr.msk.f32.vlgmr.msra.gmra.mxu0 %vm82_vm3, %v3506_v47 }
0x1105   :  { %4058 = vmatpush3.msra.mxu0 %v4997_v48  ;;  %4059 = vmatprep.mubr.msk.f32.mxu0 %vm4406_vm0, %v4405_v0 }
0x1106   :  { %4062 = vmatprep.subr.mxu0 %v4405_v0 }
0x11bc   :  { %v1354_v1 = vpop.f32.mrf.mxu0 }
0x11bd   :  { %3995 = vmatmul.mubr.msk.f32.vlgmr.msra.gmra.mxu1 %vm163_vm5, %v1354_v1 }
0x11be   :  { %v3980_v11 = vpop.f32.mrf.mxu0  ;;  %3998 = vmatpush3.msra.mxu1 %v4496_v4  ;;  %4001 = vmatprep.mubr.msk.f32.mxu1 %vm4406_vm0, %v4405_v0 }
0x11bf   :  { %3999 = vmatprep.subr.mxu1 %v4405_v0  ;;  %v5012_v11 = vld [vmem:[%s5488_s1 + $0x18] sm:$0xff] }
0x11c0   :  { %4000 = vmatpush3.msra.mxu1 %v4504_v6 }
0x11c1   :  { %4002 = vmatmul.mubr.msk.f32.vlgmr.msra.gmra.mxu1 %vm238_vm4, %v4852_v27  ;;  %4004 = vmatprep.subr.mxu1 %v4405_v0 }
0x11c2   :  { %4005 = vmatpush3.msra.mxu1 %v4558_v34  ;;  %4008 = vmatprep.mubr.msk.f32.mxu1 %vm4406_vm0, %v4405_v0 }
0x11c3   :  { %4006 = vmatprep.subr.mxu1 %v4405_v0 }
0x11c4   :  { %4007 = vmatpush3.msra.mxu1 %v4563_v35 }
0x11c5   :  { %4011 = vmatprep.subr.mxu1 %v4405_v0 }
0x127d   :  { %v1503_v2 = vpop.f32.mrf.mxu1 }
0x127e   :  { %v1507_v6 = vadd.f32 %v1503_v2, %v1433_v3  ;;  %v5021_v2 = vld [vmem:[%s5488_s1 + $0x10] sm:$0xff]  ;;  %v5028_v3 = vld [vmem:[%s5488_s1 + $0x8] sm:$0xff] }
0x127f   :  { %v3996_v4 = vpop.f32.mrf.mxu1 }
0x1280   :  { %v5035_v4 = vld [vmem:[%s5488_s1] sm:$0xff] }
0x1281   :  { %v1574_v7 = vpop.f32.mrf.mxu1 }
0x1282   :  { %v1578_v33 = vadd.f32 %v1574_v7, %v1507_v6  ;;  %v1847_v6 = vpop.f32.mrf.mxu0 }
0x1283   :  { %v4003_v13 = vpop.f32.mrf.mxu1 }
0x1284   :  { %4338 = vtanh.f32 %v1578_v33  ;;  %v3500_v18 = vmul.f32 -1.442695, %v1578_v33  ;;  %v4056_v7 = vpop.f32.mrf.mxu0 }
0x1286   :  { %4340 = vpow2.f32 %v3500_v18  ;;  %v5052_v18 = vld [vmem:[%s5489_s3] sm:$0xff] }
0x1291   :  { %v4339_v17 = vpop.eup %4338 }
0x1292   :  { %1588 = vrot.lane.b32.xlu1 %v4339_v17, %s4407_s12  ;;  %v5043_v17 = vld [vmem:[%s5489_s3 + $0x8] sm:$0xff] }
0x1293   :  { %v4341_v19 = vpop.eup %4340 }
0x1294   :  { %v1582_v20 = vadd.f32 1.0, %v4341_v19 }
0x1296   :  { %4342 = vrcp.f32 %v1582_v20  ;;  %v5067_v20 = vld [vmem:[%s5493_s4] ss:$0 sm:$0xff] }
0x12a3   :  { %v4343_v21 = vpop.eup %4342 }
0x12a4   :  { %v1586_v12 = vmul.f32 %v4343_v21, %v4847_v22 }
0x1304   :  { %v1589_v24 = vpop.permute.xlu1 %1588 }
0x1305   :  { %v1591_v25 = vmul.f32 %v4343_v21, %v1589_v24 }
0x1307   :  { %1593 = vrot.lane.b32.xlu0 %v1591_v25, %s4408_s13 }
0x1379   :  { %v1594_v26 = vpop.permute.xlu0 %1593 }
0x137a   :  { %v4940_v27 = vadd.f32 %v1594_v26, %v1586_v12 }
0x137c   :  { %4344 = vtanh.f32 %v4940_v27 }
0x1389   :  { %v4345_v50 = vpop.eup %4344 }
0x138a   :  { %1599 = vrot.lane.b32.xlu1 %v4345_v50, %s4409_s18 }
0x13fc   :  { %v1600_v28 = vpop.permute.xlu1 %1599 }
0x13fd   :  { %v1602_v29 = vmul.f32 %v4343_v21, %v1600_v28  ;;  %v1851_v21 = vadd.f32 %v5067_v20, %v1847_v6 }
0x13ff   :  { %1604 = vrot.lane.b32.xlu1 %v1602_v29, %s4410_s19 }
0x1471   :  { %v4945_v30 = vpop.permute.xlu1 %1604 }
0x1472   :  { %4009 = vmatmul.mubr.msk.f32.vlgmr.msra.gmra.mxu1 %vm238_vm4, %v4945_v30 }
0x1473   :  { %4012 = vmatpush3.msra.mxu1 %v4596_v52  ;;  %4043 = vmatprep.mubr.msk.f32.mxu1 %vm4406_vm0, %v4405_v0 }
0x1474   :  { %4013 = vmatprep.subr.mxu1 %v4405_v0 }
0x1475   :  { %4014 = vmatpush3.msra.mxu1 %v4601_v53 }
0x1476   :  { %4015 = vmatprep.subr.mxu1 %v4405_v0 }
0x1477   :  { %4016 = vmatpush3.msra.mxu1 %v4608_v54 }
0x1478   :  { %4017 = vmatprep.subr.mxu1 %v4405_v0 }
0x1479   :  { %4018 = vmatpush3.msra.mxu1 %v4615_v55 }
0x147a   :  { %4019 = vmatprep.subr.mxu1 %v4405_v0 }
0x147b   :  { %4020 = vmatpush3.msra.mxu1 %v4622_v56 }
0x147c   :  { %4021 = vmatprep.subr.mxu1 %v4405_v0 }
0x147d   :  { %4022 = vmatpush3.msra.mxu1 %v4629_v57 }
0x147e   :  { %4023 = vmatprep.subr.mxu1 %v4405_v0 }
0x147f   :  { %4024 = vmatpush3.msra.mxu1 %v4636_v58 }
0x1480   :  { %4025 = vmatprep.subr.mxu1 %v4405_v0 }
0x1481   :  { %4026 = vmatpush3.msra.mxu1 %v4643_v59 }
0x1482   :  { %4027 = vmatprep.subr.mxu1 %v4405_v0 }
0x1483   :  { %4028 = vmatpush3.msra.mxu1 %v4650_v60 }
0x1484   :  { %4029 = vmatprep.subr.mxu1 %v4405_v0 }
0x1485   :  { %4030 = vmatpush3.msra.mxu1 %v4657_v61 }
0x1486   :  { %4031 = vmatprep.subr.mxu1 %v4405_v0 }
0x1487   :  { %4032 = vmatpush3.msra.mxu1 %v4664_v62 }
0x1488   :  { %4033 = vmatprep.subr.mxu1 %v4405_v0 }
0x1489   :  { %4034 = vmatpush3.msra.mxu1 %v4671_v63 }
0x148a   :  { %4035 = vmatprep.subr.mxu1 %v4405_v0 }
0x148b   :  { %4036 = vmatpush3.msra.mxu1 %v4678_v5 }
0x148c   :  { %4037 = vmatprep.subr.mxu1 %v4405_v0 }
0x148d   :  { %4038 = vmatpush3.msra.mxu1 %v4687_v14 }
0x148e   :  { %4039 = vmatprep.subr.mxu1 %v4405_v0 }
0x148f   :  { %4040 = vmatpush3.msra.mxu1 %v4694_v15 }
0x1490   :  { %4041 = vmatprep.subr.mxu1 %v4405_v0 }
0x1491   :  { %4042 = vmatpush3.msra.mxu1 %v4701_v16 }
0x1492   :  { %4111 = vmatprep.subr.mxu1 %v4405_v0 }
0x1532   :  { %v1674_v22 = vpop.f32.mrf.mxu1 }
0x1533   :  { %v1675_v31 = vadd.f32 %v4582_v40, %v1674_v22 }
0x1534   :  { %v4010_v32 = vpop.f32.mrf.mxu1 }
0x1535   :  { %3502 = vst [vmem:[%s5496_s9 + $0x6] sm:$0x3] %v1675_v31  ;;  %v1680_v36 = vsel %vm423_vm6, %v1675_v31, -inf }
0x1536   :  { %1681 = vmax.xlane.f32.xlu0 %v1680_v36 }
0x15bf   :  { %v1682_v37 = vpop.xlane.xlu0 %1681 }
0x15c0   :  { %vm1683_vm8 = vcmp.ge.f32.partialorder %v1675_v31, %v1682_v37 }
0x15c1   :  { %v1684_v38 = vsel %vm1683_vm8, %v4589_v46, 128 }
0x15c2   :  { %v1685_v39 = vsel %vm423_vm6, %v1684_v38, 2147483647 }
0x15c3   :  { %v1687_v41 = vshra.s32 %v1685_v39, 16  ;;  %v1686_v43 = vand.u32 65535, %v1685_v39 }
0x15c5   :  { %v1689_v42 = vcvt.s32.f32 %v1687_v41  ;;  %v1688_v40 = vcvt.s32.f32 %v1686_v43 }
0x15c7   :  { %1690 = vmin.xlane.f32.xlu1 %v1689_v42 }
0x1650   :  { %v1691_v44 = vpop.xlane.xlu1 %1690 }
0x1651   :  { %vm1692_vm10 = vcmp.eq.f32.partialorder %v1689_v42, %v1691_v44  ;;  %v1697_v49 = vcvt.f32.s32 %v1691_v44 }
0x1652   :  { %v1693_v45 = vsel %vm1692_vm10, %v1688_v40, inf }
0x1653   :  { %1694 = vmin.xlane.f32.xlu0 %v1693_v45  ;;  %v1698_v8 = vshll.u32 %v1697_v49, 16 }
0x16dc   :  { %v1695_v51 = vpop.xlane.xlu0 %1694 }
0x16dd   :  { %v1696_v9 = vcvt.f32.s32 %v1695_v51 }
0x16df   :  { %v1699_v10 = vadd.s32 %v1698_v8, %v1696_v9  ;;  %v5164_v9 = vld [vmem:[%s5494_s5 + $0x8] sm:$0xff] }
0x16e1   :  { %v1700_v1 = vcvt.s32.f32 %v1699_v10  ;;  %vm1703_vm11 = vcmp.eq.s32.totalorder %v4589_v46, %v1699_v10  ;;  %v5173_v10 = vld [vmem:[%s5494_s5] sm:$0xff] }
0x16e2   :  { %4044 = vmatmul.mubr.msk.f32.vlgmr.msra.gmra.mxu1 %vm1703_vm11, %v4411_v23 }
0x16e3   :  { %3503 = vst.msk [vmem:[%s5498_s10 + $0x6] sm:$0x3] %vm447_vm9, %v1700_v1  ;;  %4112 = vmatpush3.msra.mxu1 %v5012_v11  ;;  %4119 = vmatprep.mubr.msk.f32.mxu1 %vm4406_vm0, %v4405_v0 }
0x16e4   :  { %4113 = vmatprep.subr.mxu1 %v4405_v0 }
0x16e5   :  { %4114 = vmatpush3.msra.mxu1 %v5021_v2 }
0x16e6   :  { %4115 = vmatprep.subr.mxu1 %v4405_v0 }
0x16e7   :  { %4116 = vmatpush3.msra.mxu1 %v5028_v3 }
0x16e8   :  { %4117 = vmatprep.subr.mxu1 %v4405_v0 }
0x16e9   :  { %4118 = vmatpush3.msra.mxu1 %v5035_v4 }
0x16ea   :  { %4122 = vmatprep.subr.mxu1 %v4405_v0 }
0x17a2   :  { %v1772_v33 = vpop.f32.mrf.mxu1 }
0x17a3   :  { %4060 = vmatmul.mubr.msk.f32.vlgmr.msra.gmra.mxu0 %vm163_vm5, %v1772_v33 }
0x17a4   :  { %v4045_v13 = vpop.f32.mrf.mxu1  ;;  %4063 = vmatpush3.msra.mxu0 %v5043_v17  ;;  %4066 = vmatprep.mubr.msk.f32.mxu0 %vm4406_vm0, %v4405_v0 }
0x17a5   :  { %4064 = vmatprep.subr.mxu0 %v4405_v0 }
0x17a6   :  { %4065 = vmatpush3.msra.mxu0 %v5052_v18 }
0x17a7   :  { %4067 = vmatmul.mubr.msk.f32.vlgmr.msra.gmra.mxu0 %vm238_vm4, %v4945_v30  ;;  %4069 = vmatprep.subr.mxu0 %v4405_v0 }
0x17a8   :  { %4070 = vmatpush3.msra.mxu0 %v4558_v34  ;;  %4073 = vmatprep.mubr.msk.f32.mxu0 %vm4406_vm0, %v4405_v0 }
0x17a9   :  { %4071 = vmatprep.subr.mxu0 %v4405_v0 }
0x17aa   :  { %4072 = vmatpush3.msra.mxu0 %v4563_v35 }
0x17ab   :  { %4076 = vmatprep.subr.mxu0 %v4405_v0 }
0x1863   :  { %v1921_v19 = vpop.f32.mrf.mxu0 }
0x1864   :  { %v1925_v25 = vadd.f32 %v1921_v19, %v1851_v21 }
0x1865   :  { %v4061_v24 = vpop.f32.mrf.mxu0 }
0x1867   :  { %v1992_v34 = vpop.f32.mrf.mxu0 }
0x1868   :  { %v1996_v12 = vadd.f32 %v1992_v34, %v1925_v25 }
0x1869   :  { %v4068_v26 = vpop.f32.mrf.mxu0 }
0x186a   :  { %4346 = vtanh.f32 %v1996_v12  ;;  %v3510_v35 = vmul.f32 -1.442695, %v1996_v12 }
0x186c   :  { %4348 = vpow2.f32 %v3510_v35 }
0x1877   :  { %v4347_v50 = vpop.eup %4346 }
0x1878   :  { %2006 = vrot.lane.b32.xlu0 %v4347_v50, %s4407_s12 }
0x1879   :  { %v4349_v28 = vpop.eup %4348 }
0x187a   :  { %v2000_v29 = vadd.f32 1.0, %v4349_v28 }
0x187c   :  { %4350 = vrcp.f32 %v2000_v29 }
0x1889   :  { %v4351_v30 = vpop.eup %4350 }
0x188a   :  { %v2004_v32 = vmul.f32 %v4351_v30, %v4940_v27 }
0x18ea   :  { %v2007_v22 = vpop.permute.xlu0 %2006 }
0x18eb   :  { %v2009_v31 = vmul.f32 %v4351_v30, %v2007_v22 }
0x18ed   :  { %2011 = vrot.lane.b32.xlu1 %v2009_v31, %s4408_s13 }
0x195f   :  { %v2012_v36 = vpop.permute.xlu1 %2011 }
0x1960   :  { %v5073_v37 = vadd.f32 %v2012_v36, %v2004_v32 }
0x1962   :  { %4352 = vtanh.f32 %v5073_v37 }
0x196f   :  { %v4353_v38 = vpop.eup %4352 }
0x1970   :  { %2017 = vrot.lane.b32.xlu1 %v4353_v38, %s4409_s18  ;;  %v5202_v38 = vld [vmem:[%s5497_s7 + $0x70] sm:$0xff] }
0x19e2   :  { %v2018_v39 = vpop.permute.xlu1 %2017 }
0x19e3   :  { %v2020_v41 = vmul.f32 %v4351_v30, %v2018_v39  ;;  %v5209_v39 = vld [vmem:[%s5497_s7 + $0x68] sm:$0xff] }
0x19e5   :  { %2022 = vrot.lane.b32.xlu0 %v2020_v41, %s4410_s19  ;;  %v5216_v41 = vld [vmem:[%s5497_s7 + $0x60] sm:$0xff] }
0x1a57   :  { %v5078_v42 = vpop.permute.xlu0 %2022 }
0x1a58   :  { %4074 = vmatmul.mubr.msk.f32.vlgmr.msra.gmra.mxu0 %vm238_vm4, %v5078_v42 }
0x1a59   :  { %4077 = vmatpush3.msra.mxu0 %v4596_v52  ;;  %4108 = vmatprep.mubr.msk.f32.mxu0 %vm4406_vm0, %v4405_v0 }
0x1a5a   :  { %4078 = vmatprep.subr.mxu0 %v4405_v0 }
0x1a5b   :  { %4079 = vmatpush3.msra.mxu0 %v4601_v53  ;;  %v5119_v53 = vld [vmem:[%s5495_s6] ss:$0 sm:$0xff] }
0x1a5c   :  { %4080 = vmatprep.subr.mxu0 %v4405_v0 }
0x1a5d   :  { %4081 = vmatpush3.msra.mxu0 %v4608_v54 }
0x1a5e   :  { %4082 = vmatprep.subr.mxu0 %v4405_v0 }
0x1a5f   :  { %4083 = vmatpush3.msra.mxu0 %v4615_v55 }
0x1a60   :  { %4084 = vmatprep.subr.mxu0 %v4405_v0 }
0x1a61   :  { %4085 = vmatpush3.msra.mxu0 %v4622_v56 }
0x1a62   :  { %4086 = vmatprep.subr.mxu0 %v4405_v0 }
0x1a63   :  { %4087 = vmatpush3.msra.mxu0 %v4629_v57 }
0x1a64   :  { %4088 = vmatprep.subr.mxu0 %v4405_v0 }
0x1a65   :  { %4089 = vmatpush3.msra.mxu0 %v4636_v58 }
0x1a66   :  { %4090 = vmatprep.subr.mxu0 %v4405_v0 }
0x1a67   :  { %4091 = vmatpush3.msra.mxu0 %v4643_v59 }
0x1a68   :  { %4092 = vmatprep.subr.mxu0 %v4405_v0 }
0x1a69   :  { %4093 = vmatpush3.msra.mxu0 %v4650_v60 }
0x1a6a   :  { %4094 = vmatprep.subr.mxu0 %v4405_v0 }
0x1a6b   :  { %4095 = vmatpush3.msra.mxu0 %v4657_v61 }
0x1a6c   :  { %4096 = vmatprep.subr.mxu0 %v4405_v0 }
0x1a6d   :  { %4097 = vmatpush3.msra.mxu0 %v4664_v62 }
0x1a6e   :  { %4098 = vmatprep.subr.mxu0 %v4405_v0 }
0x1a6f   :  { %4099 = vmatpush3.msra.mxu0 %v4671_v63 }
0x1a70   :  { %4100 = vmatprep.subr.mxu0 %v4405_v0 }
0x1a71   :  { %4101 = vmatpush3.msra.mxu0 %v4678_v5 }
0x1a72   :  { %4102 = vmatprep.subr.mxu0 %v4405_v0 }
0x1a73   :  { %4103 = vmatpush3.msra.mxu0 %v4687_v14 }
0x1a74   :  { %4104 = vmatprep.subr.mxu0 %v4405_v0 }
0x1a75   :  { %4105 = vmatpush3.msra.mxu0 %v4694_v15  ;;  %v3516_v15 = vld [vmem:[%s5491_s0 + $0xa] sm:$0x3] }
0x1a76   :  { %4106 = vmatprep.subr.mxu0 %v4405_v0  ;;  %4120 = vmatmul.mubr.msk.f32.vlgmr.msra.gmra.mxu1 %vm82_vm3, %v3516_v15 }
0x1a77   :  { %4107 = vmatpush3.msra.mxu0 %v4701_v16  ;;  %4123 = vmatpush3.msra.mxu1 %v4997_v48 }
0x1a78   :  { %4176 = vmatprep.subr.mxu0 %v4405_v0  ;;  %4124 = vmatprep.mubr.msk.f32.mxu1 %vm4406_vm0, %v4405_v0 }
0x1a79   :  { %4127 = vmatprep.subr.mxu1 %v4405_v0 }
0x1b18   :  { %v2092_v52 = vpop.f32.mrf.mxu0 }
0x1b19   :  { %v2093_v54 = vadd.f32 %v5119_v53, %v2092_v52  ;;  %v5230_v52 = vld [vmem:[%s5497_s7 + $0x50] sm:$0xff] }
0x1b1a   :  { %v4075_v55 = vpop.f32.mrf.mxu0 }
0x1b1b   :  { %3512 = vst [vmem:[%s5496_s9 + $0x8] sm:$0x3] %v2093_v54  ;;  %v2098_v56 = vsel %vm423_vm6, %v2093_v54, -inf  ;;  %v5244_v55 = vld [vmem:[%s5497_s7 + $0x40] sm:$0xff] }
0x1b1c   :  { %2099 = vmax.xlane.f32.xlu1 %v2098_v56  ;;  %v5251_v56 = vld [vmem:[%s5497_s7 + $0x38] sm:$0xff] }
0x1b36   :  { %v2265_v47 = vpop.f32.mrf.mxu1 }
0x1b37   :  { %v2269_v6 = vadd.f32 %v5067_v20, %v2265_v47 }
0x1b38   :  { %v4121_v49 = vpop.f32.mrf.mxu1 }
0x1ba5   :  { %v2100_v57 = vpop.xlane.xlu1 %2099 }
0x1ba6   :  { %vm2101_vm12 = vcmp.ge.f32.partialorder %v2093_v54, %v2100_v57  ;;  %v5237_v54 = vld [vmem:[%s5497_s7 + $0x48] sm:$0xff]  ;;  %v5258_v57 = vld [vmem:[%s5497_s7 + $0x30] sm:$0xff] }
0x1ba7   :  { %v2102_v58 = vsel %vm2101_vm12, %v4589_v46, 128 }
0x1ba8   :  { %v2103_v59 = vsel %vm423_vm6, %v2102_v58, 2147483647  ;;  %v5265_v58 = vld [vmem:[%s5497_s7 + $0x28] sm:$0xff] }
0x1ba9   :  { %v2105_v60 = vshra.s32 %v2103_v59, 16  ;;  %v2104_v62 = vand.u32 65535, %v2103_v59  ;;  %v5272_v59 = vld [vmem:[%s5497_s7 + $0x20] sm:$0xff] }
0x1bab   :  { %v2107_v61 = vcvt.s32.f32 %v2105_v60  ;;  %v2106_v5 = vcvt.s32.f32 %v2104_v62  ;;  %v5279_v60 = vld [vmem:[%s5497_s7 + $0x18] sm:$0xff]  ;;  %v5293_v62 = vld [vmem:[%s5497_s7 + $0x8] sm:$0xff] }
0x1bad   :  { %2108 = vmin.xlane.f32.xlu0 %v2107_v61 }
0x1c36   :  { %v2109_v63 = vpop.xlane.xlu0 %2108 }
0x1c37   :  { %vm2110_vm13 = vcmp.eq.f32.partialorder %v2107_v61, %v2109_v63  ;;  %v2115_v16 = vcvt.f32.s32 %v2109_v63  ;;  %v5286_v61 = vld [vmem:[%s5497_s7 + $0x10] sm:$0xff]  ;;  %v5300_v63 = vld [vmem:[%s5497_s7] sm:$0xff] }
0x1c38   :  { %v2111_v14 = vsel %vm2110_vm13, %v2106_v5, inf }
0x1c39   :  { %2112 = vmin.xlane.f32.xlu0 %v2111_v14  ;;  %v2116_v43 = vshll.u32 %v2115_v16, 16 }
0x1cc2   :  { %v2113_v27 = vpop.xlane.xlu0 %2112 }
0x1cc3   :  { %v2114_v44 = vcvt.f32.s32 %v2113_v27 }
0x1cc5   :  { %v2117_v40 = vadd.s32 %v2116_v43, %v2114_v44 }
0x1cc7   :  { %v2118_v45 = vcvt.s32.f32 %v2117_v40  ;;  %vm2121_vm14 = vcmp.eq.s32.totalorder %v4589_v46, %v2117_v40 }
0x1cc8   :  { %4109 = vmatmul.mubr.msk.f32.vlgmr.msra.gmra.mxu0 %vm2121_vm14, %v4411_v23 }
0x1cc9   :  { %3513 = vst.msk [vmem:[%s5498_s10 + $0x8] sm:$0x3] %vm447_vm9, %v2118_v45  ;;  %4177 = vmatpush3.msra.mxu0 %v5012_v11  ;;  %4184 = vmatprep.mubr.msk.f32.mxu0 %vm4406_vm0, %v4405_v0 }
0x1cca   :  { %4178 = vmatprep.subr.mxu0 %v4405_v0 }
0x1ccb   :  { %4179 = vmatpush3.msra.mxu0 %v5021_v2 }
0x1ccc   :  { %4180 = vmatprep.subr.mxu0 %v4405_v0 }
0x1ccd   :  { %4181 = vmatpush3.msra.mxu0 %v5028_v3 }
0x1cce   :  { %4182 = vmatprep.subr.mxu0 %v4405_v0 }
0x1ccf   :  { %4183 = vmatpush3.msra.mxu0 %v5035_v4 }
0x1cd0   :  { %4187 = vmatprep.subr.mxu0 %v4405_v0 }
0x1d88   :  { %v2190_v51 = vpop.f32.mrf.mxu0 }
0x1d89   :  { %4125 = vmatmul.mubr.msk.f32.vlgmr.msra.gmra.mxu1 %vm163_vm5, %v2190_v51 }
0x1d8a   :  { %v4110_v8 = vpop.f32.mrf.mxu0  ;;  %4128 = vmatpush3.msra.mxu1 %v5043_v17  ;;  %4131 = vmatprep.mubr.msk.f32.mxu1 %vm4406_vm0, %v4405_v0 }
0x1d8b   :  { %4129 = vmatprep.subr.mxu1 %v4405_v0 }
0x1d8c   :  { %4130 = vmatpush3.msra.mxu1 %v5052_v18 }
0x1d8d   :  { %4132 = vmatmul.mubr.msk.f32.vlgmr.msra.gmra.mxu1 %vm238_vm4, %v5078_v42  ;;  %4134 = vmatprep.subr.mxu1 %v4405_v0  ;;  %v5223_v42 = vld [vmem:[%s5497_s7 + $0x58] sm:$0xff] }
0x1d8e   :  { %4135 = vmatpush3.msra.mxu1 %v5164_v9  ;;  %4138 = vmatprep.mubr.msk.f32.mxu1 %vm4406_vm0, %v4405_v0 }
0x1d8f   :  { %4136 = vmatprep.subr.mxu1 %v4405_v0 }
0x1d90   :  { %4137 = vmatpush3.msra.mxu1 %v5173_v10 }
0x1d91   :  { %4141 = vmatprep.subr.mxu1 %v4405_v0 }
0x1e49   :  { %v2339_v1 = vpop.f32.mrf.mxu1 }
0x1e4a   :  { %v2343_v33 = vadd.f32 %v2339_v1, %v2269_v6  ;;  %v3526_v1 = vld [vmem:[%s5491_s0 + $0xc] sm:$0x3] }
0x1e4b   :  { %v4126_v7 = vpop.f32.mrf.mxu1  ;;  %4185 = vmatmul.mubr.msk.f32.vlgmr.msra.gmra.mxu0 %vm82_vm3, %v3526_v1 }
0x1e4c   :  { %4188 = vmatpush3.msra.mxu0 %v4997_v48  ;;  %4189 = vmatprep.mubr.msk.f32.mxu0 %vm4406_vm0, %v4405_v0 }
0x1e4d   :  { %v2410_v13 = vpop.f32.mrf.mxu1  ;;  %4192 = vmatprep.subr.mxu0 %v4405_v0 }
0x1e4e   :  { %v2414_v19 = vadd.f32 %v2410_v13, %v2343_v33 }
0x1e4f   :  { %v4133_v21 = vpop.f32.mrf.mxu1 }
0x1e50   :  { %4354 = vtanh.f32 %v2414_v19  ;;  %v3520_v25 = vmul.f32 -1.442695, %v2414_v19 }
0x1e52   :  { %4356 = vpow2.f32 %v3520_v25 }
0x1e5d   :  { %v4355_v24 = vpop.eup %4354 }
0x1e5e   :  { %2424 = vrot.lane.b32.xlu1 %v4355_v24, %s4407_s12 }
0x1e5f   :  { %v4357_v34 = vpop.eup %4356 }
0x1e60   :  { %v2418_v12 = vadd.f32 1.0, %v4357_v34 }
0x1e62   :  { %4358 = vrcp.f32 %v2418_v12 }
0x1e6f   :  { %v4359_v26 = vpop.eup %4358 }
0x1e70   :  { %v2422_v28 = vmul.f32 %v4359_v26, %v5073_v37  ;;  %v5193_v37 = vld [vmem:[%s5497_s7 + $0x78] sm:$0xff] }
0x1ed0   :  { %v2425_v50 = vpop.permute.xlu1 %2424 }
0x1ed1   :  { %v2427_v35 = vmul.f32 %v4359_v26, %v2425_v50 }
0x1ed3   :  { %2429 = vrot.lane.b32.xlu0 %v2427_v35, %s4408_s13 }
0x1f0b   :  { %v2683_v24 = vpop.f32.mrf.mxu0 }
0x1f0d   :  { %v4186_v25 = vpop.f32.mrf.mxu0 }
0x1f45   :  { %v2430_v29 = vpop.permute.xlu0 %2429 }
0x1f46   :  { %v5181_v30 = vadd.f32 %v2430_v29, %v2422_v28 }
0x1f48   :  { %4360 = vtanh.f32 %v5181_v30 }
0x1f55   :  { %v4361_v22 = vpop.eup %4360 }
0x1f56   :  { %2435 = vrot.lane.b32.xlu1 %v4361_v22, %s4409_s18 }
0x1fc8   :  { %v2436_v31 = vpop.permute.xlu1 %2435 }
0x1fc9   :  { %v2438_v32 = vmul.f32 %v4359_v26, %v2436_v31 }
0x1fcb   :  { %2440 = vrot.lane.b32.xlu1 %v2438_v32, %s4410_s19 }
0x203d   :  { %v5186_v36 = vpop.permute.xlu1 %2440 }
0x203e   :  { %4139 = vmatmul.mubr.msk.f32.vlgmr.msra.gmra.mxu1 %vm238_vm4, %v5186_v36 }
0x203f   :  { %4142 = vmatpush3.msra.mxu1 %v5193_v37  ;;  %4173 = vmatprep.mubr.msk.f32.mxu1 %vm4406_vm0, %v4405_v0 }
0x2040   :  { %4143 = vmatprep.subr.mxu1 %v4405_v0 }
0x2041   :  { %4144 = vmatpush3.msra.mxu1 %v5202_v38 }
0x2042   :  { %4145 = vmatprep.subr.mxu1 %v4405_v0 }
0x2043   :  { %4146 = vmatpush3.msra.mxu1 %v5209_v39 }
0x2044   :  { %4147 = vmatprep.subr.mxu1 %v4405_v0 }
0x2045   :  { %4148 = vmatpush3.msra.mxu1 %v5216_v41 }
0x2046   :  { %4149 = vmatprep.subr.mxu1 %v4405_v0 }
0x2047   :  { %4150 = vmatpush3.msra.mxu1 %v5223_v42 }
0x2048   :  { %4151 = vmatprep.subr.mxu1 %v4405_v0 }
0x2049   :  { %4152 = vmatpush3.msra.mxu1 %v5230_v52 }
0x204a   :  { %4153 = vmatprep.subr.mxu1 %v4405_v0 }
0x204b   :  { %4154 = vmatpush3.msra.mxu1 %v5237_v54 }
0x204c   :  { %4155 = vmatprep.subr.mxu1 %v4405_v0 }
0x204d   :  { %4156 = vmatpush3.msra.mxu1 %v5244_v55 }
0x204e   :  { %4157 = vmatprep.subr.mxu1 %v4405_v0 }
0x204f   :  { %4158 = vmatpush3.msra.mxu1 %v5251_v56 }
0x2050   :  { %4159 = vmatprep.subr.mxu1 %v4405_v0 }
0x2051   :  { %4160 = vmatpush3.msra.mxu1 %v5258_v57 }
0x2052   :  { %4161 = vmatprep.subr.mxu1 %v4405_v0 }
0x2053   :  { %4162 = vmatpush3.msra.mxu1 %v5265_v58 }
0x2054   :  { %4163 = vmatprep.subr.mxu1 %v4405_v0 }
0x2055   :  { %4164 = vmatpush3.msra.mxu1 %v5272_v59 }
0x2056   :  { %4165 = vmatprep.subr.mxu1 %v4405_v0 }
0x2057   :  { %4166 = vmatpush3.msra.mxu1 %v5279_v60 }
0x2058   :  { %4167 = vmatprep.subr.mxu1 %v4405_v0 }
0x2059   :  { %4168 = vmatpush3.msra.mxu1 %v5286_v61 }
0x205a   :  { %4169 = vmatprep.subr.mxu1 %v4405_v0 }
0x205b   :  { %4170 = vmatpush3.msra.mxu1 %v5293_v62 }
0x205c   :  { %4171 = vmatprep.subr.mxu1 %v4405_v0 }
0x205d   :  { %4172 = vmatpush3.msra.mxu1 %v5300_v63 }
0x205e   :  { %4241 = vmatprep.subr.mxu1 %v4405_v0 }
0x20fe   :  { %v2510_v5 = vpop.f32.mrf.mxu1 }
0x20ff   :  { %v2511_v14 = vadd.f32 %v5119_v53, %v2510_v5 }
0x2100   :  { %v4140_v15 = vpop.f32.mrf.mxu1 }
0x2101   :  { %3522 = vst [vmem:[%s5496_s9 + $0xa] sm:$0x3] %v2511_v14  ;;  %v2516_v16 = vsel %vm423_vm6, %v2511_v14, -inf }
0x2102   :  { %2517 = vmax.xlane.f32.xlu0 %v2516_v16 }
0x218b   :  { %v2518_v27 = vpop.xlane.xlu0 %2517 }
0x218c   :  { %vm2519_vm15 = vcmp.ge.f32.partialorder %v2511_v14, %v2518_v27 }
0x218d   :  { %v2520_v43 = vsel %vm2519_vm15, %v4589_v46, 128 }
0x218e   :  { %v2521_v44 = vsel %vm423_vm6, %v2520_v43, 2147483647 }
0x218f   :  { %v2523_v40 = vshra.s32 %v2521_v44, 16  ;;  %v2522_v47 = vand.u32 65535, %v2521_v44 }
0x2191   :  { %v2525_v45 = vcvt.s32.f32 %v2523_v40  ;;  %v2524_v51 = vcvt.s32.f32 %v2522_v47 }
0x2193   :  { %2526 = vmin.xlane.f32.xlu1 %v2525_v45 }
0x221c   :  { %v2527_v49 = vpop.xlane.xlu1 %2526 }
0x221d   :  { %vm2528_vm7 = vcmp.eq.f32.partialorder %v2525_v45, %v2527_v49  ;;  %v2533_v6 = vcvt.f32.s32 %v2527_v49 }
0x221e   :  { %v2529_v8 = vsel %vm2528_vm7, %v2524_v51, inf }
0x221f   :  { %2530 = vmin.xlane.f32.xlu0 %v2529_v8  ;;  %v2534_v33 = vshll.u32 %v2533_v6, 16 }
0x22a8   :  { %v2531_v7 = vpop.xlane.xlu0 %2530 }
0x22a9   :  { %v2532_v13 = vcvt.f32.s32 %v2531_v7 }
0x22ab   :  { %v2535_v19 = vadd.s32 %v2534_v33, %v2532_v13 }
0x22ad   :  { %v2536_v21 = vcvt.s32.f32 %v2535_v19  ;;  %vm2539_vm8 = vcmp.eq.s32.totalorder %v4589_v46, %v2535_v19 }
0x22ae   :  { %4174 = vmatmul.mubr.msk.f32.vlgmr.msra.gmra.mxu1 %vm2539_vm8, %v4411_v23 }
0x22af   :  { %3523 = vst.msk [vmem:[%s5498_s10 + $0xa] sm:$0x3] %vm447_vm9, %v2536_v21  ;;  %4242 = vmatpush3.msra.mxu1 %v5012_v11  ;;  %4249 = vmatprep.mubr.msk.f32.mxu1 %vm4406_vm0, %v4405_v0 }
0x22b0   :  { %4243 = vmatprep.subr.mxu1 %v4405_v0 }
0x22b1   :  { %4244 = vmatpush3.msra.mxu1 %v5021_v2 }
0x22b2   :  { %4245 = vmatprep.subr.mxu1 %v4405_v0 }
0x22b3   :  { %4246 = vmatpush3.msra.mxu1 %v5028_v3  ;;  %v2687_v3 = vadd.f32 %v5067_v20, %v2683_v24  ;;  %v3536_v24 = vld [vmem:[%s5491_s0 + $0xe] sm:$0x3] }
0x22b4   :  { %4247 = vmatprep.subr.mxu1 %v4405_v0 }
0x22b5   :  { %4248 = vmatpush3.msra.mxu1 %v5035_v4 }
0x22b6   :  { %4252 = vmatprep.subr.mxu1 %v4405_v0  ;;  %4250 = vmatmul.mubr.msk.f32.vlgmr.msra.gmra.mxu1 %vm82_vm3, %v3536_v24 }
0x22b7   :  { %4253 = vmatpush3.msra.mxu1 %v4997_v48  ;;  %4254 = vmatprep.mubr.msk.f32.mxu1 %vm4406_vm0, %v4405_v0 }
0x22b8   :  { %4257 = vmatprep.subr.mxu1 %v4405_v0 }
0x236e   :  { %v2608_v11 = vpop.f32.mrf.mxu1 }
0x236f   :  { %4190 = vmatmul.mubr.msk.f32.vlgmr.msra.gmra.mxu0 %vm163_vm5, %v2608_v11 }
0x2370   :  { %v4175_v34 = vpop.f32.mrf.mxu1  ;;  %4193 = vmatpush3.msra.mxu0 %v5043_v17  ;;  %4196 = vmatprep.mubr.msk.f32.mxu0 %vm4406_vm0, %v4405_v0 }
0x2371   :  { %4194 = vmatprep.subr.mxu0 %v4405_v0 }
0x2372   :  { %4195 = vmatpush3.msra.mxu0 %v5052_v18 }
0x2373   :  { %4197 = vmatmul.mubr.msk.f32.vlgmr.msra.gmra.mxu0 %vm238_vm4, %v5186_v36  ;;  %4199 = vmatprep.subr.mxu0 %v4405_v0 }
0x2374   :  { %4200 = vmatpush3.msra.mxu0 %v5164_v9  ;;  %4203 = vmatprep.mubr.msk.f32.mxu0 %vm4406_vm0, %v4405_v0 }
0x2375   :  { %4201 = vmatprep.subr.mxu0 %v4405_v0 }
0x2376   :  { %4202 = vmatpush3.msra.mxu0 %v5173_v10  ;;  %v3101_v48 = vpop.f32.mrf.mxu1 }
0x2377   :  { %4206 = vmatprep.subr.mxu0 %v4405_v0 }
0x242f   :  { %v2757_v2 = vpop.f32.mrf.mxu0 }
0x2430   :  { %v2761_v12 = vadd.f32 %v2757_v2, %v2687_v3 }
0x2431   :  { %v4191_v4 = vpop.f32.mrf.mxu0 }
0x2433   :  { %v2828_v26 = vpop.f32.mrf.mxu0 }
0x2434   :  { %v2832_v50 = vadd.f32 %v2828_v26, %v2761_v12  ;;  %v4251_v12 = vpop.f32.mrf.mxu1 }
0x2435   :  { %v4198_v35 = vpop.f32.mrf.mxu0 }
0x2436   :  { %4362 = vtanh.f32 %v2832_v50  ;;  %v3530_v29 = vmul.f32 -1.442695, %v2832_v50  ;;  %v3105_v35 = vadd.f32 %v5067_v20, %v3101_v48 }
0x2438   :  { %4364 = vpow2.f32 %v3530_v29 }
0x2443   :  { %v4363_v28 = vpop.eup %4362 }
0x2444   :  { %2842 = vrot.lane.b32.xlu0 %v4363_v28, %s4407_s12 }
0x2445   :  { %v4365_v22 = vpop.eup %4364 }
0x2446   :  { %v2836_v31 = vadd.f32 1.0, %v4365_v22 }
0x2448   :  { %4366 = vrcp.f32 %v2836_v31 }
0x2455   :  { %v4367_v32 = vpop.eup %4366 }
0x2456   :  { %v2840_v14 = vmul.f32 %v4367_v32, %v5181_v30 }
0x24b6   :  { %v2843_v36 = vpop.permute.xlu0 %2842 }
0x24b7   :  { %v2845_v5 = vmul.f32 %v4367_v32, %v2843_v36 }
0x24b9   :  { %2847 = vrot.lane.b32.xlu1 %v2845_v5, %s4408_s13 }
0x252b   :  { %v2848_v15 = vpop.permute.xlu1 %2847 }
0x252c   :  { %v5354_v16 = vadd.f32 %v2848_v15, %v2840_v14 }
0x252e   :  { %4368 = vtanh.f32 %v5354_v16 }
0x253b   :  { %v4369_v27 = vpop.eup %4368 }
0x253c   :  { %2853 = vrot.lane.b32.xlu1 %v4369_v27, %s4409_s18 }
0x25ae   :  { %v2854_v43 = vpop.permute.xlu1 %2853 }
0x25af   :  { %v2856_v44 = vmul.f32 %v4367_v32, %v2854_v43 }
0x25b1   :  { %2858 = vrot.lane.b32.xlu0 %v2856_v44, %s4410_s19 }
0x2623   :  { %v5359_v40 = vpop.permute.xlu0 %2858 }
0x2624   :  { %4204 = vmatmul.mubr.msk.f32.vlgmr.msra.gmra.mxu0 %vm238_vm4, %v5359_v40 }
0x2625   :  { %4207 = vmatpush3.msra.mxu0 %v5193_v37  ;;  %4238 = vmatprep.mubr.msk.f32.mxu0 %vm4406_vm0, %v4405_v0 }
0x2626   :  { %4208 = vmatprep.subr.mxu0 %v4405_v0 }
0x2627   :  { %4209 = vmatpush3.msra.mxu0 %v5202_v38 }
0x2628   :  { %4210 = vmatprep.subr.mxu0 %v4405_v0 }
0x2629   :  { %4211 = vmatpush3.msra.mxu0 %v5209_v39 }
0x262a   :  { %4212 = vmatprep.subr.mxu0 %v4405_v0 }
0x262b   :  { %4213 = vmatpush3.msra.mxu0 %v5216_v41 }
0x262c   :  { %4214 = vmatprep.subr.mxu0 %v4405_v0 }
0x262d   :  { %4215 = vmatpush3.msra.mxu0 %v5223_v42 }
0x262e   :  { %4216 = vmatprep.subr.mxu0 %v4405_v0 }
0x262f   :  { %4217 = vmatpush3.msra.mxu0 %v5230_v52 }
0x2630   :  { %4218 = vmatprep.subr.mxu0 %v4405_v0 }
0x2631   :  { %4219 = vmatpush3.msra.mxu0 %v5237_v54 }
0x2632   :  { %4220 = vmatprep.subr.mxu0 %v4405_v0 }
0x2633   :  { %4221 = vmatpush3.msra.mxu0 %v5244_v55 }
0x2634   :  { %4222 = vmatprep.subr.mxu0 %v4405_v0 }
0x2635   :  { %4223 = vmatpush3.msra.mxu0 %v5251_v56 }
0x2636   :  { %4224 = vmatprep.subr.mxu0 %v4405_v0 }
0x2637   :  { %4225 = vmatpush3.msra.mxu0 %v5258_v57 }
0x2638   :  { %4226 = vmatprep.subr.mxu0 %v4405_v0 }
0x2639   :  { %4227 = vmatpush3.msra.mxu0 %v5265_v58 }
0x263a   :  { %4228 = vmatprep.subr.mxu0 %v4405_v0 }
0x263b   :  { %4229 = vmatpush3.msra.mxu0 %v5272_v59 }
0x263c   :  { %4230 = vmatprep.subr.mxu0 %v4405_v0 }
0x263d   :  { %4231 = vmatpush3.msra.mxu0 %v5279_v60 }
0x263e   :  { %4232 = vmatprep.subr.mxu0 %v4405_v0 }
0x263f   :  { %4233 = vmatpush3.msra.mxu0 %v5286_v61 }
0x2640   :  { %4234 = vmatprep.subr.mxu0 %v4405_v0 }
0x2641   :  { %4235 = vmatpush3.msra.mxu0 %v5293_v62 }
0x2642   :  { %4236 = vmatprep.subr.mxu0 %v4405_v0 }
0x2643   :  { %4237 = vmatpush3.msra.mxu0 %v5300_v63 }
0x26e4   :  { %v2928_v30 = vpop.f32.mrf.mxu0 }
0x26e5   :  { %v2929_v45 = vadd.f32 %v5119_v53, %v2928_v30 }
0x26e6   :  { %v4205_v47 = vpop.f32.mrf.mxu0 }
0x26e7   :  { %3532 = vst [vmem:[%s5496_s9 + $0xc] sm:$0x3] %v2929_v45  ;;  %v2934_v49 = vsel %vm423_vm6, %v2929_v45, -inf }
0x26e8   :  { %2935 = vmax.xlane.f32.xlu1 %v2934_v49 }
0x2771   :  { %v2936_v51 = vpop.xlane.xlu1 %2935 }
0x2772   :  { %vm2937_vm10 = vcmp.ge.f32.partialorder %v2929_v45, %v2936_v51 }
0x2773   :  { %v2938_v8 = vsel %vm2937_vm10, %v4589_v46, 128 }
0x2774   :  { %v2939_v1 = vsel %vm423_vm6, %v2938_v8, 2147483647 }
0x2775   :  { %v2941_v6 = vshra.s32 %v2939_v1, 16  ;;  %v2940_v33 = vand.u32 65535, %v2939_v1 }
0x2777   :  { %v2943_v7 = vcvt.s32.f32 %v2941_v6  ;;  %v2942_v19 = vcvt.s32.f32 %v2940_v33 }
0x2779   :  { %2944 = vmin.xlane.f32.xlu0 %v2943_v7 }
0x2802   :  { %v2945_v13 = vpop.xlane.xlu0 %2944 }
0x2803   :  { %vm2946_vm11 = vcmp.eq.f32.partialorder %v2943_v7, %v2945_v13  ;;  %v2951_v25 = vcvt.f32.s32 %v2945_v13 }
0x2804   :  { %v2947_v21 = vsel %vm2946_vm11, %v2942_v19, inf }
0x2805   :  { %2948 = vmin.xlane.f32.xlu0 %v2947_v21  ;;  %v2952_v34 = vshll.u32 %v2951_v25, 16 }
0x288e   :  { %v2949_v11 = vpop.xlane.xlu0 %2948 }
0x288f   :  { %v2950_v2 = vcvt.f32.s32 %v2949_v11 }
0x2891   :  { %v2953_v3 = vadd.s32 %v2952_v34, %v2950_v2 }
0x2893   :  { %v2954_v4 = vcvt.s32.f32 %v2953_v3  ;;  %vm2957_vm12 = vcmp.eq.s32.totalorder %v4589_v46, %v2953_v3 }
0x2894   :  { %4239 = vmatmul.mubr.msk.f32.vlgmr.msra.gmra.mxu0 %vm2957_vm12, %v4411_v23 }
0x2895   :  { %3533 = vst.msk [vmem:[%s5498_s10 + $0xc] sm:$0x3] %vm447_vm9, %v2954_v4 }
0x2954   :  { %v3026_v26 = vpop.f32.mrf.mxu0 }
0x2955   :  { %4255 = vmatmul.mubr.msk.f32.vlgmr.msra.gmra.mxu1 %vm163_vm5, %v3026_v26 }
0x2956   :  { %v4240_v50 = vpop.f32.mrf.mxu0  ;;  %4258 = vmatpush3.msra.mxu1 %v5043_v17  ;;  %4261 = vmatprep.mubr.msk.f32.mxu1 %vm4406_vm0, %v4405_v0 }
0x2957   :  { %4259 = vmatprep.subr.mxu1 %v4405_v0 }
0x2958   :  { %4260 = vmatpush3.msra.mxu1 %v5052_v18 }
0x2959   :  { %4262 = vmatmul.mubr.msk.f32.vlgmr.msra.gmra.mxu1 %vm238_vm4, %v5359_v40  ;;  %4264 = vmatprep.subr.mxu1 %v4405_v0 }
0x295a   :  { %4265 = vmatpush3.msra.mxu1 %v5164_v9  ;;  %4268 = vmatprep.mubr.msk.f32.mxu1 %vm4406_vm0, %v4405_v0 }
0x295b   :  { %4266 = vmatprep.subr.mxu1 %v4405_v0 }
0x295c   :  { %4267 = vmatpush3.msra.mxu1 %v5173_v10 }
0x295d   :  { %4271 = vmatprep.subr.mxu1 %v4405_v0 }
0x2a15   :  { %v3175_v17 = vpop.f32.mrf.mxu1 }
0x2a16   :  { %v3179_v28 = vadd.f32 %v3175_v17, %v3105_v35 }
0x2a17   :  { %v4256_v18 = vpop.f32.mrf.mxu1 }
0x2a19   :  { %v3246_v29 = vpop.f32.mrf.mxu1 }
0x2a1a   :  { %v3250_v22 = vadd.f32 %v3246_v29, %v3179_v28 }
0x2a1b   :  { %v4263_v31 = vpop.f32.mrf.mxu1 }
0x2a1c   :  { %4370 = vtanh.f32 %v3250_v22  ;;  %v3540_v9 = vmul.f32 -1.442695, %v3250_v22 }
0x2a1e   :  { %4372 = vpow2.f32 %v3540_v9 }
0x2a29   :  { %v4371_v32 = vpop.eup %4370 }
0x2a2a   :  { %3260 = vrot.lane.b32.xlu1 %v4371_v32, %s4407_s12 }
0x2a2b   :  { %v4373_v36 = vpop.eup %4372 }
0x2a2c   :  { %v3254_v5 = vadd.f32 1.0, %v4373_v36 }
0x2a2e   :  { %4374 = vrcp.f32 %v3254_v5 }
0x2a3b   :  { %v4375_v10 = vpop.eup %4374 }
0x2a3c   :  { %v3258_v20 = vmul.f32 %v4375_v10, %v5354_v16 }
0x2a9c   :  { %v3261_v14 = vpop.permute.xlu1 %3260 }
0x2a9d   :  { %v3263_v15 = vmul.f32 %v4375_v10, %v3261_v14 }
0x2a9f   :  { %3265 = vrot.lane.b32.xlu0 %v3263_v15, %s4408_s13 }
0x2b11   :  { %v3266_v27 = vpop.permute.xlu0 %3265 }
0x2b12   :  { %v3268_v43 = vadd.f32 %v3266_v27, %v3258_v20 }
0x2b14   :  { %4376 = vtanh.f32 %v3268_v43 }
0x2b21   :  { %v4377_v44 = vpop.eup %4376 }
0x2b22   :  { %3271 = vrot.lane.b32.xlu1 %v4377_v44, %s4409_s18  ;;  %s4412_s18 = smov 112  }
0x2b94   :  { %v3272_v40 = vpop.permute.xlu1 %3271 }
0x2b95   :  { %v3274_v30 = vmul.f32 %v4375_v10, %v3272_v40 }
0x2b97   :  { %3276 = vrot.lane.b32.xlu1 %v3274_v30, %s4410_s19 }
0x2c09   :  { %v3277_v45 = vpop.permute.xlu1 %3276 }
0x2c0a   :  { %3450 = vst.msk [vmem:[#allocation2] sm:$0x3] %vm38_vm2, %v3277_v45  ;;  %4269 = vmatmul.mubr.msk.f32.vlgmr.msra.gmra.mxu1 %vm238_vm4, %v3277_v45 }
0x2c0b   :  { %4272 = vmatpush3.msra.mxu1 %v5193_v37  ;;  %4303 = vmatprep.mubr.msk.f32.mxu1 %vm4406_vm0, %v4405_v0 }
0x2c0c   :  { %4273 = vmatprep.subr.mxu1 %v4405_v0 }
0x2c0d   :  { %4274 = vmatpush3.msra.mxu1 %v5202_v38 }
0x2c0e   :  { %4275 = vmatprep.subr.mxu1 %v4405_v0 }
0x2c0f   :  { %4276 = vmatpush3.msra.mxu1 %v5209_v39 }
0x2c10   :  { %4277 = vmatprep.subr.mxu1 %v4405_v0 }
0x2c11   :  { %4278 = vmatpush3.msra.mxu1 %v5216_v41 }
0x2c12   :  { %4279 = vmatprep.subr.mxu1 %v4405_v0 }
0x2c13   :  { %4280 = vmatpush3.msra.mxu1 %v5223_v42 }
0x2c14   :  { %4281 = vmatprep.subr.mxu1 %v4405_v0 }
0x2c15   :  { %4282 = vmatpush3.msra.mxu1 %v5230_v52 }
0x2c16   :  { %4283 = vmatprep.subr.mxu1 %v4405_v0 }
0x2c17   :  { %4284 = vmatpush3.msra.mxu1 %v5237_v54 }
0x2c18   :  { %4285 = vmatprep.subr.mxu1 %v4405_v0 }
0x2c19   :  { %4286 = vmatpush3.msra.mxu1 %v5244_v55 }
0x2c1a   :  { %4287 = vmatprep.subr.mxu1 %v4405_v0 }
0x2c1b   :  { %4288 = vmatpush3.msra.mxu1 %v5251_v56 }
0x2c1c   :  { %4289 = vmatprep.subr.mxu1 %v4405_v0 }
0x2c1d   :  { %4290 = vmatpush3.msra.mxu1 %v5258_v57 }
0x2c1e   :  { %4291 = vmatprep.subr.mxu1 %v4405_v0 }
0x2c1f   :  { %4292 = vmatpush3.msra.mxu1 %v5265_v58 }
0x2c20   :  { %4293 = vmatprep.subr.mxu1 %v4405_v0 }
0x2c21   :  { %4294 = vmatpush3.msra.mxu1 %v5272_v59 }
0x2c22   :  { %4295 = vmatprep.subr.mxu1 %v4405_v0 }
0x2c23   :  { %4296 = vmatpush3.msra.mxu1 %v5279_v60 }
0x2c24   :  { %4297 = vmatprep.subr.mxu1 %v4405_v0 }
0x2c25   :  { %4298 = vmatpush3.msra.mxu1 %v5286_v61 }
0x2c26   :  { %4299 = vmatprep.subr.mxu1 %v4405_v0 }
0x2c27   :  { %4300 = vmatpush3.msra.mxu1 %v5293_v62 }
0x2c28   :  { %4301 = vmatprep.subr.mxu1 %v4405_v0 }
0x2c29   :  { %4302 = vmatpush3.msra.mxu1 %v5300_v63 }
0x2cca   :  { %v3346_v37 = vpop.f32.mrf.mxu1 }
0x2ccb   :  { %v3347_v38 = vadd.f32 %v5119_v53, %v3346_v37 }
0x2ccc   :  { %v4270_v39 = vpop.f32.mrf.mxu1 }
0x2ccd   :  { %3542 = vst [vmem:[%s5496_s9 + $0xe] sm:$0x3] %v3347_v38  ;;  %v3352_v41 = vsel %vm423_vm6, %v3347_v38, -inf }
0x2cce   :  { %3353 = vmax.xlane.f32.xlu0 %v3352_v41 }
0x2d57   :  { %v3354_v42 = vpop.xlane.xlu0 %3353 }
0x2d58   :  { %vm3355_vm0 = vcmp.ge.f32.partialorder %v3347_v38, %v3354_v42 }
0x2d59   :  { %v3356_v52 = vsel %vm3355_vm0, %v4589_v46, 128 }
0x2d5a   :  { %v3357_v54 = vsel %vm423_vm6, %v3356_v52, 2147483647 }
0x2d5b   :  { %v3359_v0 = vshra.s32 %v3357_v54, 16  ;;  %v3358_v56 = vand.u32 65535, %v3357_v54 }
0x2d5d   :  { %v3361_v55 = vcvt.s32.f32 %v3359_v0  ;;  %v3360_v53 = vcvt.s32.f32 %v3358_v56 }
0x2d5f   :  { %3362 = vmin.xlane.f32.xlu1 %v3361_v55 }
0x2de8   :  { %v3363_v57 = vpop.xlane.xlu1 %3362 }
0x2de9   :  { %vm3364_vm3 = vcmp.eq.f32.partialorder %v3361_v55, %v3363_v57  ;;  %v3369_v59 = vcvt.f32.s32 %v3363_v57 }
0x2dea   :  { %v3365_v58 = vsel %vm3364_vm3, %v3360_v53, inf }
0x2deb   :  { %3366 = vmin.xlane.f32.xlu0 %v3365_v58  ;;  %v3370_v61 = vshll.u32 %v3369_v59, 16 }
0x2e01   :  { %3452 = vrot.lane.b32.xlu0 %v3268_v43, %s4412_s18 }
0x2e74   :  { %v3367_v60 = vpop.xlane.xlu0 %3366 }
0x2e75   :  { %v3368_v62 = vcvt.f32.s32 %v3367_v60 }
0x2e77   :  { %v3371_v63 = vadd.s32 %v3370_v61, %v3368_v62 }
0x2e78   :  { %v3453_v16 = vpop.permute.xlu0 %3452 }
0x2e79   :  { %v3372_v47 = vcvt.s32.f32 %v3371_v63  ;;  %vm3375_vm4 = vcmp.eq.s32.totalorder %v4589_v46, %v3371_v63  ;;  %3455 = vst.msk [vmem:[#allocation3] sm:$0x3] %vm38_vm2, %v3453_v16 }
0x2e7a   :  { %4304 = vmatmul.mubr.msk.f32.vlgmr.msra.gmra.mxu1 %vm3375_vm4, %v4411_v23 }
0x2e7b   :  { %3543 = vst.msk [vmem:[%s5498_s10 + $0xe] sm:$0x3] %vm447_vm9, %v3372_v47 }
0x2f3a   :  { %v3444_v49 = vpop.f32.mrf.mxu1 }
0x2f3b   :  { %3457 = vst.msk [vmem:[#allocation4] sm:$0x3] %vm49_vm1, %v3444_v49 }
0x2f3c   :  { %v4305_v51 = vpop.f32.mrf.mxu1 }

</bundles_post_ra>
